<compile_context>
chip_gen: v7x
topology: tpu7x:2x2x1
jax: 0.10.0
libtpu: 0.0.40
codegen_flags: <defaults>
</compile_context>

<pallas_src>
import functools
import re

import jax
import jax.numpy as jnp
from jax.experimental import pallas as pl
from jax.experimental.pallas import tpu as pltpu

IN_FEATURES = 64 * 64 * 64      # 262144, fixed by the module's fc1
HIDDEN = 200
OUT_FEATURES = 2


# --------------------------------- kernels ------------------------------------


def _fc1_fused_kernel(x_ref, w1_ref, b1_ref, w2_ref, b2_ref, w3_ref, b3_ref,
                      o_ref, acc_ref):
    """Single-TensorCore path (v5e/v6e): stream w1 K-chunks, accumulate fc1 in a
    resident f32 scratch, and on the last step run the whole tiny head
    (b1 + ReLU -> fc2 -> ReLU -> fc3 + b3) in the epilogue.  grid = (steps,)."""
    k = pl.program_id(0)

    @pl.when(k == 0)
    def _():
        acc_ref[...] = jnp.zeros_like(acc_ref)

    x_tile = x_ref[:, k, :]                                   # (B, tk), VMEM-resident
    acc_ref[...] += jnp.dot(x_tile, w1_ref[...],
                            preferred_element_type=jnp.float32)

    @pl.when(k == pl.num_programs(0) - 1)
    def _():
        h1 = jnp.maximum(acc_ref[...] + b1_ref[...], 0.0)
        h2 = jnp.dot(h1, w2_ref[...], preferred_element_type=jnp.float32)
        h2 = jnp.maximum(h2 + b2_ref[...], 0.0)
        out = jnp.dot(h2, w3_ref[...], preferred_element_type=jnp.float32)
        o_ref[...] = (out + b3_ref[...]).astype(o_ref.dtype)


def _fc1_partial_kernel(x_ref, w1_ref, o_ref, acc_ref):
    """v7x path: grid = (splits, steps); the "parallel" split axis shards the w1
    stream across the two TensorCores, each producing a partial (B, H) fc1 sum.
    The x block is per-split, so each core only DMAs the chunk range it reads."""
    k = pl.program_id(1)

    @pl.when(k == 0)
    def _():
        acc_ref[...] = jnp.zeros_like(acc_ref)

    x_tile = x_ref[:, k, :]                                   # (B, tk)
    acc_ref[...] += jnp.dot(x_tile, w1_ref[...],
                            preferred_element_type=jnp.float32)

    @pl.when(k == pl.num_programs(1) - 1)
    def _():
        o_ref[...] = acc_ref[...]                             # partial fc1 (no bias)


def _head_kernel(p_ref, b1_ref, w2_ref, b2_ref, w3_ref, b3_ref, o_ref):
    """Combine per-split partials, then bias/ReLU -> fc2 -> ReLU -> fc3 (all tiny)."""
    h1 = jnp.maximum(jnp.sum(p_ref[...], axis=0) + b1_ref[...], 0.0)
    h2 = jnp.dot(h1, w2_ref[...], preferred_element_type=jnp.float32) + b2_ref[...]
    h2 = jnp.maximum(h2, 0.0)
    out = jnp.dot(h2, w3_ref[...], preferred_element_type=jnp.float32) + b3_ref[...]
    o_ref[...] = out.astype(o_ref.dtype)


# ------------------------------ hw config -------------------------------------


def _chip_generation():
    """Best-effort TPU generation (5, 6, 7, ...) or 0 if unknown."""
    try:
        kind = jax.devices()[0].device_kind.lower()           # e.g. "tpu v6e"
        for g in (7, 6, 5, 4, 3):
            if f"v{g}" in kind:
                return g
    except Exception:
        pass
    try:
        ver = str(getattr(pltpu.get_tpu_info(), "chip_version", ""))
        m = re.search(r"(\d+)", ver)
        if m:
            return int(m.group(1))
    except Exception:
        pass
    return 0


def _hw_config(streaming_itemsize=4):
    """Pick (tk, splits, vmem_limit) keyed on chip generation.

    VMEM is budgeted with the lane-padded w1 tile (H=200 pads to 256 lanes):
    one buffer = tk * 256 * itemsize bytes, double-buffered by the pipeline.
    """
    gen = _chip_generation()
    if gen >= 7:
        # v7x: 64 MiB VMEM per TensorCore, 2 TCs per chip -> shard the K stream.
        splits, tk, vmem_limit = 2, 16384, 52 << 20
    elif gen in (5, 6):
        # v5e / v6e: single TC, 128 MiB VMEM, fused head.
        splits, tk, vmem_limit = 1, 16384, 80 << 20
    else:
        # Unknown part: conservative defaults that fit a 64 MiB budget.
        splits, tk, vmem_limit = 1, 8192, 48 << 20
    # Sanity: double-buffered lane-padded w1 tile + x/head/acc headroom fits.
    w1_tiles = 2 * tk * 256 * streaming_itemsize
    assert w1_tiles + (8 << 20) <= vmem_limit, (gen, tk, vmem_limit)
    return tk, splits, vmem_limit


def prepare_streaming_weight(w1, dtype=jnp.bfloat16):
    """Pre-cast the fc1 weight ONCE at parameter-load time (outside the jitted
    forward).  Doing the cast inside the forward would add a full f32-read +
    bf16-write + bf16-read round trip per call and be slower than plain f32."""
    return w1.astype(dtype)


# ------------------------------- forward --------------------------------------


@functools.partial(jax.jit, static_argnames=("tk", "splits", "vmem_limit"))
def firstnet_forward(x, w1, b1, w2, b2, w3, b3, *,
                     tk=8192, splits=1, vmem_limit=48 << 20):
    B = x.shape[0]
    x_flat = x.reshape(B, -1)                    # nn.Flatten()
    K, H = w1.shape
    OUT = w3.shape[1]
    assert x_flat.shape[1] == K and K % (splits * tk) == 0
    steps = K // (splits * tk)                   # sequential K-chunks per split
    n_chunks = splits * steps

    stream_dtype = w1.dtype                      # w1 pre-cast at parameter-load time
    itemsize = jnp.dtype(stream_dtype).itemsize
    x3 = x_flat.reshape(B, n_chunks, tk).astype(stream_dtype)   # cheap (2 MB)

    b1r = b1.reshape(1, H).astype(jnp.float32)
    b2r = b2.reshape(1, H).astype(jnp.float32)
    b3r = b3.reshape(1, OUT).astype(jnp.float32)
    w2f = w2.astype(jnp.float32)
    w3f = w3.astype(jnp.float32)

    cost = pl.CostEstimate(
        flops=2 * B * K * H,
        bytes_accessed=K * H * itemsize + B * K * itemsize + splits * B * H * 4,
        transcendentals=0,
    )

    if splits == 1:
        # ---- single-TensorCore path (v5e/v6e/unknown): one fused kernel --------
        return pl.pallas_call(
            _fc1_fused_kernel,
            out_shape=jax.ShapeDtypeStruct((B, OUT), jnp.float32),
            grid_spec=pltpu.PrefetchScalarGridSpec(
                num_scalar_prefetch=0,
                grid=(steps,),
                in_specs=[
                    # x: full-array block, constant index map -> single DMA, sliced
                    # in-kernel so the pipeline is dedicated to the w1 stream.
                    pl.BlockSpec((B, n_chunks, tk), lambda k: (0, 0, 0)),
                    # w1: the dominant HBM stream, one (tk, H) tile per step.
                    pl.BlockSpec((tk, H), lambda k: (k, 0)),
                    # tiny head constants (constant index maps, <0.5 MiB total).
                    pl.BlockSpec((1, H), lambda k: (0, 0)),
                    pl.BlockSpec((H, H), lambda k: (0, 0)),
                    pl.BlockSpec((1, H), lambda k: (0, 0)),
                    pl.BlockSpec((H, OUT), lambda k: (0, 0)),
                    pl.BlockSpec((1, OUT), lambda k: (0, 0)),
                ],
                out_specs=pl.BlockSpec((B, OUT), lambda k: (0, 0)),
                scratch_shapes=[pltpu.VMEM((B, H), jnp.float32)],   # fc1 accumulator
            ),
            compiler_params=pltpu.CompilerParams(
                dimension_semantics=("arbitrary",),
                vmem_limit_bytes=vmem_limit,
            ),
            cost_estimate=cost,
        )(x3, w1, b1r, w2f, b2r, w3f, b3r)

    # ---- v7x path: shard the w1 stream across the 2 TensorCores ---------------
    partials = pl.pallas_call(
        _fc1_partial_kernel,
        out_shape=jax.ShapeDtypeStruct((splits, B, H), jnp.float32),
        grid_spec=pltpu.PrefetchScalarGridSpec(
            num_scalar_prefetch=0,
            grid=(splits, steps),
            in_specs=[
                # x: per-split block -> each core DMAs only the half it reads, once.
                pl.BlockSpec((B, steps, tk), lambda s, k: (0, s, 0)),
                # w1: one (tk, H) tile per step, split-offset along K.
                pl.BlockSpec((tk, H), lambda s, k: (s * steps + k, 0)),
            ],
            out_specs=pl.BlockSpec((None, B, H), lambda s, k: (s, 0, 0)),
            scratch_shapes=[pltpu.VMEM((B, H), jnp.float32)],       # fc1 accumulator
        ),
        compiler_params=pltpu.CompilerParams(
            # Axis 0 shards the K reduction across TensorCores; axis 1 is the
            # sequential per-core accumulation.
            dimension_semantics=("parallel", "arbitrary"),
            vmem_limit_bytes=vmem_limit,
        ),
        cost_estimate=cost,
    )(x3, w1)

    # Tiny head kernel: 2-way partial sum + b1/ReLU + fc2 + ReLU + fc3 (+ biases).
    out = pl.pallas_call(
        _head_kernel,
        out_shape=jax.ShapeDtypeStruct((B, OUT), jnp.float32),
        in_specs=[pl.BlockSpec(memory_space=pltpu.MemorySpace.VMEM)] * 6,
        out_specs=pl.BlockSpec(memory_space=pltpu.MemorySpace.VMEM),
    )(partials, b1r, w2f, b2r, w3f, b3r)
    return out


# --------------------------------- demo ----------------------------------------


def init_linear_params(key, fan_in, fan_out):
    # PyTorch nn.Linear default init: U(-1/sqrt(fan_in), +1/sqrt(fan_in)).
    kw, kb = jax.random.split(key)
    bound = 1.0 / jnp.sqrt(jnp.float32(fan_in))
    w = jax.random.uniform(kw, (fan_in, fan_out), jnp.float32, -bound, bound)  # (in,out)
    b = jax.random.uniform(kb, (fan_out,), jnp.float32, -bound, bound)
    return w, b


if __name__ == "__main__":
    key = jax.random.PRNGKey(0)
    kx, k1, k2, k3 = jax.random.split(key, 4)

    B = 2
    # Input shape implied by fc1: flatten(x) must yield 64*64*64 features.
    x = jax.random.normal(kx, (B, 64, 64, 64), jnp.float32)

    w1, b1 = init_linear_params(k1, IN_FEATURES, HIDDEN)
    w2, b2 = init_linear_params(k2, HIDDEN, HIDDEN)
    w3, b3 = init_linear_params(k3, HIDDEN, OUT_FEATURES)

    tk, splits, vmem_limit = _hw_config(streaming_itemsize=4)

    # --- f32 path (matches PyTorch numerics) -------------------------------------
    out = firstnet_forward(x, w1, b1, w2, b2, w3, b3,
                           tk=tk, splits=splits, vmem_limit=vmem_limit)
    out = jax.block_until_ready(out)

    xf = x.reshape(B, -1)
    h1 = jnp.maximum(xf @ w1 + b1, 0.0)
    h2 = jnp.maximum(h1 @ w2 + b2, 0.0)
    ref = (h2 @ w3 + b3).astype(jnp.float32)
    assert out.shape == (B, OUT_FEATURES) and out.dtype == jnp.float32
    assert jnp.allclose(out, ref, atol=1e-3, rtol=1e-3), float(jnp.max(jnp.abs(out - ref)))

    # --- optional bf16-streaming path: weight pre-cast ONCE at load time ----------
    w1_bf16 = jax.block_until_ready(prepare_streaming_weight(w1, jnp.bfloat16))
    out_bf = firstnet_forward(x, w1_bf16, b1, w2, b2, w3, b3,
                              tk=tk, splits=splits, vmem_limit=vmem_limit)
    out_bf = jax.block_until_ready(out_bf)
    h1b = jnp.maximum(
        jnp.dot(xf.astype(jnp.bfloat16), w1.astype(jnp.bfloat16),
                preferred_element_type=jnp.float32) + b1, 0.0)
    h2b = jnp.maximum(h1b @ w2 + b2, 0.0)
    refb = (h2b @ w3 + b3).astype(jnp.float32)
    assert jnp.allclose(out_bf, refb, atol=5e-2, rtol=5e-2), \
        float(jnp.max(jnp.abs(out_bf - refb)))

    print("KERNEL_OK")
</pallas_src>

<mosaic_0001>
module attributes {stable_mosaic.version = 11 : i64} {
  func.func @_fc1_fused_kernel(%arg0: i32, %arg1: memref<2x32x8192xf32, #tpu.memory_space<vmem>>, %arg2: memref<8192x200xf32, #tpu.memory_space<vmem>>, %arg3: memref<1x200xf32, #tpu.memory_space<vmem>>, %arg4: memref<200x200xf32, #tpu.memory_space<vmem>>, %arg5: memref<1x200xf32, #tpu.memory_space<vmem>>, %arg6: memref<200x2xf32, #tpu.memory_space<vmem>>, %arg7: memref<1x2xf32, #tpu.memory_space<vmem>>, %arg8: memref<2x2xf32, #tpu.memory_space<vmem>>, %arg9: memref<2x200xf32, #tpu.memory_space<vmem>>) attributes {dimension_semantics = [#tpu.dimension_semantics<arbitrary>], iteration_bounds = array<i64: 32>, scalar_prefetch = 0 : i64, scratch_operands = 1 : i64, tpu.core_type = #tpu.core_type<tc>, window_params = [{pipeline_mode = #tpu.pipeline_mode<synchronous>, transform_indices = @transform_0, window_bounds = array<i64: 2, 32, 8192>}, {transform_indices = @transform_1, window_bounds = array<i64: 8192, 200>}, {pipeline_mode = #tpu.pipeline_mode<synchronous>, transform_indices = @transform_2, window_bounds = array<i64: 1, 200>}, {pipeline_mode = #tpu.pipeline_mode<synchronous>, transform_indices = @transform_3, window_bounds = array<i64: 200, 200>}, {pipeline_mode = #tpu.pipeline_mode<synchronous>, transform_indices = @transform_4, window_bounds = array<i64: 1, 200>}, {pipeline_mode = #tpu.pipeline_mode<synchronous>, transform_indices = @transform_5, window_bounds = array<i64: 200, 2>}, {pipeline_mode = #tpu.pipeline_mode<synchronous>, transform_indices = @transform_6, window_bounds = array<i64: 1, 2>}, {pipeline_mode = #tpu.pipeline_mode<synchronous>, transform_indices = @transform_7, window_bounds = array<i64: 2, 2>}]} {
    %c0_i32 = arith.constant 0 : i32
    %0 = arith.cmpi eq, %arg0, %c0_i32 : i32
    %1 = arith.extui %0 : i1 to i32
    %c0_i32_0 = arith.constant 0 : i32
    %2 = arith.cmpi ne, %1, %c0_i32_0 : i32
    scf.if %2 {
      %cst_9 = arith.constant 0.000000e+00 : f32
      %14 = vector.broadcast %cst_9 : f32 to vector<2x200xf32>
      %c0_10 = arith.constant 0 : index
      %c0_11 = arith.constant 0 : index
      %15 = vector.load %arg9[%c0_10, %c0_11] : memref<2x200xf32, #tpu.memory_space<vmem>>, vector<2x200xf32>
      tpu.vector_store %arg9[%c0_10, %c0_11], %14 {strides = array<i32>} : memref<2x200xf32, #tpu.memory_space<vmem>>, vector<2x200xf32>,
    } else {
    }
    %c0 = arith.constant 0 : index
    %3 = arith.index_cast %arg0 : i32 to index
    %c0_1 = arith.constant 0 : index
    %4 = vector.load %arg1[%c0, %3, %c0_1] : memref<2x32x8192xf32, #tpu.memory_space<vmem>>, vector<2x1x8192xf32>
    %5 = vector.shape_cast %4 : vector<2x1x8192xf32> to vector<2x8192xf32>
    %c0_2 = arith.constant 0 : index
    %c0_3 = arith.constant 0 : index
    %6 = vector.load %arg9[%c0_2, %c0_3] : memref<2x200xf32, #tpu.memory_space<vmem>>, vector<2x200xf32>
    %c0_4 = arith.constant 0 : index
    %c0_5 = arith.constant 0 : index
    %7 = vector.load %arg2[%c0_4, %c0_5] : memref<8192x200xf32, #tpu.memory_space<vmem>>, vector<8192x200xf32>
    %cst = arith.constant dense<0.000000e+00> : vector<2x200xf32>
    %8 = tpu.matmul %5, %7, %cst {dimension_numbers = #tpu.dot_dimension_numbers<[1], [0], [0], [1], [0, 0, 1, 1], [], []>} : vector<2x8192xf32>, vector<8192x200xf32>, vector<2x200xf32> -> vector<2x200xf32>
    %9 = arith.addf %6, %8 : vector<2x200xf32>
    %c0_6 = arith.constant 0 : index
    %c0_7 = arith.constant 0 : index
    %10 = vector.load %arg9[%c0_6, %c0_7] : memref<2x200xf32, #tpu.memory_space<vmem>>, vector<2x200xf32>
    tpu.vector_store %arg9[%c0_6, %c0_7], %9 {strides = array<i32>} : memref<2x200xf32, #tpu.memory_space<vmem>>, vector<2x200xf32>,
    %c31_i32 = arith.constant 31 : i32
    %11 = arith.cmpi eq, %arg0, %c31_i32 : i32
    %12 = arith.extui %11 : i1 to i32
    %c0_i32_8 = arith.constant 0 : i32
    %13 = arith.cmpi ne, %12, %c0_i32_8 : i32
    scf.if %13 {
      %c0_9 = arith.constant 0 : index
      %c0_10 = arith.constant 0 : index
      %14 = vector.load %arg9[%c0_9, %c0_10] : memref<2x200xf32, #tpu.memory_space<vmem>>, vector<2x200xf32>
      %c0_11 = arith.constant 0 : index
      %c0_12 = arith.constant 0 : index
      %15 = vector.load %arg3[%c0_11, %c0_12] : memref<1x200xf32, #tpu.memory_space<vmem>>, vector<1x200xf32>
      %16 = vector.broadcast %15 : vector<1x200xf32> to vector<2x200xf32>
      %17 = arith.addf %14, %16 : vector<2x200xf32>
      %cst_13 = arith.constant 0.000000e+00 : f32
      %18 = vector.broadcast %cst_13 : f32 to vector<2x200xf32>
      %19 = arith.maximumf %17, %18 : vector<2x200xf32>
      %c0_14 = arith.constant 0 : index
      %c0_15 = arith.constant 0 : index
      %20 = vector.load %arg4[%c0_14, %c0_15] : memref<200x200xf32, #tpu.memory_space<vmem>>, vector<200x200xf32>
      %cst_16 = arith.constant dense<0.000000e+00> : vector<2x200xf32>
      %21 = tpu.matmul %19, %20, %cst_16 {dimension_numbers = #tpu.dot_dimension_numbers<[1], [0], [0], [1], [0, 0, 1, 1], [], []>} : vector<2x200xf32>, vector<200x200xf32>, vector<2x200xf32> -> vector<2x200xf32>
      %c0_17 = arith.constant 0 : index
      %c0_18 = arith.constant 0 : index
      %22 = vector.load %arg5[%c0_17, %c0_18] : memref<1x200xf32, #tpu.memory_space<vmem>>, vector<1x200xf32>
      %23 = vector.broadcast %22 : vector<1x200xf32> to vector<2x200xf32>
      %24 = arith.addf %21, %23 : vector<2x200xf32>
      %cst_19 = arith.constant 0.000000e+00 : f32
      %25 = vector.broadcast %cst_19 : f32 to vector<2x200xf32>
      %26 = arith.maximumf %24, %25 : vector<2x200xf32>
      %c0_20 = arith.constant 0 : index
      %c0_21 = arith.constant 0 : index
      %27 = vector.load %arg6[%c0_20, %c0_21] : memref<200x2xf32, #tpu.memory_space<vmem>>, vector<200x2xf32>
      %cst_22 = arith.constant dense<0.000000e+00> : vector<2x2xf32>
      %28 = tpu.matmul %26, %27, %cst_22 {dimension_numbers = #tpu.dot_dimension_numbers<[1], [0], [0], [1], [0, 0, 1, 1], [], []>} : vector<2x200xf32>, vector<200x2xf32>, vector<2x2xf32> -> vector<2x2xf32>
      %c0_23 = arith.constant 0 : index
      %c0_24 = arith.constant 0 : index
      %29 = vector.load %arg7[%c0_23, %c0_24] : memref<1x2xf32, #tpu.memory_space<vmem>>, vector<1x2xf32>
      %30 = vector.broadcast %29 : vector<1x2xf32> to vector<2x2xf32>
      %31 = arith.addf %28, %30 : vector<2x2xf32>
      %c0_25 = arith.constant 0 : index
      %c0_26 = arith.constant 0 : index
      %32 = vector.load %arg8[%c0_25, %c0_26] : memref<2x2xf32, #tpu.memory_space<vmem>>, vector<2x2xf32>
      tpu.vector_store %arg8[%c0_25, %c0_26], %31 {strides = array<i32>} : memref<2x2xf32, #tpu.memory_space<vmem>>, vector<2x2xf32>,
    } else {
    }
    return
  }
  func.func @transform_0(%arg0: i32) -> (i32, i32, i32) {
    %c0_i32 = arith.constant 0 : i32
    %c0_i32_0 = arith.constant 0 : i32
    %c0_i32_1 = arith.constant 0 : i32
    %c0_i32_2 = arith.constant 0 : i32
    return %c0_i32, %c0_i32_0, %c0_i32_1 : i32, i32, i32
  }
  func.func @transform_1(%arg0: i32) -> (i32, i32) {
    %c0_i32 = arith.constant 0 : i32
    %c0_i32_0 = arith.constant 0 : i32
    return %arg0, %c0_i32 : i32, i32
  }
  func.func @transform_2(%arg0: i32) -> (i32, i32) {
    %c0_i32 = arith.constant 0 : i32
    %c0_i32_0 = arith.constant 0 : i32
    %c0_i32_1 = arith.constant 0 : i32
    return %c0_i32, %c0_i32_0 : i32, i32
  }
  func.func @transform_3(%arg0: i32) -> (i32, i32) {
    %c0_i32 = arith.constant 0 : i32
    %c0_i32_0 = arith.constant 0 : i32
    %c0_i32_1 = arith.constant 0 : i32
    return %c0_i32, %c0_i32_0 : i32, i32
  }
  func.func @transform_4(%arg0: i32) -> (i32, i32) {
    %c0_i32 = arith.constant 0 : i32
    %c0_i32_0 = arith.constant 0 : i32
    %c0_i32_1 = arith.constant 0 : i32
    return %c0_i32, %c0_i32_0 : i32, i32
  }
  func.func @transform_5(%arg0: i32) -> (i32, i32) {
    %c0_i32 = arith.constant 0 : i32
    %c0_i32_0 = arith.constant 0 : i32
    %c0_i32_1 = arith.constant 0 : i32
    return %c0_i32, %c0_i32_0 : i32, i32
  }
  func.func @transform_6(%arg0: i32) -> (i32, i32) {
    %c0_i32 = arith.constant 0 : i32
    %c0_i32_0 = arith.constant 0 : i32
    %c0_i32_1 = arith.constant 0 : i32
    return %c0_i32, %c0_i32_0 : i32, i32
  }
  func.func @transform_7(%arg0: i32) -> (i32, i32) {
    %c0_i32 = arith.constant 0 : i32
    %c0_i32_0 = arith.constant 0 : i32
    %c0_i32_1 = arith.constant 0 : i32
    return %c0_i32, %c0_i32_0 : i32, i32
  }
}

</mosaic_0001>

<bundles_post_ra>
// kernel: firstnet_forward.1
= control target key start
LH: loop header
LB: loop body
LE: loop exit
PB: predicated region body
PF: predicated region fallthrough
CT: control target
= control target key end

     0   :  { %12 = vsyncpa [#allocation4], 0  ;;  %s10959_s0 = inlined_call_operand.vmem [shape: f32[2,32,8192], index: 0, kind: input, shape index: {}]   ;;  %s10960_s1 = inlined_call_operand.hbm [shape: f32[262144,200], index: 1, kind: input, shape index: {}]   ;;  %s10961_s2 = inlined_call_operand.vmem [shape: f32[1,200], index: 2, kind: input, shape index: {}]   ;;  %s10962_s3 = inlined_call_operand.vmem [shape: f32[200,200], index: 3, kind: input, shape index: {}]   ;;  %s10963_s4 = inlined_call_operand.vmem [shape: f32[1,200], index: 4, kind: input, shape index: {}]   ;;  %s10964_s5 = inlined_call_operand.vmem [shape: f32[200,2], index: 5, kind: input, shape index: {}]   ;;  %s10965_s6 = inlined_call_operand.vmem [shape: f32[1,2], index: 6, kind: input, shape index: {}]   ;;  %s10966_s7 = inlined_call_operand.hbm [shape: f32[2,2], index: 7, kind: output, shape index: {}]  }
   0x1   :  { %14 = vsyncpa [#allocation4 + $0x1], 0 }
   0x2   :  { %15 = vsyncpa [#allocation5], 0  ;;  %s8115_s24 = smov 0   ;;  %s8117_s25 = smov 0  }
   0x3   :  { %s8119_s26 = smov 0   ;;  %s8121_s27 = smov 0  }
   0x4 LB: > { %s8134_s28 = sadd.s32 4294967295, %s8064_s27   ;;  %s8137_s29 = sadd.s32 1, %s8064_s27   ;;  %s8064_s27 = sphi %s8121_s27, %s10973_s27   ;;  %s8060_s26 = sphi %s8119_s26, %s10972_s26   ;;  %s8056_s25 = sphi %s8117_s25, %s10971_s25   ;;  %s8052_s24 = sphi %s8115_s24, %s10970_s24  }
   0x5   : > { %s46_s30 = ssub.s32 %s8064_s27, %s8137_s29  ;;  %s49_s8 = sadd.s32 1, %s8060_s26 }
   0x6   : > { %p47_p0 = scmp.eq.s32.totalorder %s46_s30, 0  ;;  %p56_p1 = scmp.ne.s32.totalorder %s8060_s26, %s8056_s25 }
   0x7   : > { %p57_p2 = scmp.eq.s32.totalorder %s8064_s27, 0  ;;  %p62_p3 = scmp.ne.s32.totalorder %s8056_s25, %s8052_s24 }
   0x8   : > { %s8147_s9 = scalar_select %p47_p0, %s8060_s26, %s49_s8  }
   0x9   : > { %p58_p4 = por %p57_p2, %p56_p1  ;;  %p63_p5 = scmp.eq.s32.totalorder %s8134_s28, 0 }
   0xa   : > { %p7927_p6 = scmp.lt.s32.totalorder %s8064_s27, 32  ;;  %s230_s11 = sand.u32 1, %s8060_s26  }
   0xb   : > { %p8151_p7 = por %p63_p5, %p62_p3  ;;  %s5630_s12 = sshll.u32 %s230_s11, 14 }
   0xc   : > { %s5707_s13 = sshll.u32 %s8064_s27, 18  ;;  %s234_s17 = scalar_lea.vmem [#allocation3], %s5630_s12 }
   0xd   : > { %s8160_s16 = scalar_lea.hbm %s10960_s1, %s5707_s13  ;;  %s242_s18 = sshll.u32 %s234_s17, 4  ;;  %s8162_s18 = int_to_ptr.vmem [resolvable:$true] %s242_s18 }
   0xe   : > { %p8164_p8 = pnand %p7927_p6, %p58_p4  ;;  %s8169_s20 = scalar_lea.sflag [#allocation4], %s230_s11 }
   0xf   : > { %s7970_s21 = scalar_lea.hbm %s8160_s16, 262144  ;;  %s7975_s24 = scalar_lea.hbm %s10960_s1, 8388608 }
  0x10   : > { %p7971_p10 = scmp.ne.s32.totalorder %s8160_s16, %s7970_s21  ;;  %p7972_p11 = pneg %p8164_p8 }
  0x11   : > { %p7976_p0 = scmp.lt.u32.totalorder %s8160_s16, %s10960_s1  ;;  %p7977_p1 = scmp.lt.u32.totalorder %s7975_s24, %s7970_s21 }
  0x12   : > { %p7973_p12 = pnand %p7972_p11, %p7971_p10  ;;  %p7979_p3 = scmp.lt.u32.totalorder %s7970_s21, %s8160_s16 }
  0x13   : > { %p7978_p2 = por %p7977_p1, %p7976_p0 }
  0x14   : > { %p7974_p13 = pneg %p7973_p12 }
  0x15   : > { %p7980_p4 = por %p7979_p3, %p7978_p2 }
  0x17   : > { %p7981_p5 = pnand %p7980_p4, %p7974_p13 }
  0x19   : > { %7984 = shalt.err (!%p7981_p5)
}
  0x1a   : > { %s7985_s11 = scalar_lea.vmem %s8162_s18, 262144  ;;  %s8066_s12 = smov [#allocation3]  }
  0x1b   : > { %p7986_p6 = scmp.ne.s32.totalorder %s8162_s18, %s7985_s11  ;;  %s7990_s13 = sshll.u32 %s8066_s12, 4  ;;  %s7991_s13 = int_to_ptr.vmem [resolvable:$false] %s7990_s13 }
  0x1c   : > { %s7992_s14 = scalar_lea.vmem %s7991_s13, 524288  ;;  %p7993_p9 = scmp.lt.s32.totalorder %s8162_s18, %s7991_s13 }
  0x1d   : > { %p7988_p10 = pnand %p7986_p6, %p7972_p11  ;;  %p7994_p0 = scmp.lt.s32.totalorder %s7992_s14, %s7985_s11 }
  0x1f   : > { %p7989_p12 = pneg %p7988_p10  ;;  %p7995_p1 = por %p7994_p0, %p7993_p9 }
  0x21   : > { %p7996_p2 = pnand %p7995_p1, %p7989_p12 }
  0x23   : > { %7999 = shalt.err (!%p7996_p2)
}
  0x24   : > { %s8067_s15 = smov 256   ;;  %s8068_s17 = smov 16  }
  0x25   : > { %7926 = dma.hbm_to_vmem [thread:$0]  (!%p8164_p8), %s8160_s16, 262144, %s8162_s18, %s8169_s20, %s8067_s15, %s8067_s15, %s8068_s17  }
  0x26   : > { %p250_p11 = scmp.lt.s32.totalorder %s8064_s27, 33  ;;  %p10969_p13 = scmp.ge.s32.totalorder %s8064_s27, 1 }
  0x28   : > { %p251_p3 = pnand %p10969_p13, %p250_p11 }
  0x29   : > { %s256_s21 = sand.u32 (!%p251_p3), 1, %s8056_s25  }
  0x2a   : > { %254 = sbr.rel (%p251_p3) target bundleno = 1791 (0x6ff), region = 48  ;;  %s5635_s22 = sshll.u32 (!%p251_p3), %s256_s21, 14 }
  0x2b   : > { %s257_s23 = scalar_lea.sflag (!%p251_p3), [#allocation4], %s256_s21  ;;  %s8201_s24 = scalar_lea.vmem (!%p251_p3), [#allocation3], %s5635_s22 }
  0x31   : > { %8043 = dma.done.wait (%p8151_p7), %s257_s23, 262144  }
  0x32   : > { %8045 = vsyncadd (%p8151_p7), %s257_s23, 4294705152  ;;  %p5636_p9 = scmp.ne.s32.totalorder %s8134_s28, 0 }
  0x33   : > { %vm291_vm0 = vcmask (!%p5636_p9), 1041408   ;;  %vm292_vm1 = vcmask (!%p5636_p9), 584706   ;;  %v8069_v0 = vmov (!%p5636_p9), 0.0  }
  0x34   : > { %290 = sbr.rel (%p5636_p9) target bundleno = 59 (0x3b), region = 56  ;;  %vm293_vm2 = vmor (!%p5636_p9), %vm292_vm1, %vm291_vm0 }
  0x35   : > { %294 = vst.msk [vmem:[#allocation2] sm:$0xf] (!%p5636_p9), %vm293_vm2, %v8069_v0 }
  0x3b PF: > { %v397_v1 = vld [vmem:[%s8201_s24 + $0x8] sm:$0xff]  ;;  %v399_v2 = vld [vmem:[%s8201_s24 + $0x18] sm:$0xff]  ;;  %v396_v6 = vld [vmem:[%s8201_s24] sm:$0xff]  ;;  %s295_s27 = sshra.s32 %s8134_s28, 3  ;;  %s298_s10 = sand.u32 7, %s8134_s28  ;;  %vm5208_vm3 = vcmask 1041408  }
  0x3c   : > { %v1421_v3 = vld [vmem:[%s8201_s24 + $0x2008] sm:$0xff]  ;;  %v5723_v4 = vpack.c.bf16 %v399_v2, %v397_v1  ;;  %v1423_v5 = vld [vmem:[%s8201_s24 + $0x2018] sm:$0xff]  ;;  %v398_v7 = vld [vmem:[%s8201_s24 + $0x10] sm:$0xff]  ;;  %s5708_s16 = sshll.u32 %s295_s27, 9  ;;  %vm5209_vm4 = vcmask 584706   ;;  %p5698_p7 = scmp.ne.s32.totalorder %s8134_s28, 31 }
  0x3d   : > { %v6747_v8 = vpack.c.bf16 %v1423_v5, %v1421_v3  ;;  %v5725_v9 = vpack.c.bf16 %v398_v7, %v396_v6  ;;  %v1420_v10 = vld [vmem:[%s8201_s24 + $0x2000] sm:$0xff]  ;;  %v1422_v11 = vld [vmem:[%s8201_s24 + $0x2010] sm:$0xff]  ;;  %v401_v12 = vld [vmem:[%s8201_s24 + $0x28] sm:$0xff]  ;;  %s301_s18 = sadd.s32 %s5708_s16, %s298_s10  ;;  %vm5310_vm6 = vcmask (!%p5698_p7), 588800   ;;  %vm5491_vm7 = vcmask (!%p5698_p7), 9216  }
  0x3e   : > { %5724 = vmatprep.subr.bf16.mxu1 %v5723_v4  ;;  %v6749_v13 = vpack.c.bf16 %v1422_v11, %v1420_v10  ;;  %v403_v14 = vld [vmem:[%s8201_s24 + $0x38] sm:$0xff]  ;;  %v1425_v15 = vld [vmem:[%s8201_s24 + $0x2028] sm:$0xff]  ;;  %v400_v19 = vld [vmem:[%s8201_s24 + $0x20] sm:$0xff]  ;;  %s8305_s30 = scalar_lea.vmem %s10959_s0, %s301_s18 }
  0x3f   : > { %v1427_v16 = vld [vmem:[%s8201_s24 + $0x2038] sm:$0xff]  ;;  %6748 = vmatprep.subr.bf16.mxu0 %v6747_v8  ;;  %5726 = vmatpush1.bf16.msra.mxu1 %v5725_v9  ;;  %v5727_v17 = vpack.c.bf16 %v403_v14, %v401_v12  ;;  %v402_v20 = vld [vmem:[%s8201_s24 + $0x30] sm:$0xff]  ;;  %v1424_v21 = vld [vmem:[%s8201_s24 + $0x2020] sm:$0xff] }
  0x40   : > { %v6751_v18 = vpack.c.bf16 %v1427_v16, %v1425_v15  ;;  %6750 = vmatpush1.bf16.msra.mxu0 %v6749_v13  ;;  %v5729_v22 = vpack.c.bf16 %v402_v20, %v400_v19  ;;  %v1426_v23 = vld [vmem:[%s8201_s24 + $0x2030] sm:$0xff]  ;;  %v405_v24 = vld [vmem:[%s8201_s24 + $0x48] sm:$0xff]  ;;  %v407_v25 = vld [vmem:[%s8201_s24 + $0x58] sm:$0xff] }
  0x41   : > { %5728 = vmatprep.subr.bf16.mxu1 %v5727_v17  ;;  %v6753_v26 = vpack.c.bf16 %v1426_v23, %v1424_v21  ;;  %v5731_v27 = vpack.c.bf16 %v407_v25, %v405_v24  ;;  %v1429_v28 = vld [vmem:[%s8201_s24 + $0x2048] sm:$0xff]  ;;  %v1431_v29 = vld [vmem:[%s8201_s24 + $0x2058] sm:$0xff]  ;;  %v404_v30 = vld [vmem:[%s8201_s24 + $0x40] sm:$0xff] }
  0x42   : > { %6752 = vmatprep.subr.bf16.mxu0 %v6751_v18  ;;  %v6755_v31 = vpack.c.bf16 %v1431_v29, %v1429_v28  ;;  %v406_v32 = vld [vmem:[%s8201_s24 + $0x50] sm:$0xff]  ;;  %v1428_v33 = vld [vmem:[%s8201_s24 + $0x2040] sm:$0xff]  ;;  %v409_v36 = vld [vmem:[%s8201_s24 + $0x68] sm:$0xff] }
  0x43   : > { %v1430_v34 = vld [vmem:[%s8201_s24 + $0x2050] sm:$0xff]  ;;  %5730 = vmatpush1.bf16.msra.mxu1 %v5729_v22  ;;  %v5733_v35 = vpack.c.bf16 %v406_v32, %v404_v30  ;;  %v411_v37 = vld [vmem:[%s8201_s24 + $0x78] sm:$0xff]  ;;  %v1433_v38 = vld [vmem:[%s8201_s24 + $0x2068] sm:$0xff] }
  0x44   : > { %6754 = vmatpush1.bf16.msra.mxu0 %v6753_v26  ;;  %5732 = vmatprep.subr.bf16.mxu1 %v5731_v27  ;;  %v6757_v39 = vpack.c.bf16 %v1430_v34, %v1428_v33  ;;  %v5735_v40 = vpack.c.bf16 %v411_v37, %v409_v36  ;;  %v1435_v41 = vld [vmem:[%s8201_s24 + $0x2078] sm:$0xff]  ;;  %v408_v42 = vld [vmem:[%s8201_s24 + $0x60] sm:$0xff]  ;;  %v410_v43 = vld [vmem:[%s8201_s24 + $0x70] sm:$0xff] }
  0x45   : > { %6756 = vmatprep.subr.bf16.mxu0 %v6755_v31  ;;  %v6759_v44 = vpack.c.bf16 %v1435_v41, %v1433_v38  ;;  %v1432_v45 = vld [vmem:[%s8201_s24 + $0x2060] sm:$0xff]  ;;  %v1434_v46 = vld [vmem:[%s8201_s24 + $0x2070] sm:$0xff]  ;;  %v413_v47 = vld [vmem:[%s8201_s24 + $0x88] sm:$0xff]  ;;  %v5737_v51 = vpack.c.bf16 %v410_v43, %v408_v42 }
  0x46   : > { %v415_v48 = vld [vmem:[%s8201_s24 + $0x98] sm:$0xff]  ;;  %v1437_v49 = vld [vmem:[%s8201_s24 + $0x2088] sm:$0xff]  ;;  %v6761_v52 = vpack.c.bf16 %v1434_v46, %v1432_v45  ;;  %v412_v54 = vld [vmem:[%s8201_s24 + $0x80] sm:$0xff] }
  0x47   : > { %v1439_v50 = vld [vmem:[%s8201_s24 + $0x2098] sm:$0xff]  ;;  %5734 = vmatpush1.bf16.msra.mxu1 %v5733_v35  ;;  %v5739_v53 = vpack.c.bf16 %v415_v48, %v413_v47  ;;  %v414_v55 = vld [vmem:[%s8201_s24 + $0x90] sm:$0xff]  ;;  %v1436_v56 = vld [vmem:[%s8201_s24 + $0x2080] sm:$0xff] }
  0x48   : > { %6758 = vmatpush1.bf16.msra.mxu0 %v6757_v39  ;;  %5736 = vmatprep.subr.bf16.mxu1 %v5735_v40  ;;  %v6763_v57 = vpack.c.bf16 %v1439_v50, %v1437_v49  ;;  %v1438_v58 = vld [vmem:[%s8201_s24 + $0x2090] sm:$0xff]  ;;  %v417_v59 = vld [vmem:[%s8201_s24 + $0xa8] sm:$0xff]  ;;  %v419_v60 = vld [vmem:[%s8201_s24 + $0xb8] sm:$0xff]  ;;  %v5741_v63 = vpack.c.bf16 %v414_v55, %v412_v54 }
  0x49   : > { %6760 = vmatprep.subr.bf16.mxu0 %v6759_v44  ;;  %v1441_v61 = vld [vmem:[%s8201_s24 + $0x20a8] sm:$0xff]  ;;  %v1443_v62 = vld [vmem:[%s8201_s24 + $0x20b8] sm:$0xff]  ;;  %v6765_v0 = vpack.c.bf16 %v1438_v58, %v1436_v56  ;;  %v5743_v1 = vpack.c.bf16 %v419_v60, %v417_v59  ;;  %v416_v2 = vld [vmem:[%s8201_s24 + $0xa0] sm:$0xff]  ;;  %v8070_v60 = vmov 1966171168  }
  0x4a   : > { %v418_v3 = vld [vmem:[%s8201_s24 + $0xb0] sm:$0xff]  ;;  %v1440_v4 = vld [vmem:[%s8201_s24 + $0x20a0] sm:$0xff]  ;;  %v6767_v5 = vpack.c.bf16 %v1443_v62, %v1441_v61  ;;  %v421_v7 = vld [vmem:[%s8201_s24 + $0xc8] sm:$0xff]  ;;  %v2463_v61 = vunpack.c.l.s4 %v8070_v60  ;;  %v2465_v62 = vlaneseq }
  0x4b   : > { %5738 = vmatpush1.bf16.msra.mxu1 %v5737_v51  ;;  %v1442_v6 = vld [vmem:[%s8201_s24 + $0x20b0] sm:$0xff]  ;;  %v423_v8 = vld [vmem:[%s8201_s24 + $0xd8] sm:$0xff]  ;;  %v1445_v9 = vld [vmem:[%s8201_s24 + $0x20c8] sm:$0xff]  ;;  %v5745_v11 = vpack.c.bf16 %v418_v3, %v416_v2 }
  0x4c   : > { %6762 = vmatpush1.bf16.msra.mxu0 %v6761_v52  ;;  %5740 = vmatprep.subr.bf16.mxu1 %v5739_v53  ;;  %v1447_v10 = vld [vmem:[%s8201_s24 + $0x20d8] sm:$0xff]  ;;  %v6769_v12 = vpack.c.bf16 %v1442_v6, %v1440_v4  ;;  %v5747_v13 = vpack.c.bf16 %v423_v8, %v421_v7  ;;  %v420_v14 = vld [vmem:[%s8201_s24 + $0xc0] sm:$0xff]  ;;  %v422_v15 = vld [vmem:[%s8201_s24 + $0xd0] sm:$0xff] }
  0x4d   : > { %6764 = vmatprep.subr.bf16.mxu0 %v6763_v57  ;;  %v1444_v16 = vld [vmem:[%s8201_s24 + $0x20c0] sm:$0xff]  ;;  %v6771_v17 = vpack.c.bf16 %v1447_v10, %v1445_v9  ;;  %v1446_v18 = vld [vmem:[%s8201_s24 + $0x20d0] sm:$0xff]  ;;  %v425_v19 = vld [vmem:[%s8201_s24 + $0xe8] sm:$0xff]  ;;  %v5749_v23 = vpack.c.bf16 %v422_v15, %v420_v14  ;;  %v2464_v14 = vunpack.c.0.s8 %v2463_v61  ;;  %v8310_v15 = vshrl.u32 %v2465_v62, 7 }
  0x4e   : > { %v427_v20 = vld [vmem:[%s8201_s24 + $0xf8] sm:$0xff]  ;;  %v1449_v21 = vld [vmem:[%s8201_s24 + $0x20e8] sm:$0xff]  ;;  %v6773_v24 = vpack.c.bf16 %v1446_v18, %v1444_v16  ;;  %v424_v26 = vld [vmem:[%s8201_s24 + $0xe0] sm:$0xff] }
  0x4f   : > { %5742 = vmatpush1.bf16.msra.mxu1 %v5741_v63  ;;  %v1451_v22 = vld [vmem:[%s8201_s24 + $0x20f8] sm:$0xff]  ;;  %v5751_v25 = vpack.c.bf16 %v427_v20, %v425_v19  ;;  %v426_v27 = vld [vmem:[%s8201_s24 + $0xf0] sm:$0xff]  ;;  %v1448_v28 = vld [vmem:[%s8201_s24 + $0x20e0] sm:$0xff] }
  0x50   : > { %6766 = vmatpush1.bf16.msra.mxu0 %v6765_v0  ;;  %5744 = vmatprep.subr.bf16.mxu1 %v5743_v1  ;;  %v6775_v29 = vpack.c.bf16 %v1451_v22, %v1449_v21  ;;  %v1450_v30 = vld [vmem:[%s8201_s24 + $0x20f0] sm:$0xff]  ;;  %v429_v31 = vld [vmem:[%s8201_s24 + $0x108] sm:$0xff]  ;;  %v431_v32 = vld [vmem:[%s8201_s24 + $0x118] sm:$0xff]  ;;  %v5753_v35 = vpack.c.bf16 %v426_v27, %v424_v26 }
  0x51   : > { %6768 = vmatprep.subr.bf16.mxu0 %v6767_v5  ;;  %v1453_v33 = vld [vmem:[%s8201_s24 + $0x2108] sm:$0xff]  ;;  %v1455_v34 = vld [vmem:[%s8201_s24 + $0x2118] sm:$0xff]  ;;  %v6777_v36 = vpack.c.bf16 %v1450_v30, %v1448_v28  ;;  %v5755_v37 = vpack.c.bf16 %v431_v32, %v429_v31  ;;  %v428_v38 = vld [vmem:[%s8201_s24 + $0x100] sm:$0xff] }
  0x52   : > { %v430_v39 = vld [vmem:[%s8201_s24 + $0x110] sm:$0xff]  ;;  %v1452_v40 = vld [vmem:[%s8201_s24 + $0x2100] sm:$0xff]  ;;  %v6779_v41 = vpack.c.bf16 %v1455_v34, %v1453_v33  ;;  %v433_v43 = vld [vmem:[%s8201_s24 + $0x128] sm:$0xff] }
  0x53   : > { %5746 = vmatpush1.bf16.msra.mxu1 %v5745_v11  ;;  %v1454_v42 = vld [vmem:[%s8201_s24 + $0x2110] sm:$0xff]  ;;  %v435_v44 = vld [vmem:[%s8201_s24 + $0x138] sm:$0xff]  ;;  %v1457_v45 = vld [vmem:[%s8201_s24 + $0x2128] sm:$0xff]  ;;  %v5757_v47 = vpack.c.bf16 %v430_v39, %v428_v38 }
  0x54   : > { %6770 = vmatpush1.bf16.msra.mxu0 %v6769_v12  ;;  %5748 = vmatprep.subr.bf16.mxu1 %v5747_v13  ;;  %v1459_v46 = vld [vmem:[%s8201_s24 + $0x2138] sm:$0xff]  ;;  %v6781_v48 = vpack.c.bf16 %v1454_v42, %v1452_v40  ;;  %v5759_v49 = vpack.c.bf16 %v435_v44, %v433_v43  ;;  %v432_v50 = vld [vmem:[%s8201_s24 + $0x120] sm:$0xff]  ;;  %v434_v51 = vld [vmem:[%s8201_s24 + $0x130] sm:$0xff] }
  0x55   : > { %6772 = vmatprep.subr.bf16.mxu0 %v6771_v17  ;;  %v1456_v52 = vld [vmem:[%s8201_s24 + $0x2120] sm:$0xff]  ;;  %v6783_v53 = vpack.c.bf16 %v1459_v46, %v1457_v45  ;;  %v1458_v54 = vld [vmem:[%s8201_s24 + $0x2130] sm:$0xff]  ;;  %v437_v55 = vld [vmem:[%s8201_s24 + $0x148] sm:$0xff]  ;;  %v5761_v59 = vpack.c.bf16 %v434_v51, %v432_v50 }
  0x56   : > { %v439_v56 = vld [vmem:[%s8201_s24 + $0x158] sm:$0xff]  ;;  %v1461_v57 = vld [vmem:[%s8201_s24 + $0x2148] sm:$0xff]  ;;  %v6785_v63 = vpack.c.bf16 %v1458_v54, %v1456_v52  ;;  %v436_v1 = vld [vmem:[%s8201_s24 + $0x140] sm:$0xff] }
  0x57   : > { %5750 = vmatpush1.bf16.msra.mxu1 %v5749_v23  ;;  %v1463_v58 = vld [vmem:[%s8201_s24 + $0x2158] sm:$0xff]  ;;  %v5763_v0 = vpack.c.bf16 %v439_v56, %v437_v55  ;;  %v438_v2 = vld [vmem:[%s8201_s24 + $0x150] sm:$0xff]  ;;  %v1460_v3 = vld [vmem:[%s8201_s24 + $0x2140] sm:$0xff] }
  0x58   : > { %6774 = vmatpush1.bf16.msra.mxu0 %v6773_v24  ;;  %5752 = vmatprep.subr.bf16.mxu1 %v5751_v25  ;;  %v6787_v4 = vpack.c.bf16 %v1463_v58, %v1461_v57  ;;  %v1462_v5 = vld [vmem:[%s8201_s24 + $0x2150] sm:$0xff]  ;;  %v441_v6 = vld [vmem:[%s8201_s24 + $0x168] sm:$0xff]  ;;  %v443_v7 = vld [vmem:[%s8201_s24 + $0x178] sm:$0xff]  ;;  %v5765_v10 = vpack.c.bf16 %v438_v2, %v436_v1 }
  0x59   : > { %6776 = vmatprep.subr.bf16.mxu0 %v6775_v29  ;;  %v1465_v8 = vld [vmem:[%s8201_s24 + $0x2168] sm:$0xff]  ;;  %v1467_v9 = vld [vmem:[%s8201_s24 + $0x2178] sm:$0xff]  ;;  %v440_v11 = vld [vmem:[%s8201_s24 + $0x160] sm:$0xff]  ;;  %v6789_v16 = vpack.c.bf16 %v1462_v5, %v1460_v3  ;;  %v5767_v17 = vpack.c.bf16 %v443_v7, %v441_v6 }
  0x5a   : > { %v442_v12 = vld [vmem:[%s8201_s24 + $0x170] sm:$0xff]  ;;  %v1464_v13 = vld [vmem:[%s8201_s24 + $0x2160] sm:$0xff]  ;;  %v445_v19 = vld [vmem:[%s8201_s24 + $0x188] sm:$0xff]  ;;  %v6791_v21 = vpack.c.bf16 %v1467_v9, %v1465_v8 }
  0x5b   : > { %5754 = vmatpush1.bf16.msra.mxu1 %v5753_v35  ;;  %v1466_v18 = vld [vmem:[%s8201_s24 + $0x2170] sm:$0xff]  ;;  %v447_v20 = vld [vmem:[%s8201_s24 + $0x198] sm:$0xff]  ;;  %v1469_v22 = vld [vmem:[%s8201_s24 + $0x2188] sm:$0xff]  ;;  %v5769_v31 = vpack.c.bf16 %v442_v12, %v440_v11 }
  0x5c   : > { %6778 = vmatpush1.bf16.msra.mxu0 %v6777_v36  ;;  %5756 = vmatprep.subr.bf16.mxu1 %v5755_v37  ;;  %v1471_v23 = vld [vmem:[%s8201_s24 + $0x2198] sm:$0xff]  ;;  %v444_v25 = vld [vmem:[%s8201_s24 + $0x180] sm:$0xff]  ;;  %v446_v26 = vld [vmem:[%s8201_s24 + $0x190] sm:$0xff]  ;;  %v8330_v36 = vsub.s32 %v2464_v14, %v8310_v15  ;;  %v6793_v37 = vpack.c.bf16 %v1466_v18, %v1464_v13  ;;  %v5771_v38 = vpack.c.bf16 %v447_v20, %v445_v19 }
  0x5d   : > { %6780 = vmatprep.subr.bf16.mxu0 %v6779_v41  ;;  %v303_v24 = vld [vmem:[%s8305_s30] ss:$8 sm:$0xf]  ;;  %v6795_v42 = vpack.c.bf16 %v1471_v23, %v1469_v22  ;;  %v5773_v50 = vpack.c.bf16 %v446_v26, %v444_v25  ;;  %vm5210_vm5 = vmor %vm5209_vm4, %vm5208_vm3 }
  0x5e   : > { %v1468_v27 = vld [vmem:[%s8201_s24 + $0x2180] sm:$0xff]  ;;  %v1470_v28 = vld [vmem:[%s8201_s24 + $0x2190] sm:$0xff]  ;;  %v449_v32 = vld [vmem:[%s8201_s24 + $0x1a8] sm:$0xff] }
  0x5f   : > { %5758 = vmatpush1.bf16.msra.mxu1 %v5757_v47  ;;  %v304_v29 = vld [vmem:[%s8305_s30] ss:$8 sm:$0xf0]  ;;  %v6797_v51 = vpack.c.bf16 %v1470_v28, %v1468_v27 }
  0x60   : > { %6782 = vmatpush1.bf16.msra.mxu0 %v6781_v48  ;;  %5760 = vmatprep.subr.bf16.mxu1 %v5759_v49  ;;  %v5668_v30 = vld [vmem:[%s8305_s30 + $0x800] ss:$8 sm:$0xf]  ;;  %v8326_v34 = vor.u32 %v304_v29, %v303_v24 }
  0x61   : > { %6784 = vmatprep.subr.bf16.mxu0 %v6783_v53  ;;  %v451_v33 = vld [vmem:[%s8201_s24 + $0x1b8] sm:$0xff]  ;;  %v1473_v46 = vld [vmem:[%s8201_s24 + $0x21a8] sm:$0xff]  ;;  %v448_v52 = vld [vmem:[%s8201_s24 + $0x1a0] sm:$0xff] }
  0x62   : > { %v5669_v35 = vld [vmem:[%s8305_s30 + $0x800] ss:$8 sm:$0xf0]  ;;  %v5775_v53 = vpack.c.bf16 %v451_v33, %v449_v32 }
  0x63   : > { %5762 = vmatpush1.bf16.msra.mxu1 %v5761_v59  ;;  %v8332_v39 = vor.u32 %v5669_v35, %v5668_v30  ;;  %v5653_v40 = vld [vmem:[%s8305_s30 + $0x100] ss:$8 sm:$0xf] }
  0x64   : > { %6786 = vmatpush1.bf16.msra.mxu0 %v6785_v63  ;;  %5764 = vmatprep.subr.bf16.mxu1 %v5763_v0  ;;  %v5654_v41 = vld [vmem:[%s8305_s30 + $0x100] ss:$8 sm:$0xf0] }
  0x65   : > { %6788 = vmatprep.subr.bf16.mxu0 %v6787_v4  ;;  %v8336_v43 = vor.u32 %v5654_v41, %v5653_v40  ;;  %v5684_v44 = vld [vmem:[%s8305_s30 + $0x900] ss:$8 sm:$0xf]  ;;  %v2460_v48 = vcombine.low %v8326_v34, %v8332_v39 }
  0x66   : > { %v5685_v45 = vld [vmem:[%s8305_s30 + $0x900] ss:$8 sm:$0xf0] }
  0x67   : > { %5766 = vmatpush1.bf16.msra.mxu1 %v5765_v10  ;;  %v1475_v47 = vld [vmem:[%s8201_s24 + $0x21b8] sm:$0xff]  ;;  %v8344_v49 = vor.u32 %v5685_v45, %v5684_v44  ;;  %v450_v54 = vld [vmem:[%s8201_s24 + $0x1b0] sm:$0xff]  ;;  %v1472_v55 = vld [vmem:[%s8201_s24 + $0x21a0] sm:$0xff]  ;;  %v8351_v57 = vrot.slane %v2460_v48, %v8330_v36 }
  0x68   : > { %6790 = vmatpush1.bf16.msra.mxu0 %v6789_v16  ;;  %5768 = vmatprep.subr.bf16.mxu1 %v5767_v17  ;;  %v1474_v56 = vld [vmem:[%s8201_s24 + $0x21b0] sm:$0xff]  ;;  %v6799_v59 = vpack.c.bf16 %v1475_v47, %v1473_v46  ;;  %v453_v60 = vld [vmem:[%s8201_s24 + $0x1c8] sm:$0xff]  ;;  %v455_v61 = vld [vmem:[%s8201_s24 + $0x1d8] sm:$0xff]  ;;  %v5777_v2 = vpack.c.bf16 %v450_v54, %v448_v52 }
  0x69   : > { %6792 = vmatprep.subr.bf16.mxu0 %v6791_v21  ;;  %v2660_v58 = vcombine.low %v8336_v43, %v8344_v49  ;;  %v1477_v62 = vld [vmem:[%s8201_s24 + $0x21c8] sm:$0xff]  ;;  %v1479_v63 = vld [vmem:[%s8201_s24 + $0x21d8] sm:$0xff]  ;;  %v2476_v0 = vcombine.high %v8351_v57, %v8351_v57  ;;  %v6801_v3 = vpack.c.bf16 %v1474_v56, %v1472_v55  ;;  %v5779_v4 = vpack.c.bf16 %v455_v61, %v453_v60  ;;  %v452_v5 = vld [vmem:[%s8201_s24 + $0x1c0] sm:$0xff] }
  0x6a   : > { %v454_v6 = vld [vmem:[%s8201_s24 + $0x1d0] sm:$0xff]  ;;  %v1476_v7 = vld [vmem:[%s8201_s24 + $0x21c0] sm:$0xff]  ;;  %v6803_v10 = vpack.c.bf16 %v1479_v63, %v1477_v62  ;;  %v457_v12 = vld [vmem:[%s8201_s24 + $0x1e8] sm:$0xff]  ;;  %v2661_v32 = vcombine.high %v8336_v43, %v8344_v49  ;;  %v8398_v46 = vrot.slane %v8351_v57, %v8330_v36 }
  0x6b   : > { %5770 = vmatpush1.bf16.msra.mxu1 %v5769_v31  ;;  %v2668_v1 = vrot.slane %v2660_v58, %v8330_v36  ;;  %v8366_v8 = vrot.slane %v2476_v0, %v8330_v36  ;;  %v1478_v11 = vld [vmem:[%s8201_s24 + $0x21d0] sm:$0xff]  ;;  %v459_v13 = vld [vmem:[%s8201_s24 + $0x1f8] sm:$0xff]  ;;  %v1481_v14 = vld [vmem:[%s8201_s24 + $0x21e8] sm:$0xff]  ;;  %v5781_v18 = vpack.c.bf16 %v454_v6, %v452_v5  ;;  %v2461_v31 = vcombine.high %v8326_v34, %v8332_v39 }
  0x6c   : > { %6794 = vmatpush1.bf16.msra.mxu0 %v6793_v37  ;;  %5772 = vmatprep.subr.bf16.mxu1 %v5771_v38  ;;  %v1483_v16 = vld [vmem:[%s8201_s24 + $0x21f8] sm:$0xff]  ;;  %v6805_v19 = vpack.c.bf16 %v1478_v11, %v1476_v7  ;;  %v5783_v20 = vpack.c.bf16 %v459_v13, %v457_v12  ;;  %v456_v21 = vld [vmem:[%s8201_s24 + $0x1e0] sm:$0xff]  ;;  %v458_v22 = vld [vmem:[%s8201_s24 + $0x1f0] sm:$0xff] }
  0x6d   : > { %6796 = vmatprep.subr.bf16.mxu0 %v6795_v42  ;;  %v2676_v9 = vcombine.high %v2668_v1, %v2668_v1  ;;  %2988 = vmatprep.mubr.f32.mxu1 %v8366_v8  ;;  %v1480_v23 = vld [vmem:[%s8201_s24 + $0x21e0] sm:$0xff]  ;;  %v6807_v24 = vpack.c.bf16 %v1483_v16, %v1481_v14  ;;  %v1482_v25 = vld [vmem:[%s8201_s24 + $0x21f0] sm:$0xff]  ;;  %v461_v26 = vld [vmem:[%s8201_s24 + $0x208] sm:$0xff]  ;;  %v5785_v30 = vpack.c.bf16 %v458_v22, %v456_v21 }
  0x6e   : > { %v463_v27 = vld [vmem:[%s8201_s24 + $0x218] sm:$0xff]  ;;  %v1485_v28 = vld [vmem:[%s8201_s24 + $0x2208] sm:$0xff]  ;;  %v6809_v33 = vpack.c.bf16 %v1482_v25, %v1480_v23  ;;  %v460_v37 = vld [vmem:[%s8201_s24 + $0x200] sm:$0xff]  ;;  %v2508_v57 = vcombine.high %v8366_v8, %v8366_v8 }
  0x6f   : > { %5774 = vmatpush1.bf16.msra.mxu1 %v5773_v50  ;;  %v8375_v17 = vrot.slane %v2676_v9, %v8330_v36  ;;  %v1487_v29 = vld [vmem:[%s8201_s24 + $0x2218] sm:$0xff]  ;;  %v5787_v35 = vpack.c.bf16 %v463_v27, %v461_v26  ;;  %v462_v38 = vld [vmem:[%s8201_s24 + $0x210] sm:$0xff]  ;;  %v1484_v40 = vld [vmem:[%s8201_s24 + $0x2200] sm:$0xff] }
  0x70   : > { %6798 = vmatpush1.bf16.msra.mxu0 %v6797_v51  ;;  %5776 = vmatprep.subr.bf16.mxu1 %v5775_v53  ;;  %v6811_v41 = vpack.c.bf16 %v1487_v29, %v1485_v28  ;;  %v1486_v42 = vld [vmem:[%s8201_s24 + $0x2210] sm:$0xff]  ;;  %v465_v44 = vld [vmem:[%s8201_s24 + $0x228] sm:$0xff]  ;;  %v467_v45 = vld [vmem:[%s8201_s24 + $0x238] sm:$0xff]  ;;  %v5789_v50 = vpack.c.bf16 %v462_v38, %v460_v37  ;;  %v8403_v51 = vrot.slane %v2668_v1, %v8330_v36 }
  0x71   : > { %6800 = vmatprep.subr.bf16.mxu0 %v6799_v59  ;;  %4124 = vmatprep.mubr.f32.mxu0 %v8375_v17  ;;  %v1489_v47 = vld [vmem:[%s8201_s24 + $0x2228] sm:$0xff]  ;;  %v1491_v48 = vld [vmem:[%s8201_s24 + $0x2238] sm:$0xff]  ;;  %v6813_v52 = vpack.c.bf16 %v1486_v42, %v1484_v40  ;;  %v5791_v53 = vpack.c.bf16 %v467_v45, %v465_v44  ;;  %v464_v54 = vld [vmem:[%s8201_s24 + $0x220] sm:$0xff]  ;;  %v2708_v62 = vcombine.high %v8375_v17, %v8375_v17 }
  0x72   : > { %v466_v55 = vld [vmem:[%s8201_s24 + $0x230] sm:$0xff]  ;;  %v1488_v56 = vld [vmem:[%s8201_s24 + $0x2220] sm:$0xff]  ;;  %v6815_v58 = vpack.c.bf16 %v1491_v48, %v1489_v47  ;;  %v469_v60 = vld [vmem:[%s8201_s24 + $0x248] sm:$0xff] }
  0x73   : > { %5778 = vmatpush1.bf16.msra.mxu1 %v5777_v2  ;;  %v1490_v59 = vld [vmem:[%s8201_s24 + $0x2230] sm:$0xff]  ;;  %v471_v61 = vld [vmem:[%s8201_s24 + $0x258] sm:$0xff]  ;;  %v1493_v63 = vld [vmem:[%s8201_s24 + $0x2248] sm:$0xff]  ;;  %v5793_v1 = vpack.c.bf16 %v466_v55, %v464_v54 }
  0x74   : > { %6802 = vmatpush1.bf16.msra.mxu0 %v6801_v3  ;;  %5780 = vmatprep.subr.bf16.mxu1 %v5779_v4  ;;  %v1495_v0 = vld [vmem:[%s8201_s24 + $0x2258] sm:$0xff]  ;;  %v6817_v2 = vpack.c.bf16 %v1490_v59, %v1488_v56  ;;  %v5795_v3 = vpack.c.bf16 %v471_v61, %v469_v60  ;;  %v468_v4 = vld [vmem:[%s8201_s24 + $0x240] sm:$0xff]  ;;  %v470_v5 = vld [vmem:[%s8201_s24 + $0x250] sm:$0xff] }
  0x75   : > { %6804 = vmatprep.subr.bf16.mxu0 %v6803_v10  ;;  %v1492_v6 = vld [vmem:[%s8201_s24 + $0x2240] sm:$0xff]  ;;  %v6819_v7 = vpack.c.bf16 %v1495_v0, %v1493_v63  ;;  %v1494_v8 = vld [vmem:[%s8201_s24 + $0x2250] sm:$0xff]  ;;  %v473_v9 = vld [vmem:[%s8201_s24 + $0x268] sm:$0xff]  ;;  %v5797_v13 = vpack.c.bf16 %v470_v5, %v468_v4 }
  0x76   : > { %v475_v10 = vld [vmem:[%s8201_s24 + $0x278] sm:$0xff]  ;;  %v1497_v11 = vld [vmem:[%s8201_s24 + $0x2268] sm:$0xff]  ;;  %v6821_v14 = vpack.c.bf16 %v1494_v8, %v1492_v6  ;;  %v472_v17 = vld [vmem:[%s8201_s24 + $0x260] sm:$0xff] }
  0x77   : > { %5782 = vmatpush1.bf16.msra.mxu1 %v5781_v18  ;;  %v1499_v12 = vld [vmem:[%s8201_s24 + $0x2278] sm:$0xff]  ;;  %v5799_v16 = vpack.c.bf16 %v475_v10, %v473_v9  ;;  %v474_v18 = vld [vmem:[%s8201_s24 + $0x270] sm:$0xff]  ;;  %v477_v22 = vld [vmem:[%s8201_s24 + $0x288] sm:$0xff] }
  0x78   : > { %6806 = vmatpush1.bf16.msra.mxu0 %v6805_v19  ;;  %5784 = vmatprep.subr.bf16.mxu1 %v5783_v20  ;;  %v1496_v19 = vld [vmem:[%s8201_s24 + $0x2260] sm:$0xff]  ;;  %v6823_v20 = vpack.c.bf16 %v1499_v12, %v1497_v11  ;;  %v1498_v21 = vld [vmem:[%s8201_s24 + $0x2270] sm:$0xff]  ;;  %v479_v23 = vld [vmem:[%s8201_s24 + $0x298] sm:$0xff]  ;;  %v5801_v26 = vpack.c.bf16 %v474_v18, %v472_v17 }
  0x79   : > { %6808 = vmatprep.subr.bf16.mxu0 %v6807_v24  ;;  %v1501_v24 = vld [vmem:[%s8201_s24 + $0x2288] sm:$0xff]  ;;  %v1503_v25 = vld [vmem:[%s8201_s24 + $0x2298] sm:$0xff]  ;;  %v6825_v27 = vpack.c.bf16 %v1498_v21, %v1496_v19  ;;  %v5803_v28 = vpack.c.bf16 %v479_v23, %v477_v22  ;;  %v476_v29 = vld [vmem:[%s8201_s24 + $0x280] sm:$0xff] }
  0x7a   : > { %v1502_v37 = vld [vmem:[%s8201_s24 + $0x2290] sm:$0xff]  ;;  %v481_v38 = vld [vmem:[%s8201_s24 + $0x2a8] sm:$0xff]  ;;  %v483_v40 = vld [vmem:[%s8201_s24 + $0x2b8] sm:$0xff] }
  0x7b   : > { %5786 = vmatpush1.bf16.msra.mxu1 %v5785_v30  ;;  %v478_v30 = vld [vmem:[%s8201_s24 + $0x290] sm:$0xff]  ;;  %v1507_v42 = vld [vmem:[%s8201_s24 + $0x22b8] sm:$0xff]  ;;  %v5807_v47 = vpack.c.bf16 %v483_v40, %v481_v38  ;;  %v480_v48 = vld [vmem:[%s8201_s24 + $0x2a0] sm:$0xff] }
  0x7c   : > { %6810 = vmatpush1.bf16.msra.mxu0 %v6809_v33  ;;  %5788 = vmatprep.subr.bf16.mxu1 %v5787_v35  ;;  %v1500_v33 = vld [vmem:[%s8201_s24 + $0x2280] sm:$0xff]  ;;  %v6827_v35 = vpack.c.bf16 %v1503_v25, %v1501_v24  ;;  %v5805_v44 = vpack.c.bf16 %v478_v30, %v476_v29  ;;  %v1506_v54 = vld [vmem:[%s8201_s24 + $0x22b0] sm:$0xff]  ;;  %v485_v55 = vld [vmem:[%s8201_s24 + $0x2c8] sm:$0xff] }
  0x7d   : > { %6812 = vmatprep.subr.bf16.mxu0 %v6811_v41  ;;  %v1505_v41 = vld [vmem:[%s8201_s24 + $0x22a8] sm:$0xff]  ;;  %v6829_v45 = vpack.c.bf16 %v1502_v37, %v1500_v33  ;;  %v487_v56 = vld [vmem:[%s8201_s24 + $0x2d8] sm:$0xff]  ;;  %v486_v63 = vld [vmem:[%s8201_s24 + $0x2d0] sm:$0xff] }
  0x7e   : > { %2989 = vmatmul.mubr.f32.vlgmr.msra.gmra.mrb[0].mxu1 %v8398_v46  ;;  %v5811_v61 = vpack.c.bf16 %v487_v56, %v485_v55  ;;  %v1508_v0 = vld [vmem:[%s8201_s24 + $0x22c0] sm:$0xff]  ;;  %v491_v4 = vld [vmem:[%s8201_s24 + $0x2f8] sm:$0xff]  ;;  %v1513_v5 = vld [vmem:[%s8201_s24 + $0x22e8] sm:$0xff] }
  0x7f   : > { %5790 = vmatpush1.bf16.msra.mxu1 %v5789_v50  ;;  %4125 = vmatmul.mubr.f32.vlgmr.msra.gmra.mrb[0].mxu0 %v8403_v51  ;;  %v482_v50 = vld [vmem:[%s8201_s24 + $0x2b0] sm:$0xff]  ;;  %v1515_v6 = vld [vmem:[%s8201_s24 + $0x22f8] sm:$0xff]  ;;  %v488_v10 = vld [vmem:[%s8201_s24 + $0x2e0] sm:$0xff] }
  0x80   : > { %6814 = vmatpush1.bf16.msra.mxu0 %v6813_v52  ;;  %5792 = vmatprep.subr.bf16.mxu1 %v5791_v53  ;;  %v1504_v52 = vld [vmem:[%s8201_s24 + $0x22a0] sm:$0xff]  ;;  %v6831_v53 = vpack.c.bf16 %v1507_v42, %v1505_v41  ;;  %v5809_v59 = vpack.c.bf16 %v482_v50, %v480_v48  ;;  %v490_v11 = vld [vmem:[%s8201_s24 + $0x2f0] sm:$0xff]  ;;  %v495_v17 = vld [vmem:[%s8201_s24 + $0x318] sm:$0xff] }
  0x81   : > { %6816 = vmatprep.subr.bf16.mxu0 %v6815_v58  ;;  %3059 = vmatprep.mubr.f32.mxu1 %v2508_v57  ;;  %v1509_v57 = vld [vmem:[%s8201_s24 + $0x22c8] sm:$0xff]  ;;  %v1511_v58 = vld [vmem:[%s8201_s24 + $0x22d8] sm:$0xff]  ;;  %v6833_v60 = vpack.c.bf16 %v1506_v54, %v1504_v52  ;;  %v1512_v12 = vld [vmem:[%s8201_s24 + $0x22e0] sm:$0xff] }
  0x82   : > { %4195 = vmatprep.mubr.f32.mxu0 %v2708_v62  ;;  %v484_v62 = vld [vmem:[%s8201_s24 + $0x2c0] sm:$0xff]  ;;  %v1517_v18 = vld [vmem:[%s8201_s24 + $0x2308] sm:$0xff]  ;;  %v1519_v19 = vld [vmem:[%s8201_s24 + $0x2318] sm:$0xff] }
  0x83   : > { %5794 = vmatpush1.bf16.msra.mxu1 %v5793_v1  ;;  %v6835_v1 = vpack.c.bf16 %v1511_v58, %v1509_v57  ;;  %v492_v23 = vld [vmem:[%s8201_s24 + $0x300] sm:$0xff]  ;;  %v494_v24 = vld [vmem:[%s8201_s24 + $0x310] sm:$0xff]  ;;  %v499_v29 = vld [vmem:[%s8201_s24 + $0x338] sm:$0xff] }
  0x84   : > { %6818 = vmatpush1.bf16.msra.mxu0 %v6817_v2  ;;  %5796 = vmatprep.subr.bf16.mxu1 %v5795_v3  ;;  %v1510_v2 = vld [vmem:[%s8201_s24 + $0x22d0] sm:$0xff]  ;;  %v489_v3 = vld [vmem:[%s8201_s24 + $0x2e8] sm:$0xff]  ;;  %v1516_v25 = vld [vmem:[%s8201_s24 + $0x2300] sm:$0xff] }
  0x85   : > { %6820 = vmatprep.subr.bf16.mxu0 %v6819_v7  ;;  %v5813_v7 = vpack.c.bf16 %v486_v63, %v484_v62  ;;  %v6837_v8 = vpack.c.bf16 %v1510_v2, %v1508_v0  ;;  %v5815_v9 = vpack.c.bf16 %v491_v4, %v489_v3  ;;  %v1521_v30 = vld [vmem:[%s8201_s24 + $0x2328] sm:$0xff]  ;;  %v1523_v33 = vld [vmem:[%s8201_s24 + $0x2338] sm:$0xff]  ;;  %v496_v40 = vld [vmem:[%s8201_s24 + $0x320] sm:$0xff] }
  0x86   : > { %v498_v41 = vld [vmem:[%s8201_s24 + $0x330] sm:$0xff]  ;;  %v1520_v42 = vld [vmem:[%s8201_s24 + $0x2320] sm:$0xff]  ;;  %v503_v48 = vld [vmem:[%s8201_s24 + $0x358] sm:$0xff] }
  0x87   : > { %5798 = vmatpush1.bf16.msra.mxu1 %v5797_v13  ;;  %v6839_v13 = vpack.c.bf16 %v1515_v6, %v1513_v5  ;;  %v1525_v50 = vld [vmem:[%s8201_s24 + $0x2348] sm:$0xff]  ;;  %v1527_v52 = vld [vmem:[%s8201_s24 + $0x2358] sm:$0xff]  ;;  %v500_v56 = vld [vmem:[%s8201_s24 + $0x340] sm:$0xff] }
  0x88   : > { %6822 = vmatpush1.bf16.msra.mxu0 %v6821_v14  ;;  %5800 = vmatprep.subr.bf16.mxu1 %v5799_v16  ;;  %v1514_v14 = vld [vmem:[%s8201_s24 + $0x22f0] sm:$0xff]  ;;  %v493_v16 = vld [vmem:[%s8201_s24 + $0x308] sm:$0xff]  ;;  %v1524_v58 = vld [vmem:[%s8201_s24 + $0x2340] sm:$0xff] }
  0x89   : > { %6824 = vmatprep.subr.bf16.mxu0 %v6823_v20  ;;  %v5817_v20 = vpack.c.bf16 %v490_v11, %v488_v10  ;;  %v6841_v21 = vpack.c.bf16 %v1514_v14, %v1512_v12  ;;  %v5819_v22 = vpack.c.bf16 %v495_v17, %v493_v16  ;;  %v502_v57 = vld [vmem:[%s8201_s24 + $0x350] sm:$0xff]  ;;  %v507_v62 = vld [vmem:[%s8201_s24 + $0x378] sm:$0xff]  ;;  %v1529_v63 = vld [vmem:[%s8201_s24 + $0x2368] sm:$0xff] }
  0x8a   : > { %v1531_v0 = vld [vmem:[%s8201_s24 + $0x2378] sm:$0xff]  ;;  %v504_v4 = vld [vmem:[%s8201_s24 + $0x360] sm:$0xff]  ;;  %v506_v5 = vld [vmem:[%s8201_s24 + $0x370] sm:$0xff] }
  0x8b   : > { %5802 = vmatpush1.bf16.msra.mxu1 %v5801_v26  ;;  %v6843_v26 = vpack.c.bf16 %v1519_v19, %v1517_v18  ;;  %v1528_v6 = vld [vmem:[%s8201_s24 + $0x2360] sm:$0xff]  ;;  %v511_v10 = vld [vmem:[%s8201_s24 + $0x398] sm:$0xff]  ;;  %v1533_v11 = vld [vmem:[%s8201_s24 + $0x2388] sm:$0xff] }
  0x8c   : > { %6826 = vmatpush1.bf16.msra.mxu0 %v6825_v27  ;;  %5804 = vmatprep.subr.bf16.mxu1 %v5803_v28  ;;  %v1518_v27 = vld [vmem:[%s8201_s24 + $0x2310] sm:$0xff]  ;;  %v497_v28 = vld [vmem:[%s8201_s24 + $0x328] sm:$0xff]  ;;  %v1535_v12 = vld [vmem:[%s8201_s24 + $0x2398] sm:$0xff] }
  0x8d   : > { %6828 = vmatprep.subr.bf16.mxu0 %v6827_v35  ;;  %v5821_v35 = vpack.c.bf16 %v494_v24, %v492_v23  ;;  %v6845_v37 = vpack.c.bf16 %v1518_v27, %v1516_v25  ;;  %v5823_v38 = vpack.c.bf16 %v499_v29, %v497_v28  ;;  %v508_v17 = vld [vmem:[%s8201_s24 + $0x380] sm:$0xff]  ;;  %v510_v18 = vld [vmem:[%s8201_s24 + $0x390] sm:$0xff]  ;;  %v515_v23 = vld [vmem:[%s8201_s24 + $0x3b8] sm:$0xff] }
  0x8e   : > { %v1532_v19 = vld [vmem:[%s8201_s24 + $0x2380] sm:$0xff]  ;;  %v1537_v24 = vld [vmem:[%s8201_s24 + $0x23a8] sm:$0xff]  ;;  %v1539_v25 = vld [vmem:[%s8201_s24 + $0x23b8] sm:$0xff] }
  0x8f   : > { %5806 = vmatpush1.bf16.msra.mxu1 %v5805_v44  ;;  %v6847_v44 = vpack.c.bf16 %v1523_v33, %v1521_v30  ;;  %v512_v29 = vld [vmem:[%s8201_s24 + $0x3a0] sm:$0xff]  ;;  %v514_v30 = vld [vmem:[%s8201_s24 + $0x3b0] sm:$0xff]  ;;  %v531_v43 = vld [vmem:[%s8201_s24 + $0x438] sm:$0xff] }
  0x90   : > { %6830 = vmatpush1.bf16.msra.mxu0 %v6829_v45  ;;  %5808 = vmatprep.subr.bf16.mxu1 %v5807_v47  ;;  %v1522_v45 = vld [vmem:[%s8201_s24 + $0x2330] sm:$0xff]  ;;  %v501_v47 = vld [vmem:[%s8201_s24 + $0x348] sm:$0xff]  ;;  %v1536_v33 = vld [vmem:[%s8201_s24 + $0x23a0] sm:$0xff] }
  0x91   : > { %6832 = vmatprep.subr.bf16.mxu0 %v6831_v53  ;;  %v5825_v53 = vpack.c.bf16 %v498_v41, %v496_v40  ;;  %v6849_v54 = vpack.c.bf16 %v1522_v45, %v1520_v42  ;;  %v5827_v55 = vpack.c.bf16 %v503_v48, %v501_v47  ;;  %v519_v40 = vld [vmem:[%s8201_s24 + $0x3d8] sm:$0xff]  ;;  %v1541_v41 = vld [vmem:[%s8201_s24 + $0x23c8] sm:$0xff]  ;;  %v516_v48 = vld [vmem:[%s8201_s24 + $0x3c0] sm:$0xff] }
  0x92   : > { %v1543_v42 = vld [vmem:[%s8201_s24 + $0x23d8] sm:$0xff] }
  0x93   : > { %5810 = vmatpush1.bf16.msra.mxu1 %v5809_v59  ;;  %v6851_v59 = vpack.c.bf16 %v1527_v52, %v1525_v50  ;;  %v518_v50 = vld [vmem:[%s8201_s24 + $0x3d0] sm:$0xff]  ;;  %v1540_v52 = vld [vmem:[%s8201_s24 + $0x23c0] sm:$0xff] }
  0x94   : > { %6834 = vmatpush1.bf16.msra.mxu0 %v6833_v60  ;;  %5812 = vmatprep.subr.bf16.mxu1 %v5811_v61  ;;  %v1526_v60 = vld [vmem:[%s8201_s24 + $0x2350] sm:$0xff]  ;;  %v505_v61 = vld [vmem:[%s8201_s24 + $0x368] sm:$0xff] }
  0x95   : > { %6836 = vmatprep.subr.bf16.mxu0 %v6835_v1  ;;  %v5829_v1 = vpack.c.bf16 %v502_v57, %v500_v56  ;;  %v6853_v2 = vpack.c.bf16 %v1526_v60, %v1524_v58  ;;  %v5831_v3 = vpack.c.bf16 %v507_v62, %v505_v61  ;;  %v523_v56 = vld [vmem:[%s8201_s24 + $0x3f8] sm:$0xff]  ;;  %v1545_v57 = vld [vmem:[%s8201_s24 + $0x23e8] sm:$0xff]  ;;  %v520_v62 = vld [vmem:[%s8201_s24 + $0x3e0] sm:$0xff] }
  0x96   : > { %v1547_v58 = vld [vmem:[%s8201_s24 + $0x23f8] sm:$0xff] }
  0x97   : > { %5814 = vmatpush1.bf16.msra.mxu1 %v5813_v7  ;;  %v6855_v7 = vpack.c.bf16 %v1531_v0, %v1529_v63  ;;  %v522_v63 = vld [vmem:[%s8201_s24 + $0x3f0] sm:$0xff]  ;;  %v1544_v0 = vld [vmem:[%s8201_s24 + $0x23e0] sm:$0xff] }
  0x98   : > { %6838 = vmatpush1.bf16.msra.mxu0 %v6837_v8  ;;  %5816 = vmatprep.subr.bf16.mxu1 %v5815_v9  ;;  %v1530_v8 = vld [vmem:[%s8201_s24 + $0x2370] sm:$0xff]  ;;  %v509_v9 = vld [vmem:[%s8201_s24 + $0x388] sm:$0xff] }
  0x99   : > { %6840 = vmatprep.subr.bf16.mxu0 %v6839_v13  ;;  %v5833_v13 = vpack.c.bf16 %v506_v5, %v504_v4  ;;  %v6857_v14 = vpack.c.bf16 %v1530_v8, %v1528_v6  ;;  %v5835_v16 = vpack.c.bf16 %v511_v10, %v509_v9  ;;  %v527_v4 = vld [vmem:[%s8201_s24 + $0x418] sm:$0xff]  ;;  %v8533_v5 = vrot.slane %v2461_v31, %v8330_v36  ;;  %v1549_v6 = vld [vmem:[%s8201_s24 + $0x2408] sm:$0xff]  ;;  %v524_v31 = vld [vmem:[%s8201_s24 + $0x400] sm:$0xff] }
  0x9a   : > { %v8541_v8 = vrot.slane %v2661_v32, %v8330_v36  ;;  %v5849_v9 = vpack.c.bf16 %v522_v63, %v520_v62  ;;  %v526_v10 = vld [vmem:[%s8201_s24 + $0x410] sm:$0xff]  ;;  %v2506_v32 = vcombine.high %v8398_v46, %v8398_v46  ;;  %v528_v46 = vld [vmem:[%s8201_s24 + $0x420] sm:$0xff]  ;;  %v543_v62 = vld [vmem:[%s8201_s24 + $0x498] sm:$0xff] }
  0x9b   : > { %5818 = vmatpush1.bf16.msra.mxu1 %v5817_v20  ;;  %v6859_v20 = vpack.c.bf16 %v1535_v12, %v1533_v11  ;;  %v1548_v11 = vld [vmem:[%s8201_s24 + $0x2400] sm:$0xff]  ;;  %v2477_v49 = vcombine.high %v8533_v5, %v8533_v5  ;;  %v1565_v63 = vld [vmem:[%s8201_s24 + $0x2488] sm:$0xff] }
  0x9c   : > { %6842 = vmatpush1.bf16.msra.mxu0 %v6841_v21  ;;  %5820 = vmatprep.subr.bf16.mxu1 %v5819_v22  ;;  %v1534_v21 = vld [vmem:[%s8201_s24 + $0x2390] sm:$0xff]  ;;  %v513_v22 = vld [vmem:[%s8201_s24 + $0x3a8] sm:$0xff] }
  0x9d   : > { %6844 = vmatprep.subr.bf16.mxu0 %v6843_v26  ;;  %v5837_v26 = vpack.c.bf16 %v510_v18, %v508_v17  ;;  %v6861_v27 = vpack.c.bf16 %v1534_v21, %v1532_v19  ;;  %v5839_v28 = vpack.c.bf16 %v515_v23, %v513_v22  ;;  %v1555_v17 = vld [vmem:[%s8201_s24 + $0x2438] sm:$0xff]  ;;  %v2677_v18 = vcombine.high %v8541_v8, %v8541_v8  ;;  %v530_v23 = vld [vmem:[%s8201_s24 + $0x430] sm:$0xff] }
  0x9e   : > { %v2706_v19 = vcombine.high %v8403_v51, %v8403_v51  ;;  %v8566_v51 = vrot.slane %v2477_v49, %v8330_v36  ;;  %v546_v49 = vld [vmem:[%s8201_s24 + $0x4b0] sm:$0xff] }
  0x9f   : > { %5822 = vmatpush1.bf16.msra.mxu1 %v5821_v35  ;;  %v6863_v35 = vpack.c.bf16 %v1539_v25, %v1537_v24  ;;  %v1552_v24 = vld [vmem:[%s8201_s24 + $0x2420] sm:$0xff] }
  0xa0   : > { %6846 = vmatpush1.bf16.msra.mxu0 %v6845_v37  ;;  %5824 = vmatprep.subr.bf16.mxu1 %v5823_v38  ;;  %v1538_v37 = vld [vmem:[%s8201_s24 + $0x23b0] sm:$0xff]  ;;  %v517_v38 = vld [vmem:[%s8201_s24 + $0x3c8] sm:$0xff] }
  0xa1   : > { %6848 = vmatprep.subr.bf16.mxu0 %v6847_v44  ;;  %v5841_v44 = vpack.c.bf16 %v514_v30, %v512_v29  ;;  %v6865_v45 = vpack.c.bf16 %v1538_v37, %v1536_v33  ;;  %v5843_v47 = vpack.c.bf16 %v519_v40, %v517_v38  ;;  %v1557_v29 = vld [vmem:[%s8201_s24 + $0x2448] sm:$0xff]  ;;  %v1559_v30 = vld [vmem:[%s8201_s24 + $0x2458] sm:$0xff]  ;;  %v8571_v33 = vrot.slane %v2677_v18, %v8330_v36  ;;  %v532_v40 = vld [vmem:[%s8201_s24 + $0x440] sm:$0xff] }
  0xa2   : > { %v549_v18 = vld [vmem:[%s8201_s24 + $0x4c8] sm:$0xff] }
  0xa3   : > { %5826 = vmatpush1.bf16.msra.mxu1 %v5825_v53  ;;  %v6867_v53 = vpack.c.bf16 %v1543_v42, %v1541_v41  ;;  %v534_v41 = vld [vmem:[%s8201_s24 + $0x450] sm:$0xff]  ;;  %v1556_v42 = vld [vmem:[%s8201_s24 + $0x2440] sm:$0xff] }
  0xa4   : > { %6850 = vmatpush1.bf16.msra.mxu0 %v6849_v54  ;;  %5828 = vmatprep.subr.bf16.mxu1 %v5827_v55  ;;  %v1542_v54 = vld [vmem:[%s8201_s24 + $0x23d0] sm:$0xff]  ;;  %v521_v55 = vld [vmem:[%s8201_s24 + $0x3e8] sm:$0xff] }
  0xa5   : > { %6852 = vmatprep.subr.bf16.mxu0 %v6851_v59  ;;  %v5845_v59 = vpack.c.bf16 %v518_v50, %v516_v48  ;;  %v6869_v60 = vpack.c.bf16 %v1542_v54, %v1540_v52  ;;  %v5847_v61 = vpack.c.bf16 %v523_v56, %v521_v55  ;;  %v539_v48 = vld [vmem:[%s8201_s24 + $0x478] sm:$0xff]  ;;  %v1561_v50 = vld [vmem:[%s8201_s24 + $0x2468] sm:$0xff]  ;;  %v536_v56 = vld [vmem:[%s8201_s24 + $0x460] sm:$0xff] }
  0xa6   : > { %v1563_v52 = vld [vmem:[%s8201_s24 + $0x2478] sm:$0xff] }
  0xa7   : > { %5830 = vmatpush1.bf16.msra.mxu1 %v5829_v1  ;;  %v6871_v1 = vpack.c.bf16 %v1547_v58, %v1545_v57  ;;  %v538_v57 = vld [vmem:[%s8201_s24 + $0x470] sm:$0xff]  ;;  %v1560_v58 = vld [vmem:[%s8201_s24 + $0x2460] sm:$0xff] }
  0xa8   : > { %6854 = vmatpush1.bf16.msra.mxu0 %v6853_v2  ;;  %5832 = vmatprep.subr.bf16.mxu1 %v5831_v3  ;;  %v1546_v2 = vld [vmem:[%s8201_s24 + $0x23f0] sm:$0xff]  ;;  %v525_v3 = vld [vmem:[%s8201_s24 + $0x408] sm:$0xff] }
  0xa9   : > { %6856 = vmatprep.subr.bf16.mxu0 %v6855_v7  ;;  %v1551_v7 = vld [vmem:[%s8201_s24 + $0x2418] sm:$0xff]  ;;  %v6873_v34 = vpack.c.bf16 %v1546_v2, %v1544_v0  ;;  %v5851_v39 = vpack.c.bf16 %v527_v4, %v525_v3  ;;  %v540_v4 = vld [vmem:[%s8201_s24 + $0x480] sm:$0xff] }
  0xaa   : > { %v6875_v12 = vpack.c.bf16 %v1551_v7, %v1549_v6  ;;  %v1567_v0 = vld [vmem:[%s8201_s24 + $0x2498] sm:$0xff]  ;;  %v542_v6 = vld [vmem:[%s8201_s24 + $0x490] sm:$0xff]  ;;  %v1564_v7 = vld [vmem:[%s8201_s24 + $0x2480] sm:$0xff] }
  0xab   : > { %5834 = vmatpush1.bf16.msra.mxu1 %v5833_v13  ;;  %v1550_v13 = vld [vmem:[%s8201_s24 + $0x2410] sm:$0xff] }
  0xac   : > { %6858 = vmatpush1.bf16.msra.mxu0 %v6857_v14  ;;  %5836 = vmatprep.subr.bf16.mxu1 %v5835_v16  ;;  %v529_v14 = vld [vmem:[%s8201_s24 + $0x428] sm:$0xff]  ;;  %v6877_v21 = vpack.c.bf16 %v1550_v13, %v1548_v11  ;;  %v1571_v11 = vld [vmem:[%s8201_s24 + $0x24b8] sm:$0xff] }
  0xad   : > { %6860 = vmatprep.subr.bf16.mxu0 %v6859_v20  ;;  %v1553_v16 = vld [vmem:[%s8201_s24 + $0x2428] sm:$0xff]  ;;  %v5853_v20 = vpack.c.bf16 %v526_v10, %v524_v31  ;;  %v5855_v22 = vpack.c.bf16 %v531_v43, %v529_v14  ;;  %v547_v31 = vld [vmem:[%s8201_s24 + $0x4b8] sm:$0xff]  ;;  %v544_v43 = vld [vmem:[%s8201_s24 + $0x4a0] sm:$0xff] }
  0xae   : > { %v6879_v25 = vpack.c.bf16 %v1555_v17, %v1553_v16  ;;  %v1569_v10 = vld [vmem:[%s8201_s24 + $0x24a8] sm:$0xff]  ;;  %v1570_v17 = vld [vmem:[%s8201_s24 + $0x24b0] sm:$0xff] }
  0xaf   : > { %5838 = vmatpush1.bf16.msra.mxu1 %v5837_v26  ;;  %v1554_v26 = vld [vmem:[%s8201_s24 + $0x2430] sm:$0xff]  ;;  %v6895_v16 = vpack.c.bf16 %v1571_v11, %v1569_v10  ;;  %v565_v10 = vld [vmem:[%s8201_s24 + $0x548] sm:$0xff]  ;;  %v567_v11 = vld [vmem:[%s8201_s24 + $0x558] sm:$0xff] }
  0xb0   : > { %6862 = vmatpush1.bf16.msra.mxu0 %v6861_v27  ;;  %5840 = vmatprep.subr.bf16.mxu1 %v5839_v28  ;;  %v533_v27 = vld [vmem:[%s8201_s24 + $0x448] sm:$0xff]  ;;  %v535_v28 = vld [vmem:[%s8201_s24 + $0x458] sm:$0xff]  ;;  %v6881_v37 = vpack.c.bf16 %v1554_v26, %v1552_v24  ;;  %v548_v24 = vld [vmem:[%s8201_s24 + $0x4c0] sm:$0xff] }
  0xb1   : > { %6864 = vmatprep.subr.bf16.mxu0 %v6863_v35  ;;  %v5857_v35 = vpack.c.bf16 %v530_v23, %v528_v46  ;;  %v5859_v38 = vpack.c.bf16 %v535_v28, %v533_v27  ;;  %v1572_v26 = vld [vmem:[%s8201_s24 + $0x24c0] sm:$0xff]  ;;  %v1574_v28 = vld [vmem:[%s8201_s24 + $0x24d0] sm:$0xff] }
  0xb3   : > { %5842 = vmatpush1.bf16.msra.mxu1 %v5841_v44  ;;  %v6883_v44 = vpack.c.bf16 %v1559_v30, %v1557_v29  ;;  %v553_v29 = vld [vmem:[%s8201_s24 + $0x4e8] sm:$0xff]  ;;  %v555_v30 = vld [vmem:[%s8201_s24 + $0x4f8] sm:$0xff] }
  0xb4   : > { %6866 = vmatpush1.bf16.msra.mxu0 %v6865_v45  ;;  %5844 = vmatprep.subr.bf16.mxu1 %v5843_v47  ;;  %v1558_v45 = vld [vmem:[%s8201_s24 + $0x2450] sm:$0xff]  ;;  %v537_v47 = vld [vmem:[%s8201_s24 + $0x468] sm:$0xff] }
  0xb5   : > { %6868 = vmatprep.subr.bf16.mxu0 %v6867_v53  ;;  %v5861_v53 = vpack.c.bf16 %v534_v41, %v532_v40  ;;  %v6885_v54 = vpack.c.bf16 %v1558_v45, %v1556_v42  ;;  %v5863_v55 = vpack.c.bf16 %v539_v48, %v537_v47  ;;  %v6901_v40 = vpack.c.bf16 %v1574_v28, %v1572_v26  ;;  %v552_v42 = vld [vmem:[%s8201_s24 + $0x4e0] sm:$0xff]  ;;  %v1578_v48 = vld [vmem:[%s8201_s24 + $0x24f0] sm:$0xff] }
  0xb6   : > { %v5879_v41 = vpack.c.bf16 %v555_v30, %v553_v29  ;;  %v1576_v45 = vld [vmem:[%s8201_s24 + $0x24e0] sm:$0xff]  ;;  %v1594_v30 = vld [vmem:[%s8201_s24 + $0x2570] sm:$0xff] }
  0xb7   : > { %5846 = vmatpush1.bf16.msra.mxu1 %v5845_v59  ;;  %v6887_v59 = vpack.c.bf16 %v1563_v52, %v1561_v50  ;;  %v557_v50 = vld [vmem:[%s8201_s24 + $0x508] sm:$0xff]  ;;  %v559_v52 = vld [vmem:[%s8201_s24 + $0x518] sm:$0xff]  ;;  %v568_v26 = vld [vmem:[%s8201_s24 + $0x560] sm:$0xff] }
  0xb8   : > { %6870 = vmatpush1.bf16.msra.mxu0 %v6869_v60  ;;  %5848 = vmatprep.subr.bf16.mxu1 %v5847_v61  ;;  %v1562_v60 = vld [vmem:[%s8201_s24 + $0x2470] sm:$0xff]  ;;  %v541_v61 = vld [vmem:[%s8201_s24 + $0x488] sm:$0xff]  ;;  %v1592_v28 = vld [vmem:[%s8201_s24 + $0x2560] sm:$0xff] }
  0xb9   : > { %6872 = vmatprep.subr.bf16.mxu0 %v6871_v1  ;;  %v5865_v1 = vpack.c.bf16 %v538_v57, %v536_v56  ;;  %v6889_v2 = vpack.c.bf16 %v1562_v60, %v1560_v58  ;;  %v5867_v3 = vpack.c.bf16 %v543_v62, %v541_v61  ;;  %v6905_v56 = vpack.c.bf16 %v1578_v48, %v1576_v45  ;;  %v556_v58 = vld [vmem:[%s8201_s24 + $0x500] sm:$0xff]  ;;  %v1582_v62 = vld [vmem:[%s8201_s24 + $0x2510] sm:$0xff] }
  0xba   : > { %v5883_v57 = vpack.c.bf16 %v559_v52, %v557_v50  ;;  %v1580_v60 = vld [vmem:[%s8201_s24 + $0x2500] sm:$0xff]  ;;  %v1598_v52 = vld [vmem:[%s8201_s24 + $0x2590] sm:$0xff] }
  0xbb   : > { %5850 = vmatpush1.bf16.msra.mxu1 %v5849_v9  ;;  %v6891_v9 = vpack.c.bf16 %v1567_v0, %v1565_v63  ;;  %v561_v63 = vld [vmem:[%s8201_s24 + $0x528] sm:$0xff]  ;;  %v563_v0 = vld [vmem:[%s8201_s24 + $0x538] sm:$0xff]  ;;  %v572_v45 = vld [vmem:[%s8201_s24 + $0x580] sm:$0xff] }
  0xbc   : > { %6874 = vmatpush1.bf16.msra.mxu0 %v6873_v34  ;;  %5852 = vmatprep.subr.bf16.mxu1 %v5851_v39  ;;  %v1566_v34 = vld [vmem:[%s8201_s24 + $0x2490] sm:$0xff]  ;;  %v545_v39 = vld [vmem:[%s8201_s24 + $0x4a8] sm:$0xff]  ;;  %v1596_v48 = vld [vmem:[%s8201_s24 + $0x2580] sm:$0xff] }
  0xbd   : > { %6876 = vmatprep.subr.bf16.mxu0 %v6875_v12  ;;  %v5869_v12 = vpack.c.bf16 %v542_v6, %v540_v4  ;;  %v6893_v13 = vpack.c.bf16 %v1566_v34, %v1564_v7  ;;  %v5871_v14 = vpack.c.bf16 %v547_v31, %v545_v39  ;;  %v6909_v4 = vpack.c.bf16 %v1582_v62, %v1580_v60  ;;  %v560_v7 = vld [vmem:[%s8201_s24 + $0x520] sm:$0xff]  ;;  %v1586_v31 = vld [vmem:[%s8201_s24 + $0x2530] sm:$0xff] }
  0xbe   : > { %3060 = vmatmul.mubr.f32.vlgmr.msra.gmra.mrb[0].mxu1 %v2506_v32  ;;  %v1568_v32 = vld [vmem:[%s8201_s24 + $0x24a0] sm:$0xff]  ;;  %v5887_v6 = vpack.c.bf16 %v563_v0, %v561_v63  ;;  %v1602_v0 = vld [vmem:[%s8201_s24 + $0x25b0] sm:$0xff] }
  0xbf   : > { %5854 = vmatpush1.bf16.msra.mxu1 %v5853_v20  ;;  %4196 = vmatmul.mubr.f32.vlgmr.msra.gmra.mrb[0].mxu0 %v2706_v19  ;;  %v551_v19 = vld [vmem:[%s8201_s24 + $0x4d8] sm:$0xff]  ;;  %v1573_v20 = vld [vmem:[%s8201_s24 + $0x24c8] sm:$0xff]  ;;  %v6897_v46 = vpack.c.bf16 %v1570_v17, %v1568_v32  ;;  %v1584_v34 = vld [vmem:[%s8201_s24 + $0x2520] sm:$0xff] }
  0xc0   : > { %6878 = vmatpush1.bf16.msra.mxu0 %v6877_v21  ;;  %5856 = vmatprep.subr.bf16.mxu1 %v5855_v22  ;;  %v1575_v21 = vld [vmem:[%s8201_s24 + $0x24d8] sm:$0xff]  ;;  %v5873_v22 = vpack.c.bf16 %v546_v49, %v544_v43  ;;  %v5875_v23 = vpack.c.bf16 %v551_v19, %v549_v18  ;;  %v6913_v43 = vpack.c.bf16 %v1586_v31, %v1584_v34  ;;  %v564_v32 = vld [vmem:[%s8201_s24 + $0x540] sm:$0xff]  ;;  %v1590_v19 = vld [vmem:[%s8201_s24 + $0x2550] sm:$0xff] }
  0xc1   : > { %6880 = vmatprep.subr.bf16.mxu0 %v6879_v25  ;;  %3130 = vmatprep.mubr.f32.mxu1 %v8566_v51  ;;  %v550_v25 = vld [vmem:[%s8201_s24 + $0x4d0] sm:$0xff]  ;;  %v6899_v27 = vpack.c.bf16 %v1575_v21, %v1573_v20  ;;  %v5891_v49 = vpack.c.bf16 %v567_v11, %v565_v10  ;;  %v1588_v17 = vld [vmem:[%s8201_s24 + $0x2540] sm:$0xff]  ;;  %v569_v20 = vld [vmem:[%s8201_s24 + $0x568] sm:$0xff] }
  0xc2   : > { %4266 = vmatprep.mubr.f32.mxu0 %v8571_v33  ;;  %v571_v21 = vld [vmem:[%s8201_s24 + $0x578] sm:$0xff]  ;;  %v576_v60 = vld [vmem:[%s8201_s24 + $0x5a0] sm:$0xff]  ;;  %v1606_v11 = vld [vmem:[%s8201_s24 + $0x25d0] sm:$0xff] }
  0xc3   : > { %5858 = vmatpush1.bf16.msra.mxu1 %v5857_v35  ;;  %v1577_v35 = vld [vmem:[%s8201_s24 + $0x24e8] sm:$0xff]  ;;  %v1600_v62 = vld [vmem:[%s8201_s24 + $0x25a0] sm:$0xff] }
  0xc4   : > { %6882 = vmatpush1.bf16.msra.mxu0 %v6881_v37  ;;  %5860 = vmatprep.subr.bf16.mxu1 %v5859_v38  ;;  %v1579_v37 = vld [vmem:[%s8201_s24 + $0x24f8] sm:$0xff]  ;;  %v5877_v38 = vpack.c.bf16 %v550_v25, %v548_v24  ;;  %v6917_v24 = vpack.c.bf16 %v1590_v19, %v1588_v17  ;;  %v5895_v25 = vpack.c.bf16 %v571_v21, %v569_v20  ;;  %v580_v34 = vld [vmem:[%s8201_s24 + $0x5c0] sm:$0xff]  ;;  %v1610_v21 = vld [vmem:[%s8201_s24 + $0x25f0] sm:$0xff] }
  0xc5   : > { %6884 = vmatprep.subr.bf16.mxu0 %v6883_v44  ;;  %v554_v44 = vld [vmem:[%s8201_s24 + $0x4f0] sm:$0xff]  ;;  %v6903_v47 = vpack.c.bf16 %v1579_v37, %v1577_v35  ;;  %v573_v35 = vld [vmem:[%s8201_s24 + $0x588] sm:$0xff]  ;;  %v575_v37 = vld [vmem:[%s8201_s24 + $0x598] sm:$0xff] }
  0xc6   : > { %v1604_v31 = vld [vmem:[%s8201_s24 + $0x25c0] sm:$0xff] }
  0xc7   : > { %5862 = vmatpush1.bf16.msra.mxu1 %v5861_v53  ;;  %v1581_v53 = vld [vmem:[%s8201_s24 + $0x2508] sm:$0xff]  ;;  %v584_v17 = vld [vmem:[%s8201_s24 + $0x5e0] sm:$0xff] }
  0xc8   : > { %6886 = vmatpush1.bf16.msra.mxu0 %v6885_v54  ;;  %5864 = vmatprep.subr.bf16.mxu1 %v5863_v55  ;;  %v1583_v54 = vld [vmem:[%s8201_s24 + $0x2518] sm:$0xff]  ;;  %v5881_v55 = vpack.c.bf16 %v554_v44, %v552_v42  ;;  %v6921_v42 = vpack.c.bf16 %v1594_v30, %v1592_v28  ;;  %v5899_v44 = vpack.c.bf16 %v575_v37, %v573_v35  ;;  %v1608_v19 = vld [vmem:[%s8201_s24 + $0x25e0] sm:$0xff]  ;;  %v1614_v37 = vld [vmem:[%s8201_s24 + $0x2610] sm:$0xff] }
  0xc9   : > { %6888 = vmatprep.subr.bf16.mxu0 %v6887_v59  ;;  %v558_v59 = vld [vmem:[%s8201_s24 + $0x510] sm:$0xff]  ;;  %v6907_v61 = vpack.c.bf16 %v1583_v54, %v1581_v53  ;;  %v577_v53 = vld [vmem:[%s8201_s24 + $0x5a8] sm:$0xff]  ;;  %v579_v54 = vld [vmem:[%s8201_s24 + $0x5b8] sm:$0xff] }
  0xca   : > { %v588_v28 = vld [vmem:[%s8201_s24 + $0x600] sm:$0xff] }
  0xcb   : > { %5866 = vmatpush1.bf16.msra.mxu1 %v5865_v1  ;;  %v1585_v1 = vld [vmem:[%s8201_s24 + $0x2528] sm:$0xff]  ;;  %v1612_v30 = vld [vmem:[%s8201_s24 + $0x2600] sm:$0xff] }
  0xcc   : > { %6890 = vmatpush1.bf16.msra.mxu0 %v6889_v2  ;;  %5868 = vmatprep.subr.bf16.mxu1 %v5867_v3  ;;  %v1587_v2 = vld [vmem:[%s8201_s24 + $0x2538] sm:$0xff]  ;;  %v5885_v3 = vpack.c.bf16 %v558_v59, %v556_v58  ;;  %v6925_v58 = vpack.c.bf16 %v1598_v52, %v1596_v48  ;;  %v5903_v59 = vpack.c.bf16 %v579_v54, %v577_v53  ;;  %v592_v52 = vld [vmem:[%s8201_s24 + $0x620] sm:$0xff]  ;;  %v594_v53 = vld [vmem:[%s8201_s24 + $0x630] sm:$0xff] }
  0xcd   : > { %6892 = vmatprep.subr.bf16.mxu0 %v6891_v9  ;;  %v562_v9 = vld [vmem:[%s8201_s24 + $0x530] sm:$0xff]  ;;  %v6911_v39 = vpack.c.bf16 %v1587_v2, %v1585_v1  ;;  %v581_v1 = vld [vmem:[%s8201_s24 + $0x5c8] sm:$0xff]  ;;  %v583_v2 = vld [vmem:[%s8201_s24 + $0x5d8] sm:$0xff]  ;;  %v6941_v48 = vpack.c.bf16 %v1614_v37, %v1612_v30 }
  0xce   : > { %v608_v30 = vld [vmem:[%s8201_s24 + $0x6a0] sm:$0xff] }
  0xcf   : > { %5870 = vmatpush1.bf16.msra.mxu1 %v5869_v12  ;;  %v1589_v12 = vld [vmem:[%s8201_s24 + $0x2548] sm:$0xff]  ;;  %v1632_v37 = vld [vmem:[%s8201_s24 + $0x26a0] sm:$0xff] }
  0xd0   : > { %6894 = vmatpush1.bf16.msra.mxu0 %v6893_v13  ;;  %5872 = vmatprep.subr.bf16.mxu1 %v5871_v14  ;;  %v1591_v13 = vld [vmem:[%s8201_s24 + $0x2558] sm:$0xff]  ;;  %v5889_v14 = vpack.c.bf16 %v562_v9, %v560_v7  ;;  %v6929_v7 = vpack.c.bf16 %v1602_v0, %v1600_v62  ;;  %v5907_v9 = vpack.c.bf16 %v583_v2, %v581_v1  ;;  %v598_v0 = vld [vmem:[%s8201_s24 + $0x650] sm:$0xff]  ;;  %v1620_v1 = vld [vmem:[%s8201_s24 + $0x2640] sm:$0xff] }
  0xd1   : > { %6896 = vmatprep.subr.bf16.mxu0 %v6895_v16  ;;  %v566_v16 = vld [vmem:[%s8201_s24 + $0x550] sm:$0xff]  ;;  %v6915_v18 = vpack.c.bf16 %v1591_v13, %v1589_v12  ;;  %v585_v12 = vld [vmem:[%s8201_s24 + $0x5e8] sm:$0xff]  ;;  %v587_v13 = vld [vmem:[%s8201_s24 + $0x5f8] sm:$0xff] }
  0xd3   : > { %5874 = vmatpush1.bf16.msra.mxu1 %v5873_v22  ;;  %v1593_v22 = vld [vmem:[%s8201_s24 + $0x2568] sm:$0xff] }
  0xd4   : > { %6898 = vmatpush1.bf16.msra.mxu0 %v6897_v46  ;;  %5876 = vmatprep.subr.bf16.mxu1 %v5875_v23  ;;  %v1595_v46 = vld [vmem:[%s8201_s24 + $0x2578] sm:$0xff]  ;;  %v5893_v23 = vpack.c.bf16 %v566_v16, %v564_v32  ;;  %v6933_v32 = vpack.c.bf16 %v1606_v11, %v1604_v31  ;;  %v5911_v16 = vpack.c.bf16 %v587_v13, %v585_v12  ;;  %v600_v31 = vld [vmem:[%s8201_s24 + $0x660] sm:$0xff]  ;;  %v1626_v13 = vld [vmem:[%s8201_s24 + $0x2670] sm:$0xff] }
  0xd5   : > { %6900 = vmatprep.subr.bf16.mxu0 %v6899_v27  ;;  %v570_v27 = vld [vmem:[%s8201_s24 + $0x570] sm:$0xff]  ;;  %v6919_v29 = vpack.c.bf16 %v1595_v46, %v1593_v22  ;;  %v589_v22 = vld [vmem:[%s8201_s24 + $0x608] sm:$0xff]  ;;  %v591_v46 = vld [vmem:[%s8201_s24 + $0x618] sm:$0xff] }
  0xd6   : > { %v1624_v11 = vld [vmem:[%s8201_s24 + $0x2660] sm:$0xff] }
  0xd7   : > { %5878 = vmatpush1.bf16.msra.mxu1 %v5877_v38  ;;  %v1597_v38 = vld [vmem:[%s8201_s24 + $0x2588] sm:$0xff] }
  0xd8   : > { %6902 = vmatpush1.bf16.msra.mxu0 %v6901_v40  ;;  %5880 = vmatprep.subr.bf16.mxu1 %v5879_v41  ;;  %v1599_v40 = vld [vmem:[%s8201_s24 + $0x2598] sm:$0xff]  ;;  %v5897_v41 = vpack.c.bf16 %v570_v27, %v568_v26  ;;  %v6937_v26 = vpack.c.bf16 %v1610_v21, %v1608_v19  ;;  %v5915_v27 = vpack.c.bf16 %v591_v46, %v589_v22  ;;  %v604_v19 = vld [vmem:[%s8201_s24 + $0x680] sm:$0xff]  ;;  %v1630_v46 = vld [vmem:[%s8201_s24 + $0x2690] sm:$0xff] }
  0xd9   : > { %6904 = vmatprep.subr.bf16.mxu0 %v6903_v47  ;;  %v574_v47 = vld [vmem:[%s8201_s24 + $0x590] sm:$0xff]  ;;  %v6923_v50 = vpack.c.bf16 %v1599_v40, %v1597_v38  ;;  %v593_v38 = vld [vmem:[%s8201_s24 + $0x628] sm:$0xff]  ;;  %v595_v40 = vld [vmem:[%s8201_s24 + $0x638] sm:$0xff] }
  0xda   : > { %v1628_v21 = vld [vmem:[%s8201_s24 + $0x2680] sm:$0xff] }
  0xdb   : > { %5882 = vmatpush1.bf16.msra.mxu1 %v5881_v55  ;;  %v1601_v55 = vld [vmem:[%s8201_s24 + $0x25a8] sm:$0xff] }
  0xdc   : > { %6906 = vmatpush1.bf16.msra.mxu0 %v6905_v56  ;;  %5884 = vmatprep.subr.bf16.mxu1 %v5883_v57  ;;  %v1603_v56 = vld [vmem:[%s8201_s24 + $0x25b8] sm:$0xff]  ;;  %v5901_v57 = vpack.c.bf16 %v574_v47, %v572_v45  ;;  %v8701_v47 = vrot.slane %v8541_v8, %v8330_v36  ;;  %v2509_v8 = vcombine.high %v8566_v51, %v8566_v51 }
  0xdd   : > { %6908 = vmatprep.subr.bf16.mxu0 %v6907_v61  ;;  %v578_v61 = vld [vmem:[%s8201_s24 + $0x5b0] sm:$0xff]  ;;  %v6927_v63 = vpack.c.bf16 %v1603_v56, %v1601_v55  ;;  %v597_v56 = vld [vmem:[%s8201_s24 + $0x648] sm:$0xff] }
  0xde   : > { %v1618_v55 = vld [vmem:[%s8201_s24 + $0x2630] sm:$0xff] }
  0xdf   : > { %5886 = vmatpush1.bf16.msra.mxu1 %v5885_v3  ;;  %v1605_v3 = vld [vmem:[%s8201_s24 + $0x25c8] sm:$0xff] }
  0xe0   : > { %6910 = vmatpush1.bf16.msra.mxu0 %v6909_v4  ;;  %5888 = vmatprep.subr.bf16.mxu1 %v5887_v6  ;;  %v1607_v4 = vld [vmem:[%s8201_s24 + $0x25d8] sm:$0xff]  ;;  %v5905_v6 = vpack.c.bf16 %v578_v61, %v576_v60  ;;  %v2709_v60 = vcombine.high %v8571_v33, %v8571_v33  ;;  %v5921_v61 = vpack.c.bf16 %v594_v53, %v592_v52  ;;  %v601_v33 = vld [vmem:[%s8201_s24 + $0x668] sm:$0xff] }
  0xe1   : > { %6912 = vmatprep.subr.bf16.mxu0 %v6911_v39  ;;  %v582_v39 = vld [vmem:[%s8201_s24 + $0x5d0] sm:$0xff]  ;;  %v6931_v10 = vpack.c.bf16 %v1607_v4, %v1605_v3  ;;  %v603_v4 = vld [vmem:[%s8201_s24 + $0x678] sm:$0xff] }
  0xe2   : > { %v1622_v3 = vld [vmem:[%s8201_s24 + $0x2650] sm:$0xff] }
  0xe3   : > { %5890 = vmatpush1.bf16.msra.mxu1 %v5889_v14  ;;  %v1609_v14 = vld [vmem:[%s8201_s24 + $0x25e8] sm:$0xff] }
  0xe4   : > { %6914 = vmatpush1.bf16.msra.mxu0 %v6913_v43  ;;  %5892 = vmatprep.subr.bf16.mxu1 %v5891_v49  ;;  %v1611_v43 = vld [vmem:[%s8201_s24 + $0x25f8] sm:$0xff]  ;;  %v5909_v49 = vpack.c.bf16 %v582_v39, %v580_v34  ;;  %v6949_v34 = vpack.c.bf16 %v1622_v3, %v1620_v1  ;;  %v5927_v39 = vpack.c.bf16 %v603_v4, %v601_v33  ;;  %v1640_v1 = vld [vmem:[%s8201_s24 + $0x26e0] sm:$0xff]  ;;  %v1642_v3 = vld [vmem:[%s8201_s24 + $0x26f0] sm:$0xff] }
  0xe5   : > { %6916 = vmatprep.subr.bf16.mxu0 %v6915_v18  ;;  %v586_v18 = vld [vmem:[%s8201_s24 + $0x5f0] sm:$0xff]  ;;  %v6935_v20 = vpack.c.bf16 %v1611_v43, %v1609_v14  ;;  %v605_v14 = vld [vmem:[%s8201_s24 + $0x688] sm:$0xff]  ;;  %v607_v43 = vld [vmem:[%s8201_s24 + $0x698] sm:$0xff] }
  0xe6   : > { %v621_v33 = vld [vmem:[%s8201_s24 + $0x708] sm:$0xff]  ;;  %v623_v4 = vld [vmem:[%s8201_s24 + $0x718] sm:$0xff] }
  0xe7   : > { %5894 = vmatpush1.bf16.msra.mxu1 %v5893_v23  ;;  %v1613_v23 = vld [vmem:[%s8201_s24 + $0x2608] sm:$0xff] }
  0xe8   : > { %6918 = vmatpush1.bf16.msra.mxu0 %v6917_v24  ;;  %5896 = vmatprep.subr.bf16.mxu1 %v5895_v25  ;;  %v1615_v24 = vld [vmem:[%s8201_s24 + $0x2618] sm:$0xff]  ;;  %v5913_v25 = vpack.c.bf16 %v586_v18, %v584_v17  ;;  %v6953_v17 = vpack.c.bf16 %v1626_v13, %v1624_v11  ;;  %v5931_v18 = vpack.c.bf16 %v607_v43, %v605_v14  ;;  %v1644_v11 = vld [vmem:[%s8201_s24 + $0x2700] sm:$0xff]  ;;  %v1646_v13 = vld [vmem:[%s8201_s24 + $0x2710] sm:$0xff] }
  0xe9   : > { %6920 = vmatprep.subr.bf16.mxu0 %v6919_v29  ;;  %v590_v29 = vld [vmem:[%s8201_s24 + $0x610] sm:$0xff]  ;;  %v6939_v35 = vpack.c.bf16 %v1615_v24, %v1613_v23  ;;  %v609_v23 = vld [vmem:[%s8201_s24 + $0x6a8] sm:$0xff]  ;;  %v611_v24 = vld [vmem:[%s8201_s24 + $0x6b8] sm:$0xff] }
  0xea   : > { %v5917_v45 = vpack.c.bf16 %v590_v29, %v588_v28  ;;  %v6957_v28 = vpack.c.bf16 %v1630_v46, %v1628_v21  ;;  %v5935_v29 = vpack.c.bf16 %v611_v24, %v609_v23  ;;  %v625_v14 = vld [vmem:[%s8201_s24 + $0x728] sm:$0xff]  ;;  %v627_v43 = vld [vmem:[%s8201_s24 + $0x738] sm:$0xff]  ;;  %v1648_v21 = vld [vmem:[%s8201_s24 + $0x2720] sm:$0xff] }
  0xeb   : > { %5898 = vmatpush1.bf16.msra.mxu1 %v5897_v41  ;;  %v8695_v41 = vrot.slane %v8533_v5, %v8330_v36  ;;  %v1616_v5 = vld [vmem:[%s8201_s24 + $0x2620] sm:$0xff]  ;;  %v1650_v46 = vld [vmem:[%s8201_s24 + $0x2730] sm:$0xff]  ;;  %v629_v23 = vld [vmem:[%s8201_s24 + $0x748] sm:$0xff] }
  0xec   : > { %6922 = vmatpush1.bf16.msra.mxu0 %v6921_v42  ;;  %5900 = vmatprep.subr.bf16.mxu1 %v5899_v44  ;;  %v1617_v42 = vld [vmem:[%s8201_s24 + $0x2628] sm:$0xff]  ;;  %v1619_v44 = vld [vmem:[%s8201_s24 + $0x2638] sm:$0xff]  ;;  %v6945_v62 = vpack.c.bf16 %v1618_v55, %v1616_v5  ;;  %v612_v5 = vld [vmem:[%s8201_s24 + $0x6c0] sm:$0xff] }
  0xed   : > { %6924 = vmatprep.subr.bf16.mxu0 %v6923_v50  ;;  %v5919_v50 = vpack.c.bf16 %v595_v40, %v593_v38  ;;  %v6943_v54 = vpack.c.bf16 %v1619_v44, %v1617_v42  ;;  %v1634_v40 = vld [vmem:[%s8201_s24 + $0x26b0] sm:$0xff]  ;;  %v613_v42 = vld [vmem:[%s8201_s24 + $0x6c8] sm:$0xff]  ;;  %v615_v44 = vld [vmem:[%s8201_s24 + $0x6d8] sm:$0xff] }
  0xee   : > { %v6961_v52 = vpack.c.bf16 %v1634_v40, %v1632_v37  ;;  %v5939_v53 = vpack.c.bf16 %v615_v44, %v613_v42  ;;  %v1636_v55 = vld [vmem:[%s8201_s24 + $0x26c0] sm:$0xff]  ;;  %v631_v24 = vld [vmem:[%s8201_s24 + $0x758] sm:$0xff]  ;;  %v1654_v40 = vld [vmem:[%s8201_s24 + $0x2750] sm:$0xff] }
  0xef   : > { %5902 = vmatpush1.bf16.msra.mxu1 %v5901_v57  ;;  %v599_v57 = vld [vmem:[%s8201_s24 + $0x658] sm:$0xff]  ;;  %v1652_v37 = vld [vmem:[%s8201_s24 + $0x2740] sm:$0xff]  ;;  %v633_v42 = vld [vmem:[%s8201_s24 + $0x768] sm:$0xff] }
  0xf0   : > { %6926 = vmatpush1.bf16.msra.mxu0 %v6925_v58  ;;  %5904 = vmatprep.subr.bf16.mxu1 %v5903_v59  ;;  %v1621_v58 = vld [vmem:[%s8201_s24 + $0x2648] sm:$0xff]  ;;  %v1623_v59 = vld [vmem:[%s8201_s24 + $0x2658] sm:$0xff]  ;;  %v5923_v51 = vpack.c.bf16 %v599_v57, %v597_v56  ;;  %v1638_v57 = vld [vmem:[%s8201_s24 + $0x26d0] sm:$0xff] }
  0xf1   : > { %6928 = vmatprep.subr.bf16.mxu0 %v6927_v63  ;;  %v596_v63 = vld [vmem:[%s8201_s24 + $0x640] sm:$0xff]  ;;  %v6947_v2 = vpack.c.bf16 %v1623_v59, %v1621_v58  ;;  %v619_v58 = vld [vmem:[%s8201_s24 + $0x6f8] sm:$0xff]  ;;  %v1641_v59 = vld [vmem:[%s8201_s24 + $0x26e8] sm:$0xff] }
  0xf2   : > { %v635_v44 = vld [vmem:[%s8201_s24 + $0x778] sm:$0xff] }
  0xf3   : > { %5906 = vmatpush1.bf16.msra.mxu1 %v5905_v6  ;;  %v1625_v6 = vld [vmem:[%s8201_s24 + $0x2668] sm:$0xff] }
  0xf4   : > { %6930 = vmatpush1.bf16.msra.mxu0 %v6929_v7  ;;  %5908 = vmatprep.subr.bf16.mxu1 %v5907_v9  ;;  %v1627_v7 = vld [vmem:[%s8201_s24 + $0x2678] sm:$0xff]  ;;  %v5925_v9 = vpack.c.bf16 %v598_v0, %v596_v63  ;;  %v616_v63 = vld [vmem:[%s8201_s24 + $0x6e0] sm:$0xff]  ;;  %v618_v0 = vld [vmem:[%s8201_s24 + $0x6f0] sm:$0xff] }
  0xf5   : > { %6932 = vmatprep.subr.bf16.mxu0 %v6931_v10  ;;  %v602_v10 = vld [vmem:[%s8201_s24 + $0x670] sm:$0xff]  ;;  %v6951_v12 = vpack.c.bf16 %v1627_v7, %v1625_v6  ;;  %v1645_v6 = vld [vmem:[%s8201_s24 + $0x2708] sm:$0xff]  ;;  %v1647_v7 = vld [vmem:[%s8201_s24 + $0x2718] sm:$0xff] }
  0xf7   : > { %5910 = vmatpush1.bf16.msra.mxu1 %v5909_v49  ;;  %v1629_v49 = vld [vmem:[%s8201_s24 + $0x2688] sm:$0xff] }
  0xf8   : > { %6934 = vmatpush1.bf16.msra.mxu0 %v6933_v32  ;;  %5912 = vmatprep.subr.bf16.mxu1 %v5911_v16  ;;  %v1631_v32 = vld [vmem:[%s8201_s24 + $0x2698] sm:$0xff]  ;;  %v5929_v16 = vpack.c.bf16 %v602_v10, %v600_v31  ;;  %v620_v31 = vld [vmem:[%s8201_s24 + $0x700] sm:$0xff]  ;;  %v622_v10 = vld [vmem:[%s8201_s24 + $0x710] sm:$0xff] }
  0xf9   : > { %6936 = vmatprep.subr.bf16.mxu0 %v6935_v20  ;;  %v606_v20 = vld [vmem:[%s8201_s24 + $0x690] sm:$0xff]  ;;  %v6955_v22 = vpack.c.bf16 %v1631_v32, %v1629_v49  ;;  %v1649_v49 = vld [vmem:[%s8201_s24 + $0x2728] sm:$0xff]  ;;  %v1651_v32 = vld [vmem:[%s8201_s24 + $0x2738] sm:$0xff] }
  0xfb   : > { %5914 = vmatpush1.bf16.msra.mxu1 %v5913_v25  ;;  %v1633_v25 = vld [vmem:[%s8201_s24 + $0x26a8] sm:$0xff] }
  0xfc   : > { %6938 = vmatpush1.bf16.msra.mxu0 %v6937_v26  ;;  %5916 = vmatprep.subr.bf16.mxu1 %v5915_v27  ;;  %v1635_v26 = vld [vmem:[%s8201_s24 + $0x26b8] sm:$0xff]  ;;  %v5933_v27 = vpack.c.bf16 %v606_v20, %v604_v19  ;;  %v624_v19 = vld [vmem:[%s8201_s24 + $0x720] sm:$0xff]  ;;  %v626_v20 = vld [vmem:[%s8201_s24 + $0x730] sm:$0xff] }
  0xfd   : > { %6940 = vmatprep.subr.bf16.mxu0 %v6939_v35  ;;  %v610_v35 = vld [vmem:[%s8201_s24 + $0x6b0] sm:$0xff]  ;;  %v6959_v38 = vpack.c.bf16 %v1635_v26, %v1633_v25  ;;  %v1653_v25 = vld [vmem:[%s8201_s24 + $0x2748] sm:$0xff]  ;;  %v1655_v26 = vld [vmem:[%s8201_s24 + $0x2758] sm:$0xff] }
  0xfe   : > { %3131 = vmatmul.mubr.f32.vlgmr.msra.gmra.mrb[0].mxu1 %v8695_v41 }
  0xff   : > { %5918 = vmatpush1.bf16.msra.mxu1 %v5917_v45  ;;  %4267 = vmatmul.mubr.f32.vlgmr.msra.gmra.mrb[0].mxu0 %v8701_v47  ;;  %v1637_v45 = vld [vmem:[%s8201_s24 + $0x26c8] sm:$0xff] }
 0x100   : > { %6942 = vmatpush1.bf16.msra.mxu0 %v6941_v48  ;;  %5920 = vmatprep.subr.bf16.mxu1 %v5919_v50  ;;  %v1639_v48 = vld [vmem:[%s8201_s24 + $0x26d8] sm:$0xff]  ;;  %v5937_v50 = vpack.c.bf16 %v610_v35, %v608_v30  ;;  %v628_v30 = vld [vmem:[%s8201_s24 + $0x740] sm:$0xff]  ;;  %v630_v35 = vld [vmem:[%s8201_s24 + $0x750] sm:$0xff] }
 0x101   : > { %6944 = vmatprep.subr.bf16.mxu0 %v6943_v54  ;;  %3201 = vmatprep.mubr.f32.mxu1 %v2509_v8  ;;  %v614_v54 = vld [vmem:[%s8201_s24 + $0x6d0] sm:$0xff]  ;;  %v6963_v56 = vpack.c.bf16 %v1639_v48, %v1637_v45  ;;  %v617_v8 = vld [vmem:[%s8201_s24 + $0x6e8] sm:$0xff]  ;;  %v1659_v48 = vld [vmem:[%s8201_s24 + $0x2778] sm:$0xff] }
 0x102   : > { %4337 = vmatprep.mubr.f32.mxu0 %v2709_v60  ;;  %v1643_v60 = vld [vmem:[%s8201_s24 + $0x26f8] sm:$0xff]  ;;  %v1657_v45 = vld [vmem:[%s8201_s24 + $0x2768] sm:$0xff] }
 0x103   : > { %5922 = vmatpush1.bf16.msra.mxu1 %v5921_v61  ;;  %v5941_v61 = vpack.c.bf16 %v614_v54, %v612_v5  ;;  %v5959_v5 = vpack.c.bf16 %v635_v44, %v633_v42  ;;  %v634_v54 = vld [vmem:[%s8201_s24 + $0x770] sm:$0xff]  ;;  %v649_v42 = vld [vmem:[%s8201_s24 + $0x7e8] sm:$0xff]  ;;  %v651_v44 = vld [vmem:[%s8201_s24 + $0x7f8] sm:$0xff] }
 0x104   : > { %6946 = vmatpush1.bf16.msra.mxu0 %v6945_v62  ;;  %5924 = vmatprep.subr.bf16.mxu1 %v5923_v51  ;;  %v6965_v62 = vpack.c.bf16 %v1638_v57, %v1636_v55  ;;  %v5943_v51 = vpack.c.bf16 %v619_v58, %v617_v8  ;;  %v1656_v55 = vld [vmem:[%s8201_s24 + $0x2760] sm:$0xff]  ;;  %v6983_v57 = vpack.c.bf16 %v1659_v48, %v1657_v45  ;;  %v637_v8 = vld [vmem:[%s8201_s24 + $0x788] sm:$0xff]  ;;  %v639_v58 = vld [vmem:[%s8201_s24 + $0x798] sm:$0xff] }
 0x105   : > { %6948 = vmatprep.subr.bf16.mxu0 %v6947_v2  ;;  %v6967_v2 = vpack.c.bf16 %v1643_v60, %v1641_v59  ;;  %v1661_v59 = vld [vmem:[%s8201_s24 + $0x2788] sm:$0xff]  ;;  %v1663_v60 = vld [vmem:[%s8201_s24 + $0x2798] sm:$0xff] }
 0x106   : > { %v1673_v48 = vld [vmem:[%s8201_s24 + $0x27e8] sm:$0xff] }
 0x107   : > { %5926 = vmatpush1.bf16.msra.mxu1 %v5925_v9  ;;  %v5945_v9 = vpack.c.bf16 %v618_v0, %v616_v63  ;;  %v1660_v63 = vld [vmem:[%s8201_s24 + $0x2780] sm:$0xff]  ;;  %v1662_v0 = vld [vmem:[%s8201_s24 + $0x2790] sm:$0xff] }
 0x108   : > { %6950 = vmatpush1.bf16.msra.mxu0 %v6949_v34  ;;  %5928 = vmatprep.subr.bf16.mxu1 %v5927_v39  ;;  %v6969_v34 = vpack.c.bf16 %v1642_v3, %v1640_v1  ;;  %v5947_v39 = vpack.c.bf16 %v623_v4, %v621_v33  ;;  %v641_v1 = vld [vmem:[%s8201_s24 + $0x7a8] sm:$0xff]  ;;  %v5963_v33 = vpack.c.bf16 %v639_v58, %v637_v8  ;;  %v1674_v58 = vld [vmem:[%s8201_s24 + $0x27f0] sm:$0xff] }
 0x109   : > { %6952 = vmatprep.subr.bf16.mxu0 %v6951_v12  ;;  %v6971_v12 = vpack.c.bf16 %v1647_v7, %v1645_v6  ;;  %v1665_v4 = vld [vmem:[%s8201_s24 + $0x27a8] sm:$0xff]  ;;  %v1667_v6 = vld [vmem:[%s8201_s24 + $0x27b8] sm:$0xff] }
 0x10a   : > { %v5641_v7 = vld [vmem:[%s8305_s30 + $0x40] ss:$8 sm:$0xf] }
 0x10b   : > { %5930 = vmatpush1.bf16.msra.mxu1 %v5929_v16  ;;  %v5949_v16 = vpack.c.bf16 %v622_v10, %v620_v31  ;;  %v5673_v31 = vld [vmem:[%s8305_s30 + $0x840] ss:$8 sm:$0xf0] }
 0x10c   : > { %6954 = vmatpush1.bf16.msra.mxu0 %v6953_v17  ;;  %5932 = vmatprep.subr.bf16.mxu1 %v5931_v18  ;;  %v6973_v17 = vpack.c.bf16 %v1646_v13, %v1644_v11  ;;  %v5951_v18 = vpack.c.bf16 %v627_v43, %v625_v14  ;;  %v5657_v10 = vld [vmem:[%s8305_s30 + $0x140] ss:$8 sm:$0xf]  ;;  %v6989_v43 = vpack.c.bf16 %v1662_v0, %v1660_v63 }
 0x10d   : > { %6956 = vmatprep.subr.bf16.mxu0 %v6955_v22  ;;  %v6975_v22 = vpack.c.bf16 %v1651_v32, %v1649_v49  ;;  %v5658_v11 = vld [vmem:[%s8305_s30 + $0x140] ss:$8 sm:$0xf0] }
 0x10e   : > { %v5688_v13 = vld [vmem:[%s8305_s30 + $0x940] ss:$8 sm:$0xf] }
 0x10f   : > { %5934 = vmatpush1.bf16.msra.mxu1 %v5933_v27  ;;  %v5953_v27 = vpack.c.bf16 %v626_v20, %v624_v19  ;;  %v5689_v14 = vld [vmem:[%s8305_s30 + $0x940] ss:$8 sm:$0xf0] }
 0x110   : > { %6958 = vmatpush1.bf16.msra.mxu0 %v6957_v28  ;;  %5936 = vmatprep.subr.bf16.mxu1 %v5935_v29  ;;  %v6977_v28 = vpack.c.bf16 %v1650_v46, %v1648_v21  ;;  %v5955_v29 = vpack.c.bf16 %v631_v24, %v629_v23  ;;  %v640_v32 = vld [vmem:[%s8201_s24 + $0x7a0] sm:$0xff]  ;;  %v1666_v19 = vld [vmem:[%s8201_s24 + $0x27b0] sm:$0xff]  ;;  %v645_v20 = vld [vmem:[%s8201_s24 + $0x7c8] sm:$0xff] }
 0x111   : > { %6960 = vmatprep.subr.bf16.mxu0 %v6959_v38  ;;  %v6979_v38 = vpack.c.bf16 %v1655_v26, %v1653_v25  ;;  %v647_v21 = vld [vmem:[%s8201_s24 + $0x7d8] sm:$0xff]  ;;  %v1669_v23 = vld [vmem:[%s8201_s24 + $0x27c8] sm:$0xff]  ;;  %v8825_v25 = vor.u32 %v5658_v11, %v5657_v10  ;;  %v8827_v26 = vor.u32 %v5689_v14, %v5688_v13  ;;  %v2707_v14 = vcombine.high %v8701_v47, %v8701_v47 }
 0x112   : > { %v1671_v24 = vld [vmem:[%s8201_s24 + $0x27d8] sm:$0xff]  ;;  %v1681_v10 = vld [vmem:[%s8201_s24 + $0x2828] sm:$0xff] }
 0x113   : > { %5938 = vmatpush1.bf16.msra.mxu1 %v5937_v50  ;;  %v5957_v50 = vpack.c.bf16 %v630_v35, %v628_v30  ;;  %v644_v30 = vld [vmem:[%s8201_s24 + $0x7c0] sm:$0xff]  ;;  %v646_v35 = vld [vmem:[%s8201_s24 + $0x7d0] sm:$0xff]  ;;  %v1683_v11 = vld [vmem:[%s8201_s24 + $0x2838] sm:$0xff] }
 0x114   : > { %6962 = vmatpush1.bf16.msra.mxu0 %v6961_v52  ;;  %5940 = vmatprep.subr.bf16.mxu1 %v5939_v53  ;;  %v632_v52 = vld [vmem:[%s8201_s24 + $0x760] sm:$0xff]  ;;  %v6981_v53 = vpack.c.bf16 %v1654_v40, %v1652_v37  ;;  %v1670_v40 = vld [vmem:[%s8201_s24 + $0x27d0] sm:$0xff]  ;;  %v1685_v47 = vld [vmem:[%s8201_s24 + $0x2848] sm:$0xff] }
 0x115   : > { %6964 = vmatprep.subr.bf16.mxu0 %v6963_v56  ;;  %v1658_v56 = vld [vmem:[%s8201_s24 + $0x2770] sm:$0xff]  ;;  %v1668_v37 = vld [vmem:[%s8201_s24 + $0x27c0] sm:$0xff] }
 0x116   : > { %v6985_v3 = vpack.c.bf16 %v1658_v56, %v1656_v55  ;;  %v648_v55 = vld [vmem:[%s8201_s24 + $0x7e0] sm:$0xff]  ;;  %v650_v56 = vld [vmem:[%s8201_s24 + $0x7f0] sm:$0xff] }
 0x117   : > { %5942 = vmatpush1.bf16.msra.mxu1 %v5941_v61  ;;  %v636_v61 = vld [vmem:[%s8201_s24 + $0x780] sm:$0xff]  ;;  %v5977_v0 = vpack.c.bf16 %v650_v56, %v648_v55 }
 0x118   : > { %6966 = vmatpush1.bf16.msra.mxu0 %v6965_v62  ;;  %5944 = vmatprep.subr.bf16.mxu1 %v5943_v51  ;;  %v638_v62 = vld [vmem:[%s8201_s24 + $0x790] sm:$0xff]  ;;  %v5961_v51 = vpack.c.bf16 %v634_v54, %v632_v52  ;;  %v2710_v52 = vcombine.low %v8825_v25, %v8827_v26  ;;  %v5975_v54 = vpack.c.bf16 %v651_v44, %v649_v42  ;;  %v665_v42 = vld [vmem:[%s8201_s24 + $0x868] sm:$0xff]  ;;  %v667_v44 = vld [vmem:[%s8201_s24 + $0x878] sm:$0xff] }
 0x119   : > { %6968 = vmatprep.subr.bf16.mxu0 %v6967_v2  ;;  %v643_v2 = vld [vmem:[%s8201_s24 + $0x7b8] sm:$0xff]  ;;  %v1688_v55 = vld [vmem:[%s8201_s24 + $0x2860] sm:$0xff] }
 0x11a   : > { %v5967_v49 = vpack.c.bf16 %v643_v2, %v641_v1  ;;  %v8853_v63 = vrot.slane %v2710_v52, %v8330_v36 }
 0x11b   : > { %5946 = vmatpush1.bf16.msra.mxu1 %v5945_v9  ;;  %v5642_v9 = vld [vmem:[%s8305_s30 + $0x40] ss:$8 sm:$0xf0] }
 0x11c   : > { %6970 = vmatpush1.bf16.msra.mxu0 %v6969_v34  ;;  %5948 = vmatprep.subr.bf16.mxu1 %v5947_v39  ;;  %v6987_v34 = vpack.c.bf16 %v1663_v60, %v1661_v59  ;;  %v5672_v39 = vld [vmem:[%s8305_s30 + $0x840] ss:$8 sm:$0xf] }
 0x11d   : > { %6972 = vmatprep.subr.bf16.mxu0 %v6971_v12  ;;  %v5965_v12 = vpack.c.bf16 %v638_v62, %v636_v61  ;;  %v8821_v46 = vor.u32 %v5673_v31, %v5672_v39  ;;  %v653_v59 = vld [vmem:[%s8201_s24 + $0x808] sm:$0xff]  ;;  %v655_v60 = vld [vmem:[%s8201_s24 + $0x818] sm:$0xff]  ;;  %v2507_v31 = vcombine.high %v8695_v41, %v8695_v41  ;;  %v656_v41 = vld [vmem:[%s8201_s24 + $0x820] sm:$0xff] }
 0x11e   : > { %v1677_v62 = vld [vmem:[%s8201_s24 + $0x2808] sm:$0xff]  ;;  %v5979_v2 = vpack.c.bf16 %v655_v60, %v653_v59  ;;  %v1695_v60 = vld [vmem:[%s8201_s24 + $0x2898] sm:$0xff] }
 0x11f   : > { %5950 = vmatpush1.bf16.msra.mxu1 %v5949_v16  ;;  %v642_v16 = vld [vmem:[%s8201_s24 + $0x7b0] sm:$0xff]  ;;  %v1693_v59 = vld [vmem:[%s8201_s24 + $0x2888] sm:$0xff] }
 0x120   : > { %6974 = vmatpush1.bf16.msra.mxu0 %v6973_v17  ;;  %5952 = vmatprep.subr.bf16.mxu1 %v5951_v18  ;;  %v1664_v17 = vld [vmem:[%s8201_s24 + $0x27a0] sm:$0xff]  ;;  %v6991_v18 = vpack.c.bf16 %v1667_v6, %v1665_v4 }
 0x121   : > { %6976 = vmatprep.subr.bf16.mxu0 %v6975_v22  ;;  %v8819_v22 = vor.u32 %v5642_v9, %v5641_v7  ;;  %v1676_v4 = vld [vmem:[%s8201_s24 + $0x2800] sm:$0xff]  ;;  %v1678_v7 = vld [vmem:[%s8201_s24 + $0x2810] sm:$0xff]  ;;  %v657_v9 = vld [vmem:[%s8201_s24 + $0x828] sm:$0xff] }
 0x123   : > { %5954 = vmatpush1.bf16.msra.mxu1 %v5953_v27  ;;  %v5969_v27 = vpack.c.bf16 %v642_v16, %v640_v32  ;;  %v2510_v45 = vcombine.low %v8819_v22, %v8821_v46  ;;  %v658_v32 = vld [vmem:[%s8201_s24 + $0x830] sm:$0xff]  ;;  %v1680_v16 = vld [vmem:[%s8201_s24 + $0x2820] sm:$0xff] }
 0x124   : > { %6978 = vmatpush1.bf16.msra.mxu0 %v6977_v28  ;;  %5956 = vmatprep.subr.bf16.mxu1 %v5955_v29  ;;  %v6993_v28 = vpack.c.bf16 %v1666_v19, %v1664_v17  ;;  %v5971_v29 = vpack.c.bf16 %v647_v21, %v645_v20  ;;  %v7007_v17 = vpack.c.bf16 %v1683_v11, %v1681_v10  ;;  %v661_v19 = vld [vmem:[%s8201_s24 + $0x848] sm:$0xff]  ;;  %v663_v20 = vld [vmem:[%s8201_s24 + $0x858] sm:$0xff]  ;;  %v672_v11 = vld [vmem:[%s8201_s24 + $0x8a0] sm:$0xff] }
 0x125   : > { %6980 = vmatprep.subr.bf16.mxu0 %v6979_v38  ;;  %v6995_v38 = vpack.c.bf16 %v1671_v24, %v1669_v23  ;;  %v8848_v61 = vrot.slane %v2510_v45, %v8330_v36  ;;  %v1687_v23 = vld [vmem:[%s8201_s24 + $0x2858] sm:$0xff]  ;;  %v1689_v45 = vld [vmem:[%s8201_s24 + $0x2868] sm:$0xff] }
 0x127   : > { %5958 = vmatpush1.bf16.msra.mxu1 %v5957_v50  ;;  %v1675_v50 = vld [vmem:[%s8201_s24 + $0x27f8] sm:$0xff]  ;;  %v2526_v39 = vcombine.high %v8848_v61, %v8848_v61 }
 0x128   : > { %6982 = vmatpush1.bf16.msra.mxu0 %v6981_v53  ;;  %5960 = vmatprep.subr.bf16.mxu1 %v5959_v5  ;;  %v5973_v53 = vpack.c.bf16 %v646_v35, %v644_v30  ;;  %v6997_v5 = vpack.c.bf16 %v1670_v40, %v1668_v37  ;;  %v6999_v8 = vpack.c.bf16 %v1675_v50, %v1673_v48  ;;  %v660_v30 = vld [vmem:[%s8201_s24 + $0x840] sm:$0xff]  ;;  %v662_v35 = vld [vmem:[%s8201_s24 + $0x850] sm:$0xff]  ;;  %v1691_v48 = vld [vmem:[%s8201_s24 + $0x2878] sm:$0xff] }
 0x129   : > { %6984 = vmatprep.subr.bf16.mxu0 %v6983_v57  ;;  %v1672_v57 = vld [vmem:[%s8201_s24 + $0x27e0] sm:$0xff]  ;;  %v8878_v21 = vrot.slane %v2526_v39, %v8330_v36  ;;  %v1686_v40 = vld [vmem:[%s8201_s24 + $0x2850] sm:$0xff]  ;;  %v5989_v50 = vpack.c.bf16 %v662_v35, %v660_v30  ;;  %v7015_v56 = vpack.c.bf16 %v1691_v48, %v1689_v45  ;;  %v683_v30 = vld [vmem:[%s8201_s24 + $0x8f8] sm:$0xff] }
 0x12a   : > { %v7001_v1 = vpack.c.bf16 %v1674_v58, %v1672_v57  ;;  %v1684_v37 = vld [vmem:[%s8201_s24 + $0x2840] sm:$0xff]  ;;  %v1690_v57 = vld [vmem:[%s8201_s24 + $0x2870] sm:$0xff]  ;;  %v671_v58 = vld [vmem:[%s8201_s24 + $0x898] sm:$0xff] }
 0x12b   : > { %5962 = vmatpush1.bf16.msra.mxu1 %v5961_v51  ;;  %v1679_v51 = vld [vmem:[%s8201_s24 + $0x2818] sm:$0xff]  ;;  %v7013_v52 = vpack.c.bf16 %v1686_v40, %v1684_v37  ;;  %v1705_v35 = vld [vmem:[%s8201_s24 + $0x28e8] sm:$0xff]  ;;  %v682_v45 = vld [vmem:[%s8201_s24 + $0x8f0] sm:$0xff] }
 0x12c   : > { %6986 = vmatpush1.bf16.msra.mxu0 %v6985_v3  ;;  %5964 = vmatprep.subr.bf16.mxu1 %v5963_v33  ;;  %v652_v3 = vld [vmem:[%s8201_s24 + $0x800] sm:$0xff]  ;;  %v654_v33 = vld [vmem:[%s8201_s24 + $0x810] sm:$0xff]  ;;  %v7003_v6 = vpack.c.bf16 %v1679_v51, %v1677_v62  ;;  %v7017_v51 = vpack.c.bf16 %v1690_v57, %v1688_v55  ;;  %v1707_v37 = vld [vmem:[%s8201_s24 + $0x28f8] sm:$0xff] }
 0x12d   : > { %6988 = vmatprep.subr.bf16.mxu0 %v6987_v34  ;;  %v659_v34 = vld [vmem:[%s8201_s24 + $0x838] sm:$0xff]  ;;  %v5981_v13 = vpack.c.bf16 %v654_v33, %v652_v3  ;;  %v1692_v3 = vld [vmem:[%s8201_s24 + $0x2880] sm:$0xff]  ;;  %v7019_v33 = vpack.c.bf16 %v1695_v60, %v1693_v59  ;;  %v686_v59 = vld [vmem:[%s8201_s24 + $0x910] sm:$0xff] }
 0x12e   : > { %v1704_v48 = vld [vmem:[%s8201_s24 + $0x28e0] sm:$0xff]  ;;  %v1711_v55 = vld [vmem:[%s8201_s24 + $0x2918] sm:$0xff] }
 0x12f   : > { %5966 = vmatpush1.bf16.msra.mxu1 %v5965_v12  ;;  %v2726_v12 = vcombine.high %v8853_v63, %v8853_v63  ;;  %v1708_v60 = vld [vmem:[%s8201_s24 + $0x2900] sm:$0xff] }
 0x130   : > { %6990 = vmatpush1.bf16.msra.mxu0 %v6989_v43  ;;  %5968 = vmatprep.subr.bf16.mxu1 %v5967_v49  ;;  %v7005_v43 = vpack.c.bf16 %v1678_v7, %v1676_v4  ;;  %v5983_v49 = vpack.c.bf16 %v659_v34, %v657_v9  ;;  %v1694_v4 = vld [vmem:[%s8201_s24 + $0x2890] sm:$0xff]  ;;  %v675_v7 = vld [vmem:[%s8201_s24 + $0x8b8] sm:$0xff]  ;;  %v1697_v9 = vld [vmem:[%s8201_s24 + $0x28a8] sm:$0xff] }
 0x131   : > { %6992 = vmatprep.subr.bf16.mxu0 %v6991_v18  ;;  %v1682_v18 = vld [vmem:[%s8201_s24 + $0x2830] sm:$0xff]  ;;  %v8883_v24 = vrot.slane %v2726_v12, %v8330_v36  ;;  %v1699_v34 = vld [vmem:[%s8201_s24 + $0x28b8] sm:$0xff] }
 0x132   : > { %v674_v12 = vld [vmem:[%s8201_s24 + $0x8b0] sm:$0xff] }
 0x133   : > { %5970 = vmatpush1.bf16.msra.mxu1 %v5969_v27  ;;  %v5985_v27 = vpack.c.bf16 %v658_v32, %v656_v41  ;;  %v679_v41 = vld [vmem:[%s8201_s24 + $0x8d8] sm:$0xff]  ;;  %v1701_v32 = vld [vmem:[%s8201_s24 + $0x28c8] sm:$0xff] }
 0x134   : > { %6994 = vmatpush1.bf16.msra.mxu0 %v6993_v28  ;;  %5972 = vmatprep.subr.bf16.mxu1 %v5971_v29  ;;  %v7009_v28 = vpack.c.bf16 %v1682_v18, %v1680_v16  ;;  %v5987_v29 = vpack.c.bf16 %v663_v20, %v661_v19  ;;  %v1703_v16 = vld [vmem:[%s8201_s24 + $0x28d8] sm:$0xff]  ;;  %v676_v20 = vld [vmem:[%s8201_s24 + $0x8c0] sm:$0xff] }
 0x135   : > { %6996 = vmatprep.subr.bf16.mxu0 %v6995_v38  ;;  %v7011_v38 = vpack.c.bf16 %v1687_v23, %v1685_v47  ;;  %v678_v47 = vld [vmem:[%s8201_s24 + $0x8d0] sm:$0xff]  ;;  %v1700_v23 = vld [vmem:[%s8201_s24 + $0x28c0] sm:$0xff] }
 0x137   : > { %5974 = vmatpush1.bf16.msra.mxu1 %v5973_v53  ;;  %v5991_v53 = vpack.c.bf16 %v667_v44, %v665_v42  ;;  %v680_v44 = vld [vmem:[%s8201_s24 + $0x8e0] sm:$0xff] }
 0x138   : > { %6998 = vmatpush1.bf16.msra.mxu0 %v6997_v5  ;;  %5976 = vmatprep.subr.bf16.mxu1 %v5975_v54  ;;  %v664_v5 = vld [vmem:[%s8201_s24 + $0x860] sm:$0xff]  ;;  %v666_v54 = vld [vmem:[%s8201_s24 + $0x870] sm:$0xff] }
 0x139   : > { %7000 = vmatprep.subr.bf16.mxu0 %v6999_v8  ;;  %v669_v8 = vld [vmem:[%s8201_s24 + $0x888] sm:$0xff]  ;;  %v5993_v62 = vpack.c.bf16 %v666_v54, %v664_v5  ;;  %v687_v5 = vld [vmem:[%s8201_s24 + $0x918] sm:$0xff] }
 0x13a   : > { %v1709_v54 = vld [vmem:[%s8201_s24 + $0x2908] sm:$0xff] }
 0x13b   : > { %5978 = vmatpush1.bf16.msra.mxu1 %v5977_v0  ;;  %v5995_v0 = vpack.c.bf16 %v671_v58, %v669_v8  ;;  %v684_v58 = vld [vmem:[%s8201_s24 + $0x900] sm:$0xff] }
 0x13c   : > { %7002 = vmatpush1.bf16.msra.mxu0 %v7001_v1  ;;  %5980 = vmatprep.subr.bf16.mxu1 %v5979_v2  ;;  %v668_v1 = vld [vmem:[%s8201_s24 + $0x880] sm:$0xff]  ;;  %v670_v2 = vld [vmem:[%s8201_s24 + $0x890] sm:$0xff] }
 0x13d   : > { %7004 = vmatprep.subr.bf16.mxu0 %v7003_v6  ;;  %v673_v6 = vld [vmem:[%s8201_s24 + $0x8a8] sm:$0xff]  ;;  %v5997_v39 = vpack.c.bf16 %v670_v2, %v668_v1  ;;  %v691_v1 = vld [vmem:[%s8201_s24 + $0x938] sm:$0xff] }
 0x13e   : > { %3202 = vmatmul.mubr.f32.vlgmr.msra.gmra.mrb[0].mxu1 %v2507_v31  ;;  %v7021_v31 = vpack.c.bf16 %v1694_v4, %v1692_v3  ;;  %v5999_v10 = vpack.c.bf16 %v675_v7, %v673_v6  ;;  %v1713_v2 = vld [vmem:[%s8201_s24 + $0x2928] sm:$0xff]  ;;  %v1715_v3 = vld [vmem:[%s8201_s24 + $0x2938] sm:$0xff]  ;;  %v688_v7 = vld [vmem:[%s8201_s24 + $0x920] sm:$0xff] }
 0x13f   : > { %5982 = vmatpush1.bf16.msra.mxu1 %v5981_v13  ;;  %4338 = vmatmul.mubr.f32.vlgmr.msra.gmra.mrb[0].mxu0 %v2707_v14  ;;  %v1696_v13 = vld [vmem:[%s8201_s24 + $0x28a0] sm:$0xff]  ;;  %v7023_v14 = vpack.c.bf16 %v1699_v34, %v1697_v9  ;;  %v690_v9 = vld [vmem:[%s8201_s24 + $0x930] sm:$0xff] }
 0x140   : > { %7006 = vmatpush1.bf16.msra.mxu0 %v7005_v43  ;;  %5984 = vmatprep.subr.bf16.mxu1 %v5983_v49  ;;  %v1698_v43 = vld [vmem:[%s8201_s24 + $0x28b0] sm:$0xff]  ;;  %v677_v49 = vld [vmem:[%s8201_s24 + $0x8c8] sm:$0xff]  ;;  %v1712_v34 = vld [vmem:[%s8201_s24 + $0x2920] sm:$0xff] }
 0x141   : > { %7008 = vmatprep.subr.bf16.mxu0 %v7007_v17  ;;  %3272 = vmatprep.mubr.f32.mxu1 %v8878_v21  ;;  %v6001_v17 = vpack.c.bf16 %v674_v12, %v672_v11  ;;  %v7025_v18 = vpack.c.bf16 %v1698_v43, %v1696_v13  ;;  %v6003_v19 = vpack.c.bf16 %v679_v41, %v677_v49  ;;  %v695_v11 = vld [vmem:[%s8201_s24 + $0x958] sm:$0xff]  ;;  %v1717_v12 = vld [vmem:[%s8201_s24 + $0x2948] sm:$0xff]  ;;  %v692_v41 = vld [vmem:[%s8201_s24 + $0x940] sm:$0xff] }
 0x142   : > { %4408 = vmatprep.mubr.f32.mxu0 %v8883_v24  ;;  %v1719_v13 = vld [vmem:[%s8201_s24 + $0x2958] sm:$0xff] }
 0x143   : > { %5986 = vmatpush1.bf16.msra.mxu1 %v5985_v27  ;;  %v7027_v27 = vpack.c.bf16 %v1703_v16, %v1701_v32  ;;  %v694_v32 = vld [vmem:[%s8201_s24 + $0x950] sm:$0xff]  ;;  %v1716_v16 = vld [vmem:[%s8201_s24 + $0x2940] sm:$0xff] }
 0x144   : > { %7010 = vmatpush1.bf16.msra.mxu0 %v7009_v28  ;;  %5988 = vmatprep.subr.bf16.mxu1 %v5987_v29  ;;  %v1702_v28 = vld [vmem:[%s8201_s24 + $0x28d0] sm:$0xff]  ;;  %v681_v29 = vld [vmem:[%s8201_s24 + $0x8e8] sm:$0xff] }
 0x145   : > { %7012 = vmatprep.subr.bf16.mxu0 %v7011_v38  ;;  %v6005_v38 = vpack.c.bf16 %v678_v47, %v676_v20  ;;  %v7029_v40 = vpack.c.bf16 %v1702_v28, %v1700_v23  ;;  %v6007_v42 = vpack.c.bf16 %v683_v30, %v681_v29  ;;  %v699_v20 = vld [vmem:[%s8201_s24 + $0x978] sm:$0xff]  ;;  %v1721_v47 = vld [vmem:[%s8201_s24 + $0x2968] sm:$0xff]  ;;  %v696_v30 = vld [vmem:[%s8201_s24 + $0x960] sm:$0xff] }
 0x146   : > { %v1723_v23 = vld [vmem:[%s8201_s24 + $0x2978] sm:$0xff] }
 0x147   : > { %5990 = vmatpush1.bf16.msra.mxu1 %v5989_v50  ;;  %v7031_v50 = vpack.c.bf16 %v1707_v37, %v1705_v35  ;;  %v698_v35 = vld [vmem:[%s8201_s24 + $0x970] sm:$0xff]  ;;  %v1720_v37 = vld [vmem:[%s8201_s24 + $0x2960] sm:$0xff] }
 0x148   : > { %7014 = vmatpush1.bf16.msra.mxu0 %v7013_v52  ;;  %5992 = vmatprep.subr.bf16.mxu1 %v5991_v53  ;;  %v1706_v52 = vld [vmem:[%s8201_s24 + $0x28f0] sm:$0xff]  ;;  %v685_v53 = vld [vmem:[%s8201_s24 + $0x908] sm:$0xff] }
 0x149   : > { %7016 = vmatprep.subr.bf16.mxu0 %v7015_v56  ;;  %v6009_v56 = vpack.c.bf16 %v682_v45, %v680_v44  ;;  %v7033_v57 = vpack.c.bf16 %v1706_v52, %v1704_v48  ;;  %v6011_v8 = vpack.c.bf16 %v687_v5, %v685_v53  ;;  %v703_v44 = vld [vmem:[%s8201_s24 + $0x998] sm:$0xff]  ;;  %v1725_v45 = vld [vmem:[%s8201_s24 + $0x2988] sm:$0xff]  ;;  %v700_v5 = vld [vmem:[%s8201_s24 + $0x980] sm:$0xff] }
 0x14a   : > { %v1727_v48 = vld [vmem:[%s8201_s24 + $0x2998] sm:$0xff] }
 0x14b   : > { %5994 = vmatpush1.bf16.msra.mxu1 %v5993_v62  ;;  %v7035_v62 = vpack.c.bf16 %v1711_v55, %v1709_v54  ;;  %v702_v54 = vld [vmem:[%s8201_s24 + $0x990] sm:$0xff]  ;;  %v1724_v55 = vld [vmem:[%s8201_s24 + $0x2980] sm:$0xff] }
 0x14c   : > { %7018 = vmatpush1.bf16.msra.mxu0 %v7017_v51  ;;  %5996 = vmatprep.subr.bf16.mxu1 %v5995_v0  ;;  %v1710_v51 = vld [vmem:[%s8201_s24 + $0x2910] sm:$0xff]  ;;  %v689_v0 = vld [vmem:[%s8201_s24 + $0x928] sm:$0xff] }
 0x14d   : > { %7020 = vmatprep.subr.bf16.mxu0 %v7019_v33  ;;  %v6013_v33 = vpack.c.bf16 %v686_v59, %v684_v58  ;;  %v7037_v4 = vpack.c.bf16 %v1710_v51, %v1708_v60  ;;  %v6015_v6 = vpack.c.bf16 %v691_v1, %v689_v0  ;;  %v707_v58 = vld [vmem:[%s8201_s24 + $0x9b8] sm:$0xff]  ;;  %v1729_v59 = vld [vmem:[%s8201_s24 + $0x29a8] sm:$0xff]  ;;  %v704_v1 = vld [vmem:[%s8201_s24 + $0x9a0] sm:$0xff] }
 0x14e   : > { %v1731_v60 = vld [vmem:[%s8201_s24 + $0x29b8] sm:$0xff] }
 0x14f   : > { %5998 = vmatpush1.bf16.msra.mxu1 %v5997_v39  ;;  %v7039_v39 = vpack.c.bf16 %v1715_v3, %v1713_v2  ;;  %v706_v2 = vld [vmem:[%s8201_s24 + $0x9b0] sm:$0xff]  ;;  %v1728_v3 = vld [vmem:[%s8201_s24 + $0x29a0] sm:$0xff] }
 0x150   : > { %7022 = vmatpush1.bf16.msra.mxu0 %v7021_v31  ;;  %6000 = vmatprep.subr.bf16.mxu1 %v5999_v10  ;;  %v1714_v31 = vld [vmem:[%s8201_s24 + $0x2930] sm:$0xff]  ;;  %v693_v10 = vld [vmem:[%s8201_s24 + $0x948] sm:$0xff] }
 0x151   : > { %7024 = vmatprep.subr.bf16.mxu0 %v7023_v14  ;;  %v6017_v14 = vpack.c.bf16 %v690_v9, %v688_v7  ;;  %v7041_v43 = vpack.c.bf16 %v1714_v31, %v1712_v34  ;;  %v6019_v49 = vpack.c.bf16 %v695_v11, %v693_v10  ;;  %v711_v7 = vld [vmem:[%s8201_s24 + $0x9d8] sm:$0xff]  ;;  %v1733_v9 = vld [vmem:[%s8201_s24 + $0x29c8] sm:$0xff]  ;;  %v708_v11 = vld [vmem:[%s8201_s24 + $0x9c0] sm:$0xff] }
 0x152   : > { %v1735_v34 = vld [vmem:[%s8201_s24 + $0x29d8] sm:$0xff] }
 0x153   : > { %6002 = vmatpush1.bf16.msra.mxu1 %v6001_v17  ;;  %v7043_v17 = vpack.c.bf16 %v1719_v13, %v1717_v12  ;;  %v710_v12 = vld [vmem:[%s8201_s24 + $0x9d0] sm:$0xff]  ;;  %v1732_v13 = vld [vmem:[%s8201_s24 + $0x29c0] sm:$0xff] }
 0x154   : > { %7026 = vmatpush1.bf16.msra.mxu0 %v7025_v18  ;;  %6004 = vmatprep.subr.bf16.mxu1 %v6003_v19  ;;  %v1718_v18 = vld [vmem:[%s8201_s24 + $0x2950] sm:$0xff]  ;;  %v697_v19 = vld [vmem:[%s8201_s24 + $0x968] sm:$0xff] }
 0x155   : > { %7028 = vmatprep.subr.bf16.mxu0 %v7027_v27  ;;  %v6021_v27 = vpack.c.bf16 %v694_v32, %v692_v41  ;;  %v7045_v28 = vpack.c.bf16 %v1718_v18, %v1716_v16  ;;  %v6023_v29 = vpack.c.bf16 %v699_v20, %v697_v19  ;;  %v715_v41 = vld [vmem:[%s8201_s24 + $0x9f8] sm:$0xff]  ;;  %v1737_v32 = vld [vmem:[%s8201_s24 + $0x29e8] sm:$0xff]  ;;  %v712_v20 = vld [vmem:[%s8201_s24 + $0x9e0] sm:$0xff] }
 0x156   : > { %v1739_v16 = vld [vmem:[%s8201_s24 + $0x29f8] sm:$0xff] }
 0x157   : > { %6006 = vmatpush1.bf16.msra.mxu1 %v6005_v38  ;;  %v7047_v38 = vpack.c.bf16 %v1723_v23, %v1721_v47  ;;  %v714_v47 = vld [vmem:[%s8201_s24 + $0x9f0] sm:$0xff]  ;;  %v1736_v23 = vld [vmem:[%s8201_s24 + $0x29e0] sm:$0xff] }
 0x158   : > { %7030 = vmatpush1.bf16.msra.mxu0 %v7029_v40  ;;  %6008 = vmatprep.subr.bf16.mxu1 %v6007_v42  ;;  %v1722_v40 = vld [vmem:[%s8201_s24 + $0x2970] sm:$0xff]  ;;  %v701_v42 = vld [vmem:[%s8201_s24 + $0x988] sm:$0xff] }
 0x159   : > { %7032 = vmatprep.subr.bf16.mxu0 %v7031_v50  ;;  %v6025_v50 = vpack.c.bf16 %v698_v35, %v696_v30  ;;  %v7049_v52 = vpack.c.bf16 %v1722_v40, %v1720_v37  ;;  %v6027_v53 = vpack.c.bf16 %v703_v44, %v701_v42  ;;  %v719_v30 = vld [vmem:[%s8201_s24 + $0xa18] sm:$0xff]  ;;  %v1741_v35 = vld [vmem:[%s8201_s24 + $0x2a08] sm:$0xff]  ;;  %v716_v44 = vld [vmem:[%s8201_s24 + $0xa00] sm:$0xff] }
 0x15a   : > { %v1743_v37 = vld [vmem:[%s8201_s24 + $0x2a18] sm:$0xff] }
 0x15b   : > { %6010 = vmatpush1.bf16.msra.mxu1 %v6009_v56  ;;  %v7051_v56 = vpack.c.bf16 %v1727_v48, %v1725_v45  ;;  %v718_v45 = vld [vmem:[%s8201_s24 + $0xa10] sm:$0xff]  ;;  %v1740_v48 = vld [vmem:[%s8201_s24 + $0x2a00] sm:$0xff] }
 0x15c   : > { %7034 = vmatpush1.bf16.msra.mxu0 %v7033_v57  ;;  %6012 = vmatprep.subr.bf16.mxu1 %v6011_v8  ;;  %v1726_v57 = vld [vmem:[%s8201_s24 + $0x2990] sm:$0xff]  ;;  %v705_v8 = vld [vmem:[%s8201_s24 + $0x9a8] sm:$0xff] }
 0x15d   : > { %7036 = vmatprep.subr.bf16.mxu0 %v7035_v62  ;;  %v6029_v62 = vpack.c.bf16 %v702_v54, %v700_v5  ;;  %v7053_v51 = vpack.c.bf16 %v1726_v57, %v1724_v55  ;;  %v6031_v0 = vpack.c.bf16 %v707_v58, %v705_v8  ;;  %v723_v5 = vld [vmem:[%s8201_s24 + $0xa38] sm:$0xff]  ;;  %v9007_v54 = vrot.slane %v8848_v61, %v8330_v36  ;;  %v1745_v55 = vld [vmem:[%s8201_s24 + $0x2a28] sm:$0xff]  ;;  %v1744_v61 = vld [vmem:[%s8201_s24 + $0x2a20] sm:$0xff] }
 0x15e   : > { %v6045_v57 = vpack.c.bf16 %v718_v45, %v716_v44  ;;  %v9013_v8 = vrot.slane %v8853_v63, %v8330_v36  ;;  %v2558_v63 = vcombine.high %v8878_v21, %v8878_v21  ;;  %v739_v44 = vld [vmem:[%s8201_s24 + $0xab8] sm:$0xff]  ;;  %v1761_v45 = vld [vmem:[%s8201_s24 + $0x2aa8] sm:$0xff] }
 0x15f   : > { %6014 = vmatpush1.bf16.msra.mxu1 %v6013_v33  ;;  %v7055_v33 = vpack.c.bf16 %v1731_v60, %v1729_v59  ;;  %v720_v60 = vld [vmem:[%s8201_s24 + $0xa20] sm:$0xff] }
 0x160   : > { %7038 = vmatpush1.bf16.msra.mxu0 %v7037_v4  ;;  %6016 = vmatprep.subr.bf16.mxu1 %v6015_v6  ;;  %v1730_v4 = vld [vmem:[%s8201_s24 + $0x29b0] sm:$0xff]  ;;  %v709_v6 = vld [vmem:[%s8201_s24 + $0x9c8] sm:$0xff] }
 0x161   : > { %7040 = vmatprep.subr.bf16.mxu0 %v7039_v39  ;;  %v6033_v39 = vpack.c.bf16 %v706_v2, %v704_v1  ;;  %v7057_v31 = vpack.c.bf16 %v1730_v4, %v1728_v3  ;;  %v6035_v10 = vpack.c.bf16 %v711_v7, %v709_v6  ;;  %v725_v1 = vld [vmem:[%s8201_s24 + $0xa48] sm:$0xff]  ;;  %v727_v2 = vld [vmem:[%s8201_s24 + $0xa58] sm:$0xff]  ;;  %v2758_v4 = vcombine.high %v8883_v24, %v8883_v24 }
 0x162   : > { %v1749_v3 = vld [vmem:[%s8201_s24 + $0x2a48] sm:$0xff]  ;;  %v6051_v21 = vpack.c.bf16 %v727_v2, %v725_v1  ;;  %v740_v2 = vld [vmem:[%s8201_s24 + $0xac0] sm:$0xff] }
 0x163   : > { %6018 = vmatpush1.bf16.msra.mxu1 %v6017_v14  ;;  %v7059_v14 = vpack.c.bf16 %v1735_v34, %v1733_v9  ;;  %v724_v9 = vld [vmem:[%s8201_s24 + $0xa40] sm:$0xff]  ;;  %v726_v34 = vld [vmem:[%s8201_s24 + $0xa50] sm:$0xff]  ;;  %v729_v24 = vld [vmem:[%s8201_s24 + $0xa68] sm:$0xff] }
 0x164   : > { %7042 = vmatpush1.bf16.msra.mxu0 %v7041_v43  ;;  %6020 = vmatprep.subr.bf16.mxu1 %v6019_v49  ;;  %v1734_v43 = vld [vmem:[%s8201_s24 + $0x29d0] sm:$0xff]  ;;  %v713_v49 = vld [vmem:[%s8201_s24 + $0x9e8] sm:$0xff] }
 0x165   : > { %7044 = vmatprep.subr.bf16.mxu0 %v7043_v17  ;;  %v6037_v17 = vpack.c.bf16 %v710_v12, %v708_v11  ;;  %v7061_v18 = vpack.c.bf16 %v1734_v43, %v1732_v13  ;;  %v6039_v19 = vpack.c.bf16 %v715_v41, %v713_v49  ;;  %v731_v11 = vld [vmem:[%s8201_s24 + $0xa78] sm:$0xff]  ;;  %v1753_v12 = vld [vmem:[%s8201_s24 + $0x2a68] sm:$0xff]  ;;  %v728_v41 = vld [vmem:[%s8201_s24 + $0xa60] sm:$0xff] }
 0x166   : > { %v1755_v13 = vld [vmem:[%s8201_s24 + $0x2a78] sm:$0xff]  ;;  %v6055_v49 = vpack.c.bf16 %v731_v11, %v729_v24  ;;  %v746_v24 = vld [vmem:[%s8201_s24 + $0xaf0] sm:$0xff]  ;;  %v1768_v11 = vld [vmem:[%s8201_s24 + $0x2ae0] sm:$0xff] }
 0x167   : > { %6022 = vmatpush1.bf16.msra.mxu1 %v6021_v27  ;;  %v7063_v27 = vpack.c.bf16 %v1739_v16, %v1737_v32  ;;  %v730_v32 = vld [vmem:[%s8201_s24 + $0xa70] sm:$0xff]  ;;  %v1752_v16 = vld [vmem:[%s8201_s24 + $0x2a60] sm:$0xff] }
 0x168   : > { %7046 = vmatpush1.bf16.msra.mxu0 %v7045_v28  ;;  %6024 = vmatprep.subr.bf16.mxu1 %v6023_v29  ;;  %v1738_v28 = vld [vmem:[%s8201_s24 + $0x29f0] sm:$0xff]  ;;  %v717_v29 = vld [vmem:[%s8201_s24 + $0xa08] sm:$0xff] }
 0x169   : > { %7048 = vmatprep.subr.bf16.mxu0 %v7047_v38  ;;  %v6041_v38 = vpack.c.bf16 %v714_v47, %v712_v20  ;;  %v7065_v40 = vpack.c.bf16 %v1738_v28, %v1736_v23  ;;  %v6043_v42 = vpack.c.bf16 %v719_v30, %v717_v29  ;;  %v735_v20 = vld [vmem:[%s8201_s24 + $0xa98] sm:$0xff]  ;;  %v1757_v47 = vld [vmem:[%s8201_s24 + $0x2a88] sm:$0xff]  ;;  %v732_v30 = vld [vmem:[%s8201_s24 + $0xa80] sm:$0xff] }
 0x16a   : > { %v1759_v23 = vld [vmem:[%s8201_s24 + $0x2a98] sm:$0xff] }
 0x16b   : > { %6026 = vmatpush1.bf16.msra.mxu1 %v6025_v50  ;;  %v7067_v50 = vpack.c.bf16 %v1743_v37, %v1741_v35  ;;  %v734_v35 = vld [vmem:[%s8201_s24 + $0xa90] sm:$0xff]  ;;  %v1756_v37 = vld [vmem:[%s8201_s24 + $0x2a80] sm:$0xff] }
 0x16c   : > { %7050 = vmatpush1.bf16.msra.mxu0 %v7049_v52  ;;  %6028 = vmatprep.subr.bf16.mxu1 %v6027_v53  ;;  %v1742_v52 = vld [vmem:[%s8201_s24 + $0x2a10] sm:$0xff]  ;;  %v721_v53 = vld [vmem:[%s8201_s24 + $0xa28] sm:$0xff] }
 0x16d   : > { %7052 = vmatprep.subr.bf16.mxu0 %v7051_v56  ;;  %v1747_v56 = vld [vmem:[%s8201_s24 + $0x2a38] sm:$0xff]  ;;  %v7069_v58 = vpack.c.bf16 %v1742_v52, %v1740_v48  ;;  %v6047_v59 = vpack.c.bf16 %v723_v5, %v721_v53  ;;  %v736_v5 = vld [vmem:[%s8201_s24 + $0xaa0] sm:$0xff] }
 0x16e   : > { %v1763_v48 = vld [vmem:[%s8201_s24 + $0x2ab8] sm:$0xff] }
 0x16f   : > { %6030 = vmatpush1.bf16.msra.mxu1 %v6029_v62  ;;  %v722_v62 = vld [vmem:[%s8201_s24 + $0xa30] sm:$0xff] }
 0x170   : > { %7054 = vmatpush1.bf16.msra.mxu0 %v7053_v51  ;;  %6032 = vmatprep.subr.bf16.mxu1 %v6031_v0  ;;  %v7071_v51 = vpack.c.bf16 %v1747_v56, %v1745_v55  ;;  %v1746_v0 = vld [vmem:[%s8201_s24 + $0x2a30] sm:$0xff]  ;;  %v6049_v6 = vpack.c.bf16 %v722_v62, %v720_v60  ;;  %v1760_v56 = vld [vmem:[%s8201_s24 + $0x2aa0] sm:$0xff]  ;;  %v743_v60 = vld [vmem:[%s8201_s24 + $0xad8] sm:$0xff] }
 0x171   : > { %7056 = vmatprep.subr.bf16.mxu0 %v7055_v33  ;;  %v1751_v33 = vld [vmem:[%s8201_s24 + $0x2a58] sm:$0xff]  ;;  %v7073_v7 = vpack.c.bf16 %v1746_v0, %v1744_v61  ;;  %v738_v55 = vld [vmem:[%s8201_s24 + $0xab0] sm:$0xff]  ;;  %v1765_v62 = vld [vmem:[%s8201_s24 + $0x2ac8] sm:$0xff] }
 0x172   : > { %v1767_v61 = vld [vmem:[%s8201_s24 + $0x2ad8] sm:$0xff] }
 0x173   : > { %6034 = vmatpush1.bf16.msra.mxu1 %v6033_v39  ;;  %v1748_v39 = vld [vmem:[%s8201_s24 + $0x2a40] sm:$0xff] }
 0x174   : > { %7058 = vmatpush1.bf16.msra.mxu0 %v7057_v31  ;;  %6036 = vmatprep.subr.bf16.mxu1 %v6035_v10  ;;  %v7075_v31 = vpack.c.bf16 %v1751_v33, %v1749_v3  ;;  %v1750_v10 = vld [vmem:[%s8201_s24 + $0x2a50] sm:$0xff]  ;;  %v1764_v3 = vld [vmem:[%s8201_s24 + $0x2ac0] sm:$0xff]  ;;  %v7091_v33 = vpack.c.bf16 %v1767_v61, %v1765_v62 }
 0x175   : > { %7060 = vmatprep.subr.bf16.mxu0 %v7059_v14  ;;  %v6053_v14 = vpack.c.bf16 %v726_v34, %v724_v9  ;;  %v7077_v43 = vpack.c.bf16 %v1750_v10, %v1748_v39  ;;  %v1771_v9 = vld [vmem:[%s8201_s24 + $0x2af8] sm:$0xff]  ;;  %v744_v10 = vld [vmem:[%s8201_s24 + $0xae0] sm:$0xff]  ;;  %v1782_v61 = vld [vmem:[%s8201_s24 + $0x2b50] sm:$0xff] }
 0x177   : > { %6038 = vmatpush1.bf16.msra.mxu1 %v6037_v17  ;;  %v7079_v17 = vpack.c.bf16 %v1755_v13, %v1753_v12  ;;  %v1770_v13 = vld [vmem:[%s8201_s24 + $0x2af0] sm:$0xff] }
 0x178   : > { %7062 = vmatpush1.bf16.msra.mxu0 %v7061_v18  ;;  %6040 = vmatprep.subr.bf16.mxu1 %v6039_v19  ;;  %v1754_v18 = vld [vmem:[%s8201_s24 + $0x2a70] sm:$0xff]  ;;  %v733_v19 = vld [vmem:[%s8201_s24 + $0xa88] sm:$0xff] }
 0x179   : > { %7064 = vmatprep.subr.bf16.mxu0 %v7063_v27  ;;  %v6057_v27 = vpack.c.bf16 %v730_v32, %v728_v41  ;;  %v7081_v28 = vpack.c.bf16 %v1754_v18, %v1752_v16  ;;  %v6059_v29 = vpack.c.bf16 %v735_v20, %v733_v19  ;;  %v1775_v41 = vld [vmem:[%s8201_s24 + $0x2b18] sm:$0xff]  ;;  %v6073_v32 = vpack.c.bf16 %v746_v24, %v744_v10  ;;  %v748_v18 = vld [vmem:[%s8201_s24 + $0xb00] sm:$0xff]  ;;  %v750_v19 = vld [vmem:[%s8201_s24 + $0xb10] sm:$0xff] }
 0x17a   : > { %v7097_v16 = vpack.c.bf16 %v1770_v13, %v1768_v11  ;;  %v1772_v20 = vld [vmem:[%s8201_s24 + $0x2b00] sm:$0xff]  ;;  %v1791_v10 = vld [vmem:[%s8201_s24 + $0x2b98] sm:$0xff] }
 0x17b   : > { %6042 = vmatpush1.bf16.msra.mxu1 %v6041_v38  ;;  %v7083_v38 = vpack.c.bf16 %v1759_v23, %v1757_v47  ;;  %v1774_v23 = vld [vmem:[%s8201_s24 + $0x2b10] sm:$0xff]  ;;  %v764_v13 = vld [vmem:[%s8201_s24 + $0xb80] sm:$0xff] }
 0x17c   : > { %7066 = vmatpush1.bf16.msra.mxu0 %v7065_v40  ;;  %6044 = vmatprep.subr.bf16.mxu1 %v6043_v42  ;;  %v1758_v40 = vld [vmem:[%s8201_s24 + $0x2a90] sm:$0xff]  ;;  %v737_v42 = vld [vmem:[%s8201_s24 + $0xaa8] sm:$0xff] }
 0x17d   : > { %7068 = vmatprep.subr.bf16.mxu0 %v7067_v50  ;;  %v6061_v50 = vpack.c.bf16 %v734_v35, %v732_v30  ;;  %v7085_v52 = vpack.c.bf16 %v1758_v40, %v1756_v37  ;;  %v6063_v53 = vpack.c.bf16 %v739_v44, %v737_v42  ;;  %v1779_v30 = vld [vmem:[%s8201_s24 + $0x2b38] sm:$0xff]  ;;  %v6077_v35 = vpack.c.bf16 %v750_v19, %v748_v18  ;;  %v752_v40 = vld [vmem:[%s8201_s24 + $0xb20] sm:$0xff]  ;;  %v754_v42 = vld [vmem:[%s8201_s24 + $0xb30] sm:$0xff] }
 0x17e   : > { %3273 = vmatmul.mubr.f32.vlgmr.msra.gmra.mrb[0].mxu1 %v9007_v54  ;;  %v7101_v37 = vpack.c.bf16 %v1774_v23, %v1772_v20  ;;  %v1776_v44 = vld [vmem:[%s8201_s24 + $0x2b20] sm:$0xff]  ;;  %v1795_v18 = vld [vmem:[%s8201_s24 + $0x2bb8] sm:$0xff] }
 0x17f   : > { %6046 = vmatpush1.bf16.msra.mxu1 %v6045_v57  ;;  %4409 = vmatmul.mubr.f32.vlgmr.msra.gmra.mrb[0].mxu0 %v9013_v8  ;;  %v7087_v57 = vpack.c.bf16 %v1763_v48, %v1761_v45  ;;  %v1778_v48 = vld [vmem:[%s8201_s24 + $0x2b30] sm:$0xff]  ;;  %v768_v23 = vld [vmem:[%s8201_s24 + $0xba0] sm:$0xff] }
 0x180   : > { %7070 = vmatpush1.bf16.msra.mxu0 %v7069_v58  ;;  %6048 = vmatprep.subr.bf16.mxu1 %v6047_v59  ;;  %v1762_v58 = vld [vmem:[%s8201_s24 + $0x2ab0] sm:$0xff]  ;;  %v741_v59 = vld [vmem:[%s8201_s24 + $0xac8] sm:$0xff] }
 0x181   : > { %7072 = vmatprep.subr.bf16.mxu0 %v7071_v51  ;;  %3343 = vmatprep.mubr.f32.mxu1 %v2558_v63  ;;  %v6065_v51 = vpack.c.bf16 %v738_v55, %v736_v5  ;;  %v7089_v0 = vpack.c.bf16 %v1762_v58, %v1760_v56  ;;  %v6067_v1 = vpack.c.bf16 %v743_v60, %v741_v59  ;;  %v742_v63 = vld [vmem:[%s8201_s24 + $0xad0] sm:$0xff]  ;;  %v1783_v5 = vld [vmem:[%s8201_s24 + $0x2b58] sm:$0xff]  ;;  %v756_v58 = vld [vmem:[%s8201_s24 + $0xb40] sm:$0xff] }
 0x182   : > { %4479 = vmatprep.mubr.f32.mxu0 %v2758_v4  ;;  %v1766_v4 = vld [vmem:[%s8201_s24 + $0x2ad0] sm:$0xff]  ;;  %v6069_v34 = vpack.c.bf16 %v742_v63, %v740_v2  ;;  %v6081_v55 = vpack.c.bf16 %v754_v42, %v752_v40  ;;  %v7105_v56 = vpack.c.bf16 %v1778_v48, %v1776_v44  ;;  %v1780_v60 = vld [vmem:[%s8201_s24 + $0x2b40] sm:$0xff]  ;;  %v1787_v2 = vld [vmem:[%s8201_s24 + $0x2b78] sm:$0xff] }
 0x183   : > { %6050 = vmatpush1.bf16.msra.mxu1 %v6049_v6  ;;  %v745_v6 = vld [vmem:[%s8201_s24 + $0xae8] sm:$0xff]  ;;  %v7093_v39 = vpack.c.bf16 %v1766_v4, %v1764_v3  ;;  %v758_v59 = vld [vmem:[%s8201_s24 + $0xb50] sm:$0xff]  ;;  %v7109_v3 = vpack.c.bf16 %v1782_v61, %v1780_v60  ;;  %v760_v4 = vld [vmem:[%s8201_s24 + $0xb60] sm:$0xff]  ;;  %v2711_v60 = vcombine.high %v8825_v25, %v8827_v26 }
 0x184   : > { %7074 = vmatpush1.bf16.msra.mxu0 %v7073_v7  ;;  %6052 = vmatprep.subr.bf16.mxu1 %v6051_v21  ;;  %v747_v7 = vld [vmem:[%s8201_s24 + $0xaf8] sm:$0xff]  ;;  %v1769_v21 = vld [vmem:[%s8201_s24 + $0x2ae8] sm:$0xff]  ;;  %v6085_v63 = vpack.c.bf16 %v758_v59, %v756_v58  ;;  %v772_v48 = vld [vmem:[%s8201_s24 + $0xbc0] sm:$0xff] }
 0x185   : > { %7076 = vmatprep.subr.bf16.mxu0 %v7075_v31  ;;  %v6071_v31 = vpack.c.bf16 %v747_v7, %v745_v6  ;;  %v7095_v12 = vpack.c.bf16 %v1771_v9, %v1769_v21  ;;  %v762_v6 = vld [vmem:[%s8201_s24 + $0xb70] sm:$0xff]  ;;  %v1784_v7 = vld [vmem:[%s8201_s24 + $0x2b60] sm:$0xff]  ;;  %v1799_v40 = vld [vmem:[%s8201_s24 + $0x2bd8] sm:$0xff] }
 0x186   : > { %v1786_v9 = vld [vmem:[%s8201_s24 + $0x2b70] sm:$0xff]  ;;  %v6089_v24 = vpack.c.bf16 %v762_v6, %v760_v4  ;;  %v1801_v58 = vld [vmem:[%s8201_s24 + $0x2be8] sm:$0xff]  ;;  %v1803_v59 = vld [vmem:[%s8201_s24 + $0x2bf8] sm:$0xff]  ;;  %v9149_v4 = vrot.slane %v2711_v60, %v8330_v36 }
 0x187   : > { %6054 = vmatpush1.bf16.msra.mxu1 %v6053_v14  ;;  %v749_v14 = vld [vmem:[%s8201_s24 + $0xb08] sm:$0xff]  ;;  %v7113_v11 = vpack.c.bf16 %v1786_v9, %v1784_v7  ;;  %v780_v9 = vld [vmem:[%s8201_s24 + $0xc00] sm:$0xff] }
 0x188   : > { %7078 = vmatpush1.bf16.msra.mxu0 %v7077_v43  ;;  %6056 = vmatprep.subr.bf16.mxu1 %v6055_v49  ;;  %v751_v43 = vld [vmem:[%s8201_s24 + $0xb18] sm:$0xff]  ;;  %v1773_v49 = vld [vmem:[%s8201_s24 + $0x2b08] sm:$0xff]  ;;  %v1816_v60 = vld [vmem:[%s8201_s24 + $0x2c60] sm:$0xff] }
 0x189   : > { %7080 = vmatprep.subr.bf16.mxu0 %v7079_v17  ;;  %v6075_v17 = vpack.c.bf16 %v751_v43, %v749_v14  ;;  %v7099_v47 = vpack.c.bf16 %v1775_v41, %v1773_v49  ;;  %v766_v14 = vld [vmem:[%s8201_s24 + $0xb90] sm:$0xff]  ;;  %v1788_v43 = vld [vmem:[%s8201_s24 + $0x2b80] sm:$0xff]  ;;  %v1805_v26 = vld [vmem:[%s8201_s24 + $0x2c08] sm:$0xff] }
 0x18a   : > { %v1790_v41 = vld [vmem:[%s8201_s24 + $0x2b90] sm:$0xff]  ;;  %v6093_v19 = vpack.c.bf16 %v766_v14, %v764_v13  ;;  %v2556_v13 = vcombine.high %v9007_v54, %v9007_v54  ;;  %v1809_v14 = vld [vmem:[%s8201_s24 + $0x2c28] sm:$0xff]  ;;  %v784_v54 = vld [vmem:[%s8201_s24 + $0xc20] sm:$0xff] }
 0x18b   : > { %6058 = vmatpush1.bf16.msra.mxu1 %v6057_v27  ;;  %v753_v27 = vld [vmem:[%s8201_s24 + $0xb28] sm:$0xff]  ;;  %v7117_v20 = vpack.c.bf16 %v1790_v41, %v1788_v43  ;;  %v1811_v43 = vld [vmem:[%s8201_s24 + $0x2c38] sm:$0xff] }
 0x18c   : > { %7082 = vmatpush1.bf16.msra.mxu0 %v7081_v28  ;;  %6060 = vmatprep.subr.bf16.mxu1 %v6059_v29  ;;  %v755_v28 = vld [vmem:[%s8201_s24 + $0xb38] sm:$0xff]  ;;  %v1777_v29 = vld [vmem:[%s8201_s24 + $0x2b28] sm:$0xff] }
 0x18d   : > { %7084 = vmatprep.subr.bf16.mxu0 %v7083_v38  ;;  %v6079_v38 = vpack.c.bf16 %v755_v28, %v753_v27  ;;  %v7103_v45 = vpack.c.bf16 %v1779_v30, %v1777_v29  ;;  %v770_v27 = vld [vmem:[%s8201_s24 + $0xbb0] sm:$0xff]  ;;  %v1792_v28 = vld [vmem:[%s8201_s24 + $0x2ba0] sm:$0xff] }
 0x18e   : > { %v1794_v30 = vld [vmem:[%s8201_s24 + $0x2bb0] sm:$0xff]  ;;  %v6097_v42 = vpack.c.bf16 %v770_v27, %v768_v23  ;;  %v789_v23 = vld [vmem:[%s8201_s24 + $0xc48] sm:$0xff]  ;;  %v791_v27 = vld [vmem:[%s8201_s24 + $0xc58] sm:$0xff] }
 0x18f   : > { %6062 = vmatpush1.bf16.msra.mxu1 %v6061_v50  ;;  %v757_v50 = vld [vmem:[%s8201_s24 + $0xb48] sm:$0xff]  ;;  %v7121_v44 = vpack.c.bf16 %v1794_v30, %v1792_v28 }
 0x190   : > { %7086 = vmatpush1.bf16.msra.mxu0 %v7085_v52  ;;  %6064 = vmatprep.subr.bf16.mxu1 %v6063_v53  ;;  %v759_v52 = vld [vmem:[%s8201_s24 + $0xb58] sm:$0xff]  ;;  %v1781_v53 = vld [vmem:[%s8201_s24 + $0x2b48] sm:$0xff] }
 0x191   : > { %7088 = vmatprep.subr.bf16.mxu0 %v7087_v57  ;;  %v6083_v57 = vpack.c.bf16 %v759_v52, %v757_v50  ;;  %v7107_v62 = vpack.c.bf16 %v1783_v5, %v1781_v53  ;;  %v774_v50 = vld [vmem:[%s8201_s24 + $0xbd0] sm:$0xff]  ;;  %v1796_v52 = vld [vmem:[%s8201_s24 + $0x2bc0] sm:$0xff] }
 0x192   : > { %v1798_v5 = vld [vmem:[%s8201_s24 + $0x2bd0] sm:$0xff] }
 0x193   : > { %6066 = vmatpush1.bf16.msra.mxu1 %v6065_v51  ;;  %v761_v51 = vld [vmem:[%s8201_s24 + $0xb68] sm:$0xff]  ;;  %v7125_v61 = vpack.c.bf16 %v1798_v5, %v1796_v52  ;;  %v795_v52 = vld [vmem:[%s8201_s24 + $0xc78] sm:$0xff] }
 0x194   : > { %7090 = vmatpush1.bf16.msra.mxu0 %v7089_v0  ;;  %6068 = vmatprep.subr.bf16.mxu1 %v6067_v1  ;;  %v763_v0 = vld [vmem:[%s8201_s24 + $0xb78] sm:$0xff]  ;;  %v1785_v1 = vld [vmem:[%s8201_s24 + $0x2b68] sm:$0xff] }
 0x195   : > { %7092 = vmatprep.subr.bf16.mxu0 %v7091_v33  ;;  %v6087_v33 = vpack.c.bf16 %v763_v0, %v761_v51  ;;  %v7111_v21 = vpack.c.bf16 %v1787_v2, %v1785_v1  ;;  %v776_v0 = vld [vmem:[%s8201_s24 + $0xbe0] sm:$0xff]  ;;  %v778_v1 = vld [vmem:[%s8201_s24 + $0xbf0] sm:$0xff]  ;;  %v1819_v5 = vld [vmem:[%s8201_s24 + $0x2c78] sm:$0xff] }
 0x196   : > { %v1800_v2 = vld [vmem:[%s8201_s24 + $0x2be0] sm:$0xff]  ;;  %v6105_v6 = vpack.c.bf16 %v778_v1, %v776_v0  ;;  %v799_v0 = vld [vmem:[%s8201_s24 + $0xc98] sm:$0xff]  ;;  %v1821_v1 = vld [vmem:[%s8201_s24 + $0x2c88] sm:$0xff] }
 0x197   : > { %6070 = vmatpush1.bf16.msra.mxu1 %v6069_v34  ;;  %v765_v34 = vld [vmem:[%s8201_s24 + $0xb88] sm:$0xff] }
 0x198   : > { %7094 = vmatpush1.bf16.msra.mxu0 %v7093_v39  ;;  %6072 = vmatprep.subr.bf16.mxu1 %v6071_v31  ;;  %v767_v39 = vld [vmem:[%s8201_s24 + $0xb98] sm:$0xff]  ;;  %v1789_v31 = vld [vmem:[%s8201_s24 + $0x2b88] sm:$0xff] }
 0x199   : > { %7096 = vmatprep.subr.bf16.mxu0 %v7095_v12  ;;  %v6091_v12 = vpack.c.bf16 %v767_v39, %v765_v34  ;;  %v7115_v49 = vpack.c.bf16 %v1791_v10, %v1789_v31  ;;  %v782_v34 = vld [vmem:[%s8201_s24 + $0xc10] sm:$0xff]  ;;  %v1804_v39 = vld [vmem:[%s8201_s24 + $0x2c00] sm:$0xff] }
 0x19a   : > { %v1806_v10 = vld [vmem:[%s8201_s24 + $0x2c10] sm:$0xff]  ;;  %v6109_v41 = vpack.c.bf16 %v782_v34, %v780_v9  ;;  %v803_v9 = vld [vmem:[%s8201_s24 + $0xcb8] sm:$0xff]  ;;  %v1825_v34 = vld [vmem:[%s8201_s24 + $0x2ca8] sm:$0xff] }
 0x19b   : > { %6074 = vmatpush1.bf16.msra.mxu1 %v6073_v32  ;;  %v769_v32 = vld [vmem:[%s8201_s24 + $0xba8] sm:$0xff] }
 0x19c   : > { %7098 = vmatpush1.bf16.msra.mxu0 %v7097_v16  ;;  %6076 = vmatprep.subr.bf16.mxu1 %v6075_v17  ;;  %v771_v16 = vld [vmem:[%s8201_s24 + $0xbb8] sm:$0xff]  ;;  %v1793_v17 = vld [vmem:[%s8201_s24 + $0x2ba8] sm:$0xff] }
 0x19d   : > { %7100 = vmatprep.subr.bf16.mxu0 %v7099_v47  ;;  %v6095_v47 = vpack.c.bf16 %v771_v16, %v769_v32  ;;  %v7119_v29 = vpack.c.bf16 %v1795_v18, %v1793_v17  ;;  %v2756_v32 = vcombine.high %v9013_v8, %v9013_v8  ;;  %v7133_v16 = vpack.c.bf16 %v1806_v10, %v1804_v39  ;;  %v786_v18 = vld [vmem:[%s8201_s24 + $0xc30] sm:$0xff]  ;;  %v1813_v8 = vld [vmem:[%s8201_s24 + $0x2c48] sm:$0xff]  ;;  %v1827_v39 = vld [vmem:[%s8201_s24 + $0x2cb8] sm:$0xff] }
 0x19f   : > { %6078 = vmatpush1.bf16.msra.mxu1 %v6077_v35  ;;  %v773_v35 = vld [vmem:[%s8201_s24 + $0xbc8] sm:$0xff] }
 0x1a0   : > { %7102 = vmatpush1.bf16.msra.mxu0 %v7101_v37  ;;  %6080 = vmatprep.subr.bf16.mxu1 %v6079_v38  ;;  %v775_v37 = vld [vmem:[%s8201_s24 + $0xbd8] sm:$0xff]  ;;  %v1797_v38 = vld [vmem:[%s8201_s24 + $0x2bc8] sm:$0xff] }
 0x1a1   : > { %7104 = vmatprep.subr.bf16.mxu0 %v7103_v45  ;;  %v6099_v45 = vpack.c.bf16 %v775_v37, %v773_v35  ;;  %v7123_v53 = vpack.c.bf16 %v1799_v40, %v1797_v38  ;;  %v6113_v35 = vpack.c.bf16 %v786_v18, %v784_v54  ;;  %v6115_v38 = vpack.c.bf16 %v791_v27, %v789_v23  ;;  %v788_v40 = vld [vmem:[%s8201_s24 + $0xc40] sm:$0xff]  ;;  %v1830_v27 = vld [vmem:[%s8201_s24 + $0x2cd0] sm:$0xff] }
 0x1a3   : > { %6082 = vmatpush1.bf16.msra.mxu1 %v6081_v55  ;;  %v777_v55 = vld [vmem:[%s8201_s24 + $0xbe8] sm:$0xff] }
 0x1a4   : > { %7106 = vmatpush1.bf16.msra.mxu0 %v7105_v56  ;;  %6084 = vmatprep.subr.bf16.mxu1 %v6083_v57  ;;  %v779_v56 = vld [vmem:[%s8201_s24 + $0xbf8] sm:$0xff]  ;;  %v2511_v57 = vcombine.high %v8819_v22, %v8821_v46  ;;  %v7127_v22 = vpack.c.bf16 %v1803_v59, %v1801_v58  ;;  %v1802_v46 = vld [vmem:[%s8201_s24 + $0x2bf0] sm:$0xff]  ;;  %v792_v58 = vld [vmem:[%s8201_s24 + $0xc60] sm:$0xff] }
 0x1a5   : > { %7108 = vmatprep.subr.bf16.mxu0 %v7107_v62  ;;  %v6101_v62 = vpack.c.bf16 %v774_v50, %v772_v48  ;;  %v6103_v51 = vpack.c.bf16 %v779_v56, %v777_v55  ;;  %v7129_v7 = vpack.c.bf16 %v1802_v46, %v1800_v2  ;;  %v1814_v48 = vld [vmem:[%s8201_s24 + $0x2c50] sm:$0xff]  ;;  %v793_v50 = vld [vmem:[%s8201_s24 + $0xc68] sm:$0xff]  ;;  %v1823_v2 = vld [vmem:[%s8201_s24 + $0x2c98] sm:$0xff] }
 0x1a6   : > { %v9144_v25 = vrot.slane %v2511_v57, %v8330_v36  ;;  %v6119_v57 = vpack.c.bf16 %v795_v52, %v793_v50  ;;  %v794_v59 = vld [vmem:[%s8201_s24 + $0xc70] sm:$0xff] }
 0x1a7   : > { %6086 = vmatpush1.bf16.msra.mxu1 %v6085_v63  ;;  %v781_v63 = vld [vmem:[%s8201_s24 + $0xc08] sm:$0xff]  ;;  %v1834_v52 = vld [vmem:[%s8201_s24 + $0x2cf0] sm:$0xff] }
 0x1a8   : > { %7110 = vmatpush1.bf16.msra.mxu0 %v7109_v3  ;;  %6088 = vmatprep.subr.bf16.mxu1 %v6087_v33  ;;  %v783_v3 = vld [vmem:[%s8201_s24 + $0xc18] sm:$0xff] }
 0x1a9   : > { %7112 = vmatprep.subr.bf16.mxu0 %v7111_v21  ;;  %v1807_v33 = vld [vmem:[%s8201_s24 + $0x2c18] sm:$0xff]  ;;  %v6107_v21 = vpack.c.bf16 %v783_v3, %v781_v63  ;;  %v796_v3 = vld [vmem:[%s8201_s24 + $0xc80] sm:$0xff] }
 0x1aa   : > { %v7131_v31 = vpack.c.bf16 %v1807_v33, %v1805_v26  ;;  %v798_v26 = vld [vmem:[%s8201_s24 + $0xc90] sm:$0xff]  ;;  %v1820_v33 = vld [vmem:[%s8201_s24 + $0x2c80] sm:$0xff] }
 0x1ab   : > { %6090 = vmatpush1.bf16.msra.mxu1 %v6089_v24  ;;  %v785_v24 = vld [vmem:[%s8201_s24 + $0xc28] sm:$0xff] }
 0x1ac   : > { %7114 = vmatpush1.bf16.msra.mxu0 %v7113_v11  ;;  %6092 = vmatprep.subr.bf16.mxu1 %v6091_v12  ;;  %v787_v11 = vld [vmem:[%s8201_s24 + $0xc38] sm:$0xff]  ;;  %v2527_v12 = vcombine.high %v9144_v25, %v9144_v25 }
 0x1ad   : > { %7116 = vmatprep.subr.bf16.mxu0 %v7115_v49  ;;  %v2727_v49 = vcombine.high %v9149_v4, %v9149_v4  ;;  %v6111_v17 = vpack.c.bf16 %v787_v11, %v785_v24  ;;  %v800_v11 = vld [vmem:[%s8201_s24 + $0xca0] sm:$0xff] }
 0x1ae   : > { %v9174_v28 = vrot.slane %v2527_v12, %v8330_v36  ;;  %v802_v12 = vld [vmem:[%s8201_s24 + $0xcb0] sm:$0xff] }
 0x1af   : > { %6094 = vmatpush1.bf16.msra.mxu1 %v6093_v19  ;;  %v1808_v19 = vld [vmem:[%s8201_s24 + $0x2c20] sm:$0xff]  ;;  %v9179_v30 = vrot.slane %v2727_v49, %v8330_v36  ;;  %v805_v49 = vld [vmem:[%s8201_s24 + $0xcc8] sm:$0xff] }
 0x1b0   : > { %7118 = vmatpush1.bf16.msra.mxu0 %v7117_v20  ;;  %6096 = vmatprep.subr.bf16.mxu1 %v6095_v47  ;;  %v7135_v20 = vpack.c.bf16 %v1811_v43, %v1809_v14  ;;  %v1810_v47 = vld [vmem:[%s8201_s24 + $0x2c30] sm:$0xff]  ;;  %v7151_v14 = vpack.c.bf16 %v1827_v39, %v1825_v34  ;;  %v821_v34 = vld [vmem:[%s8201_s24 + $0xd48] sm:$0xff]  ;;  %v823_v39 = vld [vmem:[%s8201_s24 + $0xd58] sm:$0xff] }
 0x1b1   : > { %7120 = vmatprep.subr.bf16.mxu0 %v7119_v29  ;;  %v1815_v29 = vld [vmem:[%s8201_s24 + $0x2c58] sm:$0xff]  ;;  %v7137_v37 = vpack.c.bf16 %v1810_v47, %v1808_v19  ;;  %v1826_v43 = vld [vmem:[%s8201_s24 + $0x2cb0] sm:$0xff]  ;;  %v804_v19 = vld [vmem:[%s8201_s24 + $0xcc0] sm:$0xff] }
 0x1b2   : > { %v1828_v47 = vld [vmem:[%s8201_s24 + $0x2cc0] sm:$0xff] }
 0x1b3   : > { %6098 = vmatpush1.bf16.msra.mxu1 %v6097_v42  ;;  %v790_v42 = vld [vmem:[%s8201_s24 + $0xc50] sm:$0xff] }
 0x1b4   : > { %7122 = vmatpush1.bf16.msra.mxu0 %v7121_v44  ;;  %6100 = vmatprep.subr.bf16.mxu1 %v6099_v45  ;;  %v1812_v44 = vld [vmem:[%s8201_s24 + $0x2c40] sm:$0xff]  ;;  %v7139_v45 = vpack.c.bf16 %v1815_v29, %v1813_v8  ;;  %v6117_v55 = vpack.c.bf16 %v790_v42, %v788_v40  ;;  %v809_v8 = vld [vmem:[%s8201_s24 + $0xce8] sm:$0xff]  ;;  %v811_v29 = vld [vmem:[%s8201_s24 + $0xcf8] sm:$0xff]  ;;  %v7157_v40 = vpack.c.bf16 %v1830_v27, %v1828_v47 }
 0x1b5   : > { %7124 = vmatprep.subr.bf16.mxu0 %v7123_v53  ;;  %v1817_v53 = vld [vmem:[%s8201_s24 + $0x2c68] sm:$0xff]  ;;  %v7141_v56 = vpack.c.bf16 %v1814_v48, %v1812_v44  ;;  %v6135_v42 = vpack.c.bf16 %v811_v29, %v809_v8  ;;  %v808_v44 = vld [vmem:[%s8201_s24 + $0xce0] sm:$0xff]  ;;  %v1850_v29 = vld [vmem:[%s8201_s24 + $0x2d70] sm:$0xff] }
 0x1b6   : > { %v1832_v48 = vld [vmem:[%s8201_s24 + $0x2ce0] sm:$0xff] }
 0x1b7   : > { %6102 = vmatpush1.bf16.msra.mxu1 %v6101_v62  ;;  %v7143_v62 = vpack.c.bf16 %v1819_v5, %v1817_v53  ;;  %v813_v53 = vld [vmem:[%s8201_s24 + $0xd08] sm:$0xff]  ;;  %v815_v5 = vld [vmem:[%s8201_s24 + $0xd18] sm:$0xff]  ;;  %v824_v47 = vld [vmem:[%s8201_s24 + $0xd60] sm:$0xff] }
 0x1b8   : > { %7126 = vmatpush1.bf16.msra.mxu0 %v7125_v61  ;;  %6104 = vmatprep.subr.bf16.mxu1 %v6103_v51  ;;  %v1818_v61 = vld [vmem:[%s8201_s24 + $0x2c70] sm:$0xff]  ;;  %v797_v51 = vld [vmem:[%s8201_s24 + $0xc88] sm:$0xff]  ;;  %v1848_v27 = vld [vmem:[%s8201_s24 + $0x2d60] sm:$0xff] }
 0x1b9   : > { %7128 = vmatprep.subr.bf16.mxu0 %v7127_v22  ;;  %v6121_v22 = vpack.c.bf16 %v794_v59, %v792_v58  ;;  %v7145_v46 = vpack.c.bf16 %v1818_v61, %v1816_v60  ;;  %v6123_v63 = vpack.c.bf16 %v799_v0, %v797_v51  ;;  %v7161_v58 = vpack.c.bf16 %v1834_v52, %v1832_v48  ;;  %v812_v60 = vld [vmem:[%s8201_s24 + $0xd00] sm:$0xff]  ;;  %v1838_v0 = vld [vmem:[%s8201_s24 + $0x2d10] sm:$0xff] }
 0x1ba   : > { %v6139_v59 = vpack.c.bf16 %v815_v5, %v813_v53  ;;  %v1836_v61 = vld [vmem:[%s8201_s24 + $0x2d00] sm:$0xff]  ;;  %v1854_v5 = vld [vmem:[%s8201_s24 + $0x2d90] sm:$0xff] }
 0x1bb   : > { %6106 = vmatpush1.bf16.msra.mxu1 %v6105_v6  ;;  %v7147_v6 = vpack.c.bf16 %v1823_v2, %v1821_v1  ;;  %v817_v1 = vld [vmem:[%s8201_s24 + $0xd28] sm:$0xff]  ;;  %v819_v2 = vld [vmem:[%s8201_s24 + $0xd38] sm:$0xff]  ;;  %v828_v48 = vld [vmem:[%s8201_s24 + $0xd80] sm:$0xff] }
 0x1bc   : > { %7130 = vmatpush1.bf16.msra.mxu0 %v7129_v7  ;;  %6108 = vmatprep.subr.bf16.mxu1 %v6107_v21  ;;  %v1822_v7 = vld [vmem:[%s8201_s24 + $0x2c90] sm:$0xff]  ;;  %v801_v21 = vld [vmem:[%s8201_s24 + $0xca8] sm:$0xff]  ;;  %v1852_v52 = vld [vmem:[%s8201_s24 + $0x2d80] sm:$0xff] }
 0x1bd   : > { %7132 = vmatprep.subr.bf16.mxu0 %v7131_v31  ;;  %v6125_v31 = vpack.c.bf16 %v798_v26, %v796_v3  ;;  %v7149_v10 = vpack.c.bf16 %v1822_v7, %v1820_v33  ;;  %v6127_v24 = vpack.c.bf16 %v803_v9, %v801_v21  ;;  %v7165_v3 = vpack.c.bf16 %v1838_v0, %v1836_v61  ;;  %v816_v33 = vld [vmem:[%s8201_s24 + $0xd20] sm:$0xff]  ;;  %v1842_v9 = vld [vmem:[%s8201_s24 + $0x2d30] sm:$0xff] }
 0x1be   : > { %3344 = vmatmul.mubr.f32.vlgmr.msra.gmra.mrb[0].mxu1 %v2556_v13  ;;  %v1824_v13 = vld [vmem:[%s8201_s24 + $0x2ca0] sm:$0xff]  ;;  %v6143_v26 = vpack.c.bf16 %v819_v2, %v817_v1  ;;  %v1858_v2 = vld [vmem:[%s8201_s24 + $0x2db0] sm:$0xff] }
 0x1bf   : > { %6110 = vmatpush1.bf16.msra.mxu1 %v6109_v41  ;;  %4480 = vmatmul.mubr.f32.vlgmr.msra.gmra.mrb[0].mxu0 %v2756_v32  ;;  %v807_v41 = vld [vmem:[%s8201_s24 + $0xcd8] sm:$0xff]  ;;  %v1829_v32 = vld [vmem:[%s8201_s24 + $0x2cc8] sm:$0xff]  ;;  %v7153_v54 = vpack.c.bf16 %v1826_v43, %v1824_v13  ;;  %v1840_v7 = vld [vmem:[%s8201_s24 + $0x2d20] sm:$0xff] }
 0x1c0   : > { %7134 = vmatpush1.bf16.msra.mxu0 %v7133_v16  ;;  %6112 = vmatprep.subr.bf16.mxu1 %v6111_v17  ;;  %v1831_v16 = vld [vmem:[%s8201_s24 + $0x2cd8] sm:$0xff]  ;;  %v6129_v17 = vpack.c.bf16 %v802_v12, %v800_v11  ;;  %v6131_v18 = vpack.c.bf16 %v807_v41, %v805_v49  ;;  %v7169_v11 = vpack.c.bf16 %v1842_v9, %v1840_v7  ;;  %v820_v13 = vld [vmem:[%s8201_s24 + $0xd40] sm:$0xff]  ;;  %v1846_v41 = vld [vmem:[%s8201_s24 + $0x2d50] sm:$0xff] }
 0x1c1   : > { %7136 = vmatprep.subr.bf16.mxu0 %v7135_v20  ;;  %3414 = vmatprep.mubr.f32.mxu1 %v9174_v28  ;;  %v806_v20 = vld [vmem:[%s8201_s24 + $0xcd0] sm:$0xff]  ;;  %v7155_v23 = vpack.c.bf16 %v1831_v16, %v1829_v32  ;;  %v6147_v12 = vpack.c.bf16 %v823_v39, %v821_v34  ;;  %v1844_v43 = vld [vmem:[%s8201_s24 + $0x2d40] sm:$0xff]  ;;  %v825_v32 = vld [vmem:[%s8201_s24 + $0xd68] sm:$0xff] }
 0x1c2   : > { %4550 = vmatprep.mubr.f32.mxu0 %v9179_v30  ;;  %v827_v16 = vld [vmem:[%s8201_s24 + $0xd78] sm:$0xff]  ;;  %v832_v61 = vld [vmem:[%s8201_s24 + $0xda0] sm:$0xff]  ;;  %v1862_v39 = vld [vmem:[%s8201_s24 + $0x2dd0] sm:$0xff] }
 0x1c3   : > { %6114 = vmatpush1.bf16.msra.mxu1 %v6113_v35  ;;  %v1833_v35 = vld [vmem:[%s8201_s24 + $0x2ce8] sm:$0xff]  ;;  %v1856_v0 = vld [vmem:[%s8201_s24 + $0x2da0] sm:$0xff] }
 0x1c4   : > { %7138 = vmatpush1.bf16.msra.mxu0 %v7137_v37  ;;  %6116 = vmatprep.subr.bf16.mxu1 %v6115_v38  ;;  %v1835_v37 = vld [vmem:[%s8201_s24 + $0x2cf8] sm:$0xff]  ;;  %v6133_v38 = vpack.c.bf16 %v806_v20, %v804_v19  ;;  %v7173_v19 = vpack.c.bf16 %v1846_v41, %v1844_v43  ;;  %v6151_v20 = vpack.c.bf16 %v827_v16, %v825_v32  ;;  %v836_v7 = vld [vmem:[%s8201_s24 + $0xdc0] sm:$0xff]  ;;  %v1866_v16 = vld [vmem:[%s8201_s24 + $0x2df0] sm:$0xff] }
 0x1c5   : > { %7140 = vmatprep.subr.bf16.mxu0 %v7139_v45  ;;  %v810_v45 = vld [vmem:[%s8201_s24 + $0xcf0] sm:$0xff]  ;;  %v7159_v50 = vpack.c.bf16 %v1835_v37, %v1833_v35  ;;  %v829_v35 = vld [vmem:[%s8201_s24 + $0xd88] sm:$0xff]  ;;  %v831_v37 = vld [vmem:[%s8201_s24 + $0xd98] sm:$0xff] }
 0x1c6   : > { %v1860_v9 = vld [vmem:[%s8201_s24 + $0x2dc0] sm:$0xff] }
 0x1c7   : > { %6118 = vmatpush1.bf16.msra.mxu1 %v6117_v55  ;;  %v1837_v55 = vld [vmem:[%s8201_s24 + $0x2d08] sm:$0xff]  ;;  %v840_v43 = vld [vmem:[%s8201_s24 + $0xde0] sm:$0xff] }
 0x1c8   : > { %7142 = vmatpush1.bf16.msra.mxu0 %v7141_v56  ;;  %6120 = vmatprep.subr.bf16.mxu1 %v6119_v57  ;;  %v1839_v56 = vld [vmem:[%s8201_s24 + $0x2d18] sm:$0xff]  ;;  %v6137_v57 = vpack.c.bf16 %v810_v45, %v808_v44  ;;  %v7177_v44 = vpack.c.bf16 %v1850_v29, %v1848_v27  ;;  %v6155_v45 = vpack.c.bf16 %v831_v37, %v829_v35  ;;  %v1864_v41 = vld [vmem:[%s8201_s24 + $0x2de0] sm:$0xff]  ;;  %v1870_v37 = vld [vmem:[%s8201_s24 + $0x2e10] sm:$0xff] }
 0x1c9   : > { %7144 = vmatprep.subr.bf16.mxu0 %v7143_v62  ;;  %v814_v62 = vld [vmem:[%s8201_s24 + $0xd10] sm:$0xff]  ;;  %v7163_v51 = vpack.c.bf16 %v1839_v56, %v1837_v55  ;;  %v833_v55 = vld [vmem:[%s8201_s24 + $0xda8] sm:$0xff]  ;;  %v835_v56 = vld [vmem:[%s8201_s24 + $0xdb8] sm:$0xff] }
 0x1ca   : > { %v844_v27 = vld [vmem:[%s8201_s24 + $0xe00] sm:$0xff] }
 0x1cb   : > { %6122 = vmatpush1.bf16.msra.mxu1 %v6121_v22  ;;  %v1841_v22 = vld [vmem:[%s8201_s24 + $0x2d28] sm:$0xff]  ;;  %v1868_v29 = vld [vmem:[%s8201_s24 + $0x2e00] sm:$0xff] }
 0x1cc   : > { %7146 = vmatpush1.bf16.msra.mxu0 %v7145_v46  ;;  %6124 = vmatprep.subr.bf16.mxu1 %v6123_v63  ;;  %v1843_v46 = vld [vmem:[%s8201_s24 + $0x2d38] sm:$0xff]  ;;  %v6141_v63 = vpack.c.bf16 %v814_v62, %v812_v60  ;;  %v7181_v60 = vpack.c.bf16 %v1854_v5, %v1852_v52  ;;  %v6159_v62 = vpack.c.bf16 %v835_v56, %v833_v55  ;;  %v848_v5 = vld [vmem:[%s8201_s24 + $0xe20] sm:$0xff]  ;;  %v850_v55 = vld [vmem:[%s8201_s24 + $0xe30] sm:$0xff] }
 0x1cd   : > { %7148 = vmatprep.subr.bf16.mxu0 %v7147_v6  ;;  %v818_v6 = vld [vmem:[%s8201_s24 + $0xd30] sm:$0xff]  ;;  %v7167_v21 = vpack.c.bf16 %v1843_v46, %v1841_v22  ;;  %v837_v22 = vld [vmem:[%s8201_s24 + $0xdc8] sm:$0xff]  ;;  %v839_v46 = vld [vmem:[%s8201_s24 + $0xdd8] sm:$0xff]  ;;  %v7197_v52 = vpack.c.bf16 %v1870_v37, %v1868_v29 }
 0x1ce   : > { %v864_v29 = vld [vmem:[%s8201_s24 + $0xea0] sm:$0xff] }
 0x1cf   : > { %6126 = vmatpush1.bf16.msra.mxu1 %v6125_v31  ;;  %v1845_v31 = vld [vmem:[%s8201_s24 + $0x2d48] sm:$0xff]  ;;  %v1888_v37 = vld [vmem:[%s8201_s24 + $0x2ea0] sm:$0xff] }
 0x1d0   : > { %7150 = vmatpush1.bf16.msra.mxu0 %v7149_v10  ;;  %6128 = vmatprep.subr.bf16.mxu1 %v6127_v24  ;;  %v1847_v10 = vld [vmem:[%s8201_s24 + $0x2d58] sm:$0xff]  ;;  %v6145_v24 = vpack.c.bf16 %v818_v6, %v816_v33  ;;  %v7185_v33 = vpack.c.bf16 %v1858_v2, %v1856_v0  ;;  %v6163_v6 = vpack.c.bf16 %v839_v46, %v837_v22  ;;  %v854_v2 = vld [vmem:[%s8201_s24 + $0xe50] sm:$0xff]  ;;  %v1876_v22 = vld [vmem:[%s8201_s24 + $0x2e40] sm:$0xff] }
 0x1d1   : > { %7152 = vmatprep.subr.bf16.mxu0 %v7151_v14  ;;  %v822_v14 = vld [vmem:[%s8201_s24 + $0xd50] sm:$0xff]  ;;  %v7171_v49 = vpack.c.bf16 %v1847_v10, %v1845_v31  ;;  %v841_v31 = vld [vmem:[%s8201_s24 + $0xde8] sm:$0xff]  ;;  %v843_v10 = vld [vmem:[%s8201_s24 + $0xdf8] sm:$0xff] }
 0x1d3   : > { %6130 = vmatpush1.bf16.msra.mxu1 %v6129_v17  ;;  %v1849_v17 = vld [vmem:[%s8201_s24 + $0x2d68] sm:$0xff] }
 0x1d4   : > { %7154 = vmatpush1.bf16.msra.mxu0 %v7153_v54  ;;  %6132 = vmatprep.subr.bf16.mxu1 %v6131_v18  ;;  %v1851_v54 = vld [vmem:[%s8201_s24 + $0x2d78] sm:$0xff]  ;;  %v6149_v18 = vpack.c.bf16 %v822_v14, %v820_v13  ;;  %v7189_v13 = vpack.c.bf16 %v1862_v39, %v1860_v9  ;;  %v6167_v14 = vpack.c.bf16 %v843_v10, %v841_v31  ;;  %v856_v9 = vld [vmem:[%s8201_s24 + $0xe60] sm:$0xff]  ;;  %v1882_v10 = vld [vmem:[%s8201_s24 + $0x2e70] sm:$0xff] }
 0x1d5   : > { %7156 = vmatprep.subr.bf16.mxu0 %v7155_v23  ;;  %v826_v23 = vld [vmem:[%s8201_s24 + $0xd70] sm:$0xff]  ;;  %v7175_v8 = vpack.c.bf16 %v1851_v54, %v1849_v17  ;;  %v845_v17 = vld [vmem:[%s8201_s24 + $0xe08] sm:$0xff]  ;;  %v847_v54 = vld [vmem:[%s8201_s24 + $0xe18] sm:$0xff] }
 0x1d6   : > { %v1880_v39 = vld [vmem:[%s8201_s24 + $0x2e60] sm:$0xff] }
 0x1d7   : > { %6134 = vmatpush1.bf16.msra.mxu1 %v6133_v38  ;;  %v1853_v38 = vld [vmem:[%s8201_s24 + $0x2d88] sm:$0xff] }
 0x1d8   : > { %7158 = vmatpush1.bf16.msra.mxu0 %v7157_v40  ;;  %6136 = vmatprep.subr.bf16.mxu1 %v6135_v42  ;;  %v1855_v40 = vld [vmem:[%s8201_s24 + $0x2d98] sm:$0xff]  ;;  %v6153_v42 = vpack.c.bf16 %v826_v23, %v824_v47  ;;  %v7193_v47 = vpack.c.bf16 %v1866_v16, %v1864_v41  ;;  %v6171_v23 = vpack.c.bf16 %v847_v54, %v845_v17  ;;  %v860_v41 = vld [vmem:[%s8201_s24 + $0xe80] sm:$0xff]  ;;  %v1886_v54 = vld [vmem:[%s8201_s24 + $0x2e90] sm:$0xff] }
 0x1d9   : > { %7160 = vmatprep.subr.bf16.mxu0 %v7159_v50  ;;  %v830_v50 = vld [vmem:[%s8201_s24 + $0xd90] sm:$0xff]  ;;  %v7179_v53 = vpack.c.bf16 %v1855_v40, %v1853_v38  ;;  %v849_v38 = vld [vmem:[%s8201_s24 + $0xe28] sm:$0xff]  ;;  %v851_v40 = vld [vmem:[%s8201_s24 + $0xe38] sm:$0xff] }
 0x1da   : > { %v1884_v16 = vld [vmem:[%s8201_s24 + $0x2e80] sm:$0xff] }
 0x1db   : > { %6138 = vmatpush1.bf16.msra.mxu1 %v6137_v57  ;;  %v1857_v57 = vld [vmem:[%s8201_s24 + $0x2da8] sm:$0xff] }
 0x1dc   : > { %7162 = vmatpush1.bf16.msra.mxu0 %v7161_v58  ;;  %6140 = vmatprep.subr.bf16.mxu1 %v6139_v59  ;;  %v1859_v58 = vld [vmem:[%s8201_s24 + $0x2db8] sm:$0xff]  ;;  %v6157_v59 = vpack.c.bf16 %v830_v50, %v828_v48  ;;  %v9309_v50 = vrot.slane %v9149_v4, %v8330_v36  ;;  %v2559_v4 = vcombine.high %v9174_v28, %v9174_v28 }
 0x1dd   : > { %7164 = vmatprep.subr.bf16.mxu0 %v7163_v51  ;;  %v834_v51 = vld [vmem:[%s8201_s24 + $0xdb0] sm:$0xff]  ;;  %v7183_v1 = vpack.c.bf16 %v1859_v58, %v1857_v57  ;;  %v853_v58 = vld [vmem:[%s8201_s24 + $0xe48] sm:$0xff] }
 0x1de   : > { %v1874_v57 = vld [vmem:[%s8201_s24 + $0x2e30] sm:$0xff] }
 0x1df   : > { %6142 = vmatpush1.bf16.msra.mxu1 %v6141_v63  ;;  %v1861_v63 = vld [vmem:[%s8201_s24 + $0x2dc8] sm:$0xff] }
 0x1e0   : > { %7166 = vmatpush1.bf16.msra.mxu0 %v7165_v3  ;;  %6144 = vmatprep.subr.bf16.mxu1 %v6143_v26  ;;  %v1863_v3 = vld [vmem:[%s8201_s24 + $0x2dd8] sm:$0xff]  ;;  %v6161_v26 = vpack.c.bf16 %v834_v51, %v832_v61  ;;  %v2759_v61 = vcombine.high %v9179_v30, %v9179_v30  ;;  %v6177_v51 = vpack.c.bf16 %v850_v55, %v848_v5  ;;  %v857_v30 = vld [vmem:[%s8201_s24 + $0xe68] sm:$0xff] }
 0x1e1   : > { %7168 = vmatprep.subr.bf16.mxu0 %v7167_v21  ;;  %v838_v21 = vld [vmem:[%s8201_s24 + $0xdd0] sm:$0xff]  ;;  %v7187_v34 = vpack.c.bf16 %v1863_v3, %v1861_v63  ;;  %v859_v3 = vld [vmem:[%s8201_s24 + $0xe78] sm:$0xff] }
 0x1e2   : > { %v1878_v63 = vld [vmem:[%s8201_s24 + $0x2e50] sm:$0xff] }
 0x1e3   : > { %6146 = vmatpush1.bf16.msra.mxu1 %v6145_v24  ;;  %v1865_v24 = vld [vmem:[%s8201_s24 + $0x2de8] sm:$0xff] }
 0x1e4   : > { %7170 = vmatpush1.bf16.msra.mxu0 %v7169_v11  ;;  %6148 = vmatprep.subr.bf16.mxu1 %v6147_v12  ;;  %v1867_v11 = vld [vmem:[%s8201_s24 + $0x2df8] sm:$0xff]  ;;  %v6165_v12 = vpack.c.bf16 %v838_v21, %v836_v7  ;;  %v7205_v7 = vpack.c.bf16 %v1878_v63, %v1876_v22  ;;  %v6183_v21 = vpack.c.bf16 %v859_v3, %v857_v30  ;;  %v1896_v22 = vld [vmem:[%s8201_s24 + $0x2ee0] sm:$0xff]  ;;  %v1898_v63 = vld [vmem:[%s8201_s24 + $0x2ef0] sm:$0xff] }
 0x1e5   : > { %7172 = vmatprep.subr.bf16.mxu0 %v7171_v49  ;;  %v842_v49 = vld [vmem:[%s8201_s24 + $0xdf0] sm:$0xff]  ;;  %v7191_v32 = vpack.c.bf16 %v1867_v11, %v1865_v24  ;;  %v861_v24 = vld [vmem:[%s8201_s24 + $0xe88] sm:$0xff]  ;;  %v863_v11 = vld [vmem:[%s8201_s24 + $0xe98] sm:$0xff] }
 0x1e6   : > { %v877_v30 = vld [vmem:[%s8201_s24 + $0xf08] sm:$0xff]  ;;  %v879_v3 = vld [vmem:[%s8201_s24 + $0xf18] sm:$0xff] }
 0x1e7   : > { %6150 = vmatpush1.bf16.msra.mxu1 %v6149_v18  ;;  %v1869_v18 = vld [vmem:[%s8201_s24 + $0x2e08] sm:$0xff] }
 0x1e8   : > { %7174 = vmatpush1.bf16.msra.mxu0 %v7173_v19  ;;  %6152 = vmatprep.subr.bf16.mxu1 %v6151_v20  ;;  %v1871_v19 = vld [vmem:[%s8201_s24 + $0x2e18] sm:$0xff]  ;;  %v6169_v20 = vpack.c.bf16 %v842_v49, %v840_v43  ;;  %v7209_v43 = vpack.c.bf16 %v1882_v10, %v1880_v39  ;;  %v6187_v49 = vpack.c.bf16 %v863_v11, %v861_v24  ;;  %v1900_v39 = vld [vmem:[%s8201_s24 + $0x2f00] sm:$0xff]  ;;  %v1902_v10 = vld [vmem:[%s8201_s24 + $0x2f10] sm:$0xff] }
 0x1e9   : > { %7176 = vmatprep.subr.bf16.mxu0 %v7175_v8  ;;  %v846_v8 = vld [vmem:[%s8201_s24 + $0xe10] sm:$0xff]  ;;  %v7195_v35 = vpack.c.bf16 %v1871_v19, %v1869_v18  ;;  %v865_v18 = vld [vmem:[%s8201_s24 + $0xea8] sm:$0xff]  ;;  %v867_v19 = vld [vmem:[%s8201_s24 + $0xeb8] sm:$0xff] }
 0x1ea   : > { %v6173_v48 = vpack.c.bf16 %v846_v8, %v844_v27  ;;  %v7213_v27 = vpack.c.bf16 %v1886_v54, %v1884_v16  ;;  %v6191_v8 = vpack.c.bf16 %v867_v19, %v865_v18  ;;  %v881_v24 = vld [vmem:[%s8201_s24 + $0xf28] sm:$0xff]  ;;  %v883_v11 = vld [vmem:[%s8201_s24 + $0xf38] sm:$0xff]  ;;  %v1904_v16 = vld [vmem:[%s8201_s24 + $0x2f20] sm:$0xff] }
 0x1eb   : > { %6154 = vmatpush1.bf16.msra.mxu1 %v6153_v42  ;;  %v9303_v42 = vrot.slane %v9144_v25, %v8330_v36  ;;  %v1872_v25 = vld [vmem:[%s8201_s24 + $0x2e20] sm:$0xff]  ;;  %v1906_v54 = vld [vmem:[%s8201_s24 + $0x2f30] sm:$0xff]  ;;  %v885_v18 = vld [vmem:[%s8201_s24 + $0xf48] sm:$0xff] }
 0x1ec   : > { %7178 = vmatpush1.bf16.msra.mxu0 %v7177_v44  ;;  %6156 = vmatprep.subr.bf16.mxu1 %v6155_v45  ;;  %v1873_v44 = vld [vmem:[%s8201_s24 + $0x2e28] sm:$0xff]  ;;  %v1875_v45 = vld [vmem:[%s8201_s24 + $0x2e38] sm:$0xff]  ;;  %v7201_v0 = vpack.c.bf16 %v1874_v57, %v1872_v25  ;;  %v868_v25 = vld [vmem:[%s8201_s24 + $0xec0] sm:$0xff] }
 0x1ed   : > { %7180 = vmatprep.subr.bf16.mxu0 %v7179_v53  ;;  %v6175_v53 = vpack.c.bf16 %v851_v40, %v849_v38  ;;  %v7199_v56 = vpack.c.bf16 %v1875_v45, %v1873_v44  ;;  %v1890_v40 = vld [vmem:[%s8201_s24 + $0x2eb0] sm:$0xff]  ;;  %v869_v44 = vld [vmem:[%s8201_s24 + $0xec8] sm:$0xff]  ;;  %v871_v45 = vld [vmem:[%s8201_s24 + $0xed8] sm:$0xff] }
 0x1ee   : > { %v7217_v5 = vpack.c.bf16 %v1890_v40, %v1888_v37  ;;  %v6195_v55 = vpack.c.bf16 %v871_v45, %v869_v44  ;;  %v1892_v57 = vld [vmem:[%s8201_s24 + $0x2ec0] sm:$0xff]  ;;  %v887_v19 = vld [vmem:[%s8201_s24 + $0xf58] sm:$0xff]  ;;  %v1910_v40 = vld [vmem:[%s8201_s24 + $0x2f50] sm:$0xff] }
 0x1ef   : > { %6158 = vmatpush1.bf16.msra.mxu1 %v6157_v59  ;;  %v855_v59 = vld [vmem:[%s8201_s24 + $0xe58] sm:$0xff]  ;;  %v1908_v37 = vld [vmem:[%s8201_s24 + $0x2f40] sm:$0xff]  ;;  %v889_v44 = vld [vmem:[%s8201_s24 + $0xf68] sm:$0xff] }
 0x1f0   : > { %7182 = vmatpush1.bf16.msra.mxu0 %v7181_v60  ;;  %6160 = vmatprep.subr.bf16.mxu1 %v6159_v62  ;;  %v1877_v60 = vld [vmem:[%s8201_s24 + $0x2e48] sm:$0xff]  ;;  %v1879_v62 = vld [vmem:[%s8201_s24 + $0x2e58] sm:$0xff]  ;;  %v6179_v28 = vpack.c.bf16 %v855_v59, %v853_v58  ;;  %v1894_v59 = vld [vmem:[%s8201_s24 + $0x2ed0] sm:$0xff] }
 0x1f1   : > { %7184 = vmatprep.subr.bf16.mxu0 %v7183_v1  ;;  %v852_v1 = vld [vmem:[%s8201_s24 + $0xe40] sm:$0xff]  ;;  %v7203_v46 = vpack.c.bf16 %v1879_v62, %v1877_v60  ;;  %v875_v60 = vld [vmem:[%s8201_s24 + $0xef8] sm:$0xff]  ;;  %v1897_v62 = vld [vmem:[%s8201_s24 + $0x2ee8] sm:$0xff] }
 0x1f2   : > { %v891_v45 = vld [vmem:[%s8201_s24 + $0xf78] sm:$0xff] }
 0x1f3   : > { %6162 = vmatpush1.bf16.msra.mxu1 %v6161_v26  ;;  %v1881_v26 = vld [vmem:[%s8201_s24 + $0x2e68] sm:$0xff] }
 0x1f4   : > { %7186 = vmatpush1.bf16.msra.mxu0 %v7185_v33  ;;  %6164 = vmatprep.subr.bf16.mxu1 %v6163_v6  ;;  %v1883_v33 = vld [vmem:[%s8201_s24 + $0x2e78] sm:$0xff]  ;;  %v6181_v6 = vpack.c.bf16 %v854_v2, %v852_v1  ;;  %v872_v1 = vld [vmem:[%s8201_s24 + $0xee0] sm:$0xff]  ;;  %v874_v2 = vld [vmem:[%s8201_s24 + $0xef0] sm:$0xff] }
 0x1f5   : > { %7188 = vmatprep.subr.bf16.mxu0 %v7187_v34  ;;  %v858_v34 = vld [vmem:[%s8201_s24 + $0xe70] sm:$0xff]  ;;  %v7207_v31 = vpack.c.bf16 %v1883_v33, %v1881_v26  ;;  %v1901_v26 = vld [vmem:[%s8201_s24 + $0x2f08] sm:$0xff]  ;;  %v1903_v33 = vld [vmem:[%s8201_s24 + $0x2f18] sm:$0xff] }
 0x1f7   : > { %6166 = vmatpush1.bf16.msra.mxu1 %v6165_v12  ;;  %v1885_v12 = vld [vmem:[%s8201_s24 + $0x2e88] sm:$0xff] }
 0x1f8   : > { %7190 = vmatpush1.bf16.msra.mxu0 %v7189_v13  ;;  %6168 = vmatprep.subr.bf16.mxu1 %v6167_v14  ;;  %v1887_v13 = vld [vmem:[%s8201_s24 + $0x2e98] sm:$0xff]  ;;  %v6185_v14 = vpack.c.bf16 %v858_v34, %v856_v9  ;;  %v876_v9 = vld [vmem:[%s8201_s24 + $0xf00] sm:$0xff]  ;;  %v878_v34 = vld [vmem:[%s8201_s24 + $0xf10] sm:$0xff] }
 0x1f9   : > { %7192 = vmatprep.subr.bf16.mxu0 %v7191_v32  ;;  %v862_v32 = vld [vmem:[%s8201_s24 + $0xe90] sm:$0xff]  ;;  %v7211_v17 = vpack.c.bf16 %v1887_v13, %v1885_v12  ;;  %v1905_v12 = vld [vmem:[%s8201_s24 + $0x2f28] sm:$0xff]  ;;  %v1907_v13 = vld [vmem:[%s8201_s24 + $0x2f38] sm:$0xff] }
 0x1fb   : > { %6170 = vmatpush1.bf16.msra.mxu1 %v6169_v20  ;;  %v1889_v20 = vld [vmem:[%s8201_s24 + $0x2ea8] sm:$0xff] }
 0x1fc   : > { %7194 = vmatpush1.bf16.msra.mxu0 %v7193_v47  ;;  %6172 = vmatprep.subr.bf16.mxu1 %v6171_v23  ;;  %v1891_v47 = vld [vmem:[%s8201_s24 + $0x2eb8] sm:$0xff]  ;;  %v6189_v23 = vpack.c.bf16 %v862_v32, %v860_v41  ;;  %v880_v41 = vld [vmem:[%s8201_s24 + $0xf20] sm:$0xff]  ;;  %v882_v32 = vld [vmem:[%s8201_s24 + $0xf30] sm:$0xff] }
 0x1fd   : > { %7196 = vmatprep.subr.bf16.mxu0 %v7195_v35  ;;  %v866_v35 = vld [vmem:[%s8201_s24 + $0xeb0] sm:$0xff]  ;;  %v7215_v38 = vpack.c.bf16 %v1891_v47, %v1889_v20  ;;  %v1909_v20 = vld [vmem:[%s8201_s24 + $0x2f48] sm:$0xff]  ;;  %v1911_v47 = vld [vmem:[%s8201_s24 + $0x2f58] sm:$0xff] }
 0x1fe   : > { %3415 = vmatmul.mubr.f32.vlgmr.msra.gmra.mrb[0].mxu1 %v9303_v42 }
 0x1ff   : > { %6174 = vmatpush1.bf16.msra.mxu1 %v6173_v48  ;;  %4551 = vmatmul.mubr.f32.vlgmr.msra.gmra.mrb[0].mxu0 %v9309_v50  ;;  %v1893_v48 = vld [vmem:[%s8201_s24 + $0x2ec8] sm:$0xff] }
 0x200   : > { %7198 = vmatpush1.bf16.msra.mxu0 %v7197_v52  ;;  %6176 = vmatprep.subr.bf16.mxu1 %v6175_v53  ;;  %v1895_v52 = vld [vmem:[%s8201_s24 + $0x2ed8] sm:$0xff]  ;;  %v6193_v53 = vpack.c.bf16 %v866_v35, %v864_v29  ;;  %v884_v29 = vld [vmem:[%s8201_s24 + $0xf40] sm:$0xff]  ;;  %v886_v35 = vld [vmem:[%s8201_s24 + $0xf50] sm:$0xff] }
 0x201   : > { %7200 = vmatprep.subr.bf16.mxu0 %v7199_v56  ;;  %3485 = vmatprep.mubr.f32.mxu1 %v2559_v4  ;;  %v870_v56 = vld [vmem:[%s8201_s24 + $0xed0] sm:$0xff]  ;;  %v7219_v58 = vpack.c.bf16 %v1895_v52, %v1893_v48  ;;  %v873_v4 = vld [vmem:[%s8201_s24 + $0xee8] sm:$0xff]  ;;  %v1915_v52 = vld [vmem:[%s8201_s24 + $0x2f78] sm:$0xff] }
 0x202   : > { %4621 = vmatprep.mubr.f32.mxu0 %v2759_v61  ;;  %v1899_v61 = vld [vmem:[%s8201_s24 + $0x2ef8] sm:$0xff]  ;;  %v1913_v48 = vld [vmem:[%s8201_s24 + $0x2f68] sm:$0xff] }
 0x203   : > { %6178 = vmatpush1.bf16.msra.mxu1 %v6177_v51  ;;  %v6197_v51 = vpack.c.bf16 %v870_v56, %v868_v25  ;;  %v6215_v25 = vpack.c.bf16 %v891_v45, %v889_v44  ;;  %v890_v56 = vld [vmem:[%s8201_s24 + $0xf70] sm:$0xff]  ;;  %v905_v44 = vld [vmem:[%s8201_s24 + $0xfe8] sm:$0xff]  ;;  %v907_v45 = vld [vmem:[%s8201_s24 + $0xff8] sm:$0xff] }
 0x204   : > { %7202 = vmatpush1.bf16.msra.mxu0 %v7201_v0  ;;  %6180 = vmatprep.subr.bf16.mxu1 %v6179_v28  ;;  %v7221_v0 = vpack.c.bf16 %v1894_v59, %v1892_v57  ;;  %v6199_v28 = vpack.c.bf16 %v875_v60, %v873_v4  ;;  %v1912_v57 = vld [vmem:[%s8201_s24 + $0x2f60] sm:$0xff]  ;;  %v7239_v59 = vpack.c.bf16 %v1915_v52, %v1913_v48  ;;  %v893_v4 = vld [vmem:[%s8201_s24 + $0xf88] sm:$0xff]  ;;  %v895_v60 = vld [vmem:[%s8201_s24 + $0xf98] sm:$0xff] }
 0x205   : > { %7204 = vmatprep.subr.bf16.mxu0 %v7203_v46  ;;  %v7223_v46 = vpack.c.bf16 %v1899_v61, %v1897_v62  ;;  %v1917_v62 = vld [vmem:[%s8201_s24 + $0x2f88] sm:$0xff]  ;;  %v1919_v61 = vld [vmem:[%s8201_s24 + $0x2f98] sm:$0xff] }
 0x206   : > { %v1929_v52 = vld [vmem:[%s8201_s24 + $0x2fe8] sm:$0xff] }
 0x207   : > { %6182 = vmatpush1.bf16.msra.mxu1 %v6181_v6  ;;  %v6201_v6 = vpack.c.bf16 %v874_v2, %v872_v1  ;;  %v1916_v1 = vld [vmem:[%s8201_s24 + $0x2f80] sm:$0xff]  ;;  %v1918_v2 = vld [vmem:[%s8201_s24 + $0x2f90] sm:$0xff] }
 0x208   : > { %7206 = vmatpush1.bf16.msra.mxu0 %v7205_v7  ;;  %6184 = vmatprep.subr.bf16.mxu1 %v6183_v21  ;;  %v7225_v7 = vpack.c.bf16 %v1898_v63, %v1896_v22  ;;  %v6203_v21 = vpack.c.bf16 %v879_v3, %v877_v30  ;;  %v897_v22 = vld [vmem:[%s8201_s24 + $0xfa8] sm:$0xff]  ;;  %v6219_v30 = vpack.c.bf16 %v895_v60, %v893_v4  ;;  %v1930_v60 = vld [vmem:[%s8201_s24 + $0x2ff0] sm:$0xff] }
 0x209   : > { %7208 = vmatprep.subr.bf16.mxu0 %v7207_v31  ;;  %v7227_v31 = vpack.c.bf16 %v1903_v33, %v1901_v26  ;;  %v1921_v3 = vld [vmem:[%s8201_s24 + $0x2fa8] sm:$0xff]  ;;  %v1923_v26 = vld [vmem:[%s8201_s24 + $0x2fb8] sm:$0xff] }
 0x20a   : > { %v5645_v33 = vld [vmem:[%s8305_s30 + $0x80] ss:$8 sm:$0xf] }
 0x20b   : > { %6186 = vmatpush1.bf16.msra.mxu1 %v6185_v14  ;;  %v6205_v14 = vpack.c.bf16 %v878_v34, %v876_v9  ;;  %v5677_v9 = vld [vmem:[%s8305_s30 + $0x880] ss:$8 sm:$0xf0] }
 0x20c   : > { %7210 = vmatpush1.bf16.msra.mxu0 %v7209_v43  ;;  %6188 = vmatprep.subr.bf16.mxu1 %v6187_v49  ;;  %v7229_v43 = vpack.c.bf16 %v1902_v10, %v1900_v39  ;;  %v6207_v49 = vpack.c.bf16 %v883_v11, %v881_v24  ;;  %v5661_v34 = vld [vmem:[%s8305_s30 + $0x180] ss:$8 sm:$0xf]  ;;  %v7245_v11 = vpack.c.bf16 %v1918_v2, %v1916_v1 }
 0x20d   : > { %7212 = vmatprep.subr.bf16.mxu0 %v7211_v17  ;;  %v7231_v17 = vpack.c.bf16 %v1907_v13, %v1905_v12  ;;  %v5662_v39 = vld [vmem:[%s8305_s30 + $0x180] ss:$8 sm:$0xf0] }
 0x20e   : > { %v5692_v10 = vld [vmem:[%s8305_s30 + $0x980] ss:$8 sm:$0xf] }
 0x20f   : > { %6190 = vmatpush1.bf16.msra.mxu1 %v6189_v23  ;;  %v6209_v23 = vpack.c.bf16 %v882_v32, %v880_v41  ;;  %v5693_v24 = vld [vmem:[%s8305_s30 + $0x980] ss:$8 sm:$0xf0] }
 0x210   : > { %7214 = vmatpush1.bf16.msra.mxu0 %v7213_v27  ;;  %6192 = vmatprep.subr.bf16.mxu1 %v6191_v8  ;;  %v7233_v27 = vpack.c.bf16 %v1906_v54, %v1904_v16  ;;  %v6211_v8 = vpack.c.bf16 %v887_v19, %v885_v18  ;;  %v896_v13 = vld [vmem:[%s8201_s24 + $0xfa0] sm:$0xff]  ;;  %v1922_v41 = vld [vmem:[%s8201_s24 + $0x2fb0] sm:$0xff]  ;;  %v901_v32 = vld [vmem:[%s8201_s24 + $0xfc8] sm:$0xff] }
 0x211   : > { %7216 = vmatprep.subr.bf16.mxu0 %v7215_v38  ;;  %v7235_v38 = vpack.c.bf16 %v1911_v47, %v1909_v20  ;;  %v903_v16 = vld [vmem:[%s8201_s24 + $0xfd8] sm:$0xff]  ;;  %v1925_v18 = vld [vmem:[%s8201_s24 + $0x2fc8] sm:$0xff]  ;;  %v9433_v20 = vor.u32 %v5662_v39, %v5661_v34  ;;  %v9435_v47 = vor.u32 %v5693_v24, %v5692_v10  ;;  %v2757_v24 = vcombine.high %v9309_v50, %v9309_v50 }
 0x212   : > { %v1927_v19 = vld [vmem:[%s8201_s24 + $0x2fd8] sm:$0xff]  ;;  %v1937_v34 = vld [vmem:[%s8201_s24 + $0x3028] sm:$0xff] }
 0x213   : > { %6194 = vmatpush1.bf16.msra.mxu1 %v6193_v53  ;;  %v6213_v53 = vpack.c.bf16 %v886_v35, %v884_v29  ;;  %v900_v29 = vld [vmem:[%s8201_s24 + $0xfc0] sm:$0xff]  ;;  %v902_v35 = vld [vmem:[%s8201_s24 + $0xfd0] sm:$0xff]  ;;  %v1939_v39 = vld [vmem:[%s8201_s24 + $0x3038] sm:$0xff] }
 0x214   : > { %7218 = vmatpush1.bf16.msra.mxu0 %v7217_v5  ;;  %6196 = vmatprep.subr.bf16.mxu1 %v6195_v55  ;;  %v888_v5 = vld [vmem:[%s8201_s24 + $0xf60] sm:$0xff]  ;;  %v7237_v55 = vpack.c.bf16 %v1910_v40, %v1908_v37  ;;  %v1926_v40 = vld [vmem:[%s8201_s24 + $0x2fd0] sm:$0xff]  ;;  %v1941_v50 = vld [vmem:[%s8201_s24 + $0x3048] sm:$0xff] }
 0x215   : > { %7220 = vmatprep.subr.bf16.mxu0 %v7219_v58  ;;  %v1914_v58 = vld [vmem:[%s8201_s24 + $0x2f70] sm:$0xff]  ;;  %v1924_v37 = vld [vmem:[%s8201_s24 + $0x2fc0] sm:$0xff] }
 0x216   : > { %v7241_v63 = vpack.c.bf16 %v1914_v58, %v1912_v57  ;;  %v904_v57 = vld [vmem:[%s8201_s24 + $0xfe0] sm:$0xff]  ;;  %v906_v58 = vld [vmem:[%s8201_s24 + $0xff0] sm:$0xff] }
 0x217   : > { %6198 = vmatpush1.bf16.msra.mxu1 %v6197_v51  ;;  %v892_v51 = vld [vmem:[%s8201_s24 + $0xf80] sm:$0xff]  ;;  %v6233_v2 = vpack.c.bf16 %v906_v58, %v904_v57 }
 0x218   : > { %7222 = vmatpush1.bf16.msra.mxu0 %v7221_v0  ;;  %6200 = vmatprep.subr.bf16.mxu1 %v6199_v28  ;;  %v894_v0 = vld [vmem:[%s8201_s24 + $0xf90] sm:$0xff]  ;;  %v6217_v28 = vpack.c.bf16 %v890_v56, %v888_v5  ;;  %v2760_v5 = vcombine.low %v9433_v20, %v9435_v47  ;;  %v6231_v56 = vpack.c.bf16 %v907_v45, %v905_v44  ;;  %v921_v44 = vld [vmem:[%s8201_s24 + $0x1068] sm:$0xff]  ;;  %v923_v45 = vld [vmem:[%s8201_s24 + $0x1078] sm:$0xff] }
 0x219   : > { %7224 = vmatprep.subr.bf16.mxu0 %v7223_v46  ;;  %v899_v46 = vld [vmem:[%s8201_s24 + $0xfb8] sm:$0xff]  ;;  %v1944_v57 = vld [vmem:[%s8201_s24 + $0x3060] sm:$0xff] }
 0x21a   : > { %v6223_v12 = vpack.c.bf16 %v899_v46, %v897_v22  ;;  %v9461_v1 = vrot.slane %v2760_v5, %v8330_v36 }
 0x21b   : > { %6202 = vmatpush1.bf16.msra.mxu1 %v6201_v6  ;;  %v5646_v6 = vld [vmem:[%s8305_s30 + $0x80] ss:$8 sm:$0xf0] }
 0x21c   : > { %7226 = vmatpush1.bf16.msra.mxu0 %v7225_v7  ;;  %6204 = vmatprep.subr.bf16.mxu1 %v6203_v21  ;;  %v7243_v7 = vpack.c.bf16 %v1919_v61, %v1917_v62  ;;  %v5676_v21 = vld [vmem:[%s8305_s30 + $0x880] ss:$8 sm:$0xf] }
 0x21d   : > { %7228 = vmatprep.subr.bf16.mxu0 %v7227_v31  ;;  %v6221_v31 = vpack.c.bf16 %v894_v0, %v892_v51  ;;  %v9429_v54 = vor.u32 %v5677_v9, %v5676_v21  ;;  %v909_v62 = vld [vmem:[%s8201_s24 + $0x1008] sm:$0xff]  ;;  %v911_v61 = vld [vmem:[%s8201_s24 + $0x1018] sm:$0xff]  ;;  %v2557_v9 = vcombine.high %v9303_v42, %v9303_v42  ;;  %v912_v42 = vld [vmem:[%s8201_s24 + $0x1020] sm:$0xff] }
 0x21e   : > { %v1933_v0 = vld [vmem:[%s8201_s24 + $0x3008] sm:$0xff]  ;;  %v6235_v46 = vpack.c.bf16 %v911_v61, %v909_v62  ;;  %v1951_v61 = vld [vmem:[%s8201_s24 + $0x3098] sm:$0xff] }
 0x21f   : > { %6206 = vmatpush1.bf16.msra.mxu1 %v6205_v14  ;;  %v898_v14 = vld [vmem:[%s8201_s24 + $0xfb0] sm:$0xff]  ;;  %v1949_v62 = vld [vmem:[%s8201_s24 + $0x3088] sm:$0xff] }
 0x220   : > { %7230 = vmatpush1.bf16.msra.mxu0 %v7229_v43  ;;  %6208 = vmatprep.subr.bf16.mxu1 %v6207_v49  ;;  %v1920_v43 = vld [vmem:[%s8201_s24 + $0x2fa0] sm:$0xff]  ;;  %v7247_v49 = vpack.c.bf16 %v1923_v26, %v1921_v3 }
 0x221   : > { %7232 = vmatprep.subr.bf16.mxu0 %v7231_v17  ;;  %v9427_v17 = vor.u32 %v5646_v6, %v5645_v33  ;;  %v1932_v3 = vld [vmem:[%s8201_s24 + $0x3000] sm:$0xff]  ;;  %v1934_v33 = vld [vmem:[%s8201_s24 + $0x3010] sm:$0xff]  ;;  %v913_v6 = vld [vmem:[%s8201_s24 + $0x1028] sm:$0xff] }
 0x223   : > { %6210 = vmatpush1.bf16.msra.mxu1 %v6209_v23  ;;  %v6225_v23 = vpack.c.bf16 %v898_v14, %v896_v13  ;;  %v2560_v48 = vcombine.low %v9427_v17, %v9429_v54  ;;  %v914_v13 = vld [vmem:[%s8201_s24 + $0x1030] sm:$0xff]  ;;  %v1936_v14 = vld [vmem:[%s8201_s24 + $0x3020] sm:$0xff] }
 0x224   : > { %7234 = vmatpush1.bf16.msra.mxu0 %v7233_v27  ;;  %6212 = vmatprep.subr.bf16.mxu1 %v6211_v8  ;;  %v7249_v27 = vpack.c.bf16 %v1922_v41, %v1920_v43  ;;  %v6227_v8 = vpack.c.bf16 %v903_v16, %v901_v32  ;;  %v7263_v43 = vpack.c.bf16 %v1939_v39, %v1937_v34  ;;  %v917_v41 = vld [vmem:[%s8201_s24 + $0x1048] sm:$0xff]  ;;  %v919_v32 = vld [vmem:[%s8201_s24 + $0x1058] sm:$0xff]  ;;  %v928_v39 = vld [vmem:[%s8201_s24 + $0x10a0] sm:$0xff] }
 0x225   : > { %7236 = vmatprep.subr.bf16.mxu0 %v7235_v38  ;;  %v7251_v38 = vpack.c.bf16 %v1927_v19, %v1925_v18  ;;  %v9456_v51 = vrot.slane %v2560_v48, %v8330_v36  ;;  %v1943_v18 = vld [vmem:[%s8201_s24 + $0x3058] sm:$0xff]  ;;  %v1945_v48 = vld [vmem:[%s8201_s24 + $0x3068] sm:$0xff] }
 0x227   : > { %6214 = vmatpush1.bf16.msra.mxu1 %v6213_v53  ;;  %v1931_v53 = vld [vmem:[%s8201_s24 + $0x2ff8] sm:$0xff]  ;;  %v2576_v21 = vcombine.high %v9456_v51, %v9456_v51 }
 0x228   : > { %7238 = vmatpush1.bf16.msra.mxu0 %v7237_v55  ;;  %6216 = vmatprep.subr.bf16.mxu1 %v6215_v25  ;;  %v6229_v55 = vpack.c.bf16 %v902_v35, %v900_v29  ;;  %v7253_v25 = vpack.c.bf16 %v1926_v40, %v1924_v37  ;;  %v7255_v4 = vpack.c.bf16 %v1931_v53, %v1929_v52  ;;  %v916_v29 = vld [vmem:[%s8201_s24 + $0x1040] sm:$0xff]  ;;  %v918_v35 = vld [vmem:[%s8201_s24 + $0x1050] sm:$0xff]  ;;  %v1947_v52 = vld [vmem:[%s8201_s24 + $0x3078] sm:$0xff] }
 0x229   : > { %7240 = vmatprep.subr.bf16.mxu0 %v7239_v59  ;;  %v1928_v59 = vld [vmem:[%s8201_s24 + $0x2fe0] sm:$0xff]  ;;  %v9486_v16 = vrot.slane %v2576_v21, %v8330_v36  ;;  %v1942_v40 = vld [vmem:[%s8201_s24 + $0x3050] sm:$0xff]  ;;  %v6245_v53 = vpack.c.bf16 %v918_v35, %v916_v29  ;;  %v7271_v58 = vpack.c.bf16 %v1947_v52, %v1945_v48  ;;  %v939_v29 = vld [vmem:[%s8201_s24 + $0x10f8] sm:$0xff] }
 0x22a   : > { %v7257_v22 = vpack.c.bf16 %v1930_v60, %v1928_v59  ;;  %v1940_v37 = vld [vmem:[%s8201_s24 + $0x3040] sm:$0xff]  ;;  %v1946_v59 = vld [vmem:[%s8201_s24 + $0x3070] sm:$0xff]  ;;  %v927_v60 = vld [vmem:[%s8201_s24 + $0x1098] sm:$0xff] }
 0x22b   : > { %6218 = vmatpush1.bf16.msra.mxu1 %v6217_v28  ;;  %v1935_v28 = vld [vmem:[%s8201_s24 + $0x3018] sm:$0xff]  ;;  %v7269_v5 = vpack.c.bf16 %v1942_v40, %v1940_v37  ;;  %v1961_v35 = vld [vmem:[%s8201_s24 + $0x30e8] sm:$0xff]  ;;  %v938_v48 = vld [vmem:[%s8201_s24 + $0x10f0] sm:$0xff] }
 0x22c   : > { %7242 = vmatpush1.bf16.msra.mxu0 %v7241_v63  ;;  %6220 = vmatprep.subr.bf16.mxu1 %v6219_v30  ;;  %v908_v63 = vld [vmem:[%s8201_s24 + $0x1000] sm:$0xff]  ;;  %v910_v30 = vld [vmem:[%s8201_s24 + $0x1010] sm:$0xff]  ;;  %v7259_v26 = vpack.c.bf16 %v1935_v28, %v1933_v0  ;;  %v7273_v28 = vpack.c.bf16 %v1946_v59, %v1944_v57  ;;  %v1963_v37 = vld [vmem:[%s8201_s24 + $0x30f8] sm:$0xff] }
 0x22d   : > { %7244 = vmatprep.subr.bf16.mxu0 %v7243_v7  ;;  %v915_v7 = vld [vmem:[%s8201_s24 + $0x1038] sm:$0xff]  ;;  %v6237_v10 = vpack.c.bf16 %v910_v30, %v908_v63  ;;  %v1948_v63 = vld [vmem:[%s8201_s24 + $0x3080] sm:$0xff]  ;;  %v7275_v30 = vpack.c.bf16 %v1951_v61, %v1949_v62  ;;  %v942_v62 = vld [vmem:[%s8201_s24 + $0x1110] sm:$0xff] }
 0x22e   : > { %v1960_v52 = vld [vmem:[%s8201_s24 + $0x30e0] sm:$0xff]  ;;  %v1967_v57 = vld [vmem:[%s8201_s24 + $0x3118] sm:$0xff] }
 0x22f   : > { %6222 = vmatpush1.bf16.msra.mxu1 %v6221_v31  ;;  %v2776_v31 = vcombine.high %v9461_v1, %v9461_v1  ;;  %v1964_v61 = vld [vmem:[%s8201_s24 + $0x3100] sm:$0xff] }
 0x230   : > { %7246 = vmatpush1.bf16.msra.mxu0 %v7245_v11  ;;  %6224 = vmatprep.subr.bf16.mxu1 %v6223_v12  ;;  %v7261_v11 = vpack.c.bf16 %v1934_v33, %v1932_v3  ;;  %v6239_v12 = vpack.c.bf16 %v915_v7, %v913_v6  ;;  %v1950_v3 = vld [vmem:[%s8201_s24 + $0x3090] sm:$0xff]  ;;  %v931_v33 = vld [vmem:[%s8201_s24 + $0x10b8] sm:$0xff]  ;;  %v1953_v6 = vld [vmem:[%s8201_s24 + $0x30a8] sm:$0xff] }
 0x231   : > { %7248 = vmatprep.subr.bf16.mxu0 %v7247_v49  ;;  %v1938_v49 = vld [vmem:[%s8201_s24 + $0x3030] sm:$0xff]  ;;  %v9491_v19 = vrot.slane %v2776_v31, %v8330_v36  ;;  %v1955_v7 = vld [vmem:[%s8201_s24 + $0x30b8] sm:$0xff] }
 0x232   : > { %v930_v31 = vld [vmem:[%s8201_s24 + $0x10b0] sm:$0xff] }
 0x233   : > { %6226 = vmatpush1.bf16.msra.mxu1 %v6225_v23  ;;  %v6241_v23 = vpack.c.bf16 %v914_v13, %v912_v42  ;;  %v935_v42 = vld [vmem:[%s8201_s24 + $0x10d8] sm:$0xff]  ;;  %v1957_v13 = vld [vmem:[%s8201_s24 + $0x30c8] sm:$0xff] }
 0x234   : > { %7250 = vmatpush1.bf16.msra.mxu0 %v7249_v27  ;;  %6228 = vmatprep.subr.bf16.mxu1 %v6227_v8  ;;  %v7265_v27 = vpack.c.bf16 %v1938_v49, %v1936_v14  ;;  %v6243_v8 = vpack.c.bf16 %v919_v32, %v917_v41  ;;  %v1959_v14 = vld [vmem:[%s8201_s24 + $0x30d8] sm:$0xff]  ;;  %v932_v32 = vld [vmem:[%s8201_s24 + $0x10c0] sm:$0xff] }
 0x235   : > { %7252 = vmatprep.subr.bf16.mxu0 %v7251_v38  ;;  %v7267_v38 = vpack.c.bf16 %v1943_v18, %v1941_v50  ;;  %v934_v50 = vld [vmem:[%s8201_s24 + $0x10d0] sm:$0xff]  ;;  %v1956_v18 = vld [vmem:[%s8201_s24 + $0x30c0] sm:$0xff] }
 0x237   : > { %6230 = vmatpush1.bf16.msra.mxu1 %v6229_v55  ;;  %v6247_v55 = vpack.c.bf16 %v923_v45, %v921_v44  ;;  %v936_v45 = vld [vmem:[%s8201_s24 + $0x10e0] sm:$0xff] }
 0x238   : > { %7254 = vmatpush1.bf16.msra.mxu0 %v7253_v25  ;;  %6232 = vmatprep.subr.bf16.mxu1 %v6231_v56  ;;  %v920_v25 = vld [vmem:[%s8201_s24 + $0x1060] sm:$0xff]  ;;  %v922_v56 = vld [vmem:[%s8201_s24 + $0x1070] sm:$0xff] }
 0x239   : > { %7256 = vmatprep.subr.bf16.mxu0 %v7255_v4  ;;  %v925_v4 = vld [vmem:[%s8201_s24 + $0x1088] sm:$0xff]  ;;  %v6249_v0 = vpack.c.bf16 %v922_v56, %v920_v25  ;;  %v943_v25 = vld [vmem:[%s8201_s24 + $0x1118] sm:$0xff] }
 0x23a   : > { %v1965_v56 = vld [vmem:[%s8201_s24 + $0x3108] sm:$0xff] }
 0x23b   : > { %6234 = vmatpush1.bf16.msra.mxu1 %v6233_v2  ;;  %v6251_v2 = vpack.c.bf16 %v927_v60, %v925_v4  ;;  %v940_v60 = vld [vmem:[%s8201_s24 + $0x1100] sm:$0xff] }
 0x23c   : > { %7258 = vmatpush1.bf16.msra.mxu0 %v7257_v22  ;;  %6236 = vmatprep.subr.bf16.mxu1 %v6235_v46  ;;  %v924_v22 = vld [vmem:[%s8201_s24 + $0x1080] sm:$0xff]  ;;  %v926_v46 = vld [vmem:[%s8201_s24 + $0x1090] sm:$0xff] }
 0x23d   : > { %7260 = vmatprep.subr.bf16.mxu0 %v7259_v26  ;;  %v929_v26 = vld [vmem:[%s8201_s24 + $0x10a8] sm:$0xff]  ;;  %v6253_v21 = vpack.c.bf16 %v926_v46, %v924_v22  ;;  %v947_v22 = vld [vmem:[%s8201_s24 + $0x1138] sm:$0xff] }
 0x23e   : > { %3486 = vmatmul.mubr.f32.vlgmr.msra.gmra.mrb[0].mxu1 %v2557_v9  ;;  %v7277_v9 = vpack.c.bf16 %v1950_v3, %v1948_v63  ;;  %v6255_v34 = vpack.c.bf16 %v931_v33, %v929_v26  ;;  %v1969_v46 = vld [vmem:[%s8201_s24 + $0x3128] sm:$0xff]  ;;  %v1971_v63 = vld [vmem:[%s8201_s24 + $0x3138] sm:$0xff]  ;;  %v944_v33 = vld [vmem:[%s8201_s24 + $0x1120] sm:$0xff] }
 0x23f   : > { %6238 = vmatpush1.bf16.msra.mxu1 %v6237_v10  ;;  %4622 = vmatmul.mubr.f32.vlgmr.msra.gmra.mrb[0].mxu0 %v2757_v24  ;;  %v1952_v10 = vld [vmem:[%s8201_s24 + $0x30a0] sm:$0xff]  ;;  %v7279_v24 = vpack.c.bf16 %v1955_v7, %v1953_v6  ;;  %v946_v6 = vld [vmem:[%s8201_s24 + $0x1130] sm:$0xff] }
 0x240   : > { %7262 = vmatpush1.bf16.msra.mxu0 %v7261_v11  ;;  %6240 = vmatprep.subr.bf16.mxu1 %v6239_v12  ;;  %v1954_v11 = vld [vmem:[%s8201_s24 + $0x30b0] sm:$0xff]  ;;  %v933_v12 = vld [vmem:[%s8201_s24 + $0x10c8] sm:$0xff]  ;;  %v1968_v7 = vld [vmem:[%s8201_s24 + $0x3120] sm:$0xff] }
 0x241   : > { %7264 = vmatprep.subr.bf16.mxu0 %v7263_v43  ;;  %3556 = vmatprep.mubr.f32.mxu1 %v9486_v16  ;;  %v6257_v43 = vpack.c.bf16 %v930_v31, %v928_v39  ;;  %v7281_v49 = vpack.c.bf16 %v1954_v11, %v1952_v10  ;;  %v6259_v41 = vpack.c.bf16 %v935_v42, %v933_v12  ;;  %v951_v39 = vld [vmem:[%s8201_s24 + $0x1158] sm:$0xff]  ;;  %v1973_v31 = vld [vmem:[%s8201_s24 + $0x3148] sm:$0xff]  ;;  %v948_v42 = vld [vmem:[%s8201_s24 + $0x1140] sm:$0xff] }
 0x242   : > { %4692 = vmatprep.mubr.f32.mxu0 %v9491_v19  ;;  %v1975_v10 = vld [vmem:[%s8201_s24 + $0x3158] sm:$0xff] }
 0x243   : > { %6242 = vmatpush1.bf16.msra.mxu1 %v6241_v23  ;;  %v7283_v23 = vpack.c.bf16 %v1959_v14, %v1957_v13  ;;  %v950_v13 = vld [vmem:[%s8201_s24 + $0x1150] sm:$0xff]  ;;  %v1972_v14 = vld [vmem:[%s8201_s24 + $0x3140] sm:$0xff] }
 0x244   : > { %7266 = vmatpush1.bf16.msra.mxu0 %v7265_v27  ;;  %6244 = vmatprep.subr.bf16.mxu1 %v6243_v8  ;;  %v1958_v27 = vld [vmem:[%s8201_s24 + $0x30d0] sm:$0xff]  ;;  %v937_v8 = vld [vmem:[%s8201_s24 + $0x10e8] sm:$0xff] }
 0x245   : > { %7268 = vmatprep.subr.bf16.mxu0 %v7267_v38  ;;  %v6261_v38 = vpack.c.bf16 %v934_v50, %v932_v32  ;;  %v7285_v40 = vpack.c.bf16 %v1958_v27, %v1956_v18  ;;  %v6263_v44 = vpack.c.bf16 %v939_v29, %v937_v8  ;;  %v955_v32 = vld [vmem:[%s8201_s24 + $0x1178] sm:$0xff]  ;;  %v1977_v50 = vld [vmem:[%s8201_s24 + $0x3168] sm:$0xff]  ;;  %v952_v29 = vld [vmem:[%s8201_s24 + $0x1160] sm:$0xff] }
 0x246   : > { %v1979_v18 = vld [vmem:[%s8201_s24 + $0x3178] sm:$0xff] }
 0x247   : > { %6246 = vmatpush1.bf16.msra.mxu1 %v6245_v53  ;;  %v7287_v53 = vpack.c.bf16 %v1963_v37, %v1961_v35  ;;  %v954_v35 = vld [vmem:[%s8201_s24 + $0x1170] sm:$0xff]  ;;  %v1976_v37 = vld [vmem:[%s8201_s24 + $0x3160] sm:$0xff] }
 0x248   : > { %7270 = vmatpush1.bf16.msra.mxu0 %v7269_v5  ;;  %6248 = vmatprep.subr.bf16.mxu1 %v6247_v55  ;;  %v1962_v5 = vld [vmem:[%s8201_s24 + $0x30f0] sm:$0xff]  ;;  %v941_v55 = vld [vmem:[%s8201_s24 + $0x1108] sm:$0xff] }
 0x249   : > { %7272 = vmatprep.subr.bf16.mxu0 %v7271_v58  ;;  %v6265_v58 = vpack.c.bf16 %v938_v48, %v936_v45  ;;  %v7289_v59 = vpack.c.bf16 %v1962_v5, %v1960_v52  ;;  %v6267_v4 = vpack.c.bf16 %v943_v25, %v941_v55  ;;  %v959_v45 = vld [vmem:[%s8201_s24 + $0x1198] sm:$0xff]  ;;  %v1981_v48 = vld [vmem:[%s8201_s24 + $0x3188] sm:$0xff]  ;;  %v956_v25 = vld [vmem:[%s8201_s24 + $0x1180] sm:$0xff] }
 0x24a   : > { %v1983_v52 = vld [vmem:[%s8201_s24 + $0x3198] sm:$0xff] }
 0x24b   : > { %6250 = vmatpush1.bf16.msra.mxu1 %v6249_v0  ;;  %v7291_v0 = vpack.c.bf16 %v1967_v57, %v1965_v56  ;;  %v958_v56 = vld [vmem:[%s8201_s24 + $0x1190] sm:$0xff]  ;;  %v1980_v57 = vld [vmem:[%s8201_s24 + $0x3180] sm:$0xff] }
 0x24c   : > { %7274 = vmatpush1.bf16.msra.mxu0 %v7273_v28  ;;  %6252 = vmatprep.subr.bf16.mxu1 %v6251_v2  ;;  %v1966_v28 = vld [vmem:[%s8201_s24 + $0x3110] sm:$0xff]  ;;  %v945_v2 = vld [vmem:[%s8201_s24 + $0x1128] sm:$0xff] }
 0x24d   : > { %7276 = vmatprep.subr.bf16.mxu0 %v7275_v30  ;;  %v6269_v30 = vpack.c.bf16 %v942_v62, %v940_v60  ;;  %v7293_v3 = vpack.c.bf16 %v1966_v28, %v1964_v61  ;;  %v6271_v26 = vpack.c.bf16 %v947_v22, %v945_v2  ;;  %v963_v60 = vld [vmem:[%s8201_s24 + $0x11b8] sm:$0xff]  ;;  %v1985_v62 = vld [vmem:[%s8201_s24 + $0x31a8] sm:$0xff]  ;;  %v960_v22 = vld [vmem:[%s8201_s24 + $0x11a0] sm:$0xff] }
 0x24e   : > { %v1987_v61 = vld [vmem:[%s8201_s24 + $0x31b8] sm:$0xff] }
 0x24f   : > { %6254 = vmatpush1.bf16.msra.mxu1 %v6253_v21  ;;  %v7295_v21 = vpack.c.bf16 %v1971_v63, %v1969_v46  ;;  %v962_v46 = vld [vmem:[%s8201_s24 + $0x11b0] sm:$0xff]  ;;  %v1984_v63 = vld [vmem:[%s8201_s24 + $0x31a0] sm:$0xff] }
 0x250   : > { %7278 = vmatpush1.bf16.msra.mxu0 %v7277_v9  ;;  %6256 = vmatprep.subr.bf16.mxu1 %v6255_v34  ;;  %v1970_v9 = vld [vmem:[%s8201_s24 + $0x3130] sm:$0xff]  ;;  %v949_v34 = vld [vmem:[%s8201_s24 + $0x1148] sm:$0xff] }
 0x251   : > { %7280 = vmatprep.subr.bf16.mxu0 %v7279_v24  ;;  %v6273_v24 = vpack.c.bf16 %v946_v6, %v944_v33  ;;  %v7297_v11 = vpack.c.bf16 %v1970_v9, %v1968_v7  ;;  %v6275_v12 = vpack.c.bf16 %v951_v39, %v949_v34  ;;  %v967_v33 = vld [vmem:[%s8201_s24 + $0x11d8] sm:$0xff]  ;;  %v1989_v6 = vld [vmem:[%s8201_s24 + $0x31c8] sm:$0xff]  ;;  %v964_v39 = vld [vmem:[%s8201_s24 + $0x11c0] sm:$0xff] }
 0x252   : > { %v1991_v7 = vld [vmem:[%s8201_s24 + $0x31d8] sm:$0xff] }
 0x253   : > { %6258 = vmatpush1.bf16.msra.mxu1 %v6257_v43  ;;  %v7299_v43 = vpack.c.bf16 %v1975_v10, %v1973_v31  ;;  %v966_v31 = vld [vmem:[%s8201_s24 + $0x11d0] sm:$0xff]  ;;  %v1988_v10 = vld [vmem:[%s8201_s24 + $0x31c0] sm:$0xff] }
 0x254   : > { %7282 = vmatpush1.bf16.msra.mxu0 %v7281_v49  ;;  %6260 = vmatprep.subr.bf16.mxu1 %v6259_v41  ;;  %v1974_v49 = vld [vmem:[%s8201_s24 + $0x3150] sm:$0xff]  ;;  %v953_v41 = vld [vmem:[%s8201_s24 + $0x1168] sm:$0xff] }
 0x255   : > { %7284 = vmatprep.subr.bf16.mxu0 %v7283_v23  ;;  %v6277_v23 = vpack.c.bf16 %v950_v13, %v948_v42  ;;  %v7301_v27 = vpack.c.bf16 %v1974_v49, %v1972_v14  ;;  %v6279_v8 = vpack.c.bf16 %v955_v32, %v953_v41  ;;  %v971_v42 = vld [vmem:[%s8201_s24 + $0x11f8] sm:$0xff]  ;;  %v1993_v13 = vld [vmem:[%s8201_s24 + $0x31e8] sm:$0xff]  ;;  %v968_v32 = vld [vmem:[%s8201_s24 + $0x11e0] sm:$0xff] }
 0x256   : > { %v1995_v14 = vld [vmem:[%s8201_s24 + $0x31f8] sm:$0xff] }
 0x257   : > { %6262 = vmatpush1.bf16.msra.mxu1 %v6261_v38  ;;  %v7303_v38 = vpack.c.bf16 %v1979_v18, %v1977_v50  ;;  %v970_v50 = vld [vmem:[%s8201_s24 + $0x11f0] sm:$0xff]  ;;  %v1992_v18 = vld [vmem:[%s8201_s24 + $0x31e0] sm:$0xff] }
 0x258   : > { %7286 = vmatpush1.bf16.msra.mxu0 %v7285_v40  ;;  %6264 = vmatprep.subr.bf16.mxu1 %v6263_v44  ;;  %v1978_v40 = vld [vmem:[%s8201_s24 + $0x3170] sm:$0xff]  ;;  %v957_v44 = vld [vmem:[%s8201_s24 + $0x1188] sm:$0xff] }
 0x259   : > { %7288 = vmatprep.subr.bf16.mxu0 %v7287_v53  ;;  %v6281_v53 = vpack.c.bf16 %v954_v35, %v952_v29  ;;  %v7305_v5 = vpack.c.bf16 %v1978_v40, %v1976_v37  ;;  %v6283_v55 = vpack.c.bf16 %v959_v45, %v957_v44  ;;  %v975_v29 = vld [vmem:[%s8201_s24 + $0x1218] sm:$0xff]  ;;  %v1997_v35 = vld [vmem:[%s8201_s24 + $0x3208] sm:$0xff]  ;;  %v972_v45 = vld [vmem:[%s8201_s24 + $0x1200] sm:$0xff] }
 0x25a   : > { %v1999_v37 = vld [vmem:[%s8201_s24 + $0x3218] sm:$0xff] }
 0x25b   : > { %6266 = vmatpush1.bf16.msra.mxu1 %v6265_v58  ;;  %v7307_v58 = vpack.c.bf16 %v1983_v52, %v1981_v48  ;;  %v974_v48 = vld [vmem:[%s8201_s24 + $0x1210] sm:$0xff]  ;;  %v1996_v52 = vld [vmem:[%s8201_s24 + $0x3200] sm:$0xff] }
 0x25c   : > { %7290 = vmatpush1.bf16.msra.mxu0 %v7289_v59  ;;  %6268 = vmatprep.subr.bf16.mxu1 %v6267_v4  ;;  %v1982_v59 = vld [vmem:[%s8201_s24 + $0x3190] sm:$0xff]  ;;  %v961_v4 = vld [vmem:[%s8201_s24 + $0x11a8] sm:$0xff] }
 0x25d   : > { %7292 = vmatprep.subr.bf16.mxu0 %v7291_v0  ;;  %v6285_v0 = vpack.c.bf16 %v958_v56, %v956_v25  ;;  %v7309_v28 = vpack.c.bf16 %v1982_v59, %v1980_v57  ;;  %v6287_v2 = vpack.c.bf16 %v963_v60, %v961_v4  ;;  %v979_v25 = vld [vmem:[%s8201_s24 + $0x1238] sm:$0xff]  ;;  %v9615_v56 = vrot.slane %v9456_v51, %v8330_v36  ;;  %v2001_v57 = vld [vmem:[%s8201_s24 + $0x3228] sm:$0xff]  ;;  %v2000_v51 = vld [vmem:[%s8201_s24 + $0x3220] sm:$0xff] }
 0x25e   : > { %v6301_v59 = vpack.c.bf16 %v974_v48, %v972_v45  ;;  %v9621_v4 = vrot.slane %v9461_v1, %v8330_v36  ;;  %v2608_v1 = vcombine.high %v9486_v16, %v9486_v16  ;;  %v995_v45 = vld [vmem:[%s8201_s24 + $0x12b8] sm:$0xff]  ;;  %v2017_v48 = vld [vmem:[%s8201_s24 + $0x32a8] sm:$0xff] }
 0x25f   : > { %6270 = vmatpush1.bf16.msra.mxu1 %v6269_v30  ;;  %v7311_v30 = vpack.c.bf16 %v1987_v61, %v1985_v62  ;;  %v976_v61 = vld [vmem:[%s8201_s24 + $0x1220] sm:$0xff] }
 0x260   : > { %7294 = vmatpush1.bf16.msra.mxu0 %v7293_v3  ;;  %6272 = vmatprep.subr.bf16.mxu1 %v6271_v26  ;;  %v1986_v3 = vld [vmem:[%s8201_s24 + $0x31b0] sm:$0xff]  ;;  %v965_v26 = vld [vmem:[%s8201_s24 + $0x11c8] sm:$0xff] }
 0x261   : > { %7296 = vmatprep.subr.bf16.mxu0 %v7295_v21  ;;  %v6289_v21 = vpack.c.bf16 %v962_v46, %v960_v22  ;;  %v7313_v9 = vpack.c.bf16 %v1986_v3, %v1984_v63  ;;  %v6291_v34 = vpack.c.bf16 %v967_v33, %v965_v26  ;;  %v981_v22 = vld [vmem:[%s8201_s24 + $0x1248] sm:$0xff]  ;;  %v983_v46 = vld [vmem:[%s8201_s24 + $0x1258] sm:$0xff]  ;;  %v2808_v3 = vcombine.high %v9491_v19, %v9491_v19 }
 0x262   : > { %v2005_v63 = vld [vmem:[%s8201_s24 + $0x3248] sm:$0xff]  ;;  %v6307_v16 = vpack.c.bf16 %v983_v46, %v981_v22  ;;  %v996_v46 = vld [vmem:[%s8201_s24 + $0x12c0] sm:$0xff] }
 0x263   : > { %6274 = vmatpush1.bf16.msra.mxu1 %v6273_v24  ;;  %v7315_v24 = vpack.c.bf16 %v1991_v7, %v1989_v6  ;;  %v980_v6 = vld [vmem:[%s8201_s24 + $0x1240] sm:$0xff]  ;;  %v982_v7 = vld [vmem:[%s8201_s24 + $0x1250] sm:$0xff]  ;;  %v985_v19 = vld [vmem:[%s8201_s24 + $0x1268] sm:$0xff] }
 0x264   : > { %7298 = vmatpush1.bf16.msra.mxu0 %v7297_v11  ;;  %6276 = vmatprep.subr.bf16.mxu1 %v6275_v12  ;;  %v1990_v11 = vld [vmem:[%s8201_s24 + $0x31d0] sm:$0xff]  ;;  %v969_v12 = vld [vmem:[%s8201_s24 + $0x11e8] sm:$0xff] }
 0x265   : > { %7300 = vmatprep.subr.bf16.mxu0 %v7299_v43  ;;  %v6293_v43 = vpack.c.bf16 %v966_v31, %v964_v39  ;;  %v7317_v49 = vpack.c.bf16 %v1990_v11, %v1988_v10  ;;  %v6295_v41 = vpack.c.bf16 %v971_v42, %v969_v12  ;;  %v987_v39 = vld [vmem:[%s8201_s24 + $0x1278] sm:$0xff]  ;;  %v2009_v31 = vld [vmem:[%s8201_s24 + $0x3268] sm:$0xff]  ;;  %v984_v42 = vld [vmem:[%s8201_s24 + $0x1260] sm:$0xff] }
 0x266   : > { %v2011_v10 = vld [vmem:[%s8201_s24 + $0x3278] sm:$0xff]  ;;  %v6311_v12 = vpack.c.bf16 %v987_v39, %v985_v19  ;;  %v1002_v19 = vld [vmem:[%s8201_s24 + $0x12f0] sm:$0xff]  ;;  %v2024_v39 = vld [vmem:[%s8201_s24 + $0x32e0] sm:$0xff] }
 0x267   : > { %6278 = vmatpush1.bf16.msra.mxu1 %v6277_v23  ;;  %v7319_v23 = vpack.c.bf16 %v1995_v14, %v1993_v13  ;;  %v986_v13 = vld [vmem:[%s8201_s24 + $0x1270] sm:$0xff]  ;;  %v2008_v14 = vld [vmem:[%s8201_s24 + $0x3260] sm:$0xff] }
 0x268   : > { %7302 = vmatpush1.bf16.msra.mxu0 %v7301_v27  ;;  %6280 = vmatprep.subr.bf16.mxu1 %v6279_v8  ;;  %v1994_v27 = vld [vmem:[%s8201_s24 + $0x31f0] sm:$0xff]  ;;  %v973_v8 = vld [vmem:[%s8201_s24 + $0x1208] sm:$0xff] }
 0x269   : > { %7304 = vmatprep.subr.bf16.mxu0 %v7303_v38  ;;  %v6297_v38 = vpack.c.bf16 %v970_v50, %v968_v32  ;;  %v7321_v40 = vpack.c.bf16 %v1994_v27, %v1992_v18  ;;  %v6299_v44 = vpack.c.bf16 %v975_v29, %v973_v8  ;;  %v991_v32 = vld [vmem:[%s8201_s24 + $0x1298] sm:$0xff]  ;;  %v2013_v50 = vld [vmem:[%s8201_s24 + $0x3288] sm:$0xff]  ;;  %v988_v29 = vld [vmem:[%s8201_s24 + $0x1280] sm:$0xff] }
 0x26a   : > { %v2015_v18 = vld [vmem:[%s8201_s24 + $0x3298] sm:$0xff] }
 0x26b   : > { %6282 = vmatpush1.bf16.msra.mxu1 %v6281_v53  ;;  %v7323_v53 = vpack.c.bf16 %v1999_v37, %v1997_v35  ;;  %v990_v35 = vld [vmem:[%s8201_s24 + $0x1290] sm:$0xff]  ;;  %v2012_v37 = vld [vmem:[%s8201_s24 + $0x3280] sm:$0xff] }
 0x26c   : > { %7306 = vmatpush1.bf16.msra.mxu0 %v7305_v5  ;;  %6284 = vmatprep.subr.bf16.mxu1 %v6283_v55  ;;  %v1998_v5 = vld [vmem:[%s8201_s24 + $0x3210] sm:$0xff]  ;;  %v977_v55 = vld [vmem:[%s8201_s24 + $0x1228] sm:$0xff] }
 0x26d   : > { %7308 = vmatprep.subr.bf16.mxu0 %v7307_v58  ;;  %v2003_v58 = vld [vmem:[%s8201_s24 + $0x3238] sm:$0xff]  ;;  %v7325_v60 = vpack.c.bf16 %v1998_v5, %v1996_v52  ;;  %v6303_v62 = vpack.c.bf16 %v979_v25, %v977_v55  ;;  %v992_v25 = vld [vmem:[%s8201_s24 + $0x12a0] sm:$0xff] }
 0x26e   : > { %v2019_v52 = vld [vmem:[%s8201_s24 + $0x32b8] sm:$0xff] }
 0x26f   : > { %6286 = vmatpush1.bf16.msra.mxu1 %v6285_v0  ;;  %v978_v0 = vld [vmem:[%s8201_s24 + $0x1230] sm:$0xff] }
 0x270   : > { %7310 = vmatpush1.bf16.msra.mxu0 %v7309_v28  ;;  %6288 = vmatprep.subr.bf16.mxu1 %v6287_v2  ;;  %v7327_v28 = vpack.c.bf16 %v2003_v58, %v2001_v57  ;;  %v2002_v2 = vld [vmem:[%s8201_s24 + $0x3230] sm:$0xff]  ;;  %v6305_v26 = vpack.c.bf16 %v978_v0, %v976_v61  ;;  %v2016_v58 = vld [vmem:[%s8201_s24 + $0x32a0] sm:$0xff]  ;;  %v999_v61 = vld [vmem:[%s8201_s24 + $0x12d8] sm:$0xff] }
 0x271   : > { %7312 = vmatprep.subr.bf16.mxu0 %v7311_v30  ;;  %v2007_v30 = vld [vmem:[%s8201_s24 + $0x3258] sm:$0xff]  ;;  %v7329_v33 = vpack.c.bf16 %v2002_v2, %v2000_v51  ;;  %v994_v57 = vld [vmem:[%s8201_s24 + $0x12b0] sm:$0xff]  ;;  %v2021_v0 = vld [vmem:[%s8201_s24 + $0x32c8] sm:$0xff] }
 0x272   : > { %v2023_v51 = vld [vmem:[%s8201_s24 + $0x32d8] sm:$0xff] }
 0x273   : > { %6290 = vmatpush1.bf16.msra.mxu1 %v6289_v21  ;;  %v2004_v21 = vld [vmem:[%s8201_s24 + $0x3240] sm:$0xff] }
 0x274   : > { %7314 = vmatpush1.bf16.msra.mxu0 %v7313_v9  ;;  %6292 = vmatprep.subr.bf16.mxu1 %v6291_v34  ;;  %v7331_v9 = vpack.c.bf16 %v2007_v30, %v2005_v63  ;;  %v2006_v34 = vld [vmem:[%s8201_s24 + $0x3250] sm:$0xff]  ;;  %v2020_v63 = vld [vmem:[%s8201_s24 + $0x32c0] sm:$0xff]  ;;  %v7347_v30 = vpack.c.bf16 %v2023_v51, %v2021_v0 }
 0x275   : > { %7316 = vmatprep.subr.bf16.mxu0 %v7315_v24  ;;  %v6309_v24 = vpack.c.bf16 %v982_v7, %v980_v6  ;;  %v7333_v11 = vpack.c.bf16 %v2006_v34, %v2004_v21  ;;  %v2027_v6 = vld [vmem:[%s8201_s24 + $0x32f8] sm:$0xff]  ;;  %v1000_v34 = vld [vmem:[%s8201_s24 + $0x12e0] sm:$0xff]  ;;  %v2038_v51 = vld [vmem:[%s8201_s24 + $0x3350] sm:$0xff] }
 0x277   : > { %6294 = vmatpush1.bf16.msra.mxu1 %v6293_v43  ;;  %v7335_v43 = vpack.c.bf16 %v2011_v10, %v2009_v31  ;;  %v2026_v10 = vld [vmem:[%s8201_s24 + $0x32f0] sm:$0xff] }
 0x278   : > { %7318 = vmatpush1.bf16.msra.mxu0 %v7317_v49  ;;  %6296 = vmatprep.subr.bf16.mxu1 %v6295_v41  ;;  %v2010_v49 = vld [vmem:[%s8201_s24 + $0x3270] sm:$0xff]  ;;  %v989_v41 = vld [vmem:[%s8201_s24 + $0x1288] sm:$0xff] }
 0x279   : > { %7320 = vmatprep.subr.bf16.mxu0 %v7319_v23  ;;  %v6313_v23 = vpack.c.bf16 %v986_v13, %v984_v42  ;;  %v7337_v27 = vpack.c.bf16 %v2010_v49, %v2008_v14  ;;  %v6315_v8 = vpack.c.bf16 %v991_v32, %v989_v41  ;;  %v2031_v42 = vld [vmem:[%s8201_s24 + $0x3318] sm:$0xff]  ;;  %v6329_v13 = vpack.c.bf16 %v1002_v19, %v1000_v34  ;;  %v1004_v49 = vld [vmem:[%s8201_s24 + $0x1300] sm:$0xff]  ;;  %v1006_v41 = vld [vmem:[%s8201_s24 + $0x1310] sm:$0xff] }
 0x27a   : > { %v7353_v14 = vpack.c.bf16 %v2026_v10, %v2024_v39  ;;  %v2028_v32 = vld [vmem:[%s8201_s24 + $0x3300] sm:$0xff]  ;;  %v2047_v34 = vld [vmem:[%s8201_s24 + $0x3398] sm:$0xff] }
 0x27b   : > { %6298 = vmatpush1.bf16.msra.mxu1 %v6297_v38  ;;  %v7339_v38 = vpack.c.bf16 %v2015_v18, %v2013_v50  ;;  %v2030_v18 = vld [vmem:[%s8201_s24 + $0x3310] sm:$0xff]  ;;  %v1020_v10 = vld [vmem:[%s8201_s24 + $0x1380] sm:$0xff] }
 0x27c   : > { %7322 = vmatpush1.bf16.msra.mxu0 %v7321_v40  ;;  %6300 = vmatprep.subr.bf16.mxu1 %v6299_v44  ;;  %v2014_v40 = vld [vmem:[%s8201_s24 + $0x3290] sm:$0xff]  ;;  %v993_v44 = vld [vmem:[%s8201_s24 + $0x12a8] sm:$0xff] }
 0x27d   : > { %7324 = vmatprep.subr.bf16.mxu0 %v7323_v53  ;;  %v6317_v53 = vpack.c.bf16 %v990_v35, %v988_v29  ;;  %v7341_v5 = vpack.c.bf16 %v2014_v40, %v2012_v37  ;;  %v6319_v55 = vpack.c.bf16 %v995_v45, %v993_v44  ;;  %v2035_v29 = vld [vmem:[%s8201_s24 + $0x3338] sm:$0xff]  ;;  %v6333_v35 = vpack.c.bf16 %v1006_v41, %v1004_v49  ;;  %v1008_v40 = vld [vmem:[%s8201_s24 + $0x1320] sm:$0xff]  ;;  %v1010_v44 = vld [vmem:[%s8201_s24 + $0x1330] sm:$0xff] }
 0x27e   : > { %3557 = vmatmul.mubr.f32.vlgmr.msra.gmra.mrb[0].mxu1 %v9615_v56  ;;  %v7357_v37 = vpack.c.bf16 %v2030_v18, %v2028_v32  ;;  %v2032_v45 = vld [vmem:[%s8201_s24 + $0x3320] sm:$0xff]  ;;  %v2051_v49 = vld [vmem:[%s8201_s24 + $0x33b8] sm:$0xff] }
 0x27f   : > { %6302 = vmatpush1.bf16.msra.mxu1 %v6301_v59  ;;  %4693 = vmatmul.mubr.f32.vlgmr.msra.gmra.mrb[0].mxu0 %v9621_v4  ;;  %v7343_v59 = vpack.c.bf16 %v2019_v52, %v2017_v48  ;;  %v2034_v52 = vld [vmem:[%s8201_s24 + $0x3330] sm:$0xff]  ;;  %v1024_v18 = vld [vmem:[%s8201_s24 + $0x13a0] sm:$0xff] }
 0x280   : > { %7326 = vmatpush1.bf16.msra.mxu0 %v7325_v60  ;;  %6304 = vmatprep.subr.bf16.mxu1 %v6303_v62  ;;  %v2018_v60 = vld [vmem:[%s8201_s24 + $0x32b0] sm:$0xff]  ;;  %v997_v62 = vld [vmem:[%s8201_s24 + $0x12c8] sm:$0xff] }
 0x281   : > { %7328 = vmatprep.subr.bf16.mxu0 %v7327_v28  ;;  %3627 = vmatprep.mubr.f32.mxu1 %v2608_v1  ;;  %v6321_v28 = vpack.c.bf16 %v994_v57, %v992_v25  ;;  %v7345_v2 = vpack.c.bf16 %v2018_v60, %v2016_v58  ;;  %v6323_v22 = vpack.c.bf16 %v999_v61, %v997_v62  ;;  %v998_v1 = vld [vmem:[%s8201_s24 + $0x12d0] sm:$0xff]  ;;  %v2039_v25 = vld [vmem:[%s8201_s24 + $0x3358] sm:$0xff]  ;;  %v1012_v60 = vld [vmem:[%s8201_s24 + $0x1340] sm:$0xff] }
 0x282   : > { %4763 = vmatprep.mubr.f32.mxu0 %v2808_v3  ;;  %v2022_v3 = vld [vmem:[%s8201_s24 + $0x32d0] sm:$0xff]  ;;  %v6325_v7 = vpack.c.bf16 %v998_v1, %v996_v46  ;;  %v6337_v57 = vpack.c.bf16 %v1010_v44, %v1008_v40  ;;  %v7361_v58 = vpack.c.bf16 %v2034_v52, %v2032_v45  ;;  %v2036_v61 = vld [vmem:[%s8201_s24 + $0x3340] sm:$0xff]  ;;  %v2043_v46 = vld [vmem:[%s8201_s24 + $0x3378] sm:$0xff] }
 0x283   : > { %6306 = vmatpush1.bf16.msra.mxu1 %v6305_v26  ;;  %v1001_v26 = vld [vmem:[%s8201_s24 + $0x12e8] sm:$0xff]  ;;  %v7349_v21 = vpack.c.bf16 %v2022_v3, %v2020_v63  ;;  %v1014_v62 = vld [vmem:[%s8201_s24 + $0x1350] sm:$0xff]  ;;  %v7365_v63 = vpack.c.bf16 %v2038_v51, %v2036_v61  ;;  %v1016_v3 = vld [vmem:[%s8201_s24 + $0x1360] sm:$0xff]  ;;  %v2761_v61 = vcombine.high %v9433_v20, %v9435_v47 }
 0x284   : > { %7330 = vmatpush1.bf16.msra.mxu0 %v7329_v33  ;;  %6308 = vmatprep.subr.bf16.mxu1 %v6307_v16  ;;  %v1003_v33 = vld [vmem:[%s8201_s24 + $0x12f8] sm:$0xff]  ;;  %v2025_v16 = vld [vmem:[%s8201_s24 + $0x32e8] sm:$0xff]  ;;  %v6341_v1 = vpack.c.bf16 %v1014_v62, %v1012_v60  ;;  %v1028_v52 = vld [vmem:[%s8201_s24 + $0x13c0] sm:$0xff] }
 0x285   : > { %7332 = vmatprep.subr.bf16.mxu0 %v7331_v9  ;;  %v6327_v9 = vpack.c.bf16 %v1003_v33, %v1001_v26  ;;  %v7351_v31 = vpack.c.bf16 %v2027_v6, %v2025_v16  ;;  %v1018_v26 = vld [vmem:[%s8201_s24 + $0x1370] sm:$0xff]  ;;  %v2040_v33 = vld [vmem:[%s8201_s24 + $0x3360] sm:$0xff]  ;;  %v2055_v40 = vld [vmem:[%s8201_s24 + $0x33d8] sm:$0xff] }
 0x286   : > { %v2042_v6 = vld [vmem:[%s8201_s24 + $0x3370] sm:$0xff]  ;;  %v6345_v19 = vpack.c.bf16 %v1018_v26, %v1016_v3  ;;  %v2057_v60 = vld [vmem:[%s8201_s24 + $0x33e8] sm:$0xff]  ;;  %v2059_v62 = vld [vmem:[%s8201_s24 + $0x33f8] sm:$0xff]  ;;  %v9757_v3 = vrot.slane %v2761_v61, %v8330_v36 }
 0x287   : > { %6310 = vmatpush1.bf16.msra.mxu1 %v6309_v24  ;;  %v1005_v24 = vld [vmem:[%s8201_s24 + $0x1308] sm:$0xff]  ;;  %v7369_v39 = vpack.c.bf16 %v2042_v6, %v2040_v33  ;;  %v1036_v6 = vld [vmem:[%s8201_s24 + $0x1400] sm:$0xff] }
 0x288   : > { %7334 = vmatpush1.bf16.msra.mxu0 %v7333_v11  ;;  %6312 = vmatprep.subr.bf16.mxu1 %v6311_v12  ;;  %v1007_v11 = vld [vmem:[%s8201_s24 + $0x1318] sm:$0xff]  ;;  %v2029_v12 = vld [vmem:[%s8201_s24 + $0x3308] sm:$0xff]  ;;  %v2072_v61 = vld [vmem:[%s8201_s24 + $0x3460] sm:$0xff] }
 0x289   : > { %7336 = vmatprep.subr.bf16.mxu0 %v7335_v43  ;;  %v6331_v43 = vpack.c.bf16 %v1007_v11, %v1005_v24  ;;  %v7355_v50 = vpack.c.bf16 %v2031_v42, %v2029_v12  ;;  %v1022_v24 = vld [vmem:[%s8201_s24 + $0x1390] sm:$0xff]  ;;  %v2044_v11 = vld [vmem:[%s8201_s24 + $0x3380] sm:$0xff]  ;;  %v2061_v47 = vld [vmem:[%s8201_s24 + $0x3408] sm:$0xff] }
 0x28a   : > { %v2046_v42 = vld [vmem:[%s8201_s24 + $0x3390] sm:$0xff]  ;;  %v6349_v41 = vpack.c.bf16 %v1022_v24, %v1020_v10  ;;  %v2606_v10 = vcombine.high %v9615_v56, %v9615_v56  ;;  %v2065_v24 = vld [vmem:[%s8201_s24 + $0x3428] sm:$0xff]  ;;  %v1040_v56 = vld [vmem:[%s8201_s24 + $0x1420] sm:$0xff] }
 0x28b   : > { %6314 = vmatpush1.bf16.msra.mxu1 %v6313_v23  ;;  %v1009_v23 = vld [vmem:[%s8201_s24 + $0x1328] sm:$0xff]  ;;  %v7373_v32 = vpack.c.bf16 %v2046_v42, %v2044_v11  ;;  %v2067_v11 = vld [vmem:[%s8201_s24 + $0x3438] sm:$0xff] }
 0x28c   : > { %7338 = vmatpush1.bf16.msra.mxu0 %v7337_v27  ;;  %6316 = vmatprep.subr.bf16.mxu1 %v6315_v8  ;;  %v1011_v27 = vld [vmem:[%s8201_s24 + $0x1338] sm:$0xff]  ;;  %v2033_v8 = vld [vmem:[%s8201_s24 + $0x3328] sm:$0xff] }
 0x28d   : > { %7340 = vmatprep.subr.bf16.mxu0 %v7339_v38  ;;  %v6335_v38 = vpack.c.bf16 %v1011_v27, %v1009_v23  ;;  %v7359_v48 = vpack.c.bf16 %v2035_v29, %v2033_v8  ;;  %v1026_v23 = vld [vmem:[%s8201_s24 + $0x13b0] sm:$0xff]  ;;  %v2048_v27 = vld [vmem:[%s8201_s24 + $0x33a0] sm:$0xff] }
 0x28e   : > { %v2050_v29 = vld [vmem:[%s8201_s24 + $0x33b0] sm:$0xff]  ;;  %v6353_v44 = vpack.c.bf16 %v1026_v23, %v1024_v18  ;;  %v1045_v18 = vld [vmem:[%s8201_s24 + $0x1448] sm:$0xff]  ;;  %v1047_v23 = vld [vmem:[%s8201_s24 + $0x1458] sm:$0xff] }
 0x28f   : > { %6318 = vmatpush1.bf16.msra.mxu1 %v6317_v53  ;;  %v1013_v53 = vld [vmem:[%s8201_s24 + $0x1348] sm:$0xff]  ;;  %v7377_v45 = vpack.c.bf16 %v2050_v29, %v2048_v27 }
 0x290   : > { %7342 = vmatpush1.bf16.msra.mxu0 %v7341_v5  ;;  %6320 = vmatprep.subr.bf16.mxu1 %v6319_v55  ;;  %v1015_v5 = vld [vmem:[%s8201_s24 + $0x1358] sm:$0xff]  ;;  %v2037_v55 = vld [vmem:[%s8201_s24 + $0x3348] sm:$0xff] }
 0x291   : > { %7344 = vmatprep.subr.bf16.mxu0 %v7343_v59  ;;  %v6339_v59 = vpack.c.bf16 %v1015_v5, %v1013_v53  ;;  %v7363_v0 = vpack.c.bf16 %v2039_v25, %v2037_v55  ;;  %v1030_v53 = vld [vmem:[%s8201_s24 + $0x13d0] sm:$0xff]  ;;  %v2052_v5 = vld [vmem:[%s8201_s24 + $0x33c0] sm:$0xff] }
 0x292   : > { %v2054_v25 = vld [vmem:[%s8201_s24 + $0x33d0] sm:$0xff] }
 0x293   : > { %6322 = vmatpush1.bf16.msra.mxu1 %v6321_v28  ;;  %v1017_v28 = vld [vmem:[%s8201_s24 + $0x1368] sm:$0xff]  ;;  %v7381_v51 = vpack.c.bf16 %v2054_v25, %v2052_v5  ;;  %v1051_v5 = vld [vmem:[%s8201_s24 + $0x1478] sm:$0xff] }
 0x294   : > { %7346 = vmatpush1.bf16.msra.mxu0 %v7345_v2  ;;  %6324 = vmatprep.subr.bf16.mxu1 %v6323_v22  ;;  %v1019_v2 = vld [vmem:[%s8201_s24 + $0x1378] sm:$0xff]  ;;  %v2041_v22 = vld [vmem:[%s8201_s24 + $0x3368] sm:$0xff] }
 0x295   : > { %7348 = vmatprep.subr.bf16.mxu0 %v7347_v30  ;;  %v6343_v30 = vpack.c.bf16 %v1019_v2, %v1017_v28  ;;  %v7367_v16 = vpack.c.bf16 %v2043_v46, %v2041_v22  ;;  %v1032_v2 = vld [vmem:[%s8201_s24 + $0x13e0] sm:$0xff]  ;;  %v1034_v22 = vld [vmem:[%s8201_s24 + $0x13f0] sm:$0xff]  ;;  %v2075_v25 = vld [vmem:[%s8201_s24 + $0x3478] sm:$0xff] }
 0x296   : > { %v2056_v46 = vld [vmem:[%s8201_s24 + $0x33e0] sm:$0xff]  ;;  %v6361_v26 = vpack.c.bf16 %v1034_v22, %v1032_v2  ;;  %v1055_v2 = vld [vmem:[%s8201_s24 + $0x1498] sm:$0xff]  ;;  %v2077_v22 = vld [vmem:[%s8201_s24 + $0x3488] sm:$0xff] }
 0x297   : > { %6326 = vmatpush1.bf16.msra.mxu1 %v6325_v7  ;;  %v1021_v7 = vld [vmem:[%s8201_s24 + $0x1388] sm:$0xff] }
 0x298   : > { %7350 = vmatpush1.bf16.msra.mxu0 %v7349_v21  ;;  %6328 = vmatprep.subr.bf16.mxu1 %v6327_v9  ;;  %v1023_v21 = vld [vmem:[%s8201_s24 + $0x1398] sm:$0xff]  ;;  %v2045_v9 = vld [vmem:[%s8201_s24 + $0x3388] sm:$0xff] }
 0x299   : > { %7352 = vmatprep.subr.bf16.mxu0 %v7351_v31  ;;  %v6347_v31 = vpack.c.bf16 %v1023_v21, %v1021_v7  ;;  %v7371_v12 = vpack.c.bf16 %v2047_v34, %v2045_v9  ;;  %v1038_v7 = vld [vmem:[%s8201_s24 + $0x1410] sm:$0xff]  ;;  %v2060_v21 = vld [vmem:[%s8201_s24 + $0x3400] sm:$0xff] }
 0x29a   : > { %v2062_v34 = vld [vmem:[%s8201_s24 + $0x3410] sm:$0xff]  ;;  %v6365_v42 = vpack.c.bf16 %v1038_v7, %v1036_v6  ;;  %v1059_v6 = vld [vmem:[%s8201_s24 + $0x14b8] sm:$0xff]  ;;  %v2081_v7 = vld [vmem:[%s8201_s24 + $0x34a8] sm:$0xff] }
 0x29b   : > { %6330 = vmatpush1.bf16.msra.mxu1 %v6329_v13  ;;  %v1025_v13 = vld [vmem:[%s8201_s24 + $0x13a8] sm:$0xff] }
 0x29c   : > { %7354 = vmatpush1.bf16.msra.mxu0 %v7353_v14  ;;  %6332 = vmatprep.subr.bf16.mxu1 %v6331_v43  ;;  %v1027_v14 = vld [vmem:[%s8201_s24 + $0x13b8] sm:$0xff]  ;;  %v2049_v43 = vld [vmem:[%s8201_s24 + $0x33a8] sm:$0xff] }
 0x29d   : > { %7356 = vmatprep.subr.bf16.mxu0 %v7355_v50  ;;  %v6351_v50 = vpack.c.bf16 %v1027_v14, %v1025_v13  ;;  %v7375_v8 = vpack.c.bf16 %v2051_v49, %v2049_v43  ;;  %v2806_v13 = vcombine.high %v9621_v4, %v9621_v4  ;;  %v7389_v14 = vpack.c.bf16 %v2062_v34, %v2060_v21  ;;  %v1042_v49 = vld [vmem:[%s8201_s24 + $0x1430] sm:$0xff]  ;;  %v2069_v4 = vld [vmem:[%s8201_s24 + $0x3448] sm:$0xff]  ;;  %v2083_v21 = vld [vmem:[%s8201_s24 + $0x34b8] sm:$0xff] }
 0x29f   : > { %6334 = vmatpush1.bf16.msra.mxu1 %v6333_v35  ;;  %v1029_v35 = vld [vmem:[%s8201_s24 + $0x13c8] sm:$0xff] }
 0x2a0   : > { %7358 = vmatpush1.bf16.msra.mxu0 %v7357_v37  ;;  %6336 = vmatprep.subr.bf16.mxu1 %v6335_v38  ;;  %v1031_v37 = vld [vmem:[%s8201_s24 + $0x13d8] sm:$0xff]  ;;  %v2053_v38 = vld [vmem:[%s8201_s24 + $0x33c8] sm:$0xff] }
 0x2a1   : > { %7360 = vmatprep.subr.bf16.mxu0 %v7359_v48  ;;  %v6355_v48 = vpack.c.bf16 %v1031_v37, %v1029_v35  ;;  %v7379_v55 = vpack.c.bf16 %v2055_v40, %v2053_v38  ;;  %v6369_v35 = vpack.c.bf16 %v1042_v49, %v1040_v56  ;;  %v6371_v38 = vpack.c.bf16 %v1047_v23, %v1045_v18  ;;  %v1044_v40 = vld [vmem:[%s8201_s24 + $0x1440] sm:$0xff]  ;;  %v2086_v23 = vld [vmem:[%s8201_s24 + $0x34d0] sm:$0xff] }
 0x2a3   : > { %6338 = vmatpush1.bf16.msra.mxu1 %v6337_v57  ;;  %v1033_v57 = vld [vmem:[%s8201_s24 + $0x13e8] sm:$0xff] }
 0x2a4   : > { %7362 = vmatpush1.bf16.msra.mxu0 %v7361_v58  ;;  %6340 = vmatprep.subr.bf16.mxu1 %v6339_v59  ;;  %v1035_v58 = vld [vmem:[%s8201_s24 + $0x13f8] sm:$0xff]  ;;  %v2561_v59 = vcombine.high %v9427_v17, %v9429_v54  ;;  %v7383_v17 = vpack.c.bf16 %v2059_v62, %v2057_v60  ;;  %v2058_v54 = vld [vmem:[%s8201_s24 + $0x33f0] sm:$0xff]  ;;  %v1048_v60 = vld [vmem:[%s8201_s24 + $0x1460] sm:$0xff] }
 0x2a5   : > { %7364 = vmatprep.subr.bf16.mxu0 %v7363_v0  ;;  %v6357_v0 = vpack.c.bf16 %v1030_v53, %v1028_v52  ;;  %v6359_v28 = vpack.c.bf16 %v1035_v58, %v1033_v57  ;;  %v7385_v33 = vpack.c.bf16 %v2058_v54, %v2056_v46  ;;  %v2070_v52 = vld [vmem:[%s8201_s24 + $0x3450] sm:$0xff]  ;;  %v1049_v53 = vld [vmem:[%s8201_s24 + $0x1468] sm:$0xff]  ;;  %v2079_v46 = vld [vmem:[%s8201_s24 + $0x3498] sm:$0xff] }
 0x2a6   : > { %v9752_v20 = vrot.slane %v2561_v59, %v8330_v36  ;;  %v6375_v59 = vpack.c.bf16 %v1051_v5, %v1049_v53  ;;  %v1050_v62 = vld [vmem:[%s8201_s24 + $0x1470] sm:$0xff] }
 0x2a7   : > { %6342 = vmatpush1.bf16.msra.mxu1 %v6341_v1  ;;  %v1037_v1 = vld [vmem:[%s8201_s24 + $0x1408] sm:$0xff]  ;;  %v2090_v5 = vld [vmem:[%s8201_s24 + $0x34f0] sm:$0xff] }
 0x2a8   : > { %7366 = vmatpush1.bf16.msra.mxu0 %v7365_v63  ;;  %6344 = vmatprep.subr.bf16.mxu1 %v6343_v30  ;;  %v1039_v63 = vld [vmem:[%s8201_s24 + $0x1418] sm:$0xff] }
 0x2a9   : > { %7368 = vmatprep.subr.bf16.mxu0 %v7367_v16  ;;  %v2063_v30 = vld [vmem:[%s8201_s24 + $0x3418] sm:$0xff]  ;;  %v6363_v16 = vpack.c.bf16 %v1039_v63, %v1037_v1  ;;  %v1052_v63 = vld [vmem:[%s8201_s24 + $0x1480] sm:$0xff] }
 0x2aa   : > { %v7387_v9 = vpack.c.bf16 %v2063_v30, %v2061_v47  ;;  %v1054_v47 = vld [vmem:[%s8201_s24 + $0x1490] sm:$0xff]  ;;  %v2076_v30 = vld [vmem:[%s8201_s24 + $0x3480] sm:$0xff] }
 0x2ab   : > { %6346 = vmatpush1.bf16.msra.mxu1 %v6345_v19  ;;  %v1041_v19 = vld [vmem:[%s8201_s24 + $0x1428] sm:$0xff] }
 0x2ac   : > { %7370 = vmatpush1.bf16.msra.mxu0 %v7369_v39  ;;  %6348 = vmatprep.subr.bf16.mxu1 %v6347_v31  ;;  %v1043_v39 = vld [vmem:[%s8201_s24 + $0x1438] sm:$0xff]  ;;  %v2577_v31 = vcombine.high %v9752_v20, %v9752_v20 }
 0x2ad   : > { %7372 = vmatprep.subr.bf16.mxu0 %v7371_v12  ;;  %v2777_v12 = vcombine.high %v9757_v3, %v9757_v3  ;;  %v6367_v43 = vpack.c.bf16 %v1043_v39, %v1041_v19  ;;  %v1056_v39 = vld [vmem:[%s8201_s24 + $0x14a0] sm:$0xff] }
 0x2ae   : > { %v9782_v27 = vrot.slane %v2577_v31, %v8330_v36  ;;  %v1058_v31 = vld [vmem:[%s8201_s24 + $0x14b0] sm:$0xff] }
 0x2af   : > { %6350 = vmatpush1.bf16.msra.mxu1 %v6349_v41  ;;  %v2064_v41 = vld [vmem:[%s8201_s24 + $0x3420] sm:$0xff]  ;;  %v9787_v29 = vrot.slane %v2777_v12, %v8330_v36  ;;  %v1061_v12 = vld [vmem:[%s8201_s24 + $0x14c8] sm:$0xff] }
 0x2b0   : > { %7374 = vmatpush1.bf16.msra.mxu0 %v7373_v32  ;;  %6352 = vmatprep.subr.bf16.mxu1 %v6351_v50  ;;  %v7391_v32 = vpack.c.bf16 %v2067_v11, %v2065_v24  ;;  %v2066_v50 = vld [vmem:[%s8201_s24 + $0x3430] sm:$0xff]  ;;  %v7407_v24 = vpack.c.bf16 %v2083_v21, %v2081_v7  ;;  %v1077_v7 = vld [vmem:[%s8201_s24 + $0x1548] sm:$0xff]  ;;  %v1079_v21 = vld [vmem:[%s8201_s24 + $0x1558] sm:$0xff] }
 0x2b1   : > { %7376 = vmatprep.subr.bf16.mxu0 %v7375_v8  ;;  %v2071_v8 = vld [vmem:[%s8201_s24 + $0x3458] sm:$0xff]  ;;  %v7393_v37 = vpack.c.bf16 %v2066_v50, %v2064_v41  ;;  %v2082_v11 = vld [vmem:[%s8201_s24 + $0x34b0] sm:$0xff]  ;;  %v1060_v41 = vld [vmem:[%s8201_s24 + $0x14c0] sm:$0xff] }
 0x2b2   : > { %v2084_v50 = vld [vmem:[%s8201_s24 + $0x34c0] sm:$0xff] }
 0x2b3   : > { %6354 = vmatpush1.bf16.msra.mxu1 %v6353_v44  ;;  %v1046_v44 = vld [vmem:[%s8201_s24 + $0x1450] sm:$0xff] }
 0x2b4   : > { %7378 = vmatpush1.bf16.msra.mxu0 %v7377_v45  ;;  %6356 = vmatprep.subr.bf16.mxu1 %v6355_v48  ;;  %v2068_v45 = vld [vmem:[%s8201_s24 + $0x3440] sm:$0xff]  ;;  %v7395_v48 = vpack.c.bf16 %v2071_v8, %v2069_v4  ;;  %v6373_v57 = vpack.c.bf16 %v1046_v44, %v1044_v40  ;;  %v1065_v4 = vld [vmem:[%s8201_s24 + $0x14e8] sm:$0xff]  ;;  %v1067_v8 = vld [vmem:[%s8201_s24 + $0x14f8] sm:$0xff]  ;;  %v7413_v40 = vpack.c.bf16 %v2086_v23, %v2084_v50 }
 0x2b5   : > { %7380 = vmatprep.subr.bf16.mxu0 %v7379_v55  ;;  %v2073_v55 = vld [vmem:[%s8201_s24 + $0x3468] sm:$0xff]  ;;  %v7397_v58 = vpack.c.bf16 %v2070_v52, %v2068_v45  ;;  %v6391_v44 = vpack.c.bf16 %v1067_v8, %v1065_v4  ;;  %v1064_v45 = vld [vmem:[%s8201_s24 + $0x14e0] sm:$0xff]  ;;  %v2106_v8 = vld [vmem:[%s8201_s24 + $0x3570] sm:$0xff] }
 0x2b6   : > { %v2088_v52 = vld [vmem:[%s8201_s24 + $0x34e0] sm:$0xff] }
 0x2b7   : > { %6358 = vmatpush1.bf16.msra.mxu1 %v6357_v0  ;;  %v7399_v0 = vpack.c.bf16 %v2075_v25, %v2073_v55  ;;  %v1069_v55 = vld [vmem:[%s8201_s24 + $0x1508] sm:$0xff]  ;;  %v1071_v25 = vld [vmem:[%s8201_s24 + $0x1518] sm:$0xff]  ;;  %v1080_v50 = vld [vmem:[%s8201_s24 + $0x1560] sm:$0xff] }
 0x2b8   : > { %7382 = vmatpush1.bf16.msra.mxu0 %v7381_v51  ;;  %6360 = vmatprep.subr.bf16.mxu1 %v6359_v28  ;;  %v2074_v51 = vld [vmem:[%s8201_s24 + $0x3470] sm:$0xff]  ;;  %v1053_v28 = vld [vmem:[%s8201_s24 + $0x1488] sm:$0xff]  ;;  %v2104_v23 = vld [vmem:[%s8201_s24 + $0x3560] sm:$0xff] }
 0x2b9   : > { %7384 = vmatprep.subr.bf16.mxu0 %v7383_v17  ;;  %v6377_v17 = vpack.c.bf16 %v1050_v62, %v1048_v60  ;;  %v7401_v54 = vpack.c.bf16 %v2074_v51, %v2072_v61  ;;  %v6379_v1 = vpack.c.bf16 %v1055_v2, %v1053_v28  ;;  %v7417_v60 = vpack.c.bf16 %v2090_v5, %v2088_v52  ;;  %v1068_v61 = vld [vmem:[%s8201_s24 + $0x1500] sm:$0xff]  ;;  %v2094_v2 = vld [vmem:[%s8201_s24 + $0x3510] sm:$0xff] }
 0x2ba   : > { %v6395_v62 = vpack.c.bf16 %v1071_v25, %v1069_v55  ;;  %v2092_v51 = vld [vmem:[%s8201_s24 + $0x3500] sm:$0xff]  ;;  %v2110_v25 = vld [vmem:[%s8201_s24 + $0x3590] sm:$0xff] }
 0x2bb   : > { %6362 = vmatpush1.bf16.msra.mxu1 %v6361_v26  ;;  %v7403_v26 = vpack.c.bf16 %v2079_v46, %v2077_v22  ;;  %v1073_v22 = vld [vmem:[%s8201_s24 + $0x1528] sm:$0xff]  ;;  %v1075_v46 = vld [vmem:[%s8201_s24 + $0x1538] sm:$0xff]  ;;  %v1084_v52 = vld [vmem:[%s8201_s24 + $0x1580] sm:$0xff] }
 0x2bc   : > { %7386 = vmatpush1.bf16.msra.mxu0 %v7385_v33  ;;  %6364 = vmatprep.subr.bf16.mxu1 %v6363_v16  ;;  %v2078_v33 = vld [vmem:[%s8201_s24 + $0x3490] sm:$0xff]  ;;  %v1057_v16 = vld [vmem:[%s8201_s24 + $0x14a8] sm:$0xff]  ;;  %v2108_v5 = vld [vmem:[%s8201_s24 + $0x3580] sm:$0xff] }
 0x2bd   : > { %7388 = vmatprep.subr.bf16.mxu0 %v7387_v9  ;;  %v6381_v9 = vpack.c.bf16 %v1054_v47, %v1052_v63  ;;  %v7405_v34 = vpack.c.bf16 %v2078_v33, %v2076_v30  ;;  %v6383_v19 = vpack.c.bf16 %v1059_v6, %v1057_v16  ;;  %v7421_v63 = vpack.c.bf16 %v2094_v2, %v2092_v51  ;;  %v1072_v30 = vld [vmem:[%s8201_s24 + $0x1520] sm:$0xff]  ;;  %v2098_v6 = vld [vmem:[%s8201_s24 + $0x3530] sm:$0xff] }
 0x2be   : > { %3628 = vmatmul.mubr.f32.vlgmr.msra.gmra.mrb[0].mxu1 %v2606_v10  ;;  %v2080_v10 = vld [vmem:[%s8201_s24 + $0x34a0] sm:$0xff]  ;;  %v6399_v47 = vpack.c.bf16 %v1075_v46, %v1073_v22  ;;  %v2114_v46 = vld [vmem:[%s8201_s24 + $0x35b0] sm:$0xff] }
 0x2bf   : > { %6366 = vmatpush1.bf16.msra.mxu1 %v6365_v42  ;;  %4764 = vmatmul.mubr.f32.vlgmr.msra.gmra.mrb[0].mxu0 %v2806_v13  ;;  %v1063_v42 = vld [vmem:[%s8201_s24 + $0x14d8] sm:$0xff]  ;;  %v2085_v13 = vld [vmem:[%s8201_s24 + $0x34c8] sm:$0xff]  ;;  %v7409_v56 = vpack.c.bf16 %v2082_v11, %v2080_v10  ;;  %v2096_v33 = vld [vmem:[%s8201_s24 + $0x3520] sm:$0xff] }
 0x2c0   : > { %7390 = vmatpush1.bf16.msra.mxu0 %v7389_v14  ;;  %6368 = vmatprep.subr.bf16.mxu1 %v6367_v43  ;;  %v2087_v14 = vld [vmem:[%s8201_s24 + $0x34d8] sm:$0xff]  ;;  %v6385_v43 = vpack.c.bf16 %v1058_v31, %v1056_v39  ;;  %v6387_v49 = vpack.c.bf16 %v1063_v42, %v1061_v12  ;;  %v7425_v39 = vpack.c.bf16 %v2098_v6, %v2096_v33  ;;  %v1076_v10 = vld [vmem:[%s8201_s24 + $0x1540] sm:$0xff]  ;;  %v2102_v42 = vld [vmem:[%s8201_s24 + $0x3550] sm:$0xff] }
 0x2c1   : > { %7392 = vmatprep.subr.bf16.mxu0 %v7391_v32  ;;  %3698 = vmatprep.mubr.f32.mxu1 %v9782_v27  ;;  %v1062_v32 = vld [vmem:[%s8201_s24 + $0x14d0] sm:$0xff]  ;;  %v7411_v18 = vpack.c.bf16 %v2087_v14, %v2085_v13  ;;  %v6403_v31 = vpack.c.bf16 %v1079_v21, %v1077_v7  ;;  %v2100_v11 = vld [vmem:[%s8201_s24 + $0x3540] sm:$0xff]  ;;  %v1081_v13 = vld [vmem:[%s8201_s24 + $0x1568] sm:$0xff] }
 0x2c2   : > { %4834 = vmatprep.mubr.f32.mxu0 %v9787_v29  ;;  %v1083_v14 = vld [vmem:[%s8201_s24 + $0x1578] sm:$0xff]  ;;  %v1088_v51 = vld [vmem:[%s8201_s24 + $0x15a0] sm:$0xff]  ;;  %v2118_v21 = vld [vmem:[%s8201_s24 + $0x35d0] sm:$0xff] }
 0x2c3   : > { %6370 = vmatpush1.bf16.msra.mxu1 %v6369_v35  ;;  %v2089_v35 = vld [vmem:[%s8201_s24 + $0x34e8] sm:$0xff]  ;;  %v2112_v2 = vld [vmem:[%s8201_s24 + $0x35a0] sm:$0xff] }
 0x2c4   : > { %7394 = vmatpush1.bf16.msra.mxu0 %v7393_v37  ;;  %6372 = vmatprep.subr.bf16.mxu1 %v6371_v38  ;;  %v2091_v37 = vld [vmem:[%s8201_s24 + $0x34f8] sm:$0xff]  ;;  %v6389_v38 = vpack.c.bf16 %v1062_v32, %v1060_v41  ;;  %v7429_v41 = vpack.c.bf16 %v2102_v42, %v2100_v11  ;;  %v6407_v32 = vpack.c.bf16 %v1083_v14, %v1081_v13  ;;  %v1092_v33 = vld [vmem:[%s8201_s24 + $0x15c0] sm:$0xff]  ;;  %v2122_v14 = vld [vmem:[%s8201_s24 + $0x35f0] sm:$0xff] }
 0x2c5   : > { %7396 = vmatprep.subr.bf16.mxu0 %v7395_v48  ;;  %v1066_v48 = vld [vmem:[%s8201_s24 + $0x14f0] sm:$0xff]  ;;  %v7415_v53 = vpack.c.bf16 %v2091_v37, %v2089_v35  ;;  %v1085_v35 = vld [vmem:[%s8201_s24 + $0x1588] sm:$0xff]  ;;  %v1087_v37 = vld [vmem:[%s8201_s24 + $0x1598] sm:$0xff] }
 0x2c6   : > { %v2116_v6 = vld [vmem:[%s8201_s24 + $0x35c0] sm:$0xff] }
 0x2c7   : > { %6374 = vmatpush1.bf16.msra.mxu1 %v6373_v57  ;;  %v2093_v57 = vld [vmem:[%s8201_s24 + $0x3508] sm:$0xff]  ;;  %v1096_v11 = vld [vmem:[%s8201_s24 + $0x15e0] sm:$0xff] }
 0x2c8   : > { %7398 = vmatpush1.bf16.msra.mxu0 %v7397_v58  ;;  %6376 = vmatprep.subr.bf16.mxu1 %v6375_v59  ;;  %v2095_v58 = vld [vmem:[%s8201_s24 + $0x3518] sm:$0xff]  ;;  %v6393_v59 = vpack.c.bf16 %v1066_v48, %v1064_v45  ;;  %v7433_v45 = vpack.c.bf16 %v2106_v8, %v2104_v23  ;;  %v6411_v48 = vpack.c.bf16 %v1087_v37, %v1085_v35  ;;  %v2120_v42 = vld [vmem:[%s8201_s24 + $0x35e0] sm:$0xff]  ;;  %v2126_v37 = vld [vmem:[%s8201_s24 + $0x3610] sm:$0xff] }
 0x2c9   : > { %7400 = vmatprep.subr.bf16.mxu0 %v7399_v0  ;;  %v1070_v0 = vld [vmem:[%s8201_s24 + $0x1510] sm:$0xff]  ;;  %v7419_v28 = vpack.c.bf16 %v2095_v58, %v2093_v57  ;;  %v1089_v57 = vld [vmem:[%s8201_s24 + $0x15a8] sm:$0xff]  ;;  %v1091_v58 = vld [vmem:[%s8201_s24 + $0x15b8] sm:$0xff] }
 0x2ca   : > { %v1100_v23 = vld [vmem:[%s8201_s24 + $0x1600] sm:$0xff] }
 0x2cb   : > { %6378 = vmatpush1.bf16.msra.mxu1 %v6377_v17  ;;  %v2097_v17 = vld [vmem:[%s8201_s24 + $0x3528] sm:$0xff]  ;;  %v2124_v8 = vld [vmem:[%s8201_s24 + $0x3600] sm:$0xff] }
 0x2cc   : > { %7402 = vmatpush1.bf16.msra.mxu0 %v7401_v54  ;;  %6380 = vmatprep.subr.bf16.mxu1 %v6379_v1  ;;  %v2099_v54 = vld [vmem:[%s8201_s24 + $0x3538] sm:$0xff]  ;;  %v6397_v1 = vpack.c.bf16 %v1070_v0, %v1068_v61  ;;  %v7437_v61 = vpack.c.bf16 %v2110_v25, %v2108_v5  ;;  %v6415_v0 = vpack.c.bf16 %v1091_v58, %v1089_v57  ;;  %v1104_v25 = vld [vmem:[%s8201_s24 + $0x1620] sm:$0xff]  ;;  %v1106_v57 = vld [vmem:[%s8201_s24 + $0x1630] sm:$0xff] }
 0x2cd   : > { %7404 = vmatprep.subr.bf16.mxu0 %v7403_v26  ;;  %v1074_v26 = vld [vmem:[%s8201_s24 + $0x1530] sm:$0xff]  ;;  %v7423_v16 = vpack.c.bf16 %v2099_v54, %v2097_v17  ;;  %v1093_v17 = vld [vmem:[%s8201_s24 + $0x15c8] sm:$0xff]  ;;  %v1095_v54 = vld [vmem:[%s8201_s24 + $0x15d8] sm:$0xff]  ;;  %v7453_v5 = vpack.c.bf16 %v2126_v37, %v2124_v8 }
 0x2ce   : > { %v1120_v8 = vld [vmem:[%s8201_s24 + $0x16a0] sm:$0xff] }
 0x2cf   : > { %6382 = vmatpush1.bf16.msra.mxu1 %v6381_v9  ;;  %v2101_v9 = vld [vmem:[%s8201_s24 + $0x3548] sm:$0xff]  ;;  %v2144_v37 = vld [vmem:[%s8201_s24 + $0x36a0] sm:$0xff] }
 0x2d0   : > { %7406 = vmatpush1.bf16.msra.mxu0 %v7405_v34  ;;  %6384 = vmatprep.subr.bf16.mxu1 %v6383_v19  ;;  %v2103_v34 = vld [vmem:[%s8201_s24 + $0x3558] sm:$0xff]  ;;  %v6401_v19 = vpack.c.bf16 %v1074_v26, %v1072_v30  ;;  %v7441_v30 = vpack.c.bf16 %v2114_v46, %v2112_v2  ;;  %v6419_v26 = vpack.c.bf16 %v1095_v54, %v1093_v17  ;;  %v1110_v46 = vld [vmem:[%s8201_s24 + $0x1650] sm:$0xff]  ;;  %v2132_v17 = vld [vmem:[%s8201_s24 + $0x3640] sm:$0xff] }
 0x2d1   : > { %7408 = vmatprep.subr.bf16.mxu0 %v7407_v24  ;;  %v1078_v24 = vld [vmem:[%s8201_s24 + $0x1550] sm:$0xff]  ;;  %v7427_v12 = vpack.c.bf16 %v2103_v34, %v2101_v9  ;;  %v1097_v9 = vld [vmem:[%s8201_s24 + $0x15e8] sm:$0xff]  ;;  %v1099_v34 = vld [vmem:[%s8201_s24 + $0x15f8] sm:$0xff] }
 0x2d3   : > { %6386 = vmatpush1.bf16.msra.mxu1 %v6385_v43  ;;  %v2105_v43 = vld [vmem:[%s8201_s24 + $0x3568] sm:$0xff] }
 0x2d4   : > { %7410 = vmatpush1.bf16.msra.mxu0 %v7409_v56  ;;  %6388 = vmatprep.subr.bf16.mxu1 %v6387_v49  ;;  %v2107_v56 = vld [vmem:[%s8201_s24 + $0x3578] sm:$0xff]  ;;  %v6405_v49 = vpack.c.bf16 %v1078_v24, %v1076_v10  ;;  %v7445_v10 = vpack.c.bf16 %v2118_v21, %v2116_v6  ;;  %v6423_v24 = vpack.c.bf16 %v1099_v34, %v1097_v9  ;;  %v1112_v6 = vld [vmem:[%s8201_s24 + $0x1660] sm:$0xff]  ;;  %v2138_v34 = vld [vmem:[%s8201_s24 + $0x3670] sm:$0xff] }
 0x2d5   : > { %7412 = vmatprep.subr.bf16.mxu0 %v7411_v18  ;;  %v1082_v18 = vld [vmem:[%s8201_s24 + $0x1570] sm:$0xff]  ;;  %v7431_v4 = vpack.c.bf16 %v2107_v56, %v2105_v43  ;;  %v1101_v43 = vld [vmem:[%s8201_s24 + $0x1608] sm:$0xff]  ;;  %v1103_v56 = vld [vmem:[%s8201_s24 + $0x1618] sm:$0xff] }
 0x2d6   : > { %v2136_v21 = vld [vmem:[%s8201_s24 + $0x3660] sm:$0xff] }
 0x2d7   : > { %6390 = vmatpush1.bf16.msra.mxu1 %v6389_v38  ;;  %v2109_v38 = vld [vmem:[%s8201_s24 + $0x3588] sm:$0xff] }
 0x2d8   : > { %7414 = vmatpush1.bf16.msra.mxu0 %v7413_v40  ;;  %6392 = vmatprep.subr.bf16.mxu1 %v6391_v44  ;;  %v2111_v40 = vld [vmem:[%s8201_s24 + $0x3598] sm:$0xff]  ;;  %v6409_v44 = vpack.c.bf16 %v1082_v18, %v1080_v50  ;;  %v7449_v50 = vpack.c.bf16 %v2122_v14, %v2120_v42  ;;  %v6427_v18 = vpack.c.bf16 %v1103_v56, %v1101_v43  ;;  %v1116_v42 = vld [vmem:[%s8201_s24 + $0x1680] sm:$0xff]  ;;  %v2142_v56 = vld [vmem:[%s8201_s24 + $0x3690] sm:$0xff] }
 0x2d9   : > { %7416 = vmatprep.subr.bf16.mxu0 %v7415_v53  ;;  %v1086_v53 = vld [vmem:[%s8201_s24 + $0x1590] sm:$0xff]  ;;  %v7435_v55 = vpack.c.bf16 %v2111_v40, %v2109_v38  ;;  %v1105_v38 = vld [vmem:[%s8201_s24 + $0x1628] sm:$0xff]  ;;  %v1107_v40 = vld [vmem:[%s8201_s24 + $0x1638] sm:$0xff] }
 0x2da   : > { %v2140_v14 = vld [vmem:[%s8201_s24 + $0x3680] sm:$0xff] }
 0x2db   : > { %6394 = vmatpush1.bf16.msra.mxu1 %v6393_v59  ;;  %v2113_v59 = vld [vmem:[%s8201_s24 + $0x35a8] sm:$0xff] }
 0x2dc   : > { %7418 = vmatpush1.bf16.msra.mxu0 %v7417_v60  ;;  %6396 = vmatprep.subr.bf16.mxu1 %v6395_v62  ;;  %v2115_v60 = vld [vmem:[%s8201_s24 + $0x35b8] sm:$0xff]  ;;  %v6413_v62 = vpack.c.bf16 %v1086_v53, %v1084_v52  ;;  %v9917_v53 = vrot.slane %v9757_v3, %v8330_v36  ;;  %v2609_v3 = vcombine.high %v9782_v27, %v9782_v27 }
 0x2dd   : > { %7420 = vmatprep.subr.bf16.mxu0 %v7419_v28  ;;  %v1090_v28 = vld [vmem:[%s8201_s24 + $0x15b0] sm:$0xff]  ;;  %v7439_v22 = vpack.c.bf16 %v2115_v60, %v2113_v59  ;;  %v1109_v60 = vld [vmem:[%s8201_s24 + $0x1648] sm:$0xff] }
 0x2de   : > { %v2130_v59 = vld [vmem:[%s8201_s24 + $0x3630] sm:$0xff] }
 0x2df   : > { %6398 = vmatpush1.bf16.msra.mxu1 %v6397_v1  ;;  %v2117_v1 = vld [vmem:[%s8201_s24 + $0x35c8] sm:$0xff] }
 0x2e0   : > { %7422 = vmatpush1.bf16.msra.mxu0 %v7421_v63  ;;  %6400 = vmatprep.subr.bf16.mxu1 %v6399_v47  ;;  %v2119_v63 = vld [vmem:[%s8201_s24 + $0x35d8] sm:$0xff]  ;;  %v6417_v47 = vpack.c.bf16 %v1090_v28, %v1088_v51  ;;  %v2809_v51 = vcombine.high %v9787_v29, %v9787_v29  ;;  %v6433_v28 = vpack.c.bf16 %v1106_v57, %v1104_v25  ;;  %v1113_v29 = vld [vmem:[%s8201_s24 + $0x1668] sm:$0xff] }
 0x2e1   : > { %7424 = vmatprep.subr.bf16.mxu0 %v7423_v16  ;;  %v1094_v16 = vld [vmem:[%s8201_s24 + $0x15d0] sm:$0xff]  ;;  %v7443_v7 = vpack.c.bf16 %v2119_v63, %v2117_v1  ;;  %v1115_v63 = vld [vmem:[%s8201_s24 + $0x1678] sm:$0xff] }
 0x2e2   : > { %v2134_v1 = vld [vmem:[%s8201_s24 + $0x3650] sm:$0xff] }
 0x2e3   : > { %6402 = vmatpush1.bf16.msra.mxu1 %v6401_v19  ;;  %v2121_v19 = vld [vmem:[%s8201_s24 + $0x35e8] sm:$0xff] }
 0x2e4   : > { %7426 = vmatpush1.bf16.msra.mxu0 %v7425_v39  ;;  %6404 = vmatprep.subr.bf16.mxu1 %v6403_v31  ;;  %v2123_v39 = vld [vmem:[%s8201_s24 + $0x35f8] sm:$0xff]  ;;  %v6421_v31 = vpack.c.bf16 %v1094_v16, %v1092_v33  ;;  %v7461_v33 = vpack.c.bf16 %v2134_v1, %v2132_v17  ;;  %v6439_v16 = vpack.c.bf16 %v1115_v63, %v1113_v29  ;;  %v2152_v17 = vld [vmem:[%s8201_s24 + $0x36e0] sm:$0xff]  ;;  %v2154_v1 = vld [vmem:[%s8201_s24 + $0x36f0] sm:$0xff] }
 0x2e5   : > { %7428 = vmatprep.subr.bf16.mxu0 %v7427_v12  ;;  %v1098_v12 = vld [vmem:[%s8201_s24 + $0x15f0] sm:$0xff]  ;;  %v7447_v13 = vpack.c.bf16 %v2123_v39, %v2121_v19  ;;  %v1117_v19 = vld [vmem:[%s8201_s24 + $0x1688] sm:$0xff]  ;;  %v1119_v39 = vld [vmem:[%s8201_s24 + $0x1698] sm:$0xff] }
 0x2e6   : > { %v1133_v29 = vld [vmem:[%s8201_s24 + $0x1708] sm:$0xff]  ;;  %v1135_v63 = vld [vmem:[%s8201_s24 + $0x1718] sm:$0xff] }
 0x2e7   : > { %6406 = vmatpush1.bf16.msra.mxu1 %v6405_v49  ;;  %v2125_v49 = vld [vmem:[%s8201_s24 + $0x3608] sm:$0xff] }
 0x2e8   : > { %7430 = vmatpush1.bf16.msra.mxu0 %v7429_v41  ;;  %6408 = vmatprep.subr.bf16.mxu1 %v6407_v32  ;;  %v2127_v41 = vld [vmem:[%s8201_s24 + $0x3618] sm:$0xff]  ;;  %v6425_v32 = vpack.c.bf16 %v1098_v12, %v1096_v11  ;;  %v7465_v11 = vpack.c.bf16 %v2138_v34, %v2136_v21  ;;  %v6443_v12 = vpack.c.bf16 %v1119_v39, %v1117_v19  ;;  %v2156_v21 = vld [vmem:[%s8201_s24 + $0x3700] sm:$0xff]  ;;  %v2158_v34 = vld [vmem:[%s8201_s24 + $0x3710] sm:$0xff] }
 0x2e9   : > { %7432 = vmatprep.subr.bf16.mxu0 %v7431_v4  ;;  %v1102_v4 = vld [vmem:[%s8201_s24 + $0x1610] sm:$0xff]  ;;  %v7451_v35 = vpack.c.bf16 %v2127_v41, %v2125_v49  ;;  %v1121_v49 = vld [vmem:[%s8201_s24 + $0x16a8] sm:$0xff]  ;;  %v1123_v41 = vld [vmem:[%s8201_s24 + $0x16b8] sm:$0xff] }
 0x2ea   : > { %v6429_v52 = vpack.c.bf16 %v1102_v4, %v1100_v23  ;;  %v7469_v23 = vpack.c.bf16 %v2142_v56, %v2140_v14  ;;  %v6447_v4 = vpack.c.bf16 %v1123_v41, %v1121_v49  ;;  %v1137_v19 = vld [vmem:[%s8201_s24 + $0x1728] sm:$0xff]  ;;  %v1139_v39 = vld [vmem:[%s8201_s24 + $0x1738] sm:$0xff]  ;;  %v2160_v14 = vld [vmem:[%s8201_s24 + $0x3720] sm:$0xff] }
 0x2eb   : > { %6410 = vmatpush1.bf16.msra.mxu1 %v6409_v44  ;;  %v9911_v44 = vrot.slane %v9752_v20, %v8330_v36  ;;  %v2128_v20 = vld [vmem:[%s8201_s24 + $0x3620] sm:$0xff]  ;;  %v2162_v56 = vld [vmem:[%s8201_s24 + $0x3730] sm:$0xff]  ;;  %v1141_v49 = vld [vmem:[%s8201_s24 + $0x1748] sm:$0xff] }
 0x2ec   : > { %7434 = vmatpush1.bf16.msra.mxu0 %v7433_v45  ;;  %6412 = vmatprep.subr.bf16.mxu1 %v6411_v48  ;;  %v2129_v45 = vld [vmem:[%s8201_s24 + $0x3628] sm:$0xff]  ;;  %v2131_v48 = vld [vmem:[%s8201_s24 + $0x3638] sm:$0xff]  ;;  %v7457_v2 = vpack.c.bf16 %v2130_v59, %v2128_v20  ;;  %v1124_v20 = vld [vmem:[%s8201_s24 + $0x16c0] sm:$0xff] }
 0x2ed   : > { %7436 = vmatprep.subr.bf16.mxu0 %v7435_v55  ;;  %v6431_v55 = vpack.c.bf16 %v1107_v40, %v1105_v38  ;;  %v7455_v58 = vpack.c.bf16 %v2131_v48, %v2129_v45  ;;  %v2146_v40 = vld [vmem:[%s8201_s24 + $0x36b0] sm:$0xff]  ;;  %v1125_v45 = vld [vmem:[%s8201_s24 + $0x16c8] sm:$0xff]  ;;  %v1127_v48 = vld [vmem:[%s8201_s24 + $0x16d8] sm:$0xff] }
 0x2ee   : > { %v7473_v25 = vpack.c.bf16 %v2146_v40, %v2144_v37  ;;  %v6451_v57 = vpack.c.bf16 %v1127_v48, %v1125_v45  ;;  %v2148_v59 = vld [vmem:[%s8201_s24 + $0x36c0] sm:$0xff]  ;;  %v1143_v41 = vld [vmem:[%s8201_s24 + $0x1758] sm:$0xff]  ;;  %v2166_v40 = vld [vmem:[%s8201_s24 + $0x3750] sm:$0xff] }
 0x2ef   : > { %6414 = vmatpush1.bf16.msra.mxu1 %v6413_v62  ;;  %v1111_v62 = vld [vmem:[%s8201_s24 + $0x1658] sm:$0xff]  ;;  %v2164_v37 = vld [vmem:[%s8201_s24 + $0x3740] sm:$0xff]  ;;  %v1145_v45 = vld [vmem:[%s8201_s24 + $0x1768] sm:$0xff] }
 0x2f0   : > { %7438 = vmatpush1.bf16.msra.mxu0 %v7437_v61  ;;  %6416 = vmatprep.subr.bf16.mxu1 %v6415_v0  ;;  %v2133_v61 = vld [vmem:[%s8201_s24 + $0x3648] sm:$0xff]  ;;  %v2135_v0 = vld [vmem:[%s8201_s24 + $0x3658] sm:$0xff]  ;;  %v6435_v27 = vpack.c.bf16 %v1111_v62, %v1109_v60  ;;  %v2150_v62 = vld [vmem:[%s8201_s24 + $0x36d0] sm:$0xff] }
 0x2f1   : > { %7440 = vmatprep.subr.bf16.mxu0 %v7439_v22  ;;  %v1108_v22 = vld [vmem:[%s8201_s24 + $0x1640] sm:$0xff]  ;;  %v7459_v54 = vpack.c.bf16 %v2135_v0, %v2133_v61  ;;  %v1131_v61 = vld [vmem:[%s8201_s24 + $0x16f8] sm:$0xff]  ;;  %v2153_v0 = vld [vmem:[%s8201_s24 + $0x36e8] sm:$0xff] }
 0x2f2   : > { %v1147_v48 = vld [vmem:[%s8201_s24 + $0x1778] sm:$0xff] }
 0x2f3   : > { %6418 = vmatpush1.bf16.msra.mxu1 %v6417_v47  ;;  %v2137_v47 = vld [vmem:[%s8201_s24 + $0x3668] sm:$0xff] }
 0x2f4   : > { %7442 = vmatpush1.bf16.msra.mxu0 %v7441_v30  ;;  %6420 = vmatprep.subr.bf16.mxu1 %v6419_v26  ;;  %v2139_v30 = vld [vmem:[%s8201_s24 + $0x3678] sm:$0xff]  ;;  %v6437_v26 = vpack.c.bf16 %v1110_v46, %v1108_v22  ;;  %v1128_v22 = vld [vmem:[%s8201_s24 + $0x16e0] sm:$0xff]  ;;  %v1130_v46 = vld [vmem:[%s8201_s24 + $0x16f0] sm:$0xff] }
 0x2f5   : > { %7444 = vmatprep.subr.bf16.mxu0 %v7443_v7  ;;  %v1114_v7 = vld [vmem:[%s8201_s24 + $0x1670] sm:$0xff]  ;;  %v7463_v9 = vpack.c.bf16 %v2139_v30, %v2137_v47  ;;  %v2157_v47 = vld [vmem:[%s8201_s24 + $0x3708] sm:$0xff]  ;;  %v2159_v30 = vld [vmem:[%s8201_s24 + $0x3718] sm:$0xff] }
 0x2f7   : > { %6422 = vmatpush1.bf16.msra.mxu1 %v6421_v31  ;;  %v2141_v31 = vld [vmem:[%s8201_s24 + $0x3688] sm:$0xff] }
 0x2f8   : > { %7446 = vmatpush1.bf16.msra.mxu0 %v7445_v10  ;;  %6424 = vmatprep.subr.bf16.mxu1 %v6423_v24  ;;  %v2143_v10 = vld [vmem:[%s8201_s24 + $0x3698] sm:$0xff]  ;;  %v6441_v24 = vpack.c.bf16 %v1114_v7, %v1112_v6  ;;  %v1132_v6 = vld [vmem:[%s8201_s24 + $0x1700] sm:$0xff]  ;;  %v1134_v7 = vld [vmem:[%s8201_s24 + $0x1710] sm:$0xff] }
 0x2f9   : > { %7448 = vmatprep.subr.bf16.mxu0 %v7447_v13  ;;  %v1118_v13 = vld [vmem:[%s8201_s24 + $0x1690] sm:$0xff]  ;;  %v7467_v43 = vpack.c.bf16 %v2143_v10, %v2141_v31  ;;  %v2161_v31 = vld [vmem:[%s8201_s24 + $0x3728] sm:$0xff]  ;;  %v2163_v10 = vld [vmem:[%s8201_s24 + $0x3738] sm:$0xff] }
 0x2fb   : > { %6426 = vmatpush1.bf16.msra.mxu1 %v6425_v32  ;;  %v2145_v32 = vld [vmem:[%s8201_s24 + $0x36a8] sm:$0xff] }
 0x2fc   : > { %7450 = vmatpush1.bf16.msra.mxu0 %v7449_v50  ;;  %6428 = vmatprep.subr.bf16.mxu1 %v6427_v18  ;;  %v2147_v50 = vld [vmem:[%s8201_s24 + $0x36b8] sm:$0xff]  ;;  %v6445_v18 = vpack.c.bf16 %v1118_v13, %v1116_v42  ;;  %v1136_v42 = vld [vmem:[%s8201_s24 + $0x1720] sm:$0xff]  ;;  %v1138_v13 = vld [vmem:[%s8201_s24 + $0x1730] sm:$0xff] }
 0x2fd   : > { %7452 = vmatprep.subr.bf16.mxu0 %v7451_v35  ;;  %v1122_v35 = vld [vmem:[%s8201_s24 + $0x16b0] sm:$0xff]  ;;  %v7471_v38 = vpack.c.bf16 %v2147_v50, %v2145_v32  ;;  %v2165_v32 = vld [vmem:[%s8201_s24 + $0x3748] sm:$0xff]  ;;  %v2167_v50 = vld [vmem:[%s8201_s24 + $0x3758] sm:$0xff] }
 0x2fe   : > { %3699 = vmatmul.mubr.f32.vlgmr.msra.gmra.mrb[0].mxu1 %v9911_v44 }
 0x2ff   : > { %6430 = vmatpush1.bf16.msra.mxu1 %v6429_v52  ;;  %4835 = vmatmul.mubr.f32.vlgmr.msra.gmra.mrb[0].mxu0 %v9917_v53  ;;  %v2149_v52 = vld [vmem:[%s8201_s24 + $0x36c8] sm:$0xff] }
 0x300   : > { %7454 = vmatpush1.bf16.msra.mxu0 %v7453_v5  ;;  %6432 = vmatprep.subr.bf16.mxu1 %v6431_v55  ;;  %v2151_v5 = vld [vmem:[%s8201_s24 + $0x36d8] sm:$0xff]  ;;  %v6449_v55 = vpack.c.bf16 %v1122_v35, %v1120_v8  ;;  %v1140_v8 = vld [vmem:[%s8201_s24 + $0x1740] sm:$0xff]  ;;  %v1142_v35 = vld [vmem:[%s8201_s24 + $0x1750] sm:$0xff] }
 0x301   : > { %7456 = vmatprep.subr.bf16.mxu0 %v7455_v58  ;;  %3769 = vmatprep.mubr.f32.mxu1 %v2609_v3  ;;  %v1126_v58 = vld [vmem:[%s8201_s24 + $0x16d0] sm:$0xff]  ;;  %v7475_v60 = vpack.c.bf16 %v2151_v5, %v2149_v52  ;;  %v1129_v3 = vld [vmem:[%s8201_s24 + $0x16e8] sm:$0xff]  ;;  %v2171_v5 = vld [vmem:[%s8201_s24 + $0x3778] sm:$0xff] }
 0x302   : > { %4905 = vmatprep.mubr.f32.mxu0 %v2809_v51  ;;  %v2155_v51 = vld [vmem:[%s8201_s24 + $0x36f8] sm:$0xff]  ;;  %v2169_v52 = vld [vmem:[%s8201_s24 + $0x3768] sm:$0xff] }
 0x303   : > { %6434 = vmatpush1.bf16.msra.mxu1 %v6433_v28  ;;  %v6453_v28 = vpack.c.bf16 %v1126_v58, %v1124_v20  ;;  %v6471_v20 = vpack.c.bf16 %v1147_v48, %v1145_v45  ;;  %v1146_v58 = vld [vmem:[%s8201_s24 + $0x1770] sm:$0xff]  ;;  %v1161_v45 = vld [vmem:[%s8201_s24 + $0x17e8] sm:$0xff]  ;;  %v1163_v48 = vld [vmem:[%s8201_s24 + $0x17f8] sm:$0xff] }
 0x304   : > { %7458 = vmatpush1.bf16.msra.mxu0 %v7457_v2  ;;  %6436 = vmatprep.subr.bf16.mxu1 %v6435_v27  ;;  %v7477_v2 = vpack.c.bf16 %v2150_v62, %v2148_v59  ;;  %v6455_v27 = vpack.c.bf16 %v1131_v61, %v1129_v3  ;;  %v2168_v59 = vld [vmem:[%s8201_s24 + $0x3760] sm:$0xff]  ;;  %v7495_v62 = vpack.c.bf16 %v2171_v5, %v2169_v52  ;;  %v1149_v3 = vld [vmem:[%s8201_s24 + $0x1788] sm:$0xff]  ;;  %v1151_v61 = vld [vmem:[%s8201_s24 + $0x1798] sm:$0xff] }
 0x305   : > { %7460 = vmatprep.subr.bf16.mxu0 %v7459_v54  ;;  %v7479_v54 = vpack.c.bf16 %v2155_v51, %v2153_v0  ;;  %v2173_v0 = vld [vmem:[%s8201_s24 + $0x3788] sm:$0xff]  ;;  %v2175_v51 = vld [vmem:[%s8201_s24 + $0x3798] sm:$0xff] }
 0x306   : > { %v2185_v5 = vld [vmem:[%s8201_s24 + $0x37e8] sm:$0xff] }
 0x307   : > { %6438 = vmatpush1.bf16.msra.mxu1 %v6437_v26  ;;  %v6457_v26 = vpack.c.bf16 %v1130_v46, %v1128_v22  ;;  %v2172_v22 = vld [vmem:[%s8201_s24 + $0x3780] sm:$0xff]  ;;  %v2174_v46 = vld [vmem:[%s8201_s24 + $0x3790] sm:$0xff] }
 0x308   : > { %7462 = vmatpush1.bf16.msra.mxu0 %v7461_v33  ;;  %6440 = vmatprep.subr.bf16.mxu1 %v6439_v16  ;;  %v7481_v33 = vpack.c.bf16 %v2154_v1, %v2152_v17  ;;  %v6459_v16 = vpack.c.bf16 %v1135_v63, %v1133_v29  ;;  %v1153_v17 = vld [vmem:[%s8201_s24 + $0x17a8] sm:$0xff]  ;;  %v6475_v29 = vpack.c.bf16 %v1151_v61, %v1149_v3  ;;  %v2186_v61 = vld [vmem:[%s8201_s24 + $0x37f0] sm:$0xff] }
 0x309   : > { %7464 = vmatprep.subr.bf16.mxu0 %v7463_v9  ;;  %v7483_v9 = vpack.c.bf16 %v2159_v30, %v2157_v47  ;;  %v2177_v63 = vld [vmem:[%s8201_s24 + $0x37a8] sm:$0xff]  ;;  %v2179_v47 = vld [vmem:[%s8201_s24 + $0x37b8] sm:$0xff] }
 0x30a   : > { %v5649_v30 = vld [vmem:[%s8305_s30 + $0xc0] ss:$8 sm:$0xf] }
 0x30b   : > { %6442 = vmatpush1.bf16.msra.mxu1 %v6441_v24  ;;  %v6461_v24 = vpack.c.bf16 %v1134_v7, %v1132_v6  ;;  %v5681_v6 = vld [vmem:[%s8305_s30 + $0x8c0] ss:$8 sm:$0xf0] }
 0x30c   : > { %7466 = vmatpush1.bf16.msra.mxu0 %v7465_v11  ;;  %6444 = vmatprep.subr.bf16.mxu1 %v6443_v12  ;;  %v7485_v11 = vpack.c.bf16 %v2158_v34, %v2156_v21  ;;  %v6463_v12 = vpack.c.bf16 %v1139_v39, %v1137_v19  ;;  %v5665_v7 = vld [vmem:[%s8305_s30 + $0x1c0] ss:$8 sm:$0xf]  ;;  %v7501_v39 = vpack.c.bf16 %v2174_v46, %v2172_v22 }
 0x30d   : > { %7468 = vmatprep.subr.bf16.mxu0 %v7467_v43  ;;  %v7487_v43 = vpack.c.bf16 %v2163_v10, %v2161_v31  ;;  %v5666_v21 = vld [vmem:[%s8305_s30 + $0x1c0] ss:$8 sm:$0xf0] }
 0x30e   : > { %v5696_v34 = vld [vmem:[%s8305_s30 + $0x9c0] ss:$8 sm:$0xf] }
 0x30f   : > { %6446 = vmatpush1.bf16.msra.mxu1 %v6445_v18  ;;  %v6465_v18 = vpack.c.bf16 %v1138_v13, %v1136_v42  ;;  %v5697_v19 = vld [vmem:[%s8305_s30 + $0x9c0] ss:$8 sm:$0xf0] }
 0x310   : > { %7470 = vmatpush1.bf16.msra.mxu0 %v7469_v23  ;;  %6448 = vmatprep.subr.bf16.mxu1 %v6447_v4  ;;  %v7489_v23 = vpack.c.bf16 %v2162_v56, %v2160_v14  ;;  %v6467_v4 = vpack.c.bf16 %v1143_v41, %v1141_v49  ;;  %v1152_v10 = vld [vmem:[%s8201_s24 + $0x17a0] sm:$0xff]  ;;  %v2178_v42 = vld [vmem:[%s8201_s24 + $0x37b0] sm:$0xff]  ;;  %v1157_v13 = vld [vmem:[%s8201_s24 + $0x17c8] sm:$0xff] }
 0x311   : > { %7472 = vmatprep.subr.bf16.mxu0 %v7471_v38  ;;  %v7491_v38 = vpack.c.bf16 %v2167_v50, %v2165_v32  ;;  %v1159_v14 = vld [vmem:[%s8201_s24 + $0x17d8] sm:$0xff]  ;;  %v2181_v49 = vld [vmem:[%s8201_s24 + $0x37c8] sm:$0xff]  ;;  %v10041_v32 = vor.u32 %v5666_v21, %v5665_v7  ;;  %v10043_v50 = vor.u32 %v5697_v19, %v5696_v34  ;;  %v2807_v19 = vcombine.high %v9917_v53, %v9917_v53 }
 0x312   : > { %v2183_v41 = vld [vmem:[%s8201_s24 + $0x37d8] sm:$0xff]  ;;  %v2193_v7 = vld [vmem:[%s8201_s24 + $0x3828] sm:$0xff] }
 0x313   : > { %6450 = vmatpush1.bf16.msra.mxu1 %v6449_v55  ;;  %v6469_v55 = vpack.c.bf16 %v1142_v35, %v1140_v8  ;;  %v1156_v8 = vld [vmem:[%s8201_s24 + $0x17c0] sm:$0xff]  ;;  %v1158_v35 = vld [vmem:[%s8201_s24 + $0x17d0] sm:$0xff]  ;;  %v2195_v21 = vld [vmem:[%s8201_s24 + $0x3838] sm:$0xff] }
 0x314   : > { %7474 = vmatpush1.bf16.msra.mxu0 %v7473_v25  ;;  %6452 = vmatprep.subr.bf16.mxu1 %v6451_v57  ;;  %v1144_v25 = vld [vmem:[%s8201_s24 + $0x1760] sm:$0xff]  ;;  %v7493_v57 = vpack.c.bf16 %v2166_v40, %v2164_v37  ;;  %v2182_v40 = vld [vmem:[%s8201_s24 + $0x37d0] sm:$0xff]  ;;  %v2197_v53 = vld [vmem:[%s8201_s24 + $0x3848] sm:$0xff] }
 0x315   : > { %7476 = vmatprep.subr.bf16.mxu0 %v7475_v60  ;;  %v2170_v60 = vld [vmem:[%s8201_s24 + $0x3770] sm:$0xff]  ;;  %v2180_v37 = vld [vmem:[%s8201_s24 + $0x37c0] sm:$0xff] }
 0x316   : > { %v7497_v1 = vpack.c.bf16 %v2170_v60, %v2168_v59  ;;  %v1160_v59 = vld [vmem:[%s8201_s24 + $0x17e0] sm:$0xff]  ;;  %v1162_v60 = vld [vmem:[%s8201_s24 + $0x17f0] sm:$0xff] }
 0x317   : > { %6454 = vmatpush1.bf16.msra.mxu1 %v6453_v28  ;;  %v1148_v28 = vld [vmem:[%s8201_s24 + $0x1780] sm:$0xff]  ;;  %v6489_v46 = vpack.c.bf16 %v1162_v60, %v1160_v59 }
 0x318   : > { %7478 = vmatpush1.bf16.msra.mxu0 %v7477_v2  ;;  %6456 = vmatprep.subr.bf16.mxu1 %v6455_v27  ;;  %v1150_v2 = vld [vmem:[%s8201_s24 + $0x1790] sm:$0xff]  ;;  %v6473_v27 = vpack.c.bf16 %v1146_v58, %v1144_v25  ;;  %v2810_v25 = vcombine.low %v10041_v32, %v10043_v50  ;;  %v6487_v58 = vpack.c.bf16 %v1163_v48, %v1161_v45  ;;  %v1177_v45 = vld [vmem:[%s8201_s24 + $0x1868] sm:$0xff]  ;;  %v1179_v48 = vld [vmem:[%s8201_s24 + $0x1878] sm:$0xff] }
 0x319   : > { %7480 = vmatprep.subr.bf16.mxu0 %v7479_v54  ;;  %v1155_v54 = vld [vmem:[%s8201_s24 + $0x17b8] sm:$0xff]  ;;  %v2200_v59 = vld [vmem:[%s8201_s24 + $0x3860] sm:$0xff] }
 0x31a   : > { %v6479_v31 = vpack.c.bf16 %v1155_v54, %v1153_v17  ;;  %v10069_v22 = vrot.slane %v2810_v25, %v8330_v36 }
 0x31b   : > { %6458 = vmatpush1.bf16.msra.mxu1 %v6457_v26  ;;  %v5650_v26 = vld [vmem:[%s8305_s30 + $0xc0] ss:$8 sm:$0xf0] }
 0x31c   : > { %7482 = vmatpush1.bf16.msra.mxu0 %v7481_v33  ;;  %6460 = vmatprep.subr.bf16.mxu1 %v6459_v16  ;;  %v7499_v33 = vpack.c.bf16 %v2175_v51, %v2173_v0  ;;  %v5680_v16 = vld [vmem:[%s8305_s30 + $0x8c0] ss:$8 sm:$0xf] }
 0x31d   : > { %7484 = vmatprep.subr.bf16.mxu0 %v7483_v9  ;;  %v6477_v9 = vpack.c.bf16 %v1150_v2, %v1148_v28  ;;  %v10037_v56 = vor.u32 %v5681_v6, %v5680_v16  ;;  %v1165_v0 = vld [vmem:[%s8201_s24 + $0x1808] sm:$0xff]  ;;  %v1167_v51 = vld [vmem:[%s8201_s24 + $0x1818] sm:$0xff]  ;;  %v2607_v6 = vcombine.high %v9911_v44, %v9911_v44  ;;  %v1168_v44 = vld [vmem:[%s8201_s24 + $0x1820] sm:$0xff] }
 0x31e   : > { %v2189_v2 = vld [vmem:[%s8201_s24 + $0x3808] sm:$0xff]  ;;  %v6491_v54 = vpack.c.bf16 %v1167_v51, %v1165_v0  ;;  %v2207_v51 = vld [vmem:[%s8201_s24 + $0x3898] sm:$0xff] }
 0x31f   : > { %6462 = vmatpush1.bf16.msra.mxu1 %v6461_v24  ;;  %v1154_v24 = vld [vmem:[%s8201_s24 + $0x17b0] sm:$0xff]  ;;  %v2205_v0 = vld [vmem:[%s8201_s24 + $0x3888] sm:$0xff] }
 0x320   : > { %7486 = vmatpush1.bf16.msra.mxu0 %v7485_v11  ;;  %6464 = vmatprep.subr.bf16.mxu1 %v6463_v12  ;;  %v2176_v11 = vld [vmem:[%s8201_s24 + $0x37a0] sm:$0xff]  ;;  %v7503_v12 = vpack.c.bf16 %v2179_v47, %v2177_v63 }
 0x321   : > { %7488 = vmatprep.subr.bf16.mxu0 %v7487_v43  ;;  %v10035_v43 = vor.u32 %v5650_v26, %v5649_v30  ;;  %v2188_v63 = vld [vmem:[%s8201_s24 + $0x3800] sm:$0xff]  ;;  %v2190_v30 = vld [vmem:[%s8201_s24 + $0x3810] sm:$0xff]  ;;  %v1169_v26 = vld [vmem:[%s8201_s24 + $0x1828] sm:$0xff] }
 0x323   : > { %6466 = vmatpush1.bf16.msra.mxu1 %v6465_v18  ;;  %v6481_v18 = vpack.c.bf16 %v1154_v24, %v1152_v10  ;;  %v2610_v52 = vcombine.low %v10035_v43, %v10037_v56  ;;  %v1170_v10 = vld [vmem:[%s8201_s24 + $0x1830] sm:$0xff]  ;;  %v2192_v24 = vld [vmem:[%s8201_s24 + $0x3820] sm:$0xff] }
 0x324   : > { %7490 = vmatpush1.bf16.msra.mxu0 %v7489_v23  ;;  %6468 = vmatprep.subr.bf16.mxu1 %v6467_v4  ;;  %v7505_v23 = vpack.c.bf16 %v2178_v42, %v2176_v11  ;;  %v6483_v4 = vpack.c.bf16 %v1159_v14, %v1157_v13  ;;  %v7519_v11 = vpack.c.bf16 %v2195_v21, %v2193_v7  ;;  %v1173_v42 = vld [vmem:[%s8201_s24 + $0x1848] sm:$0xff]  ;;  %v1175_v13 = vld [vmem:[%s8201_s24 + $0x1858] sm:$0xff]  ;;  %v1184_v21 = vld [vmem:[%s8201_s24 + $0x18a0] sm:$0xff] }
 0x325   : > { %7492 = vmatprep.subr.bf16.mxu0 %v7491_v38  ;;  %v7507_v38 = vpack.c.bf16 %v2183_v41, %v2181_v49  ;;  %v10064_v28 = vrot.slane %v2610_v52, %v8330_v36  ;;  %v2199_v49 = vld [vmem:[%s8201_s24 + $0x3858] sm:$0xff]  ;;  %v2201_v52 = vld [vmem:[%s8201_s24 + $0x3868] sm:$0xff] }
 0x327   : > { %6470 = vmatpush1.bf16.msra.mxu1 %v6469_v55  ;;  %v2187_v55 = vld [vmem:[%s8201_s24 + $0x37f8] sm:$0xff]  ;;  %v2626_v16 = vcombine.high %v10064_v28, %v10064_v28 }
 0x328   : > { %7494 = vmatpush1.bf16.msra.mxu0 %v7493_v57  ;;  %6472 = vmatprep.subr.bf16.mxu1 %v6471_v20  ;;  %v6485_v57 = vpack.c.bf16 %v1158_v35, %v1156_v8  ;;  %v7509_v20 = vpack.c.bf16 %v2182_v40, %v2180_v37  ;;  %v7511_v3 = vpack.c.bf16 %v2187_v55, %v2185_v5  ;;  %v1172_v8 = vld [vmem:[%s8201_s24 + $0x1840] sm:$0xff]  ;;  %v1174_v35 = vld [vmem:[%s8201_s24 + $0x1850] sm:$0xff]  ;;  %v2203_v5 = vld [vmem:[%s8201_s24 + $0x3878] sm:$0xff] }
 0x329   : > { %7496 = vmatprep.subr.bf16.mxu0 %v7495_v62  ;;  %v2184_v62 = vld [vmem:[%s8201_s24 + $0x37e0] sm:$0xff]  ;;  %v10094_v14 = vrot.slane %v2626_v16, %v8330_v36  ;;  %v2198_v40 = vld [vmem:[%s8201_s24 + $0x3850] sm:$0xff]  ;;  %v6501_v55 = vpack.c.bf16 %v1174_v35, %v1172_v8  ;;  %v7527_v60 = vpack.c.bf16 %v2203_v5, %v2201_v52  ;;  %v1195_v8 = vld [vmem:[%s8201_s24 + $0x18f8] sm:$0xff] }
 0x32a   : > { %v7513_v17 = vpack.c.bf16 %v2186_v61, %v2184_v62  ;;  %v2196_v37 = vld [vmem:[%s8201_s24 + $0x3840] sm:$0xff]  ;;  %v2202_v62 = vld [vmem:[%s8201_s24 + $0x3870] sm:$0xff]  ;;  %v1183_v61 = vld [vmem:[%s8201_s24 + $0x1898] sm:$0xff] }
 0x32b   : > { %6474 = vmatpush1.bf16.msra.mxu1 %v6473_v27  ;;  %v2191_v27 = vld [vmem:[%s8201_s24 + $0x3818] sm:$0xff]  ;;  %v7525_v25 = vpack.c.bf16 %v2198_v40, %v2196_v37  ;;  %v2217_v35 = vld [vmem:[%s8201_s24 + $0x38e8] sm:$0xff]  ;;  %v1194_v52 = vld [vmem:[%s8201_s24 + $0x18f0] sm:$0xff] }
 0x32c   : > { %7498 = vmatpush1.bf16.msra.mxu0 %v7497_v1  ;;  %6476 = vmatprep.subr.bf16.mxu1 %v6475_v29  ;;  %v1164_v1 = vld [vmem:[%s8201_s24 + $0x1800] sm:$0xff]  ;;  %v1166_v29 = vld [vmem:[%s8201_s24 + $0x1810] sm:$0xff]  ;;  %v7515_v47 = vpack.c.bf16 %v2191_v27, %v2189_v2  ;;  %v7529_v27 = vpack.c.bf16 %v2202_v62, %v2200_v59  ;;  %v2219_v37 = vld [vmem:[%s8201_s24 + $0x38f8] sm:$0xff] }
 0x32d   : > { %7500 = vmatprep.subr.bf16.mxu0 %v7499_v33  ;;  %v1171_v33 = vld [vmem:[%s8201_s24 + $0x1838] sm:$0xff]  ;;  %v6493_v34 = vpack.c.bf16 %v1166_v29, %v1164_v1  ;;  %v2204_v1 = vld [vmem:[%s8201_s24 + $0x3880] sm:$0xff]  ;;  %v7531_v29 = vpack.c.bf16 %v2207_v51, %v2205_v0  ;;  %v1198_v0 = vld [vmem:[%s8201_s24 + $0x1910] sm:$0xff] }
 0x32e   : > { %v2216_v5 = vld [vmem:[%s8201_s24 + $0x38e0] sm:$0xff]  ;;  %v2223_v59 = vld [vmem:[%s8201_s24 + $0x3918] sm:$0xff] }
 0x32f   : > { %6478 = vmatpush1.bf16.msra.mxu1 %v6477_v9  ;;  %v2826_v9 = vcombine.high %v10069_v22, %v10069_v22  ;;  %v2220_v51 = vld [vmem:[%s8201_s24 + $0x3900] sm:$0xff] }
 0x330   : > { %7502 = vmatpush1.bf16.msra.mxu0 %v7501_v39  ;;  %6480 = vmatprep.subr.bf16.mxu1 %v6479_v31  ;;  %v7517_v39 = vpack.c.bf16 %v2190_v30, %v2188_v63  ;;  %v6495_v31 = vpack.c.bf16 %v1171_v33, %v1169_v26  ;;  %v2206_v63 = vld [vmem:[%s8201_s24 + $0x3890] sm:$0xff]  ;;  %v1187_v30 = vld [vmem:[%s8201_s24 + $0x18b8] sm:$0xff]  ;;  %v2209_v26 = vld [vmem:[%s8201_s24 + $0x38a8] sm:$0xff] }
 0x331   : > { %7504 = vmatprep.subr.bf16.mxu0 %v7503_v12  ;;  %v2194_v12 = vld [vmem:[%s8201_s24 + $0x3830] sm:$0xff]  ;;  %v10099_v41 = vrot.slane %v2826_v9, %v8330_v36  ;;  %v2211_v33 = vld [vmem:[%s8201_s24 + $0x38b8] sm:$0xff] }
 0x332   : > { %v1186_v9 = vld [vmem:[%s8201_s24 + $0x18b0] sm:$0xff] }
 0x333   : > { %6482 = vmatpush1.bf16.msra.mxu1 %v6481_v18  ;;  %v6497_v18 = vpack.c.bf16 %v1170_v10, %v1168_v44  ;;  %v1191_v44 = vld [vmem:[%s8201_s24 + $0x18d8] sm:$0xff]  ;;  %v2213_v10 = vld [vmem:[%s8201_s24 + $0x38c8] sm:$0xff] }
 0x334   : > { %7506 = vmatpush1.bf16.msra.mxu0 %v7505_v23  ;;  %6484 = vmatprep.subr.bf16.mxu1 %v6483_v4  ;;  %v7521_v23 = vpack.c.bf16 %v2194_v12, %v2192_v24  ;;  %v6499_v4 = vpack.c.bf16 %v1175_v13, %v1173_v42  ;;  %v2215_v24 = vld [vmem:[%s8201_s24 + $0x38d8] sm:$0xff]  ;;  %v1188_v13 = vld [vmem:[%s8201_s24 + $0x18c0] sm:$0xff] }
 0x335   : > { %7508 = vmatprep.subr.bf16.mxu0 %v7507_v38  ;;  %v7523_v38 = vpack.c.bf16 %v2199_v49, %v2197_v53  ;;  %v1190_v53 = vld [vmem:[%s8201_s24 + $0x18d0] sm:$0xff]  ;;  %v2212_v49 = vld [vmem:[%s8201_s24 + $0x38c0] sm:$0xff] }
 0x337   : > { %6486 = vmatpush1.bf16.msra.mxu1 %v6485_v57  ;;  %v6503_v57 = vpack.c.bf16 %v1179_v48, %v1177_v45  ;;  %v1192_v48 = vld [vmem:[%s8201_s24 + $0x18e0] sm:$0xff] }
 0x338   : > { %7510 = vmatpush1.bf16.msra.mxu0 %v7509_v20  ;;  %6488 = vmatprep.subr.bf16.mxu1 %v6487_v58  ;;  %v1176_v20 = vld [vmem:[%s8201_s24 + $0x1860] sm:$0xff]  ;;  %v1178_v58 = vld [vmem:[%s8201_s24 + $0x1870] sm:$0xff] }
 0x339   : > { %7512 = vmatprep.subr.bf16.mxu0 %v7511_v3  ;;  %v1181_v3 = vld [vmem:[%s8201_s24 + $0x1888] sm:$0xff]  ;;  %v6505_v2 = vpack.c.bf16 %v1178_v58, %v1176_v20  ;;  %v1199_v20 = vld [vmem:[%s8201_s24 + $0x1918] sm:$0xff] }
 0x33a   : > { %v2221_v58 = vld [vmem:[%s8201_s24 + $0x3908] sm:$0xff] }
 0x33b   : > { %6490 = vmatpush1.bf16.msra.mxu1 %v6489_v46  ;;  %v6507_v46 = vpack.c.bf16 %v1183_v61, %v1181_v3  ;;  %v1196_v61 = vld [vmem:[%s8201_s24 + $0x1900] sm:$0xff] }
 0x33c   : > { %7514 = vmatpush1.bf16.msra.mxu0 %v7513_v17  ;;  %6492 = vmatprep.subr.bf16.mxu1 %v6491_v54  ;;  %v1180_v17 = vld [vmem:[%s8201_s24 + $0x1880] sm:$0xff]  ;;  %v1182_v54 = vld [vmem:[%s8201_s24 + $0x1890] sm:$0xff] }
 0x33d   : > { %7516 = vmatprep.subr.bf16.mxu0 %v7515_v47  ;;  %v1185_v47 = vld [vmem:[%s8201_s24 + $0x18a8] sm:$0xff]  ;;  %v6509_v16 = vpack.c.bf16 %v1182_v54, %v1180_v17  ;;  %v1203_v17 = vld [vmem:[%s8201_s24 + $0x1938] sm:$0xff] }
 0x33e   : > { %3770 = vmatmul.mubr.f32.vlgmr.msra.gmra.mrb[0].mxu1 %v2607_v6  ;;  %v7533_v6 = vpack.c.bf16 %v2206_v63, %v2204_v1  ;;  %v6511_v7 = vpack.c.bf16 %v1187_v30, %v1185_v47  ;;  %v2225_v54 = vld [vmem:[%s8201_s24 + $0x3928] sm:$0xff]  ;;  %v2227_v1 = vld [vmem:[%s8201_s24 + $0x3938] sm:$0xff]  ;;  %v1200_v30 = vld [vmem:[%s8201_s24 + $0x1920] sm:$0xff] }
 0x33f   : > { %6494 = vmatpush1.bf16.msra.mxu1 %v6493_v34  ;;  %4906 = vmatmul.mubr.f32.vlgmr.msra.gmra.mrb[0].mxu0 %v2807_v19  ;;  %v2208_v34 = vld [vmem:[%s8201_s24 + $0x38a0] sm:$0xff]  ;;  %v7535_v19 = vpack.c.bf16 %v2211_v33, %v2209_v26  ;;  %v1202_v26 = vld [vmem:[%s8201_s24 + $0x1930] sm:$0xff] }
 0x340   : > { %7518 = vmatpush1.bf16.msra.mxu0 %v7517_v39  ;;  %6496 = vmatprep.subr.bf16.mxu1 %v6495_v31  ;;  %v2210_v39 = vld [vmem:[%s8201_s24 + $0x38b0] sm:$0xff]  ;;  %v1189_v31 = vld [vmem:[%s8201_s24 + $0x18c8] sm:$0xff]  ;;  %v2224_v33 = vld [vmem:[%s8201_s24 + $0x3920] sm:$0xff] }
 0x341   : > { %7520 = vmatprep.subr.bf16.mxu0 %v7519_v11  ;;  %3840 = vmatprep.mubr.f32.mxu1 %v10094_v14  ;;  %v6513_v11 = vpack.c.bf16 %v1186_v9, %v1184_v21  ;;  %v7537_v12 = vpack.c.bf16 %v2210_v39, %v2208_v34  ;;  %v6515_v42 = vpack.c.bf16 %v1191_v44, %v1189_v31  ;;  %v1207_v21 = vld [vmem:[%s8201_s24 + $0x1958] sm:$0xff]  ;;  %v2229_v9 = vld [vmem:[%s8201_s24 + $0x3948] sm:$0xff]  ;;  %v1204_v44 = vld [vmem:[%s8201_s24 + $0x1940] sm:$0xff] }
 0x342   : > { %4976 = vmatprep.mubr.f32.mxu0 %v10099_v41  ;;  %v2231_v34 = vld [vmem:[%s8201_s24 + $0x3958] sm:$0xff] }
 0x343   : > { %6498 = vmatpush1.bf16.msra.mxu1 %v6497_v18  ;;  %v7539_v18 = vpack.c.bf16 %v2215_v24, %v2213_v10  ;;  %v1206_v10 = vld [vmem:[%s8201_s24 + $0x1950] sm:$0xff]  ;;  %v2228_v24 = vld [vmem:[%s8201_s24 + $0x3940] sm:$0xff] }
 0x344   : > { %7522 = vmatpush1.bf16.msra.mxu0 %v7521_v23  ;;  %6500 = vmatprep.subr.bf16.mxu1 %v6499_v4  ;;  %v2214_v23 = vld [vmem:[%s8201_s24 + $0x38d0] sm:$0xff]  ;;  %v1193_v4 = vld [vmem:[%s8201_s24 + $0x18e8] sm:$0xff] }
 0x345   : > { %7524 = vmatprep.subr.bf16.mxu0 %v7523_v38  ;;  %v6517_v38 = vpack.c.bf16 %v1190_v53, %v1188_v13  ;;  %v7541_v40 = vpack.c.bf16 %v2214_v23, %v2212_v49  ;;  %v6519_v45 = vpack.c.bf16 %v1195_v8, %v1193_v4  ;;  %v1211_v13 = vld [vmem:[%s8201_s24 + $0x1978] sm:$0xff]  ;;  %v2233_v53 = vld [vmem:[%s8201_s24 + $0x3968] sm:$0xff]  ;;  %v1208_v8 = vld [vmem:[%s8201_s24 + $0x1960] sm:$0xff] }
 0x346   : > { %v2235_v49 = vld [vmem:[%s8201_s24 + $0x3978] sm:$0xff] }
 0x347   : > { %6502 = vmatpush1.bf16.msra.mxu1 %v6501_v55  ;;  %v7543_v55 = vpack.c.bf16 %v2219_v37, %v2217_v35  ;;  %v1210_v35 = vld [vmem:[%s8201_s24 + $0x1970] sm:$0xff]  ;;  %v2232_v37 = vld [vmem:[%s8201_s24 + $0x3960] sm:$0xff] }
 0x348   : > { %7526 = vmatpush1.bf16.msra.mxu0 %v7525_v25  ;;  %6504 = vmatprep.subr.bf16.mxu1 %v6503_v57  ;;  %v2218_v25 = vld [vmem:[%s8201_s24 + $0x38f0] sm:$0xff]  ;;  %v1197_v57 = vld [vmem:[%s8201_s24 + $0x1908] sm:$0xff] }
 0x349   : > { %7528 = vmatprep.subr.bf16.mxu0 %v7527_v60  ;;  %v6521_v60 = vpack.c.bf16 %v1194_v52, %v1192_v48  ;;  %v7545_v62 = vpack.c.bf16 %v2218_v25, %v2216_v5  ;;  %v6523_v3 = vpack.c.bf16 %v1199_v20, %v1197_v57  ;;  %v1215_v48 = vld [vmem:[%s8201_s24 + $0x1998] sm:$0xff]  ;;  %v2237_v52 = vld [vmem:[%s8201_s24 + $0x3988] sm:$0xff]  ;;  %v1212_v20 = vld [vmem:[%s8201_s24 + $0x1980] sm:$0xff] }
 0x34a   : > { %v2239_v5 = vld [vmem:[%s8201_s24 + $0x3998] sm:$0xff] }
 0x34b   : > { %6506 = vmatpush1.bf16.msra.mxu1 %v6505_v2  ;;  %v7547_v2 = vpack.c.bf16 %v2223_v59, %v2221_v58  ;;  %v1214_v58 = vld [vmem:[%s8201_s24 + $0x1990] sm:$0xff]  ;;  %v2236_v59 = vld [vmem:[%s8201_s24 + $0x3980] sm:$0xff] }
 0x34c   : > { %7530 = vmatpush1.bf16.msra.mxu0 %v7529_v27  ;;  %6508 = vmatprep.subr.bf16.mxu1 %v6507_v46  ;;  %v2222_v27 = vld [vmem:[%s8201_s24 + $0x3910] sm:$0xff]  ;;  %v1201_v46 = vld [vmem:[%s8201_s24 + $0x1928] sm:$0xff] }
 0x34d   : > { %7532 = vmatprep.subr.bf16.mxu0 %v7531_v29  ;;  %v6525_v29 = vpack.c.bf16 %v1198_v0, %v1196_v61  ;;  %v7549_v63 = vpack.c.bf16 %v2222_v27, %v2220_v51  ;;  %v6527_v47 = vpack.c.bf16 %v1203_v17, %v1201_v46  ;;  %v1219_v61 = vld [vmem:[%s8201_s24 + $0x19b8] sm:$0xff]  ;;  %v2241_v0 = vld [vmem:[%s8201_s24 + $0x39a8] sm:$0xff]  ;;  %v1216_v17 = vld [vmem:[%s8201_s24 + $0x19a0] sm:$0xff] }
 0x34e   : > { %v2243_v51 = vld [vmem:[%s8201_s24 + $0x39b8] sm:$0xff] }
 0x34f   : > { %6510 = vmatpush1.bf16.msra.mxu1 %v6509_v16  ;;  %v7551_v16 = vpack.c.bf16 %v2227_v1, %v2225_v54  ;;  %v1218_v54 = vld [vmem:[%s8201_s24 + $0x19b0] sm:$0xff]  ;;  %v2240_v1 = vld [vmem:[%s8201_s24 + $0x39a0] sm:$0xff] }
 0x350   : > { %7534 = vmatpush1.bf16.msra.mxu0 %v7533_v6  ;;  %6512 = vmatprep.subr.bf16.mxu1 %v6511_v7  ;;  %v2226_v6 = vld [vmem:[%s8201_s24 + $0x3930] sm:$0xff]  ;;  %v1205_v7 = vld [vmem:[%s8201_s24 + $0x1948] sm:$0xff] }
 0x351   : > { %7536 = vmatprep.subr.bf16.mxu0 %v7535_v19  ;;  %v6529_v19 = vpack.c.bf16 %v1202_v26, %v1200_v30  ;;  %v7553_v39 = vpack.c.bf16 %v2226_v6, %v2224_v33  ;;  %v6531_v31 = vpack.c.bf16 %v1207_v21, %v1205_v7  ;;  %v1223_v30 = vld [vmem:[%s8201_s24 + $0x19d8] sm:$0xff]  ;;  %v2245_v26 = vld [vmem:[%s8201_s24 + $0x39c8] sm:$0xff]  ;;  %v1220_v21 = vld [vmem:[%s8201_s24 + $0x19c0] sm:$0xff] }
 0x352   : > { %v2247_v33 = vld [vmem:[%s8201_s24 + $0x39d8] sm:$0xff] }
 0x353   : > { %6514 = vmatpush1.bf16.msra.mxu1 %v6513_v11  ;;  %v7555_v11 = vpack.c.bf16 %v2231_v34, %v2229_v9  ;;  %v1222_v9 = vld [vmem:[%s8201_s24 + $0x19d0] sm:$0xff]  ;;  %v2244_v34 = vld [vmem:[%s8201_s24 + $0x39c0] sm:$0xff] }
 0x354   : > { %7538 = vmatpush1.bf16.msra.mxu0 %v7537_v12  ;;  %6516 = vmatprep.subr.bf16.mxu1 %v6515_v42  ;;  %v2230_v12 = vld [vmem:[%s8201_s24 + $0x3950] sm:$0xff]  ;;  %v1209_v42 = vld [vmem:[%s8201_s24 + $0x1968] sm:$0xff] }
 0x355   : > { %7540 = vmatprep.subr.bf16.mxu0 %v7539_v18  ;;  %v6533_v18 = vpack.c.bf16 %v1206_v10, %v1204_v44  ;;  %v7557_v23 = vpack.c.bf16 %v2230_v12, %v2228_v24  ;;  %v6535_v4 = vpack.c.bf16 %v1211_v13, %v1209_v42  ;;  %v1227_v44 = vld [vmem:[%s8201_s24 + $0x19f8] sm:$0xff]  ;;  %v2249_v10 = vld [vmem:[%s8201_s24 + $0x39e8] sm:$0xff]  ;;  %v1224_v13 = vld [vmem:[%s8201_s24 + $0x19e0] sm:$0xff] }
 0x356   : > { %v2251_v24 = vld [vmem:[%s8201_s24 + $0x39f8] sm:$0xff] }
 0x357   : > { %6518 = vmatpush1.bf16.msra.mxu1 %v6517_v38  ;;  %v7559_v38 = vpack.c.bf16 %v2235_v49, %v2233_v53  ;;  %v1226_v53 = vld [vmem:[%s8201_s24 + $0x19f0] sm:$0xff]  ;;  %v2248_v49 = vld [vmem:[%s8201_s24 + $0x39e0] sm:$0xff] }
 0x358   : > { %7542 = vmatpush1.bf16.msra.mxu0 %v7541_v40  ;;  %6520 = vmatprep.subr.bf16.mxu1 %v6519_v45  ;;  %v2234_v40 = vld [vmem:[%s8201_s24 + $0x3970] sm:$0xff]  ;;  %v1213_v45 = vld [vmem:[%s8201_s24 + $0x1988] sm:$0xff] }
 0x359   : > { %7544 = vmatprep.subr.bf16.mxu0 %v7543_v55  ;;  %v6537_v55 = vpack.c.bf16 %v1210_v35, %v1208_v8  ;;  %v7561_v25 = vpack.c.bf16 %v2234_v40, %v2232_v37  ;;  %v6539_v57 = vpack.c.bf16 %v1215_v48, %v1213_v45  ;;  %v1231_v8 = vld [vmem:[%s8201_s24 + $0x1a18] sm:$0xff]  ;;  %v2253_v35 = vld [vmem:[%s8201_s24 + $0x3a08] sm:$0xff]  ;;  %v1228_v48 = vld [vmem:[%s8201_s24 + $0x1a00] sm:$0xff] }
 0x35a   : > { %v2255_v37 = vld [vmem:[%s8201_s24 + $0x3a18] sm:$0xff] }
 0x35b   : > { %6522 = vmatpush1.bf16.msra.mxu1 %v6521_v60  ;;  %v7563_v60 = vpack.c.bf16 %v2239_v5, %v2237_v52  ;;  %v1230_v52 = vld [vmem:[%s8201_s24 + $0x1a10] sm:$0xff]  ;;  %v2252_v5 = vld [vmem:[%s8201_s24 + $0x3a00] sm:$0xff] }
 0x35c   : > { %7546 = vmatpush1.bf16.msra.mxu0 %v7545_v62  ;;  %6524 = vmatprep.subr.bf16.mxu1 %v6523_v3  ;;  %v2238_v62 = vld [vmem:[%s8201_s24 + $0x3990] sm:$0xff]  ;;  %v1217_v3 = vld [vmem:[%s8201_s24 + $0x19a8] sm:$0xff] }
 0x35d   : > { %7548 = vmatprep.subr.bf16.mxu0 %v7547_v2  ;;  %v6541_v2 = vpack.c.bf16 %v1214_v58, %v1212_v20  ;;  %v7565_v27 = vpack.c.bf16 %v2238_v62, %v2236_v59  ;;  %v6543_v46 = vpack.c.bf16 %v1219_v61, %v1217_v3  ;;  %v1235_v20 = vld [vmem:[%s8201_s24 + $0x1a38] sm:$0xff]  ;;  %v10223_v58 = vrot.slane %v10064_v28, %v8330_v36  ;;  %v2257_v59 = vld [vmem:[%s8201_s24 + $0x3a28] sm:$0xff]  ;;  %v2256_v28 = vld [vmem:[%s8201_s24 + $0x3a20] sm:$0xff] }
 0x35e   : > { %v6557_v62 = vpack.c.bf16 %v1230_v52, %v1228_v48  ;;  %v10229_v3 = vrot.slane %v10069_v22, %v8330_v36  ;;  %v2658_v22 = vcombine.high %v10094_v14, %v10094_v14  ;;  %v1251_v48 = vld [vmem:[%s8201_s24 + $0x1ab8] sm:$0xff]  ;;  %v2273_v52 = vld [vmem:[%s8201_s24 + $0x3aa8] sm:$0xff] }
 0x35f   : > { %6526 = vmatpush1.bf16.msra.mxu1 %v6525_v29  ;;  %v7567_v29 = vpack.c.bf16 %v2243_v51, %v2241_v0  ;;  %v1232_v51 = vld [vmem:[%s8201_s24 + $0x1a20] sm:$0xff] }
 0x360   : > { %7550 = vmatpush1.bf16.msra.mxu0 %v7549_v63  ;;  %6528 = vmatprep.subr.bf16.mxu1 %v6527_v47  ;;  %v2242_v63 = vld [vmem:[%s8201_s24 + $0x39b0] sm:$0xff]  ;;  %v1221_v47 = vld [vmem:[%s8201_s24 + $0x19c8] sm:$0xff] }
 0x361   : > { %7552 = vmatprep.subr.bf16.mxu0 %v7551_v16  ;;  %v6545_v16 = vpack.c.bf16 %v1218_v54, %v1216_v17  ;;  %v7569_v6 = vpack.c.bf16 %v2242_v63, %v2240_v1  ;;  %v6547_v7 = vpack.c.bf16 %v1223_v30, %v1221_v47  ;;  %v1237_v17 = vld [vmem:[%s8201_s24 + $0x1a48] sm:$0xff]  ;;  %v1239_v54 = vld [vmem:[%s8201_s24 + $0x1a58] sm:$0xff]  ;;  %v2858_v63 = vcombine.high %v10099_v41, %v10099_v41 }
 0x362   : > { %v2261_v1 = vld [vmem:[%s8201_s24 + $0x3a48] sm:$0xff]  ;;  %v6563_v14 = vpack.c.bf16 %v1239_v54, %v1237_v17  ;;  %v1252_v54 = vld [vmem:[%s8201_s24 + $0x1ac0] sm:$0xff] }
 0x363   : > { %6530 = vmatpush1.bf16.msra.mxu1 %v6529_v19  ;;  %v7571_v19 = vpack.c.bf16 %v2247_v33, %v2245_v26  ;;  %v1236_v26 = vld [vmem:[%s8201_s24 + $0x1a40] sm:$0xff]  ;;  %v1238_v33 = vld [vmem:[%s8201_s24 + $0x1a50] sm:$0xff]  ;;  %v1241_v41 = vld [vmem:[%s8201_s24 + $0x1a68] sm:$0xff] }
 0x364   : > { %7554 = vmatpush1.bf16.msra.mxu0 %v7553_v39  ;;  %6532 = vmatprep.subr.bf16.mxu1 %v6531_v31  ;;  %v2246_v39 = vld [vmem:[%s8201_s24 + $0x39d0] sm:$0xff]  ;;  %v1225_v31 = vld [vmem:[%s8201_s24 + $0x19e8] sm:$0xff] }
 0x365   : > { %7556 = vmatprep.subr.bf16.mxu0 %v7555_v11  ;;  %v6549_v11 = vpack.c.bf16 %v1222_v9, %v1220_v21  ;;  %v7573_v12 = vpack.c.bf16 %v2246_v39, %v2244_v34  ;;  %v6551_v42 = vpack.c.bf16 %v1227_v44, %v1225_v31  ;;  %v1243_v21 = vld [vmem:[%s8201_s24 + $0x1a78] sm:$0xff]  ;;  %v2265_v9 = vld [vmem:[%s8201_s24 + $0x3a68] sm:$0xff]  ;;  %v1240_v44 = vld [vmem:[%s8201_s24 + $0x1a60] sm:$0xff] }
 0x366   : > { %v2267_v34 = vld [vmem:[%s8201_s24 + $0x3a78] sm:$0xff]  ;;  %v6567_v31 = vpack.c.bf16 %v1243_v21, %v1241_v41  ;;  %v1258_v41 = vld [vmem:[%s8201_s24 + $0x1af0] sm:$0xff]  ;;  %v2280_v21 = vld [vmem:[%s8201_s24 + $0x3ae0] sm:$0xff] }
 0x367   : > { %6534 = vmatpush1.bf16.msra.mxu1 %v6533_v18  ;;  %v7575_v18 = vpack.c.bf16 %v2251_v24, %v2249_v10  ;;  %v1242_v10 = vld [vmem:[%s8201_s24 + $0x1a70] sm:$0xff]  ;;  %v2264_v24 = vld [vmem:[%s8201_s24 + $0x3a60] sm:$0xff] }
 0x368   : > { %7558 = vmatpush1.bf16.msra.mxu0 %v7557_v23  ;;  %6536 = vmatprep.subr.bf16.mxu1 %v6535_v4  ;;  %v2250_v23 = vld [vmem:[%s8201_s24 + $0x39f0] sm:$0xff]  ;;  %v1229_v4 = vld [vmem:[%s8201_s24 + $0x1a08] sm:$0xff] }
 0x369   : > { %7560 = vmatprep.subr.bf16.mxu0 %v7559_v38  ;;  %v6553_v38 = vpack.c.bf16 %v1226_v53, %v1224_v13  ;;  %v7577_v40 = vpack.c.bf16 %v2250_v23, %v2248_v49  ;;  %v6555_v45 = vpack.c.bf16 %v1231_v8, %v1229_v4  ;;  %v1247_v13 = vld [vmem:[%s8201_s24 + $0x1a98] sm:$0xff]  ;;  %v2269_v53 = vld [vmem:[%s8201_s24 + $0x3a88] sm:$0xff]  ;;  %v1244_v8 = vld [vmem:[%s8201_s24 + $0x1a80] sm:$0xff] }
 0x36a   : > { %v2271_v49 = vld [vmem:[%s8201_s24 + $0x3a98] sm:$0xff] }
 0x36b   : > { %6538 = vmatpush1.bf16.msra.mxu1 %v6537_v55  ;;  %v7579_v55 = vpack.c.bf16 %v2255_v37, %v2253_v35  ;;  %v1246_v35 = vld [vmem:[%s8201_s24 + $0x1a90] sm:$0xff]  ;;  %v2268_v37 = vld [vmem:[%s8201_s24 + $0x3a80] sm:$0xff] }
 0x36c   : > { %7562 = vmatpush1.bf16.msra.mxu0 %v7561_v25  ;;  %6540 = vmatprep.subr.bf16.mxu1 %v6539_v57  ;;  %v2254_v25 = vld [vmem:[%s8201_s24 + $0x3a10] sm:$0xff]  ;;  %v1233_v57 = vld [vmem:[%s8201_s24 + $0x1a28] sm:$0xff] }
 0x36d   : > { %7564 = vmatprep.subr.bf16.mxu0 %v7563_v60  ;;  %v2259_v60 = vld [vmem:[%s8201_s24 + $0x3a38] sm:$0xff]  ;;  %v7581_v61 = vpack.c.bf16 %v2254_v25, %v2252_v5  ;;  %v6559_v0 = vpack.c.bf16 %v1235_v20, %v1233_v57  ;;  %v1248_v20 = vld [vmem:[%s8201_s24 + $0x1aa0] sm:$0xff] }
 0x36e   : > { %v2275_v5 = vld [vmem:[%s8201_s24 + $0x3ab8] sm:$0xff] }
 0x36f   : > { %6542 = vmatpush1.bf16.msra.mxu1 %v6541_v2  ;;  %v1234_v2 = vld [vmem:[%s8201_s24 + $0x1a30] sm:$0xff] }
 0x370   : > { %7566 = vmatpush1.bf16.msra.mxu0 %v7565_v27  ;;  %6544 = vmatprep.subr.bf16.mxu1 %v6543_v46  ;;  %v7583_v27 = vpack.c.bf16 %v2259_v60, %v2257_v59  ;;  %v2258_v46 = vld [vmem:[%s8201_s24 + $0x3a30] sm:$0xff]  ;;  %v6561_v47 = vpack.c.bf16 %v1234_v2, %v1232_v51  ;;  %v2272_v60 = vld [vmem:[%s8201_s24 + $0x3aa0] sm:$0xff]  ;;  %v1255_v51 = vld [vmem:[%s8201_s24 + $0x1ad8] sm:$0xff] }
 0x371   : > { %7568 = vmatprep.subr.bf16.mxu0 %v7567_v29  ;;  %v2263_v29 = vld [vmem:[%s8201_s24 + $0x3a58] sm:$0xff]  ;;  %v7585_v30 = vpack.c.bf16 %v2258_v46, %v2256_v28  ;;  %v1250_v59 = vld [vmem:[%s8201_s24 + $0x1ab0] sm:$0xff]  ;;  %v2277_v2 = vld [vmem:[%s8201_s24 + $0x3ac8] sm:$0xff] }
 0x372   : > { %v2279_v28 = vld [vmem:[%s8201_s24 + $0x3ad8] sm:$0xff] }
 0x373   : > { %6546 = vmatpush1.bf16.msra.mxu1 %v6545_v16  ;;  %v2260_v16 = vld [vmem:[%s8201_s24 + $0x3a40] sm:$0xff] }
 0x374   : > { %7570 = vmatpush1.bf16.msra.mxu0 %v7569_v6  ;;  %6548 = vmatprep.subr.bf16.mxu1 %v6547_v7  ;;  %v7587_v6 = vpack.c.bf16 %v2263_v29, %v2261_v1  ;;  %v2262_v7 = vld [vmem:[%s8201_s24 + $0x3a50] sm:$0xff]  ;;  %v2276_v1 = vld [vmem:[%s8201_s24 + $0x3ac0] sm:$0xff]  ;;  %v7603_v29 = vpack.c.bf16 %v2279_v28, %v2277_v2 }
 0x375   : > { %7572 = vmatprep.subr.bf16.mxu0 %v7571_v19  ;;  %v6565_v19 = vpack.c.bf16 %v1238_v33, %v1236_v26  ;;  %v7589_v39 = vpack.c.bf16 %v2262_v7, %v2260_v16  ;;  %v2283_v26 = vld [vmem:[%s8201_s24 + $0x3af8] sm:$0xff]  ;;  %v1256_v7 = vld [vmem:[%s8201_s24 + $0x1ae0] sm:$0xff]  ;;  %v2294_v28 = vld [vmem:[%s8201_s24 + $0x3b50] sm:$0xff] }
 0x377   : > { %6550 = vmatpush1.bf16.msra.mxu1 %v6549_v11  ;;  %v7591_v11 = vpack.c.bf16 %v2267_v34, %v2265_v9  ;;  %v2282_v34 = vld [vmem:[%s8201_s24 + $0x3af0] sm:$0xff] }
 0x378   : > { %7574 = vmatpush1.bf16.msra.mxu0 %v7573_v12  ;;  %6552 = vmatprep.subr.bf16.mxu1 %v6551_v42  ;;  %v2266_v12 = vld [vmem:[%s8201_s24 + $0x3a70] sm:$0xff]  ;;  %v1245_v42 = vld [vmem:[%s8201_s24 + $0x1a88] sm:$0xff] }
 0x379   : > { %7576 = vmatprep.subr.bf16.mxu0 %v7575_v18  ;;  %v6569_v18 = vpack.c.bf16 %v1242_v10, %v1240_v44  ;;  %v7593_v23 = vpack.c.bf16 %v2266_v12, %v2264_v24  ;;  %v6571_v4 = vpack.c.bf16 %v1247_v13, %v1245_v42  ;;  %v2287_v44 = vld [vmem:[%s8201_s24 + $0x3b18] sm:$0xff]  ;;  %v6585_v10 = vpack.c.bf16 %v1258_v41, %v1256_v7  ;;  %v1260_v12 = vld [vmem:[%s8201_s24 + $0x1b00] sm:$0xff]  ;;  %v1262_v42 = vld [vmem:[%s8201_s24 + $0x1b10] sm:$0xff] }
 0x37a   : > { %v7609_v24 = vpack.c.bf16 %v2282_v34, %v2280_v21  ;;  %v2284_v13 = vld [vmem:[%s8201_s24 + $0x3b00] sm:$0xff]  ;;  %v2303_v7 = vld [vmem:[%s8201_s24 + $0x3b98] sm:$0xff] }
 0x37b   : > { %6554 = vmatpush1.bf16.msra.mxu1 %v6553_v38  ;;  %v7595_v38 = vpack.c.bf16 %v2271_v49, %v2269_v53  ;;  %v2286_v49 = vld [vmem:[%s8201_s24 + $0x3b10] sm:$0xff]  ;;  %v1276_v34 = vld [vmem:[%s8201_s24 + $0x1b80] sm:$0xff] }
 0x37c   : > { %7578 = vmatpush1.bf16.msra.mxu0 %v7577_v40  ;;  %6556 = vmatprep.subr.bf16.mxu1 %v6555_v45  ;;  %v2270_v40 = vld [vmem:[%s8201_s24 + $0x3a90] sm:$0xff]  ;;  %v1249_v45 = vld [vmem:[%s8201_s24 + $0x1aa8] sm:$0xff] }
 0x37d   : > { %7580 = vmatprep.subr.bf16.mxu0 %v7579_v55  ;;  %v6573_v55 = vpack.c.bf16 %v1246_v35, %v1244_v8  ;;  %v7597_v25 = vpack.c.bf16 %v2270_v40, %v2268_v37  ;;  %v6575_v57 = vpack.c.bf16 %v1251_v48, %v1249_v45  ;;  %v2291_v8 = vld [vmem:[%s8201_s24 + $0x3b38] sm:$0xff]  ;;  %v6589_v35 = vpack.c.bf16 %v1262_v42, %v1260_v12  ;;  %v1264_v40 = vld [vmem:[%s8201_s24 + $0x1b20] sm:$0xff]  ;;  %v1266_v45 = vld [vmem:[%s8201_s24 + $0x1b30] sm:$0xff] }
 0x37e   : > { %3841 = vmatmul.mubr.f32.vlgmr.msra.gmra.mrb[0].mxu1 %v10223_v58  ;;  %v7613_v37 = vpack.c.bf16 %v2286_v49, %v2284_v13  ;;  %v2288_v48 = vld [vmem:[%s8201_s24 + $0x3b20] sm:$0xff]  ;;  %v2307_v12 = vld [vmem:[%s8201_s24 + $0x3bb8] sm:$0xff] }
 0x37f   : > { %6558 = vmatpush1.bf16.msra.mxu1 %v6557_v62  ;;  %4977 = vmatmul.mubr.f32.vlgmr.msra.gmra.mrb[0].mxu0 %v10229_v3  ;;  %v7599_v62 = vpack.c.bf16 %v2275_v5, %v2273_v52  ;;  %v2290_v5 = vld [vmem:[%s8201_s24 + $0x3b30] sm:$0xff]  ;;  %v1280_v49 = vld [vmem:[%s8201_s24 + $0x1ba0] sm:$0xff] }
 0x380   : > { %7582 = vmatpush1.bf16.msra.mxu0 %v7581_v61  ;;  %6560 = vmatprep.subr.bf16.mxu1 %v6559_v0  ;;  %v2274_v61 = vld [vmem:[%s8201_s24 + $0x3ab0] sm:$0xff]  ;;  %v1253_v0 = vld [vmem:[%s8201_s24 + $0x1ac8] sm:$0xff] }
 0x381   : > { %7584 = vmatprep.subr.bf16.mxu0 %v7583_v27  ;;  %3911 = vmatprep.mubr.f32.mxu1 %v2658_v22  ;;  %v6577_v27 = vpack.c.bf16 %v1250_v59, %v1248_v20  ;;  %v7601_v46 = vpack.c.bf16 %v2274_v61, %v2272_v60  ;;  %v6579_v17 = vpack.c.bf16 %v1255_v51, %v1253_v0  ;;  %v1254_v22 = vld [vmem:[%s8201_s24 + $0x1ad0] sm:$0xff]  ;;  %v2295_v20 = vld [vmem:[%s8201_s24 + $0x3b58] sm:$0xff]  ;;  %v1268_v61 = vld [vmem:[%s8201_s24 + $0x1b40] sm:$0xff] }
 0x382   : > { %5047 = vmatprep.mubr.f32.mxu0 %v2858_v63  ;;  %v2278_v63 = vld [vmem:[%s8201_s24 + $0x3ad0] sm:$0xff]  ;;  %v6581_v33 = vpack.c.bf16 %v1254_v22, %v1252_v54  ;;  %v6593_v59 = vpack.c.bf16 %v1266_v45, %v1264_v40  ;;  %v7617_v60 = vpack.c.bf16 %v2290_v5, %v2288_v48  ;;  %v2292_v51 = vld [vmem:[%s8201_s24 + $0x3b40] sm:$0xff]  ;;  %v2299_v54 = vld [vmem:[%s8201_s24 + $0x3b78] sm:$0xff] }
 0x383   : > { %6562 = vmatpush1.bf16.msra.mxu1 %v6561_v47  ;;  %v1257_v47 = vld [vmem:[%s8201_s24 + $0x1ae8] sm:$0xff]  ;;  %v7605_v16 = vpack.c.bf16 %v2278_v63, %v2276_v1  ;;  %v1270_v0 = vld [vmem:[%s8201_s24 + $0x1b50] sm:$0xff]  ;;  %v7621_v1 = vpack.c.bf16 %v2294_v28, %v2292_v51  ;;  %v1272_v63 = vld [vmem:[%s8201_s24 + $0x1b60] sm:$0xff]  ;;  %v2811_v51 = vcombine.high %v10041_v32, %v10043_v50 }
 0x384   : > { %7586 = vmatpush1.bf16.msra.mxu0 %v7585_v30  ;;  %6564 = vmatprep.subr.bf16.mxu1 %v6563_v14  ;;  %v1259_v30 = vld [vmem:[%s8201_s24 + $0x1af8] sm:$0xff]  ;;  %v2281_v14 = vld [vmem:[%s8201_s24 + $0x3ae8] sm:$0xff]  ;;  %v6597_v22 = vpack.c.bf16 %v1270_v0, %v1268_v61  ;;  %v1284_v5 = vld [vmem:[%s8201_s24 + $0x1bc0] sm:$0xff] }
 0x385   : > { %7588 = vmatprep.subr.bf16.mxu0 %v7587_v6  ;;  %v6583_v6 = vpack.c.bf16 %v1259_v30, %v1257_v47  ;;  %v7607_v9 = vpack.c.bf16 %v2283_v26, %v2281_v14  ;;  %v1274_v47 = vld [vmem:[%s8201_s24 + $0x1b70] sm:$0xff]  ;;  %v2296_v30 = vld [vmem:[%s8201_s24 + $0x3b60] sm:$0xff]  ;;  %v2311_v40 = vld [vmem:[%s8201_s24 + $0x3bd8] sm:$0xff] }
 0x386   : > { %v2298_v26 = vld [vmem:[%s8201_s24 + $0x3b70] sm:$0xff]  ;;  %v6601_v41 = vpack.c.bf16 %v1274_v47, %v1272_v63  ;;  %v2313_v61 = vld [vmem:[%s8201_s24 + $0x3be8] sm:$0xff]  ;;  %v2315_v0 = vld [vmem:[%s8201_s24 + $0x3bf8] sm:$0xff]  ;;  %v10365_v63 = vrot.slane %v2811_v51, %v8330_v36 }
 0x387   : > { %6566 = vmatpush1.bf16.msra.mxu1 %v6565_v19  ;;  %v1261_v19 = vld [vmem:[%s8201_s24 + $0x1b08] sm:$0xff]  ;;  %v7625_v21 = vpack.c.bf16 %v2298_v26, %v2296_v30  ;;  %v1292_v26 = vld [vmem:[%s8201_s24 + $0x1c00] sm:$0xff] }
 0x388   : > { %7590 = vmatpush1.bf16.msra.mxu0 %v7589_v39  ;;  %6568 = vmatprep.subr.bf16.mxu1 %v6567_v31  ;;  %v1263_v39 = vld [vmem:[%s8201_s24 + $0x1b18] sm:$0xff]  ;;  %v2285_v31 = vld [vmem:[%s8201_s24 + $0x3b08] sm:$0xff]  ;;  %v2328_v51 = vld [vmem:[%s8201_s24 + $0x3c60] sm:$0xff] }
 0x389   : > { %7592 = vmatprep.subr.bf16.mxu0 %v7591_v11  ;;  %v6587_v11 = vpack.c.bf16 %v1263_v39, %v1261_v19  ;;  %v7611_v53 = vpack.c.bf16 %v2287_v44, %v2285_v31  ;;  %v1278_v19 = vld [vmem:[%s8201_s24 + $0x1b90] sm:$0xff]  ;;  %v2300_v39 = vld [vmem:[%s8201_s24 + $0x3b80] sm:$0xff]  ;;  %v2317_v50 = vld [vmem:[%s8201_s24 + $0x3c08] sm:$0xff] }
 0x38a   : > { %v2302_v44 = vld [vmem:[%s8201_s24 + $0x3b90] sm:$0xff]  ;;  %v6605_v42 = vpack.c.bf16 %v1278_v19, %v1276_v34  ;;  %v2656_v34 = vcombine.high %v10223_v58, %v10223_v58  ;;  %v2321_v19 = vld [vmem:[%s8201_s24 + $0x3c28] sm:$0xff]  ;;  %v1296_v58 = vld [vmem:[%s8201_s24 + $0x1c20] sm:$0xff] }
 0x38b   : > { %6570 = vmatpush1.bf16.msra.mxu1 %v6569_v18  ;;  %v1265_v18 = vld [vmem:[%s8201_s24 + $0x1b28] sm:$0xff]  ;;  %v7629_v13 = vpack.c.bf16 %v2302_v44, %v2300_v39  ;;  %v2323_v39 = vld [vmem:[%s8201_s24 + $0x3c38] sm:$0xff] }
 0x38c   : > { %7594 = vmatpush1.bf16.msra.mxu0 %v7593_v23  ;;  %6572 = vmatprep.subr.bf16.mxu1 %v6571_v4  ;;  %v1267_v23 = vld [vmem:[%s8201_s24 + $0x1b38] sm:$0xff]  ;;  %v2289_v4 = vld [vmem:[%s8201_s24 + $0x3b28] sm:$0xff] }
 0x38d   : > { %7596 = vmatprep.subr.bf16.mxu0 %v7595_v38  ;;  %v6591_v38 = vpack.c.bf16 %v1267_v23, %v1265_v18  ;;  %v7615_v52 = vpack.c.bf16 %v2291_v8, %v2289_v4  ;;  %v1282_v18 = vld [vmem:[%s8201_s24 + $0x1bb0] sm:$0xff]  ;;  %v2304_v23 = vld [vmem:[%s8201_s24 + $0x3ba0] sm:$0xff] }
 0x38e   : > { %v2306_v8 = vld [vmem:[%s8201_s24 + $0x3bb0] sm:$0xff]  ;;  %v6609_v45 = vpack.c.bf16 %v1282_v18, %v1280_v49  ;;  %v1301_v49 = vld [vmem:[%s8201_s24 + $0x1c48] sm:$0xff]  ;;  %v1303_v18 = vld [vmem:[%s8201_s24 + $0x1c58] sm:$0xff] }
 0x38f   : > { %6574 = vmatpush1.bf16.msra.mxu1 %v6573_v55  ;;  %v1269_v55 = vld [vmem:[%s8201_s24 + $0x1b48] sm:$0xff]  ;;  %v7633_v48 = vpack.c.bf16 %v2306_v8, %v2304_v23 }
 0x390   : > { %7598 = vmatpush1.bf16.msra.mxu0 %v7597_v25  ;;  %6576 = vmatprep.subr.bf16.mxu1 %v6575_v57  ;;  %v1271_v25 = vld [vmem:[%s8201_s24 + $0x1b58] sm:$0xff]  ;;  %v2293_v57 = vld [vmem:[%s8201_s24 + $0x3b48] sm:$0xff] }
 0x391   : > { %7600 = vmatprep.subr.bf16.mxu0 %v7599_v62  ;;  %v6595_v62 = vpack.c.bf16 %v1271_v25, %v1269_v55  ;;  %v7619_v2 = vpack.c.bf16 %v2295_v20, %v2293_v57  ;;  %v1286_v55 = vld [vmem:[%s8201_s24 + $0x1bd0] sm:$0xff]  ;;  %v2308_v25 = vld [vmem:[%s8201_s24 + $0x3bc0] sm:$0xff] }
 0x392   : > { %v2310_v20 = vld [vmem:[%s8201_s24 + $0x3bd0] sm:$0xff] }
 0x393   : > { %6578 = vmatpush1.bf16.msra.mxu1 %v6577_v27  ;;  %v1273_v27 = vld [vmem:[%s8201_s24 + $0x1b68] sm:$0xff]  ;;  %v7637_v28 = vpack.c.bf16 %v2310_v20, %v2308_v25  ;;  %v1307_v25 = vld [vmem:[%s8201_s24 + $0x1c78] sm:$0xff] }
 0x394   : > { %7602 = vmatpush1.bf16.msra.mxu0 %v7601_v46  ;;  %6580 = vmatprep.subr.bf16.mxu1 %v6579_v17  ;;  %v1275_v46 = vld [vmem:[%s8201_s24 + $0x1b78] sm:$0xff]  ;;  %v2297_v17 = vld [vmem:[%s8201_s24 + $0x3b68] sm:$0xff] }
 0x395   : > { %7604 = vmatprep.subr.bf16.mxu0 %v7603_v29  ;;  %v6599_v29 = vpack.c.bf16 %v1275_v46, %v1273_v27  ;;  %v7623_v14 = vpack.c.bf16 %v2299_v54, %v2297_v17  ;;  %v1288_v46 = vld [vmem:[%s8201_s24 + $0x1be0] sm:$0xff]  ;;  %v1290_v17 = vld [vmem:[%s8201_s24 + $0x1bf0] sm:$0xff]  ;;  %v2331_v20 = vld [vmem:[%s8201_s24 + $0x3c78] sm:$0xff] }
 0x396   : > { %v2312_v54 = vld [vmem:[%s8201_s24 + $0x3be0] sm:$0xff]  ;;  %v6617_v47 = vpack.c.bf16 %v1290_v17, %v1288_v46  ;;  %v1311_v46 = vld [vmem:[%s8201_s24 + $0x1c98] sm:$0xff]  ;;  %v2333_v17 = vld [vmem:[%s8201_s24 + $0x3c88] sm:$0xff] }
 0x397   : > { %6582 = vmatpush1.bf16.msra.mxu1 %v6581_v33  ;;  %v1277_v33 = vld [vmem:[%s8201_s24 + $0x1b88] sm:$0xff] }
 0x398   : > { %7606 = vmatpush1.bf16.msra.mxu0 %v7605_v16  ;;  %6584 = vmatprep.subr.bf16.mxu1 %v6583_v6  ;;  %v1279_v16 = vld [vmem:[%s8201_s24 + $0x1b98] sm:$0xff]  ;;  %v2301_v6 = vld [vmem:[%s8201_s24 + $0x3b88] sm:$0xff] }
 0x399   : > { %7608 = vmatprep.subr.bf16.mxu0 %v7607_v9  ;;  %v6603_v9 = vpack.c.bf16 %v1279_v16, %v1277_v33  ;;  %v7627_v31 = vpack.c.bf16 %v2303_v7, %v2301_v6  ;;  %v1294_v33 = vld [vmem:[%s8201_s24 + $0x1c10] sm:$0xff]  ;;  %v2316_v16 = vld [vmem:[%s8201_s24 + $0x3c00] sm:$0xff] }
 0x39a   : > { %v2318_v7 = vld [vmem:[%s8201_s24 + $0x3c10] sm:$0xff]  ;;  %v6621_v44 = vpack.c.bf16 %v1294_v33, %v1292_v26  ;;  %v1315_v26 = vld [vmem:[%s8201_s24 + $0x1cb8] sm:$0xff]  ;;  %v2337_v33 = vld [vmem:[%s8201_s24 + $0x3ca8] sm:$0xff] }
 0x39b   : > { %6586 = vmatpush1.bf16.msra.mxu1 %v6585_v10  ;;  %v1281_v10 = vld [vmem:[%s8201_s24 + $0x1ba8] sm:$0xff] }
 0x39c   : > { %7610 = vmatpush1.bf16.msra.mxu0 %v7609_v24  ;;  %6588 = vmatprep.subr.bf16.mxu1 %v6587_v11  ;;  %v1283_v24 = vld [vmem:[%s8201_s24 + $0x1bb8] sm:$0xff]  ;;  %v2305_v11 = vld [vmem:[%s8201_s24 + $0x3ba8] sm:$0xff] }
 0x39d   : > { %7612 = vmatprep.subr.bf16.mxu0 %v7611_v53  ;;  %v6607_v53 = vpack.c.bf16 %v1283_v24, %v1281_v10  ;;  %v7631_v4 = vpack.c.bf16 %v2307_v12, %v2305_v11  ;;  %v2856_v10 = vcombine.high %v10229_v3, %v10229_v3  ;;  %v7645_v24 = vpack.c.bf16 %v2318_v7, %v2316_v16  ;;  %v1298_v12 = vld [vmem:[%s8201_s24 + $0x1c30] sm:$0xff]  ;;  %v2325_v3 = vld [vmem:[%s8201_s24 + $0x3c48] sm:$0xff]  ;;  %v2339_v16 = vld [vmem:[%s8201_s24 + $0x3cb8] sm:$0xff] }
 0x39f   : > { %6590 = vmatpush1.bf16.msra.mxu1 %v6589_v35  ;;  %v1285_v35 = vld [vmem:[%s8201_s24 + $0x1bc8] sm:$0xff] }
 0x3a0   : > { %7614 = vmatpush1.bf16.msra.mxu0 %v7613_v37  ;;  %6592 = vmatprep.subr.bf16.mxu1 %v6591_v38  ;;  %v1287_v37 = vld [vmem:[%s8201_s24 + $0x1bd8] sm:$0xff]  ;;  %v2309_v38 = vld [vmem:[%s8201_s24 + $0x3bc8] sm:$0xff] }
 0x3a1   : > { %7616 = vmatprep.subr.bf16.mxu0 %v7615_v52  ;;  %v6611_v52 = vpack.c.bf16 %v1287_v37, %v1285_v35  ;;  %v7635_v57 = vpack.c.bf16 %v2311_v40, %v2309_v38  ;;  %v6625_v35 = vpack.c.bf16 %v1298_v12, %v1296_v58  ;;  %v6627_v38 = vpack.c.bf16 %v1303_v18, %v1301_v49  ;;  %v1300_v40 = vld [vmem:[%s8201_s24 + $0x1c40] sm:$0xff]  ;;  %v2342_v18 = vld [vmem:[%s8201_s24 + $0x3cd0] sm:$0xff] }
 0x3a3   : > { %6594 = vmatpush1.bf16.msra.mxu1 %v6593_v59  ;;  %v1289_v59 = vld [vmem:[%s8201_s24 + $0x1be8] sm:$0xff] }
 0x3a4   : > { %7618 = vmatpush1.bf16.msra.mxu0 %v7617_v60  ;;  %6596 = vmatprep.subr.bf16.mxu1 %v6595_v62  ;;  %v1291_v60 = vld [vmem:[%s8201_s24 + $0x1bf8] sm:$0xff]  ;;  %v2611_v62 = vcombine.high %v10035_v43, %v10037_v56  ;;  %v7639_v43 = vpack.c.bf16 %v2315_v0, %v2313_v61  ;;  %v2314_v56 = vld [vmem:[%s8201_s24 + $0x3bf0] sm:$0xff]  ;;  %v1304_v61 = vld [vmem:[%s8201_s24 + $0x1c60] sm:$0xff] }
 0x3a5   : > { %7620 = vmatprep.subr.bf16.mxu0 %v7619_v2  ;;  %v6613_v2 = vpack.c.bf16 %v1286_v55, %v1284_v5  ;;  %v6615_v27 = vpack.c.bf16 %v1291_v60, %v1289_v59  ;;  %v7641_v30 = vpack.c.bf16 %v2314_v56, %v2312_v54  ;;  %v2326_v5 = vld [vmem:[%s8201_s24 + $0x3c50] sm:$0xff]  ;;  %v1305_v55 = vld [vmem:[%s8201_s24 + $0x1c68] sm:$0xff]  ;;  %v2335_v54 = vld [vmem:[%s8201_s24 + $0x3c98] sm:$0xff] }
 0x3a6   : > { %v10360_v32 = vrot.slane %v2611_v62, %v8330_v36  ;;  %v6631_v62 = vpack.c.bf16 %v1307_v25, %v1305_v55  ;;  %v1306_v0 = vld [vmem:[%s8201_s24 + $0x1c70] sm:$0xff] }
 0x3a7   : > { %6598 = vmatpush1.bf16.msra.mxu1 %v6597_v22  ;;  %v1293_v22 = vld [vmem:[%s8201_s24 + $0x1c08] sm:$0xff]  ;;  %v2346_v25 = vld [vmem:[%s8201_s24 + $0x3cf0] sm:$0xff] }
 0x3a8   : > { %7622 = vmatpush1.bf16.msra.mxu0 %v7621_v1  ;;  %6600 = vmatprep.subr.bf16.mxu1 %v6599_v29  ;;  %v1295_v1 = vld [vmem:[%s8201_s24 + $0x1c18] sm:$0xff] }
 0x3a9   : > { %7624 = vmatprep.subr.bf16.mxu0 %v7623_v14  ;;  %v2319_v29 = vld [vmem:[%s8201_s24 + $0x3c18] sm:$0xff]  ;;  %v6619_v14 = vpack.c.bf16 %v1295_v1, %v1293_v22  ;;  %v1308_v1 = vld [vmem:[%s8201_s24 + $0x1c80] sm:$0xff] }
 0x3aa   : > { %v7643_v6 = vpack.c.bf16 %v2319_v29, %v2317_v50  ;;  %v1310_v50 = vld [vmem:[%s8201_s24 + $0x1c90] sm:$0xff]  ;;  %v2332_v29 = vld [vmem:[%s8201_s24 + $0x3c80] sm:$0xff] }
 0x3ab   : > { %6602 = vmatpush1.bf16.msra.mxu1 %v6601_v41  ;;  %v1297_v41 = vld [vmem:[%s8201_s24 + $0x1c28] sm:$0xff] }
 0x3ac   : > { %7626 = vmatpush1.bf16.msra.mxu0 %v7625_v21  ;;  %6604 = vmatprep.subr.bf16.mxu1 %v6603_v9  ;;  %v1299_v21 = vld [vmem:[%s8201_s24 + $0x1c38] sm:$0xff]  ;;  %v2627_v9 = vcombine.high %v10360_v32, %v10360_v32 }
 0x3ad   : > { %7628 = vmatprep.subr.bf16.mxu0 %v7627_v31  ;;  %v2827_v31 = vcombine.high %v10365_v63, %v10365_v63  ;;  %v6623_v11 = vpack.c.bf16 %v1299_v21, %v1297_v41  ;;  %v1312_v21 = vld [vmem:[%s8201_s24 + $0x1ca0] sm:$0xff] }
 0x3ae   : > { %v10390_v23 = vrot.slane %v2627_v9, %v8330_v36  ;;  %v1314_v9 = vld [vmem:[%s8201_s24 + $0x1cb0] sm:$0xff] }
 0x3af   : > { %6606 = vmatpush1.bf16.msra.mxu1 %v6605_v42  ;;  %v2320_v42 = vld [vmem:[%s8201_s24 + $0x3c20] sm:$0xff]  ;;  %v10395_v8 = vrot.slane %v2827_v31, %v8330_v36  ;;  %v1317_v31 = vld [vmem:[%s8201_s24 + $0x1cc8] sm:$0xff] }
 0x3b0   : > { %7630 = vmatpush1.bf16.msra.mxu0 %v7629_v13  ;;  %6608 = vmatprep.subr.bf16.mxu1 %v6607_v53  ;;  %v7647_v13 = vpack.c.bf16 %v2323_v39, %v2321_v19  ;;  %v2322_v53 = vld [vmem:[%s8201_s24 + $0x3c30] sm:$0xff]  ;;  %v7663_v19 = vpack.c.bf16 %v2339_v16, %v2337_v33  ;;  %v1333_v33 = vld [vmem:[%s8201_s24 + $0x1d48] sm:$0xff]  ;;  %v1335_v16 = vld [vmem:[%s8201_s24 + $0x1d58] sm:$0xff] }
 0x3b1   : > { %7632 = vmatprep.subr.bf16.mxu0 %v7631_v4  ;;  %v2327_v4 = vld [vmem:[%s8201_s24 + $0x3c58] sm:$0xff]  ;;  %v7649_v37 = vpack.c.bf16 %v2322_v53, %v2320_v42  ;;  %v2338_v39 = vld [vmem:[%s8201_s24 + $0x3cb0] sm:$0xff]  ;;  %v1316_v42 = vld [vmem:[%s8201_s24 + $0x1cc0] sm:$0xff] }
 0x3b2   : > { %v2340_v53 = vld [vmem:[%s8201_s24 + $0x3cc0] sm:$0xff] }
 0x3b3   : > { %6610 = vmatpush1.bf16.msra.mxu1 %v6609_v45  ;;  %v1302_v45 = vld [vmem:[%s8201_s24 + $0x1c50] sm:$0xff] }
 0x3b4   : > { %7634 = vmatpush1.bf16.msra.mxu0 %v7633_v48  ;;  %6612 = vmatprep.subr.bf16.mxu1 %v6611_v52  ;;  %v2324_v48 = vld [vmem:[%s8201_s24 + $0x3c40] sm:$0xff]  ;;  %v7651_v52 = vpack.c.bf16 %v2327_v4, %v2325_v3  ;;  %v6629_v59 = vpack.c.bf16 %v1302_v45, %v1300_v40  ;;  %v1321_v3 = vld [vmem:[%s8201_s24 + $0x1ce8] sm:$0xff]  ;;  %v1323_v4 = vld [vmem:[%s8201_s24 + $0x1cf8] sm:$0xff]  ;;  %v7669_v40 = vpack.c.bf16 %v2342_v18, %v2340_v53 }
 0x3b5   : > { %7636 = vmatprep.subr.bf16.mxu0 %v7635_v57  ;;  %v2329_v57 = vld [vmem:[%s8201_s24 + $0x3c68] sm:$0xff]  ;;  %v7653_v60 = vpack.c.bf16 %v2326_v5, %v2324_v48  ;;  %v6647_v45 = vpack.c.bf16 %v1323_v4, %v1321_v3  ;;  %v1320_v48 = vld [vmem:[%s8201_s24 + $0x1ce0] sm:$0xff]  ;;  %v2362_v4 = vld [vmem:[%s8201_s24 + $0x3d70] sm:$0xff] }
 0x3b6   : > { %v2344_v5 = vld [vmem:[%s8201_s24 + $0x3ce0] sm:$0xff] }
 0x3b7   : > { %6614 = vmatpush1.bf16.msra.mxu1 %v6613_v2  ;;  %v7655_v2 = vpack.c.bf16 %v2331_v20, %v2329_v57  ;;  %v1325_v57 = vld [vmem:[%s8201_s24 + $0x1d08] sm:$0xff]  ;;  %v1327_v20 = vld [vmem:[%s8201_s24 + $0x1d18] sm:$0xff]  ;;  %v1336_v53 = vld [vmem:[%s8201_s24 + $0x1d60] sm:$0xff] }
 0x3b8   : > { %7638 = vmatpush1.bf16.msra.mxu0 %v7637_v28  ;;  %6616 = vmatprep.subr.bf16.mxu1 %v6615_v27  ;;  %v2330_v28 = vld [vmem:[%s8201_s24 + $0x3c70] sm:$0xff]  ;;  %v1309_v27 = vld [vmem:[%s8201_s24 + $0x1c88] sm:$0xff]  ;;  %v2360_v18 = vld [vmem:[%s8201_s24 + $0x3d60] sm:$0xff] }
 0x3b9   : > { %7640 = vmatprep.subr.bf16.mxu0 %v7639_v43  ;;  %v6633_v43 = vpack.c.bf16 %v1306_v0, %v1304_v61  ;;  %v7657_v56 = vpack.c.bf16 %v2330_v28, %v2328_v51  ;;  %v6635_v22 = vpack.c.bf16 %v1311_v46, %v1309_v27  ;;  %v7673_v61 = vpack.c.bf16 %v2346_v25, %v2344_v5  ;;  %v1324_v51 = vld [vmem:[%s8201_s24 + $0x1d00] sm:$0xff]  ;;  %v2350_v46 = vld [vmem:[%s8201_s24 + $0x3d10] sm:$0xff] }
 0x3ba   : > { %v6651_v0 = vpack.c.bf16 %v1327_v20, %v1325_v57  ;;  %v2348_v28 = vld [vmem:[%s8201_s24 + $0x3d00] sm:$0xff]  ;;  %v2366_v20 = vld [vmem:[%s8201_s24 + $0x3d90] sm:$0xff] }
 0x3bb   : > { %6618 = vmatpush1.bf16.msra.mxu1 %v6617_v47  ;;  %v7659_v47 = vpack.c.bf16 %v2335_v54, %v2333_v17  ;;  %v1329_v17 = vld [vmem:[%s8201_s24 + $0x1d28] sm:$0xff]  ;;  %v1331_v54 = vld [vmem:[%s8201_s24 + $0x1d38] sm:$0xff]  ;;  %v1340_v5 = vld [vmem:[%s8201_s24 + $0x1d80] sm:$0xff] }
 0x3bc   : > { %7642 = vmatpush1.bf16.msra.mxu0 %v7641_v30  ;;  %6620 = vmatprep.subr.bf16.mxu1 %v6619_v14  ;;  %v2334_v30 = vld [vmem:[%s8201_s24 + $0x3c90] sm:$0xff]  ;;  %v1313_v14 = vld [vmem:[%s8201_s24 + $0x1ca8] sm:$0xff]  ;;  %v2364_v25 = vld [vmem:[%s8201_s24 + $0x3d80] sm:$0xff] }
 0x3bd   : > { %7644 = vmatprep.subr.bf16.mxu0 %v7643_v6  ;;  %v6637_v6 = vpack.c.bf16 %v1310_v50, %v1308_v1  ;;  %v7661_v7 = vpack.c.bf16 %v2334_v30, %v2332_v29  ;;  %v6639_v41 = vpack.c.bf16 %v1315_v26, %v1313_v14  ;;  %v7677_v1 = vpack.c.bf16 %v2350_v46, %v2348_v28  ;;  %v1328_v29 = vld [vmem:[%s8201_s24 + $0x1d20] sm:$0xff]  ;;  %v2354_v26 = vld [vmem:[%s8201_s24 + $0x3d30] sm:$0xff] }
 0x3be   : > { %3912 = vmatmul.mubr.f32.vlgmr.msra.gmra.mrb[0].mxu1 %v2656_v34  ;;  %v2336_v34 = vld [vmem:[%s8201_s24 + $0x3ca0] sm:$0xff]  ;;  %v6655_v50 = vpack.c.bf16 %v1331_v54, %v1329_v17  ;;  %v2370_v54 = vld [vmem:[%s8201_s24 + $0x3db0] sm:$0xff] }
 0x3bf   : > { %6622 = vmatpush1.bf16.msra.mxu1 %v6621_v44  ;;  %5048 = vmatmul.mubr.f32.vlgmr.msra.gmra.mrb[0].mxu0 %v2856_v10  ;;  %v1319_v44 = vld [vmem:[%s8201_s24 + $0x1cd8] sm:$0xff]  ;;  %v2341_v10 = vld [vmem:[%s8201_s24 + $0x3cc8] sm:$0xff]  ;;  %v7665_v58 = vpack.c.bf16 %v2338_v39, %v2336_v34  ;;  %v2352_v30 = vld [vmem:[%s8201_s24 + $0x3d20] sm:$0xff] }
 0x3c0   : > { %7646 = vmatpush1.bf16.msra.mxu0 %v7645_v24  ;;  %6624 = vmatprep.subr.bf16.mxu1 %v6623_v11  ;;  %v2343_v24 = vld [vmem:[%s8201_s24 + $0x3cd8] sm:$0xff]  ;;  %v6641_v11 = vpack.c.bf16 %v1314_v9, %v1312_v21  ;;  %v6643_v12 = vpack.c.bf16 %v1319_v44, %v1317_v31  ;;  %v7681_v21 = vpack.c.bf16 %v2354_v26, %v2352_v30  ;;  %v1332_v34 = vld [vmem:[%s8201_s24 + $0x1d40] sm:$0xff]  ;;  %v2358_v44 = vld [vmem:[%s8201_s24 + $0x3d50] sm:$0xff] }
 0x3c1   : > { %7648 = vmatprep.subr.bf16.mxu0 %v7647_v13  ;;  %3982 = vmatprep.mubr.f32.mxu1 %v10390_v23  ;;  %v1318_v13 = vld [vmem:[%s8201_s24 + $0x1cd0] sm:$0xff]  ;;  %v7667_v49 = vpack.c.bf16 %v2343_v24, %v2341_v10  ;;  %v6659_v9 = vpack.c.bf16 %v1335_v16, %v1333_v33  ;;  %v2356_v39 = vld [vmem:[%s8201_s24 + $0x3d40] sm:$0xff]  ;;  %v1337_v10 = vld [vmem:[%s8201_s24 + $0x1d68] sm:$0xff] }
 0x3c2   : > { %5118 = vmatprep.mubr.f32.mxu0 %v10395_v8  ;;  %v1339_v24 = vld [vmem:[%s8201_s24 + $0x1d78] sm:$0xff]  ;;  %v1344_v28 = vld [vmem:[%s8201_s24 + $0x1da0] sm:$0xff]  ;;  %v2374_v16 = vld [vmem:[%s8201_s24 + $0x3dd0] sm:$0xff] }
 0x3c3   : > { %6626 = vmatpush1.bf16.msra.mxu1 %v6625_v35  ;;  %v2345_v35 = vld [vmem:[%s8201_s24 + $0x3ce8] sm:$0xff]  ;;  %v2368_v46 = vld [vmem:[%s8201_s24 + $0x3da0] sm:$0xff] }
 0x3c4   : > { %7650 = vmatpush1.bf16.msra.mxu0 %v7649_v37  ;;  %6628 = vmatprep.subr.bf16.mxu1 %v6627_v38  ;;  %v2347_v37 = vld [vmem:[%s8201_s24 + $0x3cf8] sm:$0xff]  ;;  %v6645_v38 = vpack.c.bf16 %v1318_v13, %v1316_v42  ;;  %v7685_v42 = vpack.c.bf16 %v2358_v44, %v2356_v39  ;;  %v6663_v13 = vpack.c.bf16 %v1339_v24, %v1337_v10  ;;  %v1348_v30 = vld [vmem:[%s8201_s24 + $0x1dc0] sm:$0xff]  ;;  %v2378_v24 = vld [vmem:[%s8201_s24 + $0x3df0] sm:$0xff] }
 0x3c5   : > { %7652 = vmatprep.subr.bf16.mxu0 %v7651_v52  ;;  %v1322_v52 = vld [vmem:[%s8201_s24 + $0x1cf0] sm:$0xff]  ;;  %v7671_v55 = vpack.c.bf16 %v2347_v37, %v2345_v35  ;;  %v1341_v35 = vld [vmem:[%s8201_s24 + $0x1d88] sm:$0xff]  ;;  %v1343_v37 = vld [vmem:[%s8201_s24 + $0x1d98] sm:$0xff] }
 0x3c6   : > { %v2372_v26 = vld [vmem:[%s8201_s24 + $0x3dc0] sm:$0xff] }
 0x3c7   : > { %6630 = vmatpush1.bf16.msra.mxu1 %v6629_v59  ;;  %v2349_v59 = vld [vmem:[%s8201_s24 + $0x3d08] sm:$0xff]  ;;  %v1352_v39 = vld [vmem:[%s8201_s24 + $0x1de0] sm:$0xff] }
 0x3c8   : > { %7654 = vmatpush1.bf16.msra.mxu0 %v7653_v60  ;;  %6632 = vmatprep.subr.bf16.mxu1 %v6631_v62  ;;  %v2351_v60 = vld [vmem:[%s8201_s24 + $0x3d18] sm:$0xff]  ;;  %v6649_v62 = vpack.c.bf16 %v1322_v52, %v1320_v48  ;;  %v7689_v48 = vpack.c.bf16 %v2362_v4, %v2360_v18  ;;  %v6667_v52 = vpack.c.bf16 %v1343_v37, %v1341_v35  ;;  %v2376_v44 = vld [vmem:[%s8201_s24 + $0x3de0] sm:$0xff]  ;;  %v2382_v37 = vld [vmem:[%s8201_s24 + $0x3e10] sm:$0xff] }
 0x3c9   : > { %7656 = vmatprep.subr.bf16.mxu0 %v7655_v2  ;;  %v1326_v2 = vld [vmem:[%s8201_s24 + $0x1d10] sm:$0xff]  ;;  %v7675_v27 = vpack.c.bf16 %v2351_v60, %v2349_v59  ;;  %v1345_v59 = vld [vmem:[%s8201_s24 + $0x1da8] sm:$0xff]  ;;  %v1347_v60 = vld [vmem:[%s8201_s24 + $0x1db8] sm:$0xff] }
 0x3ca   : > { %v1356_v18 = vld [vmem:[%s8201_s24 + $0x1e00] sm:$0xff] }
 0x3cb   : > { %6634 = vmatpush1.bf16.msra.mxu1 %v6633_v43  ;;  %v2353_v43 = vld [vmem:[%s8201_s24 + $0x3d28] sm:$0xff]  ;;  %v2380_v4 = vld [vmem:[%s8201_s24 + $0x3e00] sm:$0xff] }
 0x3cc   : > { %7658 = vmatpush1.bf16.msra.mxu0 %v7657_v56  ;;  %6636 = vmatprep.subr.bf16.mxu1 %v6635_v22  ;;  %v2355_v56 = vld [vmem:[%s8201_s24 + $0x3d38] sm:$0xff]  ;;  %v6653_v22 = vpack.c.bf16 %v1326_v2, %v1324_v51  ;;  %v7693_v51 = vpack.c.bf16 %v2366_v20, %v2364_v25  ;;  %v6671_v2 = vpack.c.bf16 %v1347_v60, %v1345_v59  ;;  %v1360_v20 = vld [vmem:[%s8201_s24 + $0x1e20] sm:$0xff]  ;;  %v1362_v59 = vld [vmem:[%s8201_s24 + $0x1e30] sm:$0xff] }
 0x3cd   : > { %7660 = vmatprep.subr.bf16.mxu0 %v7659_v47  ;;  %v1330_v47 = vld [vmem:[%s8201_s24 + $0x1d30] sm:$0xff]  ;;  %v7679_v14 = vpack.c.bf16 %v2355_v56, %v2353_v43  ;;  %v1349_v43 = vld [vmem:[%s8201_s24 + $0x1dc8] sm:$0xff]  ;;  %v1351_v56 = vld [vmem:[%s8201_s24 + $0x1dd8] sm:$0xff]  ;;  %v7709_v25 = vpack.c.bf16 %v2382_v37, %v2380_v4 }
 0x3ce   : > { %v1378_v4 = vld [vmem:[%s8201_s24 + $0x1eb0] sm:$0xff] }
 0x3cf   : > { %6638 = vmatpush1.bf16.msra.mxu1 %v6637_v6  ;;  %v2357_v6 = vld [vmem:[%s8201_s24 + $0x3d48] sm:$0xff] }
 0x3d0   : > { %7662 = vmatpush1.bf16.msra.mxu0 %v7661_v7  ;;  %6640 = vmatprep.subr.bf16.mxu1 %v6639_v41  ;;  %v2359_v7 = vld [vmem:[%s8201_s24 + $0x3d58] sm:$0xff]  ;;  %v6657_v41 = vpack.c.bf16 %v1330_v47, %v1328_v29  ;;  %v7697_v29 = vpack.c.bf16 %v2370_v54, %v2368_v46  ;;  %v6675_v47 = vpack.c.bf16 %v1351_v56, %v1349_v43  ;;  %v1364_v46 = vld [vmem:[%s8201_s24 + $0x1e40] sm:$0xff]  ;;  %v2390_v56 = vld [vmem:[%s8201_s24 + $0x3e50] sm:$0xff] }
 0x3d1   : > { %7664 = vmatprep.subr.bf16.mxu0 %v7663_v19  ;;  %v1334_v19 = vld [vmem:[%s8201_s24 + $0x1d50] sm:$0xff]  ;;  %v7683_v31 = vpack.c.bf16 %v2359_v7, %v2357_v6  ;;  %v1353_v6 = vld [vmem:[%s8201_s24 + $0x1de8] sm:$0xff]  ;;  %v1355_v7 = vld [vmem:[%s8201_s24 + $0x1df8] sm:$0xff] }
 0x3d2   : > { %v2388_v54 = vld [vmem:[%s8201_s24 + $0x3e40] sm:$0xff] }
 0x3d3   : > { %6642 = vmatpush1.bf16.msra.mxu1 %v6641_v11  ;;  %v2361_v11 = vld [vmem:[%s8201_s24 + $0x3d68] sm:$0xff] }
 0x3d4   : > { %7666 = vmatpush1.bf16.msra.mxu0 %v7665_v58  ;;  %6644 = vmatprep.subr.bf16.mxu1 %v6643_v12  ;;  %v2363_v58 = vld [vmem:[%s8201_s24 + $0x3d78] sm:$0xff]  ;;  %v6661_v12 = vpack.c.bf16 %v1334_v19, %v1332_v34  ;;  %v7701_v34 = vpack.c.bf16 %v2374_v16, %v2372_v26  ;;  %v6679_v19 = vpack.c.bf16 %v1355_v7, %v1353_v6  ;;  %v1370_v26 = vld [vmem:[%s8201_s24 + $0x1e70] sm:$0xff]  ;;  %v1373_v7 = vld [vmem:[%s8201_s24 + $0x1e88] sm:$0xff] }
 0x3d5   : > { %7668 = vmatprep.subr.bf16.mxu0 %v7667_v49  ;;  %v1338_v49 = vld [vmem:[%s8201_s24 + $0x1d70] sm:$0xff]  ;;  %v7687_v3 = vpack.c.bf16 %v2363_v58, %v2361_v11  ;;  %v1357_v11 = vld [vmem:[%s8201_s24 + $0x1e08] sm:$0xff]  ;;  %v1359_v58 = vld [vmem:[%s8201_s24 + $0x1e18] sm:$0xff] }
 0x3d6   : > { %v2394_v6 = vld [vmem:[%s8201_s24 + $0x3e70] sm:$0xff] }
 0x3d7   : > { %6646 = vmatpush1.bf16.msra.mxu1 %v6645_v38  ;;  %v2365_v38 = vld [vmem:[%s8201_s24 + $0x3d88] sm:$0xff] }
 0x3d8   : > { %7670 = vmatpush1.bf16.msra.mxu0 %v7669_v40  ;;  %6648 = vmatprep.subr.bf16.mxu1 %v6647_v45  ;;  %v2367_v40 = vld [vmem:[%s8201_s24 + $0x3d98] sm:$0xff]  ;;  %v6665_v45 = vpack.c.bf16 %v1338_v49, %v1336_v53  ;;  %v7705_v53 = vpack.c.bf16 %v2378_v24, %v2376_v44  ;;  %v6683_v49 = vpack.c.bf16 %v1359_v58, %v1357_v11  ;;  %v1374_v44 = vld [vmem:[%s8201_s24 + $0x1e90] sm:$0xff]  ;;  %v1377_v58 = vld [vmem:[%s8201_s24 + $0x1ea8] sm:$0xff] }
 0x3d9   : > { %7672 = vmatprep.subr.bf16.mxu0 %v7671_v55  ;;  %v1342_v55 = vld [vmem:[%s8201_s24 + $0x1d90] sm:$0xff]  ;;  %v7691_v57 = vpack.c.bf16 %v2367_v40, %v2365_v38  ;;  %v1361_v38 = vld [vmem:[%s8201_s24 + $0x1e28] sm:$0xff]  ;;  %v1363_v40 = vld [vmem:[%s8201_s24 + $0x1e38] sm:$0xff] }
 0x3da   : > { %v2398_v11 = vld [vmem:[%s8201_s24 + $0x3e90] sm:$0xff] }
 0x3db   : > { %6650 = vmatpush1.bf16.msra.mxu1 %v6649_v62  ;;  %v2369_v62 = vld [vmem:[%s8201_s24 + $0x3da8] sm:$0xff] }
 0x3dc   : > { %7674 = vmatpush1.bf16.msra.mxu0 %v7673_v61  ;;  %6652 = vmatprep.subr.bf16.mxu1 %v6651_v0  ;;  %v2371_v61 = vld [vmem:[%s8201_s24 + $0x3db8] sm:$0xff]  ;;  %v6669_v0 = vpack.c.bf16 %v1342_v55, %v1340_v5  ;;  %v10525_v55 = vrot.slane %v10365_v63, %v8330_v36  ;;  %v2389_v63 = vld [vmem:[%s8201_s24 + $0x3e48] sm:$0xff] }
 0x3dd   : > { %7676 = vmatprep.subr.bf16.mxu0 %v7675_v27  ;;  %v1346_v27 = vld [vmem:[%s8201_s24 + $0x1db0] sm:$0xff]  ;;  %v7695_v17 = vpack.c.bf16 %v2371_v61, %v2369_v62  ;;  %v1365_v61 = vld [vmem:[%s8201_s24 + $0x1e48] sm:$0xff] }
 0x3de   : > { %v2386_v62 = vld [vmem:[%s8201_s24 + $0x3e30] sm:$0xff] }
 0x3df   : > { %6654 = vmatpush1.bf16.msra.mxu1 %v6653_v22  ;;  %v2373_v22 = vld [vmem:[%s8201_s24 + $0x3dc8] sm:$0xff] }
 0x3e0   : > { %7678 = vmatpush1.bf16.msra.mxu0 %v7677_v1  ;;  %6656 = vmatprep.subr.bf16.mxu1 %v6655_v50  ;;  %v2375_v1 = vld [vmem:[%s8201_s24 + $0x3dd8] sm:$0xff]  ;;  %v6673_v50 = vpack.c.bf16 %v1346_v27, %v1344_v28  ;;  %v6689_v28 = vpack.c.bf16 %v1362_v59, %v1360_v20  ;;  %v1380_v59 = vld [vmem:[%s8201_s24 + $0x1ec0] sm:$0xff] }
 0x3e1   : > { %7680 = vmatprep.subr.bf16.mxu0 %v7679_v14  ;;  %v1350_v14 = vld [vmem:[%s8201_s24 + $0x1dd0] sm:$0xff]  ;;  %v7699_v33 = vpack.c.bf16 %v2375_v1, %v2373_v22  ;;  %v1371_v22 = vld [vmem:[%s8201_s24 + $0x1e78] sm:$0xff]  ;;  %v2393_v1 = vld [vmem:[%s8201_s24 + $0x3e68] sm:$0xff] }
 0x3e3   : > { %6658 = vmatpush1.bf16.msra.mxu1 %v6657_v41  ;;  %v2377_v41 = vld [vmem:[%s8201_s24 + $0x3de8] sm:$0xff] }
 0x3e4   : > { %7682 = vmatpush1.bf16.msra.mxu0 %v7681_v21  ;;  %6660 = vmatprep.subr.bf16.mxu1 %v6659_v9  ;;  %v2379_v21 = vld [vmem:[%s8201_s24 + $0x3df8] sm:$0xff]  ;;  %v6677_v9 = vpack.c.bf16 %v1350_v14, %v1348_v30  ;;  %v1368_v14 = vld [vmem:[%s8201_s24 + $0x1e60] sm:$0xff] }
 0x3e5   : > { %7684 = vmatprep.subr.bf16.mxu0 %v7683_v31  ;;  %v1354_v31 = vld [vmem:[%s8201_s24 + $0x1df0] sm:$0xff]  ;;  %v7703_v10 = vpack.c.bf16 %v2379_v21, %v2377_v41  ;;  %v1375_v41 = vld [vmem:[%s8201_s24 + $0x1e98] sm:$0xff]  ;;  %v2397_v21 = vld [vmem:[%s8201_s24 + $0x3e88] sm:$0xff] }
 0x3e7   : > { %6662 = vmatpush1.bf16.msra.mxu1 %v6661_v12  ;;  %v2381_v12 = vld [vmem:[%s8201_s24 + $0x3e08] sm:$0xff] }
 0x3e8   : > { %7686 = vmatpush1.bf16.msra.mxu0 %v7685_v42  ;;  %6664 = vmatprep.subr.bf16.mxu1 %v6663_v13  ;;  %v2383_v42 = vld [vmem:[%s8201_s24 + $0x3e18] sm:$0xff]  ;;  %v6681_v13 = vpack.c.bf16 %v1354_v31, %v1352_v39  ;;  %v6699_v39 = vpack.c.bf16 %v1375_v41, %v1373_v7  ;;  %v1372_v31 = vld [vmem:[%s8201_s24 + $0x1e80] sm:$0xff]  ;;  %v2417_v41 = vld [vmem:[%s8201_s24 + $0x3f28] sm:$0xff] }
 0x3e9   : > { %7688 = vmatprep.subr.bf16.mxu0 %v7687_v3  ;;  %v1358_v3 = vld [vmem:[%s8201_s24 + $0x1e10] sm:$0xff]  ;;  %v7707_v35 = vpack.c.bf16 %v2383_v42, %v2381_v12  ;;  %v1379_v12 = vld [vmem:[%s8201_s24 + $0x1eb8] sm:$0xff]  ;;  %v2401_v42 = vld [vmem:[%s8201_s24 + $0x3ea8] sm:$0xff] }
 0x3ea   : > { %v6685_v5 = vpack.c.bf16 %v1358_v3, %v1356_v18  ;;  %v6703_v18 = vpack.c.bf16 %v1379_v12, %v1377_v58  ;;  %v1376_v3 = vld [vmem:[%s8201_s24 + $0x1ea0] sm:$0xff]  ;;  %v1395_v7 = vld [vmem:[%s8201_s24 + $0x1f38] sm:$0xff]  ;;  %v2421_v12 = vld [vmem:[%s8201_s24 + $0x3f48] sm:$0xff] }
 0x3eb   : > { %6666 = vmatpush1.bf16.msra.mxu1 %v6665_v45  ;;  %v10519_v45 = vrot.slane %v10360_v32, %v8330_v36  ;;  %v2384_v32 = vld [vmem:[%s8201_s24 + $0x3e20] sm:$0xff]  ;;  %v2659_v36 = vcombine.high %v10390_v23, %v10390_v23  ;;  %v1399_v58 = vld [vmem:[%s8201_s24 + $0x1f58] sm:$0xff] }
 0x3ec   : > { %7690 = vmatpush1.bf16.msra.mxu0 %v7689_v48  ;;  %6668 = vmatprep.subr.bf16.mxu1 %v6667_v52  ;;  %v2385_v48 = vld [vmem:[%s8201_s24 + $0x3e28] sm:$0xff]  ;;  %v2387_v52 = vld [vmem:[%s8201_s24 + $0x3e38] sm:$0xff]  ;;  %v7713_v27 = vpack.c.bf16 %v2386_v62, %v2384_v32  ;;  %v1382_v32 = vld [vmem:[%s8201_s24 + $0x1ed0] sm:$0xff] }
 0x3ed   : > { %7692 = vmatprep.subr.bf16.mxu0 %v7691_v57  ;;  %v6687_v57 = vpack.c.bf16 %v1363_v40, %v1361_v38  ;;  %v7711_v60 = vpack.c.bf16 %v2387_v52, %v2385_v48  ;;  %v2402_v38 = vld [vmem:[%s8201_s24 + $0x3eb0] sm:$0xff]  ;;  %v1381_v40 = vld [vmem:[%s8201_s24 + $0x1ec8] sm:$0xff]  ;;  %v1383_v48 = vld [vmem:[%s8201_s24 + $0x1ed8] sm:$0xff] }
 0x3ee   : > { %v2405_v52 = vld [vmem:[%s8201_s24 + $0x3ec8] sm:$0xff]  ;;  %v6707_v20 = vpack.c.bf16 %v1383_v48, %v1381_v40  ;;  %v1403_v40 = vld [vmem:[%s8201_s24 + $0x1f78] sm:$0xff] }
 0x3ef   : > { %6670 = vmatpush1.bf16.msra.mxu1 %v6669_v0  ;;  %v1367_v0 = vld [vmem:[%s8201_s24 + $0x1e58] sm:$0xff]  ;;  %v2425_v48 = vld [vmem:[%s8201_s24 + $0x3f68] sm:$0xff] }
 0x3f0   : > { %7694 = vmatpush1.bf16.msra.mxu0 %v7693_v51  ;;  %6672 = vmatprep.subr.bf16.mxu1 %v6671_v2  ;;  %v2391_v51 = vld [vmem:[%s8201_s24 + $0x3e58] sm:$0xff]  ;;  %v2859_v2 = vcombine.high %v10395_v8, %v10395_v8  ;;  %v6691_v23 = vpack.c.bf16 %v1367_v0, %v1365_v61  ;;  %v1369_v8 = vld [vmem:[%s8201_s24 + $0x1e68] sm:$0xff]  ;;  %v2406_v61 = vld [vmem:[%s8201_s24 + $0x3ed0] sm:$0xff] }
 0x3f1   : > { %7696 = vmatprep.subr.bf16.mxu0 %v7695_v17  ;;  %v1366_v17 = vld [vmem:[%s8201_s24 + $0x1e50] sm:$0xff]  ;;  %v7715_v43 = vpack.c.bf16 %v2391_v51, %v2389_v63  ;;  %v6695_v30 = vpack.c.bf16 %v1371_v22, %v1369_v8  ;;  %v1385_v0 = vld [vmem:[%s8201_s24 + $0x1ee8] sm:$0xff]  ;;  %v2411_v51 = vld [vmem:[%s8201_s24 + $0x3ef8] sm:$0xff] }
 0x3f2   : > { %v2409_v63 = vld [vmem:[%s8201_s24 + $0x3ee8] sm:$0xff]  ;;  %v1391_v8 = vld [vmem:[%s8201_s24 + $0x1f18] sm:$0xff] }
 0x3f3   : > { %6674 = vmatpush1.bf16.msra.mxu1 %v6673_v50  ;;  %v2395_v50 = vld [vmem:[%s8201_s24 + $0x3e78] sm:$0xff]  ;;  %v2413_v22 = vld [vmem:[%s8201_s24 + $0x3f08] sm:$0xff] }
 0x3f4   : > { %7698 = vmatpush1.bf16.msra.mxu0 %v7697_v29  ;;  %6676 = vmatprep.subr.bf16.mxu1 %v6675_v47  ;;  %v6693_v29 = vpack.c.bf16 %v1366_v17, %v1364_v46  ;;  %v7717_v47 = vpack.c.bf16 %v2390_v56, %v2388_v54  ;;  %v7719_v16 = vpack.c.bf16 %v2395_v50, %v2393_v1  ;;  %v1386_v46 = vld [vmem:[%s8201_s24 + $0x1ef0] sm:$0xff]  ;;  %v2408_v17 = vld [vmem:[%s8201_s24 + $0x3ee0] sm:$0xff]  ;;  %v1389_v56 = vld [vmem:[%s8201_s24 + $0x1f08] sm:$0xff] }
 0x3f5   : > { %7700 = vmatprep.subr.bf16.mxu0 %v7699_v33  ;;  %v2392_v33 = vld [vmem:[%s8201_s24 + $0x3e60] sm:$0xff]  ;;  %v7735_v54 = vpack.c.bf16 %v2411_v51, %v2409_v63  ;;  %v2415_v1 = vld [vmem:[%s8201_s24 + $0x3f18] sm:$0xff] }
 0x3f6   : > { %v2431_v63 = vld [vmem:[%s8201_s24 + $0x3f98] sm:$0xff] }
 0x3f7   : > { %6678 = vmatpush1.bf16.msra.mxu1 %v6677_v9  ;;  %v2399_v9 = vld [vmem:[%s8201_s24 + $0x3e98] sm:$0xff] }
 0x3f8   : > { %7702 = vmatpush1.bf16.msra.mxu0 %v7701_v34  ;;  %6680 = vmatprep.subr.bf16.mxu1 %v6679_v19  ;;  %v6697_v34 = vpack.c.bf16 %v1370_v26, %v1368_v14  ;;  %v7721_v19 = vpack.c.bf16 %v2394_v6, %v2392_v33  ;;  %v7723_v24 = vpack.c.bf16 %v2399_v9, %v2397_v21  ;;  %v1390_v14 = vld [vmem:[%s8201_s24 + $0x1f10] sm:$0xff]  ;;  %v2412_v26 = vld [vmem:[%s8201_s24 + $0x3f00] sm:$0xff]  ;;  %v1393_v6 = vld [vmem:[%s8201_s24 + $0x1f28] sm:$0xff] }
 0x3f9   : > { %7704 = vmatprep.subr.bf16.mxu0 %v7703_v10  ;;  %v2396_v10 = vld [vmem:[%s8201_s24 + $0x3e80] sm:$0xff]  ;;  %v7739_v33 = vpack.c.bf16 %v2415_v1, %v2413_v22  ;;  %v2419_v21 = vld [vmem:[%s8201_s24 + $0x3f38] sm:$0xff] }
 0x3fa   : > { %v2435_v22 = vld [vmem:[%s8201_s24 + $0x3fb8] sm:$0xff] }
 0x3fb   : > { %6682 = vmatpush1.bf16.msra.mxu1 %v6681_v13  ;;  %v2403_v13 = vld [vmem:[%s8201_s24 + $0x3eb8] sm:$0xff] }
 0x3fc   : > { %7706 = vmatpush1.bf16.msra.mxu0 %v7705_v53  ;;  %6684 = vmatprep.subr.bf16.mxu1 %v6683_v49  ;;  %v6701_v53 = vpack.c.bf16 %v1374_v44, %v1372_v31  ;;  %v7725_v49 = vpack.c.bf16 %v2398_v11, %v2396_v10  ;;  %v7727_v37 = vpack.c.bf16 %v2403_v13, %v2401_v42  ;;  %v1394_v31 = vld [vmem:[%s8201_s24 + $0x1f30] sm:$0xff]  ;;  %v2416_v44 = vld [vmem:[%s8201_s24 + $0x3f20] sm:$0xff]  ;;  %v1397_v11 = vld [vmem:[%s8201_s24 + $0x1f48] sm:$0xff] }
 0x3fd   : > { %7708 = vmatprep.subr.bf16.mxu0 %v7707_v35  ;;  %v2400_v35 = vld [vmem:[%s8201_s24 + $0x3ea0] sm:$0xff]  ;;  %v7743_v10 = vpack.c.bf16 %v2419_v21, %v2417_v41  ;;  %v2423_v42 = vld [vmem:[%s8201_s24 + $0x3f58] sm:$0xff] }
 0x3fe   : > { %3983 = vmatmul.mubr.f32.vlgmr.msra.gmra.mrb[0].mxu1 %v10519_v45  ;;  %v2439_v41 = vld [vmem:[%s8201_s24 + $0x3fd8] sm:$0xff] }
 0x3ff   : > { %6686 = vmatpush1.bf16.msra.mxu1 %v6685_v5  ;;  %5119 = vmatmul.mubr.f32.vlgmr.msra.gmra.mrb[0].mxu0 %v10525_v55  ;;  %v2407_v5 = vld [vmem:[%s8201_s24 + $0x3ed8] sm:$0xff] }
 0x400   : > { %7710 = vmatpush1.bf16.msra.mxu0 %v7709_v25  ;;  %6688 = vmatprep.subr.bf16.mxu1 %v6687_v57  ;;  %v6705_v25 = vpack.c.bf16 %v1378_v4, %v1376_v3  ;;  %v7729_v57 = vpack.c.bf16 %v2402_v38, %v2400_v35  ;;  %v7731_v62 = vpack.c.bf16 %v2407_v5, %v2405_v52  ;;  %v1398_v3 = vld [vmem:[%s8201_s24 + $0x1f50] sm:$0xff]  ;;  %v2420_v4 = vld [vmem:[%s8201_s24 + $0x3f40] sm:$0xff]  ;;  %v1401_v38 = vld [vmem:[%s8201_s24 + $0x1f68] sm:$0xff] }
 0x401   : > { %7712 = vmatprep.subr.bf16.mxu0 %v7711_v60  ;;  %4053 = vmatprep.mubr.f32.mxu1 %v2659_v36  ;;  %v2404_v60 = vld [vmem:[%s8201_s24 + $0x3ec0] sm:$0xff]  ;;  %v1387_v36 = vld [vmem:[%s8201_s24 + $0x1ef8] sm:$0xff]  ;;  %v7747_v35 = vpack.c.bf16 %v2423_v42, %v2421_v12 }
 0x402   : > { %5189 = vmatprep.mubr.f32.mxu0 %v2859_v2  ;;  %v6709_v2 = vpack.c.bf16 %v1382_v32, %v1380_v59  ;;  %v2427_v52 = vld [vmem:[%s8201_s24 + $0x3f78] sm:$0xff]  ;;  %v1402_v59 = vld [vmem:[%s8201_s24 + $0x1f70] sm:$0xff]  ;;  %v2424_v32 = vld [vmem:[%s8201_s24 + $0x3f60] sm:$0xff] }
 0x403   : > { %6690 = vmatpush1.bf16.msra.mxu1 %v6689_v28  ;;  %v7733_v28 = vpack.c.bf16 %v2406_v61, %v2404_v60  ;;  %v7751_v60 = vpack.c.bf16 %v2427_v52, %v2425_v48  ;;  %v1405_v61 = vld [vmem:[%s8201_s24 + $0x1f88] sm:$0xff]  ;;  %v2443_v12 = vld [vmem:[%s8201_s24 + $0x3ff8] sm:$0xff]  ;;  %v2857_v48 = vcombine.high %v10525_v55, %v10525_v55  ;;  %v8071_v52 = vmov 1983009808  }
 0x404   : > { %7714 = vmatpush1.bf16.msra.mxu0 %v7713_v27  ;;  %6692 = vmatprep.subr.bf16.mxu1 %v6691_v23  ;;  %v6711_v27 = vpack.c.bf16 %v1387_v36, %v1385_v0  ;;  %v1384_v23 = vld [vmem:[%s8201_s24 + $0x1ee0] sm:$0xff]  ;;  %v1407_v0 = vld [vmem:[%s8201_s24 + $0x1f98] sm:$0xff]  ;;  %v2429_v36 = vld [vmem:[%s8201_s24 + $0x3f88] sm:$0xff] }
 0x405   : > { %7716 = vmatprep.subr.bf16.mxu0 %v7715_v43  ;;  %v2410_v43 = vld [vmem:[%s8201_s24 + $0x3ef0] sm:$0xff]  ;;  %v6713_v50 = vpack.c.bf16 %v1386_v46, %v1384_v23  ;;  %v2428_v46 = vld [vmem:[%s8201_s24 + $0x3f80] sm:$0xff] }
 0x406   : > { %v1406_v23 = vld [vmem:[%s8201_s24 + $0x1f90] sm:$0xff] }
 0x407   : > { %6694 = vmatpush1.bf16.msra.mxu1 %v6693_v29  ;;  %v7737_v29 = vpack.c.bf16 %v2410_v43, %v2408_v17  ;;  %v7755_v17 = vpack.c.bf16 %v2431_v63, %v2429_v36  ;;  %v1409_v43 = vld [vmem:[%s8201_s24 + $0x1fa8] sm:$0xff] }
 0x408   : > { %7718 = vmatpush1.bf16.msra.mxu0 %v7717_v47  ;;  %6696 = vmatprep.subr.bf16.mxu1 %v6695_v30  ;;  %v6715_v47 = vpack.c.bf16 %v1391_v8, %v1389_v56  ;;  %v1388_v30 = vld [vmem:[%s8201_s24 + $0x1f00] sm:$0xff]  ;;  %v1411_v56 = vld [vmem:[%s8201_s24 + $0x1fb8] sm:$0xff]  ;;  %v2433_v8 = vld [vmem:[%s8201_s24 + $0x3fa8] sm:$0xff] }
 0x409   : > { %7720 = vmatprep.subr.bf16.mxu0 %v7719_v16  ;;  %v2414_v16 = vld [vmem:[%s8201_s24 + $0x3f10] sm:$0xff]  ;;  %v6717_v9 = vpack.c.bf16 %v1390_v14, %v1388_v30  ;;  %v2432_v14 = vld [vmem:[%s8201_s24 + $0x3fa0] sm:$0xff] }
 0x40a   : > { %v1410_v30 = vld [vmem:[%s8201_s24 + $0x1fb0] sm:$0xff]  ;;  %v5239_v63 = vld [vmem:[%s10962_s3 + $0x8] sm:$0xff] (!%p5698_p7) }
 0x40b   : > { %6698 = vmatpush1.bf16.msra.mxu1 %v6697_v34  ;;  %v7741_v34 = vpack.c.bf16 %v2414_v16, %v2412_v26  ;;  %v7759_v26 = vpack.c.bf16 %v2435_v22, %v2433_v8  ;;  %v1413_v16 = vld [vmem:[%s8201_s24 + $0x1fc8] sm:$0xff]  ;;  %v8072_v22 = vmov (!%p5698_p7), 0.0|0.0  }
 0x40c   : > { %7722 = vmatpush1.bf16.msra.mxu0 %v7721_v19  ;;  %6700 = vmatprep.subr.bf16.mxu1 %v6699_v39  ;;  %v6719_v19 = vpack.c.bf16 %v1395_v7, %v1393_v6  ;;  %v1392_v39 = vld [vmem:[%s8201_s24 + $0x1f20] sm:$0xff]  ;;  %v1415_v6 = vld [vmem:[%s8201_s24 + $0x1fd8] sm:$0xff]  ;;  %v2437_v7 = vld [vmem:[%s8201_s24 + $0x3fc8] sm:$0xff] }
 0x40d   : > { %7724 = vmatprep.subr.bf16.mxu0 %v7723_v24  ;;  %v2418_v24 = vld [vmem:[%s8201_s24 + $0x3f30] sm:$0xff]  ;;  %v6721_v13 = vpack.c.bf16 %v1394_v31, %v1392_v39  ;;  %v2436_v31 = vld [vmem:[%s8201_s24 + $0x3fc0] sm:$0xff] }
 0x40e   : > { %v1414_v39 = vld [vmem:[%s8201_s24 + $0x1fd0] sm:$0xff]  ;;  %v5247_v8 = vld [vmem:[%s10962_s3 + $0x48] sm:$0xff] (!%p5698_p7) }
 0x40f   : > { %6702 = vmatpush1.bf16.msra.mxu1 %v6701_v53  ;;  %v7745_v53 = vpack.c.bf16 %v2418_v24, %v2416_v44  ;;  %v7763_v44 = vpack.c.bf16 %v2439_v41, %v2437_v7  ;;  %v1417_v24 = vld [vmem:[%s8201_s24 + $0x1fe8] sm:$0xff] }
 0x410   : > { %7726 = vmatpush1.bf16.msra.mxu0 %v7725_v49  ;;  %6704 = vmatprep.subr.bf16.mxu1 %v6703_v18  ;;  %v6723_v49 = vpack.c.bf16 %v1399_v58, %v1397_v11  ;;  %v1396_v18 = vld [vmem:[%s8201_s24 + $0x1f40] sm:$0xff]  ;;  %v1419_v11 = vld [vmem:[%s8201_s24 + $0x1ff8] sm:$0xff]  ;;  %v2441_v58 = vld [vmem:[%s8201_s24 + $0x3fe8] sm:$0xff] }
 0x411   : > { %7728 = vmatprep.subr.bf16.mxu0 %v7727_v37  ;;  %v2422_v37 = vld [vmem:[%s8201_s24 + $0x3f50] sm:$0xff]  ;;  %v6725_v5 = vpack.c.bf16 %v1398_v3, %v1396_v18  ;;  %v7767_v3 = vpack.c.bf16 %v2443_v12, %v2441_v58  ;;  %v5255_v41 = vld [vmem:[%s10962_s3 + $0x88] sm:$0xff] (!%p5698_p7)  ;;  %v5258_v58 = vld [vmem:[%s10962_s3 + $0xa0] sm:$0xff] (!%p5698_p7) }
 0x412   : > { %v1418_v18 = vld [vmem:[%s8201_s24 + $0x1ff0] sm:$0xff] }
 0x413   : > { %6706 = vmatpush1.bf16.msra.mxu1 %v6705_v25  ;;  %v7749_v25 = vpack.c.bf16 %v2422_v37, %v2420_v4  ;;  %v2440_v4 = vld [vmem:[%s8201_s24 + $0x3fe0] sm:$0xff]  ;;  %v5252_v7 = vld [vmem:[%s10962_s3 + $0x70] sm:$0xff] (!%p5698_p7) }
 0x414   : > { %7730 = vmatpush1.bf16.msra.mxu0 %v7729_v57  ;;  %6708 = vmatprep.subr.bf16.mxu1 %v6707_v20  ;;  %v6727_v57 = vpack.c.bf16 %v1403_v40, %v1401_v38  ;;  %v1400_v20 = vld [vmem:[%s8201_s24 + $0x1f60] sm:$0xff]  ;;  %v2657_v40 = vcombine.high %v10519_v45, %v10519_v45  ;;  %v5260_v12 = vld [vmem:[%s10962_s3 + $0xb0] sm:$0xff] (!%p5698_p7) }
 0x415   : > { %7732 = vmatprep.subr.bf16.mxu0 %v7731_v62  ;;  %v2426_v62 = vld [vmem:[%s8201_s24 + $0x3f70] sm:$0xff]  ;;  %v6729_v51 = vpack.c.bf16 %v1402_v59, %v1400_v20 }
 0x417   : > { %6710 = vmatpush1.bf16.msra.mxu1 %v6709_v2  ;;  %v7753_v2 = vpack.c.bf16 %v2426_v62, %v2424_v32 }
 0x418   : > { %7734 = vmatpush1.bf16.msra.mxu0 %v7733_v28  ;;  %6712 = vmatprep.subr.bf16.mxu1 %v6711_v27  ;;  %v6731_v28 = vpack.c.bf16 %v1407_v0, %v1405_v61  ;;  %v1404_v27 = vld [vmem:[%s8201_s24 + $0x1f80] sm:$0xff]  ;;  %v395_v0 = vld [vmem:[#allocation2] sm:$0xf] }
 0x419   : > { %7736 = vmatprep.subr.bf16.mxu0 %v7735_v54  ;;  %v2430_v54 = vld [vmem:[%s8201_s24 + $0x3f90] sm:$0xff]  ;;  %v6733_v1 = vpack.c.bf16 %v1406_v23, %v1404_v27  ;;  %v5243_v23 = vld [vmem:[%s10962_s3 + $0x28] sm:$0xff] (!%p5698_p7) }
 0x41a   : > { %v5240_v27 = vld [vmem:[%s10962_s3 + $0x10] sm:$0xff] (!%p5698_p7) }
 0x41b   : > { %6714 = vmatpush1.bf16.msra.mxu1 %v6713_v50  ;;  %v7757_v50 = vpack.c.bf16 %v2430_v54, %v2428_v46  ;;  %v5245_v46 = vld [vmem:[%s10962_s3 + $0x38] sm:$0xff] (!%p5698_p7) }
 0x41c   : > { %7738 = vmatpush1.bf16.msra.mxu0 %v7737_v29  ;;  %6716 = vmatprep.subr.bf16.mxu1 %v6715_v47  ;;  %v6735_v29 = vpack.c.bf16 %v1411_v56, %v1409_v43  ;;  %v1408_v47 = vld [vmem:[%s8201_s24 + $0x1fa0] sm:$0xff]  ;;  %v7775_v54 = vpack.c.bf16 (!%p5698_p7), %v5245_v46, %v5243_v23  ;;  %v5244_v56 = vld [vmem:[%s10962_s3 + $0x30] sm:$0xff] (!%p5698_p7)  ;;  %v5273_v23 = vld [vmem:[%s10962_s3 + $0x118] sm:$0xff] (!%p5698_p7) }
 0x41d   : > { %7740 = vmatprep.subr.bf16.mxu0 %v7739_v33  ;;  %v2434_v33 = vld [vmem:[%s8201_s24 + $0x3fb0] sm:$0xff]  ;;  %v6737_v21 = vpack.c.bf16 %v1410_v30, %v1408_v47  ;;  %v5242_v43 = vld [vmem:[%s10962_s3 + $0x20] sm:$0xff] (!%p5698_p7) }
 0x41e   : > { %v5246_v47 = vld [vmem:[%s10962_s3 + $0x40] sm:$0xff] (!%p5698_p7)  ;;  %v5248_v30 = vld [vmem:[%s10962_s3 + $0x50] sm:$0xff] (!%p5698_p7) }
 0x41f   : > { %6718 = vmatpush1.bf16.msra.mxu1 %v6717_v9  ;;  %v7761_v9 = vpack.c.bf16 %v2434_v33, %v2432_v14  ;;  %v5251_v14 = vld [vmem:[%s10962_s3 + $0x68] sm:$0xff] (!%p5698_p7)  ;;  %v7781_v33 = vpack.c.bf16 (!%p5698_p7), %v5248_v30, %v5246_v47  ;;  %v5277_v47 = vld [vmem:[%s10962_s3 + $0x138] sm:$0xff] (!%p5698_p7) }
 0x420   : > { %7742 = vmatpush1.bf16.msra.mxu0 %v7741_v34  ;;  %6720 = vmatprep.subr.bf16.mxu1 %v6719_v19  ;;  %v6739_v34 = vpack.c.bf16 %v1415_v6, %v1413_v16  ;;  %v1412_v19 = vld [vmem:[%s8201_s24 + $0x1fc0] sm:$0xff] }
 0x421   : > { %7744 = vmatprep.subr.bf16.mxu0 %v7743_v10  ;;  %v2438_v10 = vld [vmem:[%s8201_s24 + $0x3fd0] sm:$0xff]  ;;  %v6741_v42 = vpack.c.bf16 %v1414_v39, %v1412_v19  ;;  %v5250_v6 = vld [vmem:[%s10962_s3 + $0x60] sm:$0xff] (!%p5698_p7) }
 0x422   : > { %v5254_v19 = vld [vmem:[%s10962_s3 + $0x80] sm:$0xff] (!%p5698_p7)  ;;  %v5256_v39 = vld [vmem:[%s10962_s3 + $0x90] sm:$0xff] (!%p5698_p7) }
 0x423   : > { %6722 = vmatpush1.bf16.msra.mxu1 %v6721_v13  ;;  %v7765_v13 = vpack.c.bf16 %v2438_v10, %v2436_v31  ;;  %v5259_v31 = vld [vmem:[%s10962_s3 + $0xa8] sm:$0xff] (!%p5698_p7)  ;;  %v5221_v10 = vsub.s32 (!%p5698_p7), 0, %v8310_v15 }
 0x424   : > { %7746 = vmatpush1.bf16.msra.mxu0 %v7745_v53  ;;  %6724 = vmatprep.subr.bf16.mxu1 %v6723_v49  ;;  %v6743_v53 = vpack.c.bf16 %v1419_v11, %v1417_v24  ;;  %v1416_v49 = vld [vmem:[%s8201_s24 + $0x1fe0] sm:$0xff]  ;;  %v5225_v24 = vsub.s32 (!%p5698_p7), 1, %v8310_v15  ;;  %v7789_v11 = vpack.c.bf16 (!%p5698_p7), %v5256_v39, %v5254_v19  ;;  %v5397_v19 = vld [vmem:[%s10964_s5 + $0x58] sm:$0xff] (!%p5698_p7) }
 0x425   : > { %7748 = vmatprep.subr.bf16.mxu0 %v7747_v35  ;;  %v2442_v35 = vld [vmem:[%s8201_s24 + $0x3ff0] sm:$0xff]  ;;  %v6745_v37 = vpack.c.bf16 %v1418_v18, %v1416_v49  ;;  %v5386_v49 = vld [vmem:[%s10964_s5] sm:$0xff] (!%p5698_p7)  ;;  %v5387_v18 = vld [vmem:[%s10964_s5 + $0x8] sm:$0xff] (!%p5698_p7) }
 0x426   : > { %v7769_v38 = vpack.c.bf16 %v2442_v35, %v2440_v4 }
 0x427   : > { %6726 = vmatpush1.bf16.msra.mxu1 %v6725_v5  ;;  %v5200_v5 = vunpack.c.l.s4 %v8071_v52  ;;  %v5262_v52 = vld [vmem:[%s10962_s3 + $0xc0] sm:$0xff] (!%p5698_p7) }
 0x428   : > { %7750 = vmatpush1.bf16.msra.mxu0 %v7749_v25  ;;  %6728 = vmatprep.subr.bf16.mxu1 %v6727_v57 }
 0x429   : > { %7752 = vmatprep.subr.bf16.mxu0 %v7751_v60  ;;  %v5201_v25 = vunpack.c.0.s8 %v5200_v5  ;;  %v5264_v5 = vld [vmem:[%s10962_s3 + $0xd0] sm:$0xff] (!%p5698_p7) }
 0x42b   : > { %6730 = vmatpush1.bf16.msra.mxu1 %v6729_v51  ;;  %v10654_v61 = vsub.s32 %v5201_v25, %v8310_v15  ;;  %v5241_v51 = vld [vmem:[%s10962_s3 + $0x18] sm:$0xff] (!%p5698_p7) }
 0x42c   : > { %7754 = vmatpush1.bf16.msra.mxu0 %v7753_v2  ;;  %6732 = vmatprep.subr.bf16.mxu1 %v6731_v28  ;;  %v5238_v2 = vld [vmem:[%s10962_s3] sm:$0xff] (!%p5698_p7)  ;;  %v7771_v28 = vpack.c.bf16 (!%p5698_p7), %v5241_v51, %v5239_v63 }
 0x42d   : > { %7756 = vmatprep.subr.bf16.mxu0 %v7755_v17  ;;  %v7773_v17 = vpack.c.bf16 (!%p5698_p7), %v5240_v27, %v5238_v2  ;;  %v5266_v2 = vld [vmem:[%s10962_s3 + $0xe0] sm:$0xff] (!%p5698_p7)  ;;  %v5271_v27 = vld [vmem:[%s10962_s3 + $0x108] sm:$0xff] (!%p5698_p7) }
 0x42f   : > { %6734 = vmatpush1.bf16.msra.mxu1 %v6733_v1  ;;  %v5249_v1 = vld [vmem:[%s10962_s3 + $0x58] sm:$0xff] (!%p5698_p7) }
 0x430   : > { %7758 = vmatpush1.bf16.msra.mxu0 %v7757_v50  ;;  %6736 = vmatprep.subr.bf16.mxu1 %v6735_v29  ;;  %v7777_v50 = vpack.c.bf16 (!%p5698_p7), %v5244_v56, %v5242_v43  ;;  %v7779_v29 = vpack.c.bf16 (!%p5698_p7), %v5249_v1, %v5247_v8  ;;  %v7803_v8 = vpack.c.bf16 (!%p5698_p7), %v5273_v23, %v5271_v27  ;;  %v5270_v1 = vld [vmem:[%s10962_s3 + $0x100] sm:$0xff] (!%p5698_p7) }
 0x431   : > { %7760 = vmatprep.subr.bf16.mxu0 %v7759_v26  ;;  %v5253_v26 = vld [vmem:[%s10962_s3 + $0x78] sm:$0xff] (!%p5698_p7) }
 0x432   : > { %v7783_v16 = vpack.c.bf16 (!%p5698_p7), %v5253_v26, %v5251_v14  ;;  %v5394_v14 = vld [vmem:[%s10964_s5 + $0x40] sm:$0xff] (!%p5698_p7)  ;;  %v5395_v26 = vld [vmem:[%s10964_s5 + $0x48] sm:$0xff] (!%p5698_p7) }
 0x433   : > { %6738 = vmatpush1.bf16.msra.mxu1 %v6737_v21  ;;  %v5257_v21 = vld [vmem:[%s10962_s3 + $0x98] sm:$0xff] (!%p5698_p7) }
 0x434   : > { %7762 = vmatpush1.bf16.msra.mxu0 %v7761_v9  ;;  %6740 = vmatprep.subr.bf16.mxu1 %v6739_v34  ;;  %v7785_v9 = vpack.c.bf16 (!%p5698_p7), %v5252_v7, %v5250_v6  ;;  %v7787_v34 = vpack.c.bf16 (!%p5698_p7), %v5257_v21, %v5255_v41  ;;  %v5274_v6 = vld [vmem:[%s10962_s3 + $0x120] sm:$0xff] (!%p5698_p7)  ;;  %v5276_v7 = vld [vmem:[%s10962_s3 + $0x130] sm:$0xff] (!%p5698_p7)  ;;  %v5279_v41 = vld [vmem:[%s10962_s3 + $0x148] sm:$0xff] (!%p5698_p7)  ;;  %v7832_v21 = vpack.c.bf16 (!%p5698_p7), %v5395_v26, %v5394_v14 }
 0x435   : > { %7764 = vmatprep.subr.bf16.mxu0 %v7763_v44  ;;  %v5261_v44 = vld [vmem:[%s10962_s3 + $0xb8] sm:$0xff] (!%p5698_p7)  ;;  %v7809_v39 = vpack.c.bf16 (!%p5698_p7), %v5276_v7, %v5274_v6 }
 0x437   : > { %6742 = vmatpush1.bf16.msra.mxu1 %v6741_v42  ;;  %v5263_v42 = vld [vmem:[%s10962_s3 + $0xc8] sm:$0xff] (!%p5698_p7) }
 0x438   : > { %7766 = vmatpush1.bf16.msra.mxu0 %v7765_v13  ;;  %6744 = vmatprep.subr.bf16.mxu1 %v6743_v53  ;;  %v7791_v13 = vpack.c.bf16 (!%p5698_p7), %v5261_v44, %v5259_v31  ;;  %v5217_v53 = vld [vmem:[%s10961_s2] sm:$0x3] (!%p5698_p7) }
 0x439   : > { %7768 = vmatprep.subr.bf16.mxu0 %v7767_v3  ;;  %v5265_v3 = vld [vmem:[%s10962_s3 + $0xd8] sm:$0xff] (!%p5698_p7)  ;;  %v5222_v4 = vrot.slane (!%p5698_p7), %v5217_v53, %v5221_v10  ;;  %v5226_v35 = vrot.slane (!%p5698_p7), %v5217_v53, %v5225_v24  ;;  %v5278_v44 = vld [vmem:[%s10962_s3 + $0x140] sm:$0xff] (!%p5698_p7)  ;;  %v5399_v53 = vld [vmem:[%s10964_s5 + $0x68] sm:$0xff] (!%p5698_p7) }
 0x43b   : > { %6746 = vmatpush1.bf16.msra.mxu1 %v6745_v37  ;;  %v7820_v37 = vpack.c.bf16 (!%p5698_p7), %v5387_v18, %v5386_v49  ;;  %v5227_v25 = vcombine.low (!%p5698_p7), %v5222_v4, %v5226_v35  ;;  %v5284_v4 = vld [vmem:[%s10962_s3 + $0x170] sm:$0xff] (!%p5698_p7) }
 0x43c   : > { %7770 = vmatpush1.bf16.msra.mxu0 %v7769_v38  ;;  %7819 = vmatprep.subr.bf16.mxu1 (!%p5698_p7), %v8072_v22  ;;  %v5388_v38 = vld [vmem:[%s10964_s5 + $0x10] sm:$0xff] (!%p5698_p7) }
 0x43d   : > { %7772 = vmatprep.subr.bf16.mxu0 (!%p5698_p7), %v7771_v28  ;;  %v5268_v28 = vld [vmem:[%s10962_s3 + $0xf0] sm:$0xff] (!%p5698_p7) }
 0x43e   : > { %4054 = vmatmul.mubr.f32.vlgmr.msra.gmra.mrb[0].mxu1 %v2657_v40  ;;  %v5389_v40 = vld [vmem:[%s10964_s5 + $0x18] sm:$0xff] (!%p5698_p7)  ;;  %v7801_v43 = vpack.c.bf16 (!%p5698_p7), %v5268_v28, %v5266_v2  ;;  %v8073_v2 = vmov (!%p5698_p7), 0.0  }
 0x43f   : > { %5190 = vmatmul.mubr.f32.vlgmr.msra.gmra.mrb[0].mxu0 %v2857_v48  ;;  %v7793_v48 = vpack.c.bf16 (!%p5698_p7), %v5260_v12, %v5258_v58  ;;  %7821 = vmatpush1.bf16.msra.mxu1 (!%p5698_p7), %v7820_v37  ;;  %v5283_v58 = vld [vmem:[%s10962_s3 + $0x168] sm:$0xff] (!%p5698_p7)  ;;  %v5400_v37 = vld [vmem:[%s10964_s5 + $0x70] sm:$0xff] (!%p5698_p7) }
 0x440   : > { %7774 = vmatpush1.bf16.msra.mxu0 (!%p5698_p7), %v7773_v17  ;;  %7822 = vmatprep.subr.bf16.mxu1 (!%p5698_p7), %v8072_v22  ;;  %v5392_v17 = vld [vmem:[%s10964_s5 + $0x30] sm:$0xff] (!%p5698_p7) }
 0x441   : > { %7776 = vmatprep.subr.bf16.mxu0 (!%p5698_p7), %v7775_v54  ;;  %v5393_v54 = vld [vmem:[%s10964_s5 + $0x38] sm:$0xff] (!%p5698_p7) }
 0x444   : > { %7778 = vmatpush1.bf16.msra.mxu0 (!%p5698_p7), %v7777_v50  ;;  %v5272_v50 = vld [vmem:[%s10962_s3 + $0x110] sm:$0xff] (!%p5698_p7) }
 0x445   : > { %7780 = vmatprep.subr.bf16.mxu0 (!%p5698_p7), %v7779_v29  ;;  %v5275_v29 = vld [vmem:[%s10962_s3 + $0x128] sm:$0xff] (!%p5698_p7) }
 0x448   : > { %7782 = vmatpush1.bf16.msra.mxu0 (!%p5698_p7), %v7781_v33  ;;  %v7805_v33 = vpack.c.bf16 (!%p5698_p7), %v5272_v50, %v5270_v1 }
 0x449   : > { %7784 = vmatprep.subr.bf16.mxu0 (!%p5698_p7), %v7783_v16  ;;  %v7807_v16 = vpack.c.bf16 (!%p5698_p7), %v5277_v47, %v5275_v29 }
 0x44c   : > { %7786 = vmatpush1.bf16.msra.mxu0 (!%p5698_p7), %v7785_v9  ;;  %v5281_v9 = vld [vmem:[%s10962_s3 + $0x158] sm:$0xff] (!%p5698_p7) }
 0x44d   : > { %7788 = vmatprep.subr.bf16.mxu0 (!%p5698_p7), %v7787_v34  ;;  %v5396_v34 = vld [vmem:[%s10964_s5 + $0x50] sm:$0xff] (!%p5698_p7)  ;;  %v7811_v31 = vpack.c.bf16 (!%p5698_p7), %v5281_v9, %v5279_v41 }
 0x44e   : > { %v7835_v12 = vpack.c.bf16 (!%p5698_p7), %v5397_v19, %v5396_v34 }
 0x450   : > { %7790 = vmatpush1.bf16.msra.mxu0 (!%p5698_p7), %v7789_v11  ;;  %v5280_v11 = vld [vmem:[%s10962_s3 + $0x150] sm:$0xff] (!%p5698_p7) }
 0x451   : > { %7792 = vmatprep.subr.bf16.mxu0 (!%p5698_p7), %v7791_v13  ;;  %v5398_v13 = vld [vmem:[%s10964_s5 + $0x60] sm:$0xff] (!%p5698_p7)  ;;  %v7813_v49 = vpack.c.bf16 (!%p5698_p7), %v5280_v11, %v5278_v44 }
 0x452   : > { %v7838_v35 = vpack.c.bf16 (!%p5698_p7), %v5399_v53, %v5398_v13 }
 0x454   : > { %7794 = vmatpush1.bf16.msra.mxu0 (!%p5698_p7), %v7793_v48 }
 0x511   : > { %v4055_v57 = vpop.f32.mrb[0].mxu1 }
 0x512   : > { %v5191_v20 = vpop.f32.mrb[0].mxu0  ;;  %v4057_v59 = vpop.f32.mrb[1].mxu1 }
 0x513   : > { %v7855_v32 = vadd.f32 %v5191_v20, %v4055_v57  ;;  %v5193_v60 = vpop.f32.mrb[1].mxu0  ;;  %v7823_v57 = vpack.c.bf16 (!%p5698_p7), %v5389_v40, %v5388_v38  ;;  %v7795_v20 = vpack.c.bf16 (!%p5698_p7), %v5265_v3, %v5263_v42  ;;  %v5285_v42 = vld [vmem:[%s10962_s3 + $0x178] sm:$0xff] (!%p5698_p7)  ;;  %v5282_v3 = vld [vmem:[%s10962_s3 + $0x160] sm:$0xff] (!%p5698_p7) }
 0x514   : > { %v7856_v62 = vadd.f32 %v5193_v60, %v4057_v59  ;;  %v5391_v60 = vld [vmem:[%s10964_s5 + $0x28] sm:$0xff] (!%p5698_p7)  ;;  %v7815_v18 = vpack.c.bf16 (!%p5698_p7), %v5285_v42, %v5283_v58  ;;  %v5401_v38 = vld [vmem:[%s10964_s5 + $0x78] sm:$0xff] (!%p5698_p7)  ;;  %v7817_v40 = vpack.c.bf16 (!%p5698_p7), %v5284_v4, %v5282_v3 }
 0x515   : > { %7824 = vmatpush1.bf16.msra.mxu1 (!%p5698_p7), %v7823_v57  ;;  %7796 = vmatprep.subr.bf16.mxu0 (!%p5698_p7), %v7795_v20  ;;  %v7841_v48 = vpack.c.bf16 (!%p5698_p7), %v5401_v38, %v5400_v37  ;;  %v5286_v57 = vld [vmem:[%s10962_s3 + $0x180] sm:$0xff] (!%p5698_p7) }
 0x516   : > { %v5198_v45 = vcombine.low %v7855_v32, %v7856_v62  ;;  %5215 = sbr.rel (%p5698_p7) target bundleno = 1766 (0x6e6), region = 60  ;;  %v5390_v32 = vld [vmem:[%s10964_s5 + $0x20] sm:$0xff] (!%p5698_p7)  ;;  %v5267_v62 = vld [vmem:[%s10962_s3 + $0xe8] sm:$0xff] (!%p5698_p7)  ;;  %7825 = vmatprep.subr.bf16.mxu1 (!%p5698_p7), %v8072_v22 }
 0x517   : > { %v7826_v63 = vpack.c.bf16 (!%p5698_p7), %v5391_v60, %v5390_v32  ;;  %v5405_v32 = vld [vmem:[%s10964_s5 + $0x98] sm:$0xff] (!%p5698_p7) }
 0x518   : > { %v5205_v55 = vrot.slane %v5198_v45, %v10654_v61  ;;  %v5269_v45 = vld [vmem:[%s10962_s3 + $0xf8] sm:$0xff] (!%p5698_p7) }
 0x519   : > { %v7799_v51 = vpack.c.bf16 (!%p5698_p7), %v5269_v45, %v5267_v62  ;;  %7827 = vmatpush1.bf16.msra.mxu1 (!%p5698_p7), %v7826_v63  ;;  %v5406_v62 = vld [vmem:[%s10964_s5 + $0xa0] sm:$0xff] (!%p5698_p7)  ;;  %v5407_v45 = vld [vmem:[%s10964_s5 + $0xa8] sm:$0xff] (!%p5698_p7) }
 0x51a   : > { %v5207_v36 = vadd.f32 %v5205_v55, %v395_v0  ;;  %v5234_v0 = vrot.slane (!%p5698_p7), %v5227_v25, %v10654_v61  ;;  %v7797_v55 = vpack.c.bf16 (!%p5698_p7), %v5264_v5, %v5262_v52  ;;  %7828 = vmatprep.subr.bf16.mxu1 (!%p5698_p7), %v8072_v22  ;;  %v5287_v52 = vld [vmem:[%s10962_s3 + $0x188] sm:$0xff] (!%p5698_p7)  ;;  %v5402_v5 = vld [vmem:[%s10964_s5 + $0x80] sm:$0xff] (!%p5698_p7) }
 0x51b   : > { %v5403_v25 = vld [vmem:[%s10964_s5 + $0x88] sm:$0xff] (!%p5698_p7) }
 0x51c   : > { %5211 = vst.msk [vmem:[#allocation2] sm:$0xf] %vm5210_vm5, %v5207_v36  ;;  %7798 = vmatpush1.bf16.msra.mxu0 (!%p5698_p7), %v7797_v55  ;;  %v7844_v20 = vpack.c.bf16 (!%p5698_p7), %v5403_v25, %v5402_v5  ;;  %v5408_v55 = vld [vmem:[%s10964_s5 + $0xb0] sm:$0xff] (!%p5698_p7) }
 0x51d   : > { %7800 = vmatprep.subr.bf16.mxu0 %v7799_v51  ;;  %v5410_v51 = vld [vmem:[%s10964_s5 + $0xc0] sm:$0xff] }
 0x520   : > { %7802 = vmatpush1.bf16.msra.mxu0 %v7801_v43 }
 0x521   : > { %7804 = vmatprep.subr.bf16.mxu0 %v7803_v8  ;;  %v5700_v8 = vld [vmem:[%s10965_s6] ss:$0 sm:$0xff] }
 0x523   : > { %v5216_v59 = vld [vmem:[#allocation2] sm:$0xf] }
 0x524   : > { %v5236_v36 = vadd.f32 %v5234_v0, %v5216_v59  ;;  %7806 = vmatpush1.bf16.msra.mxu0 %v7805_v33  ;;  %v5404_v59 = vld [vmem:[%s10964_s5 + $0x90] sm:$0xff]  ;;  %v7850_v0 = vpack.c.bf16 %v5407_v45, %v5406_v62 }
 0x525   : > { %7808 = vmatprep.subr.bf16.mxu0 %v7807_v16  ;;  %v7847_v60 = vpack.c.bf16 %v5405_v32, %v5404_v59 }
 0x526   : > { %v5237_v46 = vmax.f32 %v5236_v36, 0.0  ;;  %v5409_v36 = vld [vmem:[%s10964_s5 + $0xb8] sm:$0xff] }
 0x527   : > { %v7853_v63 = vpack.c.bf16 %v5409_v36, %v5408_v55 }
 0x528   : > { %v10798_v56 = vrot.slane %v5237_v46, %v10654_v61  ;;  %v7829_v61 = vpack.c.bf16 %v5393_v54, %v5392_v17  ;;  %7810 = vmatpush1.bf16.msra.mxu0 %v7809_v39 }
 0x529   : > { %7812 = vmatprep.subr.bf16.mxu0 %v7811_v31 }
 0x52a   : > { %v5308_v30 = vcombine.high %v10798_v56, %v10798_v56  ;;  %7830 = vmatpush1.bf16.msra.mxu1 %v7829_v61 }
 0x52b   : > { %7831 = vmatprep.subr.bf16.mxu1 %v8072_v22 }
 0x52c   : > { %5699 = vmatprep.mubr.msk.f32.mxu0 %vm5310_vm6, %v5308_v30  ;;  %7814 = vmatpush1.bf16.msra.mxu0 %v7813_v49 }
 0x52d   : > { %7816 = vmatprep.subr.bf16.mxu0 %v7815_v18 }
 0x52e   : > { %7833 = vmatpush1.bf16.msra.mxu1 %v7832_v21 }
 0x52f   : > { %7834 = vmatprep.subr.bf16.mxu1 %v8072_v22 }
 0x530   : > { %7818 = vmatpush1.bf16.msra.mxu0 %v7817_v40 }
 0x531   : > { %5361 = vmatprep.subr.mxu0 %v5287_v52 }
 0x532   : > { %7836 = vmatpush1.bf16.msra.mxu1 %v7835_v12 }
 0x533   : > { %7837 = vmatprep.subr.bf16.mxu1 %v8072_v22 }
 0x534   : > { %5362 = vmatpush1.msra.mxu0 %v5286_v57 }
 0x535   : > { %5378 = vmatmul.mubr.f32.vlgmr.msra.gmra.mrb[0].mxu0 %v10798_v56 }
 0x536   : > { %7839 = vmatpush1.bf16.msra.mxu1 %v7838_v35 }
 0x537   : > { %7840 = vmatprep.subr.bf16.mxu1 %v8072_v22 }
 0x53a   : > { %7842 = vmatpush1.bf16.msra.mxu1 %v7841_v48 }
 0x53b   : > { %7843 = vmatprep.subr.bf16.mxu1 %v8072_v22 }
 0x53e   : > { %7845 = vmatpush1.bf16.msra.mxu1 %v7844_v20 }
 0x53f   : > { %7846 = vmatprep.subr.bf16.mxu1 %v8072_v22 }
 0x542   : > { %7848 = vmatpush1.bf16.msra.mxu1 %v7847_v60 }
 0x543   : > { %7849 = vmatprep.subr.bf16.mxu1 %v8072_v22 }
 0x546   : > { %7851 = vmatpush1.bf16.msra.mxu1 %v7850_v0 }
 0x547   : > { %7852 = vmatprep.subr.bf16.mxu1 %v8072_v22  ;;  %v5288_v22 = vld [vmem:[%s10963_s4] sm:$0x3] }
 0x548   : > { %v5293_v28 = vrot.slane %v5288_v22, %v5221_v10  ;;  %v5297_v27 = vrot.slane %v5288_v22, %v5225_v24 }
 0x54a   : > { %7854 = vmatpush1.bf16.msra.mxu1 %v7853_v63 }
 0x54b   : > { %5469 = vmatprep.subr.mxu1 %v8073_v2 }
 0x54e   : > { %5470 = vmatpush1.msra.mxu1 %v5410_v51 }
 0x608   : > { %v5379_v23 = vpop.f32.mrb[0].mxu0 }
 0x609   : > { %v5380_v46 = vadd.f32 %v5379_v23, %v5293_v28  ;;  %v5381_v17 = vpop.f32.mrb[1].mxu0 }
 0x60a   : > { %v5382_v54 = vadd.f32 %v5381_v17, %v5297_v27 }
 0x60b   : > { %v5384_v56 = vmax.f32 %v5380_v46, 0.0 }
 0x60c   : > { %v5385_v43 = vmax.f32 %v5382_v54, 0.0 }
 0x60e   : > { %5701 = vmatprep.mubr.msk.f32.mxu1 %vm5310_vm6, %v5385_v43 }
 0x60f   : > { %5486 = vmatmul.mubr.f32.vlgmr.msra.gmra.mrb[0].mxu1 %v5384_v56 }
 0x6e2   : > { %v5487_v1 = vpop.f32.mrb[0].mxu1 }
 0x6e3   : > { %v5488_v50 = vadd.f32 %v5700_v8, %v5487_v1  ;;  %v5489_v10 = vpop.f32.mrb[1].mxu1 }
 0x6e5   : > { %5492 = vst.msk [vmem:[#allocation6] sm:$0x3] %vm5491_vm7, %v5488_v50 }
 0x6e6 PF: > { %p7928_p8 = scmp.eq.s32.totalorder %s8134_s28, 31  ;;  %s8074_s10 = smov [#allocation6]  }
 0x6e7   : > { %s5500_s16 = sshll.u32 %s8074_s10, 4  ;;  %s5501_s16 = int_to_ptr.vmem [resolvable:$true] %s5500_s16 }
 0x6e8   : > { %s8000_s18 = scalar_lea.vmem %s5501_s16, 32  ;;  %p8007_p10 = scmp.lt.s32.totalorder %s5501_s16, %s5501_s16 }
 0x6e9   : > { %p8001_p4 = scmp.ne.s32.totalorder %s5501_s16, %s8000_s18  ;;  %p8008_p12 = scmp.lt.s32.totalorder %s8000_s18, %s8000_s18 }
 0x6eb   : > { %p8002_p5 = pnand %p8001_p4, %p7928_p8  ;;  %p8009_p0 = por %p8008_p12, %p8007_p10 }
 0x6ed   : > { %p8003_p6 = pneg %p8002_p5 }
 0x6ef   : > { %p8010_p1 = pnand %p8009_p0, %p8003_p6 }
 0x6f1   : > { %8013 = shalt.err (!%p8010_p1)
}
 0x6f2   : > { %s8014_s30 = scalar_lea.hbm %s10966_s7, 32 }
 0x6f3   : > { %p8015_p2 = scmp.ne.s32.totalorder %s10966_s7, %s8014_s30  ;;  %p8020_p3 = scmp.lt.u32.totalorder %s8014_s30, %s10966_s7 }
 0x6f5   : > { %p8016_p11 = pnand %p8015_p2, %p7928_p8 }
 0x6f7   : > { %p8017_p13 = pneg %p8016_p11 }
 0x6f9   : > { %p8022_p9 = pnand %p8020_p3, %p8017_p13 }
 0x6fb   : > { %8025 = shalt.err (!%p8022_p9)
}
 0x6fc   : > { %7920 = dma.vmem_to_hbm [thread:$0]  (%p7928_p8), %s5501_s16, 32, %s10966_s7, [#allocation5]  }
 0x6fd   : > { %8047 = dma.done.wait (%p7928_p8), [#allocation5], 32  }
 0x6fe   : > { %8049 = vsyncadd (%p7928_p8), [#allocation5], 4294967264 }
 0x6ff PF: > { %p18_p7 = scmp.ge.s32.totalorder %s8137_s29, 34   ;;  %s10970_s24 = smov %s8056_s25 }
 0x700   : > { %s10971_s25 = smov %s8060_s26  ;;  %s10972_s26 = smov %s8147_s9 }
 0x701   : > { %s10973_s27 = smov %s8137_s29  ;;  %20 = sbr.rel (!%p18_p7) target bundleno = 4 (0x4), region = 109 }
 0x708   :  { %5513 = vsyncpa [#allocation4], 1 }
 0x709   :  { %5515 = vsyncpa [#allocation4 + $0x1], 1 }
 0x70a   :  { %5516 = vsyncpa [#allocation5], 1 }
 0x70b   :  { %5518 = vsyncpa [#allocation5 + $0x1], 1 }

</bundles_post_ra>
